<compile_context>
chip_gen: v5e
topology: v5e:2x2
jax: 0.10.0
libtpu: 0.0.40
codegen_flags: <defaults>
</compile_context>

<pallas_src>
import math

import jax
import jax.numpy as jnp
from jax.experimental import pallas as pl
from jax.experimental.pallas import tpu as pltpu

VMEM_SPEC = pl.BlockSpec(memory_space=pltpu.MemorySpace.VMEM)
NEG_INF = -1e30


# ---------------------------------------------------------------------------
# Positional encoding / parameters
# ---------------------------------------------------------------------------
def positional_encoding(max_len, d_model):
    position = jnp.arange(max_len, dtype=jnp.float32)[:, None]
    div_term = jnp.exp(jnp.arange(0, d_model, 2, dtype=jnp.float32)
                       * (-math.log(10000.0) / d_model))
    pe = jnp.zeros((max_len, d_model), jnp.float32)
    pe = pe.at[:, 0::2].set(jnp.sin(position * div_term))
    pe = pe.at[:, 1::2].set(jnp.cos(position * div_term))
    return pe


def init_params(key, history_dim, action_dim, output_dim, D, num_layers, FF):
    keys = iter(jax.random.split(key, 512))

    def lin(din, dout):
        return {"w": jax.random.normal(next(keys), (din, dout), jnp.float32) * 0.05,
                "b": jax.random.normal(next(keys), (1, dout), jnp.float32) * 0.05}

    def mha_p():
        # packed QKV: wqkv = [wq | wk | wv], bqkv = [bq | bk | bv]
        return {"wqkv": jax.random.normal(next(keys), (D, 3 * D), jnp.float32) * 0.05,
                "bqkv": jax.random.normal(next(keys), (1, 3 * D), jnp.float32) * 0.05,
                "wo": jax.random.normal(next(keys), (D, D), jnp.float32) * 0.05,
                "bo": jax.random.normal(next(keys), (1, D), jnp.float32) * 0.05}

    def ln_p():
        return {"g": jnp.ones((1, D), jnp.float32), "b": jnp.zeros((1, D), jnp.float32)}

    params = {
        "hist_emb": lin(history_dim, D),
        "act_emb": lin(action_dim, D),
        "out_emb": lin(D, output_dim),
        "enc": [], "dec": [],
        "enc_ln": ln_p(), "dec_ln": ln_p(),
    }
    for _ in range(num_layers):
        params["enc"].append({"sa": mha_p(), "lin1": lin(D, FF), "lin2": lin(FF, D),
                              "ln1": ln_p(), "ln2": ln_p()})
    for _ in range(num_layers):
        params["dec"].append({"sa": mha_p(), "ca": mha_p(),
                              "lin1": lin(D, FF), "lin2": lin(FF, D),
                              "ln1": ln_p(), "ln2": ln_p(), "ln3": ln_p()})
    return params


# ---------------------------------------------------------------------------
# Host-side parameter slab packing (one contiguous (rows, 128) f32 buffer)
# ---------------------------------------------------------------------------
class _SlabBuilder:
    def __init__(self, width=128):
        self.width = width
        self.chunks = []
        self.offset = 0
        self.index = {}

    def add(self, name, arr):
        arr = jnp.asarray(arr, jnp.float32)
        assert arr.ndim == 2 and arr.shape[1] <= self.width, (name, arr.shape)
        r, c = arr.shape
        r_pad = ((r + 7) // 8) * 8                       # sublane-aligned rows
        buf = jnp.zeros((r_pad, self.width), jnp.float32).at[:r, :c].set(arr)
        self.chunks.append(buf)
        self.index[name] = (self.offset, r, r_pad, c)
        self.offset += r_pad

    def finalize(self):
        return jnp.concatenate(self.chunks, axis=0), dict(self.index)


def pack_params(params, num_heads):
    D = params["hist_emb"]["w"].shape[1]
    hd = D // num_heads
    qscale = 1.0 / math.sqrt(hd)
    sb = _SlabBuilder(128)

    sb.add("hist_w", params["hist_emb"]["w"])
    sb.add("act_w", params["act_emb"]["w"])
    sb.add("out_w", params["out_emb"]["w"])
    sb.add("out_b", params["out_emb"]["b"])
    sb.add("enc_ln_g", params["enc_ln"]["g"])
    sb.add("enc_ln_b", params["enc_ln"]["b"])
    sb.add("dec_ln_g", params["dec_ln"]["g"])
    sb.add("dec_ln_b", params["dec_ln"]["b"])

    def add_self_attn(prefix, mp):
        # fold 1/sqrt(head_dim) into the Q columns (weight and bias)
        wqkv = mp["wqkv"].at[:, :D].multiply(qscale)
        bqkv = mp["bqkv"].at[:, :D].multiply(qscale)
        sb.add(prefix + "wqkv", wqkv)
        sb.add(prefix + "bqkv", bqkv)
        sb.add(prefix + "wo", mp["wo"])
        sb.add(prefix + "bo", mp["bo"])

    def add_cross_attn(prefix, mp):
        sb.add(prefix + "wq", mp["wqkv"][:, :D] * qscale)
        sb.add(prefix + "bq", mp["bqkv"][:, :D] * qscale)
        sb.add(prefix + "wkv", mp["wqkv"][:, D:])
        sb.add(prefix + "bkv", mp["bqkv"][:, D:])
        sb.add(prefix + "wo", mp["wo"])
        sb.add(prefix + "bo", mp["bo"])

    def add_ffn(prefix, l1, l2):
        sb.add(prefix + "w1", l1["w"])
        sb.add(prefix + "b1", l1["b"])
        sb.add(prefix + "w2", l2["w"])
        sb.add(prefix + "b2", l2["b"])

    def add_ln(prefix, lp):
        sb.add(prefix + "g", lp["g"])
        sb.add(prefix + "b", lp["b"])

    for i, layer in enumerate(params["enc"]):
        add_self_attn(f"enc{i}_sa_", layer["sa"])
        add_ffn(f"enc{i}_ff_", layer["lin1"], layer["lin2"])
        add_ln(f"enc{i}_ln1_", layer["ln1"])
        add_ln(f"enc{i}_ln2_", layer["ln2"])
    for i, layer in enumerate(params["dec"]):
        add_self_attn(f"dec{i}_sa_", layer["sa"])
        add_cross_attn(f"dec{i}_ca_", layer["ca"])
        add_ffn(f"dec{i}_ff_", layer["lin1"], layer["lin2"])
        add_ln(f"dec{i}_ln1_", layer["ln1"])
        add_ln(f"dec{i}_ln2_", layer["ln2"])
        add_ln(f"dec{i}_ln3_", layer["ln3"])

    return sb.finalize()


def _pad_cols(x, mult=8):
    c = x.shape[1]
    cp = ((c + mult - 1) // mult) * mult
    if cp == c:
        return x
    return jnp.concatenate([x, jnp.zeros((x.shape[0], cp - c), x.dtype)], axis=1)


# ---------------------------------------------------------------------------
# Fused Pallas kernel (whole forward pass, single gridless invocation)
# ---------------------------------------------------------------------------
def make_fused_kernel(index, B, S, T, D, H, num_layers):
    hd = D // H

    def kernel(hist_ref, act_ref, hist_bias_ref, act_bias_ref, slab_ref, out_ref):

        def P(name, padded_rows=False):
            off, r, rp, c = index[name]
            rows = rp if padded_rows else r
            return slab_ref[off:off + rows, 0:c]

        def layer_norm(x, g, b):
            # one-pass statistics: mean and mean-of-squares are independent reductions
            m = jnp.mean(x, axis=-1, keepdims=True)
            ms = jnp.mean(x * x, axis=-1, keepdims=True)
            var = ms - m * m
            return (x - m) * jax.lax.rsqrt(var + 1e-5) * g + b

        def ffn(x, prefix):
            h = jnp.dot(x, P(prefix + "w1"),
                        preferred_element_type=jnp.float32) + P(prefix + "b1")
            h = jnp.maximum(h, 0.0)
            return jnp.dot(h, P(prefix + "w2"),
                           preferred_element_type=jnp.float32) + P(prefix + "b2")

        def attend(q3, k3, v3, Tq, wo, bo, mask_bias):
            # q3:(B,Tq,D) (Q already pre-scaled via weights), k3/v3:(B,Tk,D)
            acc = jnp.zeros((B * Tq, D), jnp.float32)
            for h in range(H):                      # short static head loop
                lo, hi = h * hd, (h + 1) * hd
                s = jnp.einsum("bqd,bkd->bqk", q3[:, :, lo:hi], k3[:, :, lo:hi],
                               preferred_element_type=jnp.float32)     # (B,Tq,Tk)
                if mask_bias is not None:
                    s = s + mask_bias                                  # additive 0/-1e30
                s = s - jnp.max(s, axis=-1, keepdims=True)
                p = jnp.exp(s)
                p = p * pl.reciprocal(jnp.sum(p, axis=-1, keepdims=True), approx=False)
                oh = jnp.einsum("bqk,bkd->bqd", p, v3[:, :, lo:hi],
                                preferred_element_type=jnp.float32)    # (B,Tq,hd)
                acc = acc + jnp.dot(oh.reshape(B * Tq, hd), wo[lo:hi, :],
                                    preferred_element_type=jnp.float32)
            return acc + bo

        def self_attn(x2d, Tq, prefix, mask_bias):
            qkv = jnp.dot(x2d, P(prefix + "wqkv"),
                          preferred_element_type=jnp.float32) + P(prefix + "bqkv")
            q3 = qkv[:, 0:D].reshape(B, Tq, D)
            k3 = qkv[:, D:2 * D].reshape(B, Tq, D)
            v3 = qkv[:, 2 * D:3 * D].reshape(B, Tq, D)
            return attend(q3, k3, v3, Tq, P(prefix + "wo"), P(prefix + "bo"), mask_bias)

        def cross_attn(x2d, mem2d, Tq, Tk, prefix):
            q3 = (jnp.dot(x2d, P(prefix + "wq"),
                          preferred_element_type=jnp.float32)
                  + P(prefix + "bq")).reshape(B, Tq, D)
            kv = jnp.dot(mem2d, P(prefix + "wkv"),
                         preferred_element_type=jnp.float32) + P(prefix + "bkv")
            k3 = kv[:, 0:D].reshape(B, Tk, D)
            v3 = kv[:, D:2 * D].reshape(B, Tk, D)
            return attend(q3, k3, v3, Tq, P(prefix + "wo"), P(prefix + "bo"), None)

        # --- hoisted causal additive biases (built once, reused in every layer) ---
        def causal_bias(n):
            row = jax.lax.broadcasted_iota(jnp.int32, (n, n), 0)
            col = jax.lax.broadcasted_iota(jnp.int32, (n, n), 1)
            bias2d = jnp.where(col <= row, 0.0, NEG_INF).astype(jnp.float32)
            return jnp.broadcast_to(bias2d[None, :, :], (B, n, n))

        bias_src = causal_bias(S)
        bias_tgt = bias_src if T == S else causal_bias(T)

        # --- embeddings (+ PE and embedding bias pre-folded host-side) ---
        mem = jnp.dot(hist_ref[...], P("hist_w", padded_rows=True),
                      preferred_element_type=jnp.float32) + hist_bias_ref[...]  # (B*S, D)
        x = jnp.dot(act_ref[...], P("act_w", padded_rows=True),
                    preferred_element_type=jnp.float32) + act_bias_ref[...]     # (B*T, D)

        # --- encoder (causal self-attention, post-norm) ---
        for i in range(num_layers):
            sa = self_attn(mem, S, f"enc{i}_sa_", bias_src)
            mem = layer_norm(mem + sa, P(f"enc{i}_ln1_g"), P(f"enc{i}_ln1_b"))
            ff = ffn(mem, f"enc{i}_ff_")
            mem = layer_norm(mem + ff, P(f"enc{i}_ln2_g"), P(f"enc{i}_ln2_b"))
        mem = layer_norm(mem, P("enc_ln_g"), P("enc_ln_b"))

        # --- decoder (causal self-attn, unmasked cross-attn, post-norm) ---
        for i in range(num_layers):
            sa = self_attn(x, T, f"dec{i}_sa_", bias_tgt)
            x = layer_norm(x + sa, P(f"dec{i}_ln1_g"), P(f"dec{i}_ln1_b"))
            ca = cross_attn(x, mem, T, S, f"dec{i}_ca_")
            x = layer_norm(x + ca, P(f"dec{i}_ln2_g"), P(f"dec{i}_ln2_b"))
            ff = ffn(x, f"dec{i}_ff_")
            x = layer_norm(x + ff, P(f"dec{i}_ln3_g"), P(f"dec{i}_ln3_b"))
        x = layer_norm(x, P("dec_ln_g"), P("dec_ln_b"))

        # --- output projection ---
        out_ref[...] = jnp.dot(x, P("out_w"),
                               preferred_element_type=jnp.float32) + P("out_b")

    return kernel


def torch_transformer_forward(params, history, action, pe, num_heads):
    B, S, _ = history.shape
    T = action.shape[1]
    D = params["hist_emb"]["w"].shape[1]
    out_dim = params["out_emb"]["w"].shape[1]
    num_layers = len(params["enc"])

    slab, index = pack_params(params, num_heads)

    hist2d = _pad_cols(history.reshape(B * S, -1).astype(jnp.float32))
    act2d = _pad_cols(action.reshape(B * T, -1).astype(jnp.float32))
    # positional encoding tiled over batch + embedding bias folded in (host-side)
    hist_bias = jnp.tile(pe[:S], (B, 1)) + params["hist_emb"]["b"]   # (B*S, D)
    act_bias = jnp.tile(pe[:T], (B, 1)) + params["act_emb"]["b"]     # (B*T, D)

    kernel = make_fused_kernel(index, B, S, T, D, num_heads, num_layers)
    out = pl.pallas_call(
        kernel,
        out_shape=jax.ShapeDtypeStruct((B * T, out_dim), jnp.float32),
        in_specs=[VMEM_SPEC] * 5,
        out_specs=VMEM_SPEC,
    )(hist2d, act2d, hist_bias, act_bias, slab)
    return out.reshape(B, T, out_dim)


# ---------------------------------------------------------------------------
# Pure-JAX reference (same math) for a sanity check
# ---------------------------------------------------------------------------
def _ref_forward(params, history, action, pe, num_heads):
    def lin(x, p):
        return x @ p["w"] + p["b"][0]

    def ln(x, p):
        m = jnp.mean(x, axis=-1, keepdims=True)
        v = jnp.mean((x - m) ** 2, axis=-1, keepdims=True)
        return (x - m) / jnp.sqrt(v + 1e-5) * p["g"][0] + p["b"][0]

    def mha(q_in, kv_in, p, causal):
        B, T, D = q_in.shape
        S = kv_in.shape[1]
        hd = D // num_heads
        qkv_q = q_in @ p["wqkv"] + p["bqkv"][0]
        qkv_kv = kv_in @ p["wqkv"] + p["bqkv"][0]
        q = qkv_q[..., 0:D].reshape(B, T, num_heads, hd)
        k = qkv_kv[..., D:2 * D].reshape(B, S, num_heads, hd)
        v = qkv_kv[..., 2 * D:3 * D].reshape(B, S, num_heads, hd)
        s = jnp.einsum("bthd,bshd->bhts", q, k) / math.sqrt(hd)
        if causal:
            keep = jnp.tril(jnp.ones((T, S), bool))
            s = jnp.where(keep, s, -1e30)
        a = jax.nn.softmax(s, axis=-1)
        o = jnp.einsum("bhts,bshd->bthd", a, v).reshape(B, T, D)
        return o @ p["wo"] + p["bo"][0]

    def ffn(x, l1, l2):
        return jnp.maximum(lin(x, l1), 0.0) @ l2["w"] + l2["b"][0]

    B, S, _ = history.shape
    T = action.shape[1]
    h = lin(history, params["hist_emb"]) + pe[None, :S]
    a = lin(action, params["act_emb"]) + pe[None, :T]
    mem = h
    for l in params["enc"]:
        mem = ln(mem + mha(mem, mem, l["sa"], True), l["ln1"])
        mem = ln(mem + ffn(mem, l["lin1"], l["lin2"]), l["ln2"])
    mem = ln(mem, params["enc_ln"])
    x = a
    for l in params["dec"]:
        x = ln(x + mha(x, x, l["sa"], True), l["ln1"])
        x = ln(x + mha(x, mem, l["ca"], False), l["ln2"])
        x = ln(x + ffn(x, l["lin1"], l["lin2"]), l["ln3"])
    x = ln(x, params["dec_ln"])
    return lin(x, params["out_emb"])


# ---------------------------------------------------------------------------
if __name__ == "__main__":
    # B=2, history seq S=8, action seq T=8, history_dim=6, action_dim=2,
    # output_dim=6, latent_dim=32, heads=4, layers=2, dim_feedforward=128
    B, S, T = 2, 8, 8
    HISTORY_DIM, ACTION_DIM, OUTPUT_DIM = 6, 2, 6
    LATENT_DIM, NUM_HEADS, NUM_LAYERS, FF_DIM = 32, 4, 2, 128

    key = jax.random.PRNGKey(0)
    k_p, k_h, k_a = jax.random.split(key, 3)

    params = init_params(k_p, HISTORY_DIM, ACTION_DIM, OUTPUT_DIM,
                         LATENT_DIM, NUM_LAYERS, FF_DIM)
    pe = positional_encoding(64, LATENT_DIM)

    history = jax.random.normal(k_h, (B, S, HISTORY_DIM), jnp.float32)
    action = jax.random.normal(k_a, (B, T, ACTION_DIM), jnp.float32)

    out = torch_transformer_forward(params, history, action, pe, NUM_HEADS)
    out = jax.block_until_ready(out)
    assert out.shape == (B, T, OUTPUT_DIM)

    ref = _ref_forward(params, history, action, pe, NUM_HEADS)
    max_err = float(jnp.max(jnp.abs(out - ref)))
    assert max_err < 5e-3, f"mismatch vs reference: {max_err}"

    print("KERNEL_OK")
</pallas_src>

<mosaic_0001>
module attributes {stable_mosaic.version = 11 : i64} {
  func.func @kernel(%arg0: memref<16x8xf32, #tpu.memory_space<vmem>>, %arg1: memref<16x8xf32, #tpu.memory_space<vmem>>, %arg2: memref<16x32xf32, #tpu.memory_space<vmem>>, %arg3: memref<16x32xf32, #tpu.memory_space<vmem>>, %arg4: memref<1512x128xf32, #tpu.memory_space<vmem>>, %arg5: memref<16x6xf32, #tpu.memory_space<vmem>>) attributes {dimension_semantics = [], scalar_prefetch = 0 : i64, scratch_operands = 0 : i64, tpu.core_type = #tpu.core_type<tc>} {
    %0 = tpu.iota {dimensions = array<i32: 0>} : vector<8x8xi32>
    %1 = tpu.iota {dimensions = array<i32: 1>} : vector<8x8xi32>
    %2 = arith.cmpi sle, %1, %0 : vector<8x8xi32>
    %cst = arith.constant 0.000000e+00 : f32
    %cst_0 = arith.constant -1.000000e+30 : f32
    %3 = vector.broadcast %cst : f32 to vector<8x8xf32>
    %4 = vector.broadcast %cst_0 : f32 to vector<8x8xf32>
    %5 = arith.select %2, %3, %4 : vector<8x8xi1>, vector<8x8xf32>
    %6 = vector.shape_cast %5 : vector<8x8xf32> to vector<1x8x8xf32>
    %7 = vector.shape_cast %6 : vector<1x8x8xf32> to vector<1x8x8xf32>
    %8 = vector.broadcast %7 : vector<1x8x8xf32> to vector<2x8x8xf32>
    %c0 = arith.constant 0 : index
    %c0_1 = arith.constant 0 : index
    %9 = vector.load %arg0[%c0, %c0_1] : memref<16x8xf32, #tpu.memory_space<vmem>>, vector<16x8xf32>
    %c0_2 = arith.constant 0 : index
    %c0_3 = arith.constant 0 : index
    %10 = vector.load %arg4[%c0_2, %c0_3] : memref<1512x128xf32, #tpu.memory_space<vmem>>, vector<8x32xf32>
    %cst_4 = arith.constant dense<0.000000e+00> : vector<16x32xf32>
    %11 = tpu.matmul %9, %10, %cst_4 {dimension_numbers = #tpu.dot_dimension_numbers<[1], [0], [0], [1], [0, 0, 1, 1], [], []>} : vector<16x8xf32>, vector<8x32xf32>, vector<16x32xf32> -> vector<16x32xf32>
    %c0_5 = arith.constant 0 : index
    %c0_6 = arith.constant 0 : index
    %12 = vector.load %arg2[%c0_5, %c0_6] : memref<16x32xf32, #tpu.memory_space<vmem>>, vector<16x32xf32>
    %13 = arith.addf %11, %12 : vector<16x32xf32>
    %c0_7 = arith.constant 0 : index
    %c0_8 = arith.constant 0 : index
    %14 = vector.load %arg1[%c0_7, %c0_8] : memref<16x8xf32, #tpu.memory_space<vmem>>, vector<16x8xf32>
    %c8 = arith.constant 8 : index
    %c0_9 = arith.constant 0 : index
    %15 = vector.load %arg4[%c8, %c0_9] : memref<1512x128xf32, #tpu.memory_space<vmem>>, vector<8x32xf32>
    %cst_10 = arith.constant dense<0.000000e+00> : vector<16x32xf32>
    %16 = tpu.matmul %14, %15, %cst_10 {dimension_numbers = #tpu.dot_dimension_numbers<[1], [0], [0], [1], [0, 0, 1, 1], [], []>} : vector<16x8xf32>, vector<8x32xf32>, vector<16x32xf32> -> vector<16x32xf32>
    %c0_11 = arith.constant 0 : index
    %c0_12 = arith.constant 0 : index
    %17 = vector.load %arg3[%c0_11, %c0_12] : memref<16x32xf32, #tpu.memory_space<vmem>>, vector<16x32xf32>
    %18 = arith.addf %16, %17 : vector<16x32xf32>
    %c88 = arith.constant 88 : index
    %c0_13 = arith.constant 0 : index
    %19 = vector.load %arg4[%c88, %c0_13] : memref<1512x128xf32, #tpu.memory_space<vmem>>, vector<32x96xf32>
    %cst_14 = arith.constant dense<0.000000e+00> : vector<16x96xf32>
    %20 = tpu.matmul %13, %19, %cst_14 {dimension_numbers = #tpu.dot_dimension_numbers<[1], [0], [0], [1], [0, 0, 1, 1], [], []>} : vector<16x32xf32>, vector<32x96xf32>, vector<16x96xf32> -> vector<16x96xf32>
    %c120 = arith.constant 120 : index
    %c0_15 = arith.constant 0 : index
    %21 = vector.load %arg4[%c120, %c0_15] : memref<1512x128xf32, #tpu.memory_space<vmem>>, vector<1x96xf32>
    %22 = vector.broadcast %21 : vector<1x96xf32> to vector<16x96xf32>
    %23 = arith.addf %20, %22 : vector<16x96xf32>
    %24 = vector.extract_strided_slice %23 {offsets = [0, 0], sizes = [16, 32], strides = [1, 1]} : vector<16x96xf32> to vector<16x32xf32>
    %25 = vector.shape_cast %24 : vector<16x32xf32> to vector<2x8x32xf32>
    %26 = vector.extract_strided_slice %23 {offsets = [0, 32], sizes = [16, 32], strides = [1, 1]} : vector<16x96xf32> to vector<16x32xf32>
    %27 = vector.shape_cast %26 : vector<16x32xf32> to vector<2x8x32xf32>
    %28 = vector.extract_strided_slice %23 {offsets = [0, 64], sizes = [16, 32], strides = [1, 1]} : vector<16x96xf32> to vector<16x32xf32>
    %29 = vector.shape_cast %28 : vector<16x32xf32> to vector<2x8x32xf32>
    %c128 = arith.constant 128 : index
    %c0_16 = arith.constant 0 : index
    %30 = vector.load %arg4[%c128, %c0_16] : memref<1512x128xf32, #tpu.memory_space<vmem>>, vector<32x32xf32>
    %c160 = arith.constant 160 : index
    %c0_17 = arith.constant 0 : index
    %31 = vector.load %arg4[%c160, %c0_17] : memref<1512x128xf32, #tpu.memory_space<vmem>>, vector<1x32xf32>
    %cst_18 = arith.constant 0.000000e+00 : f32
    %32 = vector.broadcast %cst_18 : f32 to vector<16x32xf32>
    %33 = vector.extract_strided_slice %25 {offsets = [0, 0, 0], sizes = [2, 8, 8], strides = [1, 1, 1]} : vector<2x8x32xf32> to vector<2x8x8xf32>
    %34 = vector.extract_strided_slice %27 {offsets = [0, 0, 0], sizes = [2, 8, 8], strides = [1, 1, 1]} : vector<2x8x32xf32> to vector<2x8x8xf32>
    "tpu.trace_start"() <{level = 10 : i32, message = "bqd,bkd->bqk"}> : () -> ()
    %cst_19 = arith.constant dense<0.000000e+00> : vector<2x8x8xf32>
    %35 = tpu.matmul %33, %34, %cst_19 {dimension_numbers = #tpu.dot_dimension_numbers<[2], [2], [1], [1], [0, 0, 0, 1, 1, 1], [0], [0]>} : vector<2x8x8xf32>, vector<2x8x8xf32>, vector<2x8x8xf32> -> vector<2x8x8xf32>
    "tpu.trace_stop"() : () -> ()
    %36 = arith.addf %35, %8 : vector<2x8x8xf32>
    %cst_20 = arith.constant dense<0xFF800000> : vector<2x8xf32>
    %37 = vector.multi_reduction <maximumf>, %36, %cst_20 [2] : vector<2x8x8xf32> to vector<2x8xf32>
    %38 = vector.shape_cast %37 : vector<2x8xf32> to vector<2x8x1xf32>
    %39 = vector.broadcast %38 : vector<2x8x1xf32> to vector<2x8x8xf32>
    %40 = arith.subf %36, %39 : vector<2x8x8xf32>
    %41 = math.exp %40 : vector<2x8x8xf32>
    %cst_21 = arith.constant dense<0.000000e+00> : vector<2x8xf32>
    %42 = vector.multi_reduction <add>, %41, %cst_21 [2] : vector<2x8x8xf32> to vector<2x8xf32>
    %43 = vector.shape_cast %42 : vector<2x8xf32> to vector<2x8x1xf32>
    %44 = tpu.reciprocal %43 : vector<2x8x1xf32> -> vector<2x8x1xf32>
    %45 = vector.broadcast %44 : vector<2x8x1xf32> to vector<2x8x8xf32>
    %46 = arith.mulf %41, %45 : vector<2x8x8xf32>
    %47 = vector.extract_strided_slice %29 {offsets = [0, 0, 0], sizes = [2, 8, 8], strides = [1, 1, 1]} : vector<2x8x32xf32> to vector<2x8x8xf32>
    "tpu.trace_start"() <{level = 10 : i32, message = "bqk,bkd->bqd"}> : () -> ()
    %cst_22 = arith.constant dense<0.000000e+00> : vector<2x8x8xf32>
    %48 = tpu.matmul %46, %47, %cst_22 {dimension_numbers = #tpu.dot_dimension_numbers<[2], [1], [1], [2], [0, 0, 0, 1, 1, 2], [0], [0]>} : vector<2x8x8xf32>, vector<2x8x8xf32>, vector<2x8x8xf32> -> vector<2x8x8xf32>
    "tpu.trace_stop"() : () -> ()
    %49 = vector.shape_cast %48 : vector<2x8x8xf32> to vector<16x8xf32>
    %50 = vector.extract_strided_slice %30 {offsets = [0, 0], sizes = [8, 32], strides = [1, 1]} : vector<32x32xf32> to vector<8x32xf32>
    %cst_23 = arith.constant dense<0.000000e+00> : vector<16x32xf32>
    %51 = tpu.matmul %49, %50, %cst_23 {dimension_numbers = #tpu.dot_dimension_numbers<[1], [0], [0], [1], [0, 0, 1, 1], [], []>} : vector<16x8xf32>, vector<8x32xf32>, vector<16x32xf32> -> vector<16x32xf32>
    %52 = arith.addf %32, %51 : vector<16x32xf32>
    %53 = vector.extract_strided_slice %25 {offsets = [0, 0, 8], sizes = [2, 8, 8], strides = [1, 1, 1]} : vector<2x8x32xf32> to vector<2x8x8xf32>
    %54 = vector.extract_strided_slice %27 {offsets = [0, 0, 8], sizes = [2, 8, 8], strides = [1, 1, 1]} : vector<2x8x32xf32> to vector<2x8x8xf32>
    "tpu.trace_start"() <{level = 10 : i32, message = "bqd,bkd->bqk"}> : () -> ()
    %cst_24 = arith.constant dense<0.000000e+00> : vector<2x8x8xf32>
    %55 = tpu.matmul %53, %54, %cst_24 {dimension_numbers = #tpu.dot_dimension_numbers<[2], [2], [1], [1], [0, 0, 0, 1, 1, 1], [0], [0]>} : vector<2x8x8xf32>, vector<2x8x8xf32>, vector<2x8x8xf32> -> vector<2x8x8xf32>
    "tpu.trace_stop"() : () -> ()
    %56 = arith.addf %55, %8 : vector<2x8x8xf32>
    %cst_25 = arith.constant dense<0xFF800000> : vector<2x8xf32>
    %57 = vector.multi_reduction <maximumf>, %56, %cst_25 [2] : vector<2x8x8xf32> to vector<2x8xf32>
    %58 = vector.shape_cast %57 : vector<2x8xf32> to vector<2x8x1xf32>
    %59 = vector.broadcast %58 : vector<2x8x1xf32> to vector<2x8x8xf32>
    %60 = arith.subf %56, %59 : vector<2x8x8xf32>
    %61 = math.exp %60 : vector<2x8x8xf32>
    %cst_26 = arith.constant dense<0.000000e+00> : vector<2x8xf32>
    %62 = vector.multi_reduction <add>, %61, %cst_26 [2] : vector<2x8x8xf32> to vector<2x8xf32>
    %63 = vector.shape_cast %62 : vector<2x8xf32> to vector<2x8x1xf32>
    %64 = tpu.reciprocal %63 : vector<2x8x1xf32> -> vector<2x8x1xf32>
    %65 = vector.broadcast %64 : vector<2x8x1xf32> to vector<2x8x8xf32>
    %66 = arith.mulf %61, %65 : vector<2x8x8xf32>
    %67 = vector.extract_strided_slice %29 {offsets = [0, 0, 8], sizes = [2, 8, 8], strides = [1, 1, 1]} : vector<2x8x32xf32> to vector<2x8x8xf32>
    "tpu.trace_start"() <{level = 10 : i32, message = "bqk,bkd->bqd"}> : () -> ()
    %cst_27 = arith.constant dense<0.000000e+00> : vector<2x8x8xf32>
    %68 = tpu.matmul %66, %67, %cst_27 {dimension_numbers = #tpu.dot_dimension_numbers<[2], [1], [1], [2], [0, 0, 0, 1, 1, 2], [0], [0]>} : vector<2x8x8xf32>, vector<2x8x8xf32>, vector<2x8x8xf32> -> vector<2x8x8xf32>
    "tpu.trace_stop"() : () -> ()
    %69 = vector.shape_cast %68 : vector<2x8x8xf32> to vector<16x8xf32>
    %70 = vector.extract_strided_slice %30 {offsets = [8, 0], sizes = [8, 32], strides = [1, 1]} : vector<32x32xf32> to vector<8x32xf32>
    %cst_28 = arith.constant dense<0.000000e+00> : vector<16x32xf32>
    %71 = tpu.matmul %69, %70, %cst_28 {dimension_numbers = #tpu.dot_dimension_numbers<[1], [0], [0], [1], [0, 0, 1, 1], [], []>} : vector<16x8xf32>, vector<8x32xf32>, vector<16x32xf32> -> vector<16x32xf32>
    %72 = arith.addf %52, %71 : vector<16x32xf32>
    %73 = vector.extract_strided_slice %25 {offsets = [0, 0, 16], sizes = [2, 8, 8], strides = [1, 1, 1]} : vector<2x8x32xf32> to vector<2x8x8xf32>
    %74 = vector.extract_strided_slice %27 {offsets = [0, 0, 16], sizes = [2, 8, 8], strides = [1, 1, 1]} : vector<2x8x32xf32> to vector<2x8x8xf32>
    "tpu.trace_start"() <{level = 10 : i32, message = "bqd,bkd->bqk"}> : () -> ()
    %cst_29 = arith.constant dense<0.000000e+00> : vector<2x8x8xf32>
    %75 = tpu.matmul %73, %74, %cst_29 {dimension_numbers = #tpu.dot_dimension_numbers<[2], [2], [1], [1], [0, 0, 0, 1, 1, 1], [0], [0]>} : vector<2x8x8xf32>, vector<2x8x8xf32>, vector<2x8x8xf32> -> vector<2x8x8xf32>
    "tpu.trace_stop"() : () -> ()
    %76 = arith.addf %75, %8 : vector<2x8x8xf32>
    %cst_30 = arith.constant dense<0xFF800000> : vector<2x8xf32>
    %77 = vector.multi_reduction <maximumf>, %76, %cst_30 [2] : vector<2x8x8xf32> to vector<2x8xf32>
    %78 = vector.shape_cast %77 : vector<2x8xf32> to vector<2x8x1xf32>
    %79 = vector.broadcast %78 : vector<2x8x1xf32> to vector<2x8x8xf32>
    %80 = arith.subf %76, %79 : vector<2x8x8xf32>
    %81 = math.exp %80 : vector<2x8x8xf32>
    %cst_31 = arith.constant dense<0.000000e+00> : vector<2x8xf32>
    %82 = vector.multi_reduction <add>, %81, %cst_31 [2] : vector<2x8x8xf32> to vector<2x8xf32>
    %83 = vector.shape_cast %82 : vector<2x8xf32> to vector<2x8x1xf32>
    %84 = tpu.reciprocal %83 : vector<2x8x1xf32> -> vector<2x8x1xf32>
    %85 = vector.broadcast %84 : vector<2x8x1xf32> to vector<2x8x8xf32>
    %86 = arith.mulf %81, %85 : vector<2x8x8xf32>
    %87 = vector.extract_strided_slice %29 {offsets = [0, 0, 16], sizes = [2, 8, 8], strides = [1, 1, 1]} : vector<2x8x32xf32> to vector<2x8x8xf32>
    "tpu.trace_start"() <{level = 10 : i32, message = "bqk,bkd->bqd"}> : () -> ()
    %cst_32 = arith.constant dense<0.000000e+00> : vector<2x8x8xf32>
    %88 = tpu.matmul %86, %87, %cst_32 {dimension_numbers = #tpu.dot_dimension_numbers<[2], [1], [1], [2], [0, 0, 0, 1, 1, 2], [0], [0]>} : vector<2x8x8xf32>, vector<2x8x8xf32>, vector<2x8x8xf32> -> vector<2x8x8xf32>
    "tpu.trace_stop"() : () -> ()
    %89 = vector.shape_cast %88 : vector<2x8x8xf32> to vector<16x8xf32>
    %90 = vector.extract_strided_slice %30 {offsets = [16, 0], sizes = [8, 32], strides = [1, 1]} : vector<32x32xf32> to vector<8x32xf32>
    %cst_33 = arith.constant dense<0.000000e+00> : vector<16x32xf32>
    %91 = tpu.matmul %89, %90, %cst_33 {dimension_numbers = #tpu.dot_dimension_numbers<[1], [0], [0], [1], [0, 0, 1, 1], [], []>} : vector<16x8xf32>, vector<8x32xf32>, vector<16x32xf32> -> vector<16x32xf32>
    %92 = arith.addf %72, %91 : vector<16x32xf32>
    %93 = vector.extract_strided_slice %25 {offsets = [0, 0, 24], sizes = [2, 8, 8], strides = [1, 1, 1]} : vector<2x8x32xf32> to vector<2x8x8xf32>
    %94 = vector.extract_strided_slice %27 {offsets = [0, 0, 24], sizes = [2, 8, 8], strides = [1, 1, 1]} : vector<2x8x32xf32> to vector<2x8x8xf32>
    "tpu.trace_start"() <{level = 10 : i32, message = "bqd,bkd->bqk"}> : () -> ()
    %cst_34 = arith.constant dense<0.000000e+00> : vector<2x8x8xf32>
    %95 = tpu.matmul %93, %94, %cst_34 {dimension_numbers = #tpu.dot_dimension_numbers<[2], [2], [1], [1], [0, 0, 0, 1, 1, 1], [0], [0]>} : vector<2x8x8xf32>, vector<2x8x8xf32>, vector<2x8x8xf32> -> vector<2x8x8xf32>
    "tpu.trace_stop"() : () -> ()
    %96 = arith.addf %95, %8 : vector<2x8x8xf32>
    %cst_35 = arith.constant dense<0xFF800000> : vector<2x8xf32>
    %97 = vector.multi_reduction <maximumf>, %96, %cst_35 [2] : vector<2x8x8xf32> to vector<2x8xf32>
    %98 = vector.shape_cast %97 : vector<2x8xf32> to vector<2x8x1xf32>
    %99 = vector.broadcast %98 : vector<2x8x1xf32> to vector<2x8x8xf32>
    %100 = arith.subf %96, %99 : vector<2x8x8xf32>
    %101 = math.exp %100 : vector<2x8x8xf32>
    %cst_36 = arith.constant dense<0.000000e+00> : vector<2x8xf32>
    %102 = vector.multi_reduction <add>, %101, %cst_36 [2] : vector<2x8x8xf32> to vector<2x8xf32>
    %103 = vector.shape_cast %102 : vector<2x8xf32> to vector<2x8x1xf32>
    %104 = tpu.reciprocal %103 : vector<2x8x1xf32> -> vector<2x8x1xf32>
    %105 = vector.broadcast %104 : vector<2x8x1xf32> to vector<2x8x8xf32>
    %106 = arith.mulf %101, %105 : vector<2x8x8xf32>
    %107 = vector.extract_strided_slice %29 {offsets = [0, 0, 24], sizes = [2, 8, 8], strides = [1, 1, 1]} : vector<2x8x32xf32> to vector<2x8x8xf32>
    "tpu.trace_start"() <{level = 10 : i32, message = "bqk,bkd->bqd"}> : () -> ()
    %cst_37 = arith.constant dense<0.000000e+00> : vector<2x8x8xf32>
    %108 = tpu.matmul %106, %107, %cst_37 {dimension_numbers = #tpu.dot_dimension_numbers<[2], [1], [1], [2], [0, 0, 0, 1, 1, 2], [0], [0]>} : vector<2x8x8xf32>, vector<2x8x8xf32>, vector<2x8x8xf32> -> vector<2x8x8xf32>
    "tpu.trace_stop"() : () -> ()
    %109 = vector.shape_cast %108 : vector<2x8x8xf32> to vector<16x8xf32>
    %110 = vector.extract_strided_slice %30 {offsets = [24, 0], sizes = [8, 32], strides = [1, 1]} : vector<32x32xf32> to vector<8x32xf32>
    %cst_38 = arith.constant dense<0.000000e+00> : vector<16x32xf32>
    %111 = tpu.matmul %109, %110, %cst_38 {dimension_numbers = #tpu.dot_dimension_numbers<[1], [0], [0], [1], [0, 0, 1, 1], [], []>} : vector<16x8xf32>, vector<8x32xf32>, vector<16x32xf32> -> vector<16x32xf32>
    %112 = arith.addf %92, %111 : vector<16x32xf32>
    %113 = vector.broadcast %31 : vector<1x32xf32> to vector<16x32xf32>
    %114 = arith.addf %112, %113 : vector<16x32xf32>
    %115 = arith.addf %13, %114 : vector<16x32xf32>
    %c344 = arith.constant 344 : index
    %c0_39 = arith.constant 0 : index
    %116 = vector.load %arg4[%c344, %c0_39] : memref<1512x128xf32, #tpu.memory_space<vmem>>, vector<1x32xf32>
    %c352 = arith.constant 352 : index
    %c0_40 = arith.constant 0 : index
    %117 = vector.load %arg4[%c352, %c0_40] : memref<1512x128xf32, #tpu.memory_space<vmem>>, vector<1x32xf32>
    %cst_41 = arith.constant dense<0.000000e+00> : vector<16xf32>
    %118 = vector.multi_reduction <add>, %115, %cst_41 [1] : vector<16x32xf32> to vector<16xf32>
    %119 = vector.shape_cast %118 : vector<16xf32> to vector<16x1xf32>
    %cst_42 = arith.constant 3.200000e+01 : f32
    %120 = vector.broadcast %cst_42 : f32 to vector<16x1xf32>
    %121 = arith.divf %119, %120 : vector<16x1xf32>
    %122 = arith.mulf %115, %115 : vector<16x32xf32>
    %cst_43 = arith.constant dense<0.000000e+00> : vector<16xf32>
    %123 = vector.multi_reduction <add>, %122, %cst_43 [1] : vector<16x32xf32> to vector<16xf32>
    %124 = vector.shape_cast %123 : vector<16xf32> to vector<16x1xf32>
    %cst_44 = arith.constant 3.200000e+01 : f32
    %125 = vector.broadcast %cst_44 : f32 to vector<16x1xf32>
    %126 = arith.divf %124, %125 : vector<16x1xf32>
    %127 = arith.mulf %121, %121 : vector<16x1xf32>
    %128 = arith.subf %126, %127 : vector<16x1xf32>
    %129 = vector.broadcast %121 : vector<16x1xf32> to vector<16x32xf32>
    %130 = arith.subf %115, %129 : vector<16x32xf32>
    %cst_45 = arith.constant 9.99999974E-6 : f32
    %131 = vector.broadcast %cst_45 : f32 to vector<16x1xf32>
    %132 = arith.addf %128, %131 : vector<16x1xf32>
    %133 = math.rsqrt %132 : vector<16x1xf32>
    %134 = vector.broadcast %133 : vector<16x1xf32> to vector<16x32xf32>
    %135 = arith.mulf %130, %134 : vector<16x32xf32>
    %136 = vector.broadcast %116 : vector<1x32xf32> to vector<16x32xf32>
    %137 = arith.mulf %135, %136 : vector<16x32xf32>
    %138 = vector.broadcast %117 : vector<1x32xf32> to vector<16x32xf32>
    %139 = arith.addf %137, %138 : vector<16x32xf32>
    %c168 = arith.constant 168 : index
    %c0_46 = arith.constant 0 : index
    %140 = vector.load %arg4[%c168, %c0_46] : memref<1512x128xf32, #tpu.memory_space<vmem>>, vector<32x128xf32>
    %cst_47 = arith.constant dense<0.000000e+00> : vector<16x128xf32>
    %141 = tpu.matmul %139, %140, %cst_47 {dimension_numbers = #tpu.dot_dimension_numbers<[1], [0], [0], [1], [0, 0, 1, 1], [], []>} : vector<16x32xf32>, vector<32x128xf32>, vector<16x128xf32> -> vector<16x128xf32>
    %c200 = arith.constant 200 : index
    %c0_48 = arith.constant 0 : index
    %142 = vector.load %arg4[%c200, %c0_48] : memref<1512x128xf32, #tpu.memory_space<vmem>>, vector<1x128xf32>
    %143 = vector.broadcast %142 : vector<1x128xf32> to vector<16x128xf32>
    %144 = arith.addf %141, %143 : vector<16x128xf32>
    %cst_49 = arith.constant 0.000000e+00 : f32
    %145 = vector.broadcast %cst_49 : f32 to vector<16x128xf32>
    %146 = arith.maximumf %144, %145 : vector<16x128xf32>
    %c208 = arith.constant 208 : index
    %c0_50 = arith.constant 0 : index
    %147 = vector.load %arg4[%c208, %c0_50] : memref<1512x128xf32, #tpu.memory_space<vmem>>, vector<128x32xf32>
    %cst_51 = arith.constant dense<0.000000e+00> : vector<16x32xf32>
    %148 = tpu.matmul %146, %147, %cst_51 {dimension_numbers = #tpu.dot_dimension_numbers<[1], [0], [0], [1], [0, 0, 1, 1], [], []>} : vector<16x128xf32>, vector<128x32xf32>, vector<16x32xf32> -> vector<16x32xf32>
    %c336 = arith.constant 336 : index
    %c0_52 = arith.constant 0 : index
    %149 = vector.load %arg4[%c336, %c0_52] : memref<1512x128xf32, #tpu.memory_space<vmem>>, vector<1x32xf32>
    %150 = vector.broadcast %149 : vector<1x32xf32> to vector<16x32xf32>
    %151 = arith.addf %148, %150 : vector<16x32xf32>
    %152 = arith.addf %139, %151 : vector<16x32xf32>
    %c360 = arith.constant 360 : index
    %c0_53 = arith.constant 0 : index
    %153 = vector.load %arg4[%c360, %c0_53] : memref<1512x128xf32, #tpu.memory_space<vmem>>, vector<1x32xf32>
    %c368 = arith.constant 368 : index
    %c0_54 = arith.constant 0 : index
    %154 = vector.load %arg4[%c368, %c0_54] : memref<1512x128xf32, #tpu.memory_space<vmem>>, vector<1x32xf32>
    %cst_55 = arith.constant dense<0.000000e+00> : vector<16xf32>
    %155 = vector.multi_reduction <add>, %152, %cst_55 [1] : vector<16x32xf32> to vector<16xf32>
    %156 = vector.shape_cast %155 : vector<16xf32> to vector<16x1xf32>
    %cst_56 = arith.constant 3.200000e+01 : f32
    %157 = vector.broadcast %cst_56 : f32 to vector<16x1xf32>
    %158 = arith.divf %156, %157 : vector<16x1xf32>
    %159 = arith.mulf %152, %152 : vector<16x32xf32>
    %cst_57 = arith.constant dense<0.000000e+00> : vector<16xf32>
    %160 = vector.multi_reduction <add>, %159, %cst_57 [1] : vector<16x32xf32> to vector<16xf32>
    %161 = vector.shape_cast %160 : vector<16xf32> to vector<16x1xf32>
    %cst_58 = arith.constant 3.200000e+01 : f32
    %162 = vector.broadcast %cst_58 : f32 to vector<16x1xf32>
    %163 = arith.divf %161, %162 : vector<16x1xf32>
    %164 = arith.mulf %158, %158 : vector<16x1xf32>
    %165 = arith.subf %163, %164 : vector<16x1xf32>
    %166 = vector.broadcast %158 : vector<16x1xf32> to vector<16x32xf32>
    %167 = arith.subf %152, %166 : vector<16x32xf32>
    %cst_59 = arith.constant 9.99999974E-6 : f32
    %168 = vector.broadcast %cst_59 : f32 to vector<16x1xf32>
    %169 = arith.addf %165, %168 : vector<16x1xf32>
    %170 = math.rsqrt %169 : vector<16x1xf32>
    %171 = vector.broadcast %170 : vector<16x1xf32> to vector<16x32xf32>
    %172 = arith.mulf %167, %171 : vector<16x32xf32>
    %173 = vector.broadcast %153 : vector<1x32xf32> to vector<16x32xf32>
    %174 = arith.mulf %172, %173 : vector<16x32xf32>
    %175 = vector.broadcast %154 : vector<1x32xf32> to vector<16x32xf32>
    %176 = arith.addf %174, %175 : vector<16x32xf32>
    %c376 = arith.constant 376 : index
    %c0_60 = arith.constant 0 : index
    %177 = vector.load %arg4[%c376, %c0_60] : memref<1512x128xf32, #tpu.memory_space<vmem>>, vector<32x96xf32>
    %cst_61 = arith.constant dense<0.000000e+00> : vector<16x96xf32>
    %178 = tpu.matmul %176, %177, %cst_61 {dimension_numbers = #tpu.dot_dimension_numbers<[1], [0], [0], [1], [0, 0, 1, 1], [], []>} : vector<16x32xf32>, vector<32x96xf32>, vector<16x96xf32> -> vector<16x96xf32>
    %c408 = arith.constant 408 : index
    %c0_62 = arith.constant 0 : index
    %179 = vector.load %arg4[%c408, %c0_62] : memref<1512x128xf32, #tpu.memory_space<vmem>>, vector<1x96xf32>
    %180 = vector.broadcast %179 : vector<1x96xf32> to vector<16x96xf32>
    %181 = arith.addf %178, %180 : vector<16x96xf32>
    %182 = vector.extract_strided_slice %181 {offsets = [0, 0], sizes = [16, 32], strides = [1, 1]} : vector<16x96xf32> to vector<16x32xf32>
    %183 = vector.shape_cast %182 : vector<16x32xf32> to vector<2x8x32xf32>
    %184 = vector.extract_strided_slice %181 {offsets = [0, 32], sizes = [16, 32], strides = [1, 1]} : vector<16x96xf32> to vector<16x32xf32>
    %185 = vector.shape_cast %184 : vector<16x32xf32> to vector<2x8x32xf32>
    %186 = vector.extract_strided_slice %181 {offsets = [0, 64], sizes = [16, 32], strides = [1, 1]} : vector<16x96xf32> to vector<16x32xf32>
    %187 = vector.shape_cast %186 : vector<16x32xf32> to vector<2x8x32xf32>
    %c416 = arith.constant 416 : index
    %c0_63 = arith.constant 0 : index
    %188 = vector.load %arg4[%c416, %c0_63] : memref<1512x128xf32, #tpu.memory_space<vmem>>, vector<32x32xf32>
    %c448 = arith.constant 448 : index
    %c0_64 = arith.constant 0 : index
    %189 = vector.load %arg4[%c448, %c0_64] : memref<1512x128xf32, #tpu.memory_space<vmem>>, vector<1x32xf32>
    %cst_65 = arith.constant 0.000000e+00 : f32
    %190 = vector.broadcast %cst_65 : f32 to vector<16x32xf32>
    %191 = vector.extract_strided_slice %183 {offsets = [0, 0, 0], sizes = [2, 8, 8], strides = [1, 1, 1]} : vector<2x8x32xf32> to vector<2x8x8xf32>
    %192 = vector.extract_strided_slice %185 {offsets = [0, 0, 0], sizes = [2, 8, 8], strides = [1, 1, 1]} : vector<2x8x32xf32> to vector<2x8x8xf32>
    "tpu.trace_start"() <{level = 10 : i32, message = "bqd,bkd->bqk"}> : () -> ()
    %cst_66 = arith.constant dense<0.000000e+00> : vector<2x8x8xf32>
    %193 = tpu.matmul %191, %192, %cst_66 {dimension_numbers = #tpu.dot_dimension_numbers<[2], [2], [1], [1], [0, 0, 0, 1, 1, 1], [0], [0]>} : vector<2x8x8xf32>, vector<2x8x8xf32>, vector<2x8x8xf32> -> vector<2x8x8xf32>
    "tpu.trace_stop"() : () -> ()
    %194 = arith.addf %193, %8 : vector<2x8x8xf32>
    %cst_67 = arith.constant dense<0xFF800000> : vector<2x8xf32>
    %195 = vector.multi_reduction <maximumf>, %194, %cst_67 [2] : vector<2x8x8xf32> to vector<2x8xf32>
    %196 = vector.shape_cast %195 : vector<2x8xf32> to vector<2x8x1xf32>
    %197 = vector.broadcast %196 : vector<2x8x1xf32> to vector<2x8x8xf32>
    %198 = arith.subf %194, %197 : vector<2x8x8xf32>
    %199 = math.exp %198 : vector<2x8x8xf32>
    %cst_68 = arith.constant dense<0.000000e+00> : vector<2x8xf32>
    %200 = vector.multi_reduction <add>, %199, %cst_68 [2] : vector<2x8x8xf32> to vector<2x8xf32>
    %201 = vector.shape_cast %200 : vector<2x8xf32> to vector<2x8x1xf32>
    %202 = tpu.reciprocal %201 : vector<2x8x1xf32> -> vector<2x8x1xf32>
    %203 = vector.broadcast %202 : vector<2x8x1xf32> to vector<2x8x8xf32>
    %204 = arith.mulf %199, %203 : vector<2x8x8xf32>
    %205 = vector.extract_strided_slice %187 {offsets = [0, 0, 0], sizes = [2, 8, 8], strides = [1, 1, 1]} : vector<2x8x32xf32> to vector<2x8x8xf32>
    "tpu.trace_start"() <{level = 10 : i32, message = "bqk,bkd->bqd"}> : () -> ()
    %cst_69 = arith.constant dense<0.000000e+00> : vector<2x8x8xf32>
    %206 = tpu.matmul %204, %205, %cst_69 {dimension_numbers = #tpu.dot_dimension_numbers<[2], [1], [1], [2], [0, 0, 0, 1, 1, 2], [0], [0]>} : vector<2x8x8xf32>, vector<2x8x8xf32>, vector<2x8x8xf32> -> vector<2x8x8xf32>
    "tpu.trace_stop"() : () -> ()
    %207 = vector.shape_cast %206 : vector<2x8x8xf32> to vector<16x8xf32>
    %208 = vector.extract_strided_slice %188 {offsets = [0, 0], sizes = [8, 32], strides = [1, 1]} : vector<32x32xf32> to vector<8x32xf32>
    %cst_70 = arith.constant dense<0.000000e+00> : vector<16x32xf32>
    %209 = tpu.matmul %207, %208, %cst_70 {dimension_numbers = #tpu.dot_dimension_numbers<[1], [0], [0], [1], [0, 0, 1, 1], [], []>} : vector<16x8xf32>, vector<8x32xf32>, vector<16x32xf32> -> vector<16x32xf32>
    %210 = arith.addf %190, %209 : vector<16x32xf32>
    %211 = vector.extract_strided_slice %183 {offsets = [0, 0, 8], sizes = [2, 8, 8], strides = [1, 1, 1]} : vector<2x8x32xf32> to vector<2x8x8xf32>
    %212 = vector.extract_strided_slice %185 {offsets = [0, 0, 8], sizes = [2, 8, 8], strides = [1, 1, 1]} : vector<2x8x32xf32> to vector<2x8x8xf32>
    "tpu.trace_start"() <{level = 10 : i32, message = "bqd,bkd->bqk"}> : () -> ()
    %cst_71 = arith.constant dense<0.000000e+00> : vector<2x8x8xf32>
    %213 = tpu.matmul %211, %212, %cst_71 {dimension_numbers = #tpu.dot_dimension_numbers<[2], [2], [1], [1], [0, 0, 0, 1, 1, 1], [0], [0]>} : vector<2x8x8xf32>, vector<2x8x8xf32>, vector<2x8x8xf32> -> vector<2x8x8xf32>
    "tpu.trace_stop"() : () -> ()
    %214 = arith.addf %213, %8 : vector<2x8x8xf32>
    %cst_72 = arith.constant dense<0xFF800000> : vector<2x8xf32>
    %215 = vector.multi_reduction <maximumf>, %214, %cst_72 [2] : vector<2x8x8xf32> to vector<2x8xf32>
    %216 = vector.shape_cast %215 : vector<2x8xf32> to vector<2x8x1xf32>
    %217 = vector.broadcast %216 : vector<2x8x1xf32> to vector<2x8x8xf32>
    %218 = arith.subf %214, %217 : vector<2x8x8xf32>
    %219 = math.exp %218 : vector<2x8x8xf32>
    %cst_73 = arith.constant dense<0.000000e+00> : vector<2x8xf32>
    %220 = vector.multi_reduction <add>, %219, %cst_73 [2] : vector<2x8x8xf32> to vector<2x8xf32>
    %221 = vector.shape_cast %220 : vector<2x8xf32> to vector<2x8x1xf32>
    %222 = tpu.reciprocal %221 : vector<2x8x1xf32> -> vector<2x8x1xf32>
    %223 = vector.broadcast %222 : vector<2x8x1xf32> to vector<2x8x8xf32>
    %224 = arith.mulf %219, %223 : vector<2x8x8xf32>
    %225 = vector.extract_strided_slice %187 {offsets = [0, 0, 8], sizes = [2, 8, 8], strides = [1, 1, 1]} : vector<2x8x32xf32> to vector<2x8x8xf32>
    "tpu.trace_start"() <{level = 10 : i32, message = "bqk,bkd->bqd"}> : () -> ()
    %cst_74 = arith.constant dense<0.000000e+00> : vector<2x8x8xf32>
    %226 = tpu.matmul %224, %225, %cst_74 {dimension_numbers = #tpu.dot_dimension_numbers<[2], [1], [1], [2], [0, 0, 0, 1, 1, 2], [0], [0]>} : vector<2x8x8xf32>, vector<2x8x8xf32>, vector<2x8x8xf32> -> vector<2x8x8xf32>
    "tpu.trace_stop"() : () -> ()
    %227 = vector.shape_cast %226 : vector<2x8x8xf32> to vector<16x8xf32>
    %228 = vector.extract_strided_slice %188 {offsets = [8, 0], sizes = [8, 32], strides = [1, 1]} : vector<32x32xf32> to vector<8x32xf32>
    %cst_75 = arith.constant dense<0.000000e+00> : vector<16x32xf32>
    %229 = tpu.matmul %227, %228, %cst_75 {dimension_numbers = #tpu.dot_dimension_numbers<[1], [0], [0], [1], [0, 0, 1, 1], [], []>} : vector<16x8xf32>, vector<8x32xf32>, vector<16x32xf32> -> vector<16x32xf32>
    %230 = arith.addf %210, %229 : vector<16x32xf32>
    %231 = vector.extract_strided_slice %183 {offsets = [0, 0, 16], sizes = [2, 8, 8], strides = [1, 1, 1]} : vector<2x8x32xf32> to vector<2x8x8xf32>
    %232 = vector.extract_strided_slice %185 {offsets = [0, 0, 16], sizes = [2, 8, 8], strides = [1, 1, 1]} : vector<2x8x32xf32> to vector<2x8x8xf32>
    "tpu.trace_start"() <{level = 10 : i32, message = "bqd,bkd->bqk"}> : () -> ()
    %cst_76 = arith.constant dense<0.000000e+00> : vector<2x8x8xf32>
    %233 = tpu.matmul %231, %232, %cst_76 {dimension_numbers = #tpu.dot_dimension_numbers<[2], [2], [1], [1], [0, 0, 0, 1, 1, 1], [0], [0]>} : vector<2x8x8xf32>, vector<2x8x8xf32>, vector<2x8x8xf32> -> vector<2x8x8xf32>
    "tpu.trace_stop"() : () -> ()
    %234 = arith.addf %233, %8 : vector<2x8x8xf32>
    %cst_77 = arith.constant dense<0xFF800000> : vector<2x8xf32>
    %235 = vector.multi_reduction <maximumf>, %234, %cst_77 [2] : vector<2x8x8xf32> to vector<2x8xf32>
    %236 = vector.shape_cast %235 : vector<2x8xf32> to vector<2x8x1xf32>
    %237 = vector.broadcast %236 : vector<2x8x1xf32> to vector<2x8x8xf32>
    %238 = arith.subf %234, %237 : vector<2x8x8xf32>
    %239 = math.exp %238 : vector<2x8x8xf32>
    %cst_78 = arith.constant dense<0.000000e+00> : vector<2x8xf32>
    %240 = vector.multi_reduction <add>, %239, %cst_78 [2] : vector<2x8x8xf32> to vector<2x8xf32>
    %241 = vector.shape_cast %240 : vector<2x8xf32> to vector<2x8x1xf32>
    %242 = tpu.reciprocal %241 : vector<2x8x1xf32> -> vector<2x8x1xf32>
    %243 = vector.broadcast %242 : vector<2x8x1xf32> to vector<2x8x8xf32>
    %244 = arith.mulf %239, %243 : vector<2x8x8xf32>
    %245 = vector.extract_strided_slice %187 {offsets = [0, 0, 16], sizes = [2, 8, 8], strides = [1, 1, 1]} : vector<2x8x32xf32> to vector<2x8x8xf32>
    "tpu.trace_start"() <{level = 10 : i32, message = "bqk,bkd->bqd"}> : () -> ()
    %cst_79 = arith.constant dense<0.000000e+00> : vector<2x8x8xf32>
    %246 = tpu.matmul %244, %245, %cst_79 {dimension_numbers = #tpu.dot_dimension_numbers<[2], [1], [1], [2], [0, 0, 0, 1, 1, 2], [0], [0]>} : vector<2x8x8xf32>, vector<2x8x8xf32>, vector<2x8x8xf32> -> vector<2x8x8xf32>
    "tpu.trace_stop"() : () -> ()
    %247 = vector.shape_cast %246 : vector<2x8x8xf32> to vector<16x8xf32>
    %248 = vector.extract_strided_slice %188 {offsets = [16, 0], sizes = [8, 32], strides = [1, 1]} : vector<32x32xf32> to vector<8x32xf32>
    %cst_80 = arith.constant dense<0.000000e+00> : vector<16x32xf32>
    %249 = tpu.matmul %247, %248, %cst_80 {dimension_numbers = #tpu.dot_dimension_numbers<[1], [0], [0], [1], [0, 0, 1, 1], [], []>} : vector<16x8xf32>, vector<8x32xf32>, vector<16x32xf32> -> vector<16x32xf32>
    %250 = arith.addf %230, %249 : vector<16x32xf32>
    %251 = vector.extract_strided_slice %183 {offsets = [0, 0, 24], sizes = [2, 8, 8], strides = [1, 1, 1]} : vector<2x8x32xf32> to vector<2x8x8xf32>
    %252 = vector.extract_strided_slice %185 {offsets = [0, 0, 24], sizes = [2, 8, 8], strides = [1, 1, 1]} : vector<2x8x32xf32> to vector<2x8x8xf32>
    "tpu.trace_start"() <{level = 10 : i32, message = "bqd,bkd->bqk"}> : () -> ()
    %cst_81 = arith.constant dense<0.000000e+00> : vector<2x8x8xf32>
    %253 = tpu.matmul %251, %252, %cst_81 {dimension_numbers = #tpu.dot_dimension_numbers<[2], [2], [1], [1], [0, 0, 0, 1, 1, 1], [0], [0]>} : vector<2x8x8xf32>, vector<2x8x8xf32>, vector<2x8x8xf32> -> vector<2x8x8xf32>
    "tpu.trace_stop"() : () -> ()
    %254 = arith.addf %253, %8 : vector<2x8x8xf32>
    %cst_82 = arith.constant dense<0xFF800000> : vector<2x8xf32>
    %255 = vector.multi_reduction <maximumf>, %254, %cst_82 [2] : vector<2x8x8xf32> to vector<2x8xf32>
    %256 = vector.shape_cast %255 : vector<2x8xf32> to vector<2x8x1xf32>
    %257 = vector.broadcast %256 : vector<2x8x1xf32> to vector<2x8x8xf32>
    %258 = arith.subf %254, %257 : vector<2x8x8xf32>
    %259 = math.exp %258 : vector<2x8x8xf32>
    %cst_83 = arith.constant dense<0.000000e+00> : vector<2x8xf32>
    %260 = vector.multi_reduction <add>, %259, %cst_83 [2] : vector<2x8x8xf32> to vector<2x8xf32>
    %261 = vector.shape_cast %260 : vector<2x8xf32> to vector<2x8x1xf32>
    %262 = tpu.reciprocal %261 : vector<2x8x1xf32> -> vector<2x8x1xf32>
    %263 = vector.broadcast %262 : vector<2x8x1xf32> to vector<2x8x8xf32>
    %264 = arith.mulf %259, %263 : vector<2x8x8xf32>
    %265 = vector.extract_strided_slice %187 {offsets = [0, 0, 24], sizes = [2, 8, 8], strides = [1, 1, 1]} : vector<2x8x32xf32> to vector<2x8x8xf32>
    "tpu.trace_start"() <{level = 10 : i32, message = "bqk,bkd->bqd"}> : () -> ()
    %cst_84 = arith.constant dense<0.000000e+00> : vector<2x8x8xf32>
    %266 = tpu.matmul %264, %265, %cst_84 {dimension_numbers = #tpu.dot_dimension_numbers<[2], [1], [1], [2], [0, 0, 0, 1, 1, 2], [0], [0]>} : vector<2x8x8xf32>, vector<2x8x8xf32>, vector<2x8x8xf32> -> vector<2x8x8xf32>
    "tpu.trace_stop"() : () -> ()
    %267 = vector.shape_cast %266 : vector<2x8x8xf32> to vector<16x8xf32>
    %268 = vector.extract_strided_slice %188 {offsets = [24, 0], sizes = [8, 32], strides = [1, 1]} : vector<32x32xf32> to vector<8x32xf32>
    %cst_85 = arith.constant dense<0.000000e+00> : vector<16x32xf32>
    %269 = tpu.matmul %267, %268, %cst_85 {dimension_numbers = #tpu.dot_dimension_numbers<[1], [0], [0], [1], [0, 0, 1, 1], [], []>} : vector<16x8xf32>, vector<8x32xf32>, vector<16x32xf32> -> vector<16x32xf32>
    %270 = arith.addf %250, %269 : vector<16x32xf32>
    %271 = vector.broadcast %189 : vector<1x32xf32> to vector<16x32xf32>
    %272 = arith.addf %270, %271 : vector<16x32xf32>
    %273 = arith.addf %176, %272 : vector<16x32xf32>
    %c632 = arith.constant 632 : index
    %c0_86 = arith.constant 0 : index
    %274 = vector.load %arg4[%c632, %c0_86] : memref<1512x128xf32, #tpu.memory_space<vmem>>, vector<1x32xf32>
    %c640 = arith.constant 640 : index
    %c0_87 = arith.constant 0 : index
    %275 = vector.load %arg4[%c640, %c0_87] : memref<1512x128xf32, #tpu.memory_space<vmem>>, vector<1x32xf32>
    %cst_88 = arith.constant dense<0.000000e+00> : vector<16xf32>
    %276 = vector.multi_reduction <add>, %273, %cst_88 [1] : vector<16x32xf32> to vector<16xf32>
    %277 = vector.shape_cast %276 : vector<16xf32> to vector<16x1xf32>
    %cst_89 = arith.constant 3.200000e+01 : f32
    %278 = vector.broadcast %cst_89 : f32 to vector<16x1xf32>
    %279 = arith.divf %277, %278 : vector<16x1xf32>
    %280 = arith.mulf %273, %273 : vector<16x32xf32>
    %cst_90 = arith.constant dense<0.000000e+00> : vector<16xf32>
    %281 = vector.multi_reduction <add>, %280, %cst_90 [1] : vector<16x32xf32> to vector<16xf32>
    %282 = vector.shape_cast %281 : vector<16xf32> to vector<16x1xf32>
    %cst_91 = arith.constant 3.200000e+01 : f32
    %283 = vector.broadcast %cst_91 : f32 to vector<16x1xf32>
    %284 = arith.divf %282, %283 : vector<16x1xf32>
    %285 = arith.mulf %279, %279 : vector<16x1xf32>
    %286 = arith.subf %284, %285 : vector<16x1xf32>
    %287 = vector.broadcast %279 : vector<16x1xf32> to vector<16x32xf32>
    %288 = arith.subf %273, %287 : vector<16x32xf32>
    %cst_92 = arith.constant 9.99999974E-6 : f32
    %289 = vector.broadcast %cst_92 : f32 to vector<16x1xf32>
    %290 = arith.addf %286, %289 : vector<16x1xf32>
    %291 = math.rsqrt %290 : vector<16x1xf32>
    %292 = vector.broadcast %291 : vector<16x1xf32> to vector<16x32xf32>
    %293 = arith.mulf %288, %292 : vector<16x32xf32>
    %294 = vector.broadcast %274 : vector<1x32xf32> to vector<16x32xf32>
    %295 = arith.mulf %293, %294 : vector<16x32xf32>
    %296 = vector.broadcast %275 : vector<1x32xf32> to vector<16x32xf32>
    %297 = arith.addf %295, %296 : vector<16x32xf32>
    %c456 = arith.constant 456 : index
    %c0_93 = arith.constant 0 : index
    %298 = vector.load %arg4[%c456, %c0_93] : memref<1512x128xf32, #tpu.memory_space<vmem>>, vector<32x128xf32>
    %cst_94 = arith.constant dense<0.000000e+00> : vector<16x128xf32>
    %299 = tpu.matmul %297, %298, %cst_94 {dimension_numbers = #tpu.dot_dimension_numbers<[1], [0], [0], [1], [0, 0, 1, 1], [], []>} : vector<16x32xf32>, vector<32x128xf32>, vector<16x128xf32> -> vector<16x128xf32>
    %c488 = arith.constant 488 : index
    %c0_95 = arith.constant 0 : index
    %300 = vector.load %arg4[%c488, %c0_95] : memref<1512x128xf32, #tpu.memory_space<vmem>>, vector<1x128xf32>
    %301 = vector.broadcast %300 : vector<1x128xf32> to vector<16x128xf32>
    %302 = arith.addf %299, %301 : vector<16x128xf32>
    %cst_96 = arith.constant 0.000000e+00 : f32
    %303 = vector.broadcast %cst_96 : f32 to vector<16x128xf32>
    %304 = arith.maximumf %302, %303 : vector<16x128xf32>
    %c496 = arith.constant 496 : index
    %c0_97 = arith.constant 0 : index
    %305 = vector.load %arg4[%c496, %c0_97] : memref<1512x128xf32, #tpu.memory_space<vmem>>, vector<128x32xf32>
    %cst_98 = arith.constant dense<0.000000e+00> : vector<16x32xf32>
    %306 = tpu.matmul %304, %305, %cst_98 {dimension_numbers = #tpu.dot_dimension_numbers<[1], [0], [0], [1], [0, 0, 1, 1], [], []>} : vector<16x128xf32>, vector<128x32xf32>, vector<16x32xf32> -> vector<16x32xf32>
    %c624 = arith.constant 624 : index
    %c0_99 = arith.constant 0 : index
    %307 = vector.load %arg4[%c624, %c0_99] : memref<1512x128xf32, #tpu.memory_space<vmem>>, vector<1x32xf32>
    %308 = vector.broadcast %307 : vector<1x32xf32> to vector<16x32xf32>
    %309 = arith.addf %306, %308 : vector<16x32xf32>
    %310 = arith.addf %297, %309 : vector<16x32xf32>
    %c648 = arith.constant 648 : index
    %c0_100 = arith.constant 0 : index
    %311 = vector.load %arg4[%c648, %c0_100] : memref<1512x128xf32, #tpu.memory_space<vmem>>, vector<1x32xf32>
    %c656 = arith.constant 656 : index
    %c0_101 = arith.constant 0 : index
    %312 = vector.load %arg4[%c656, %c0_101] : memref<1512x128xf32, #tpu.memory_space<vmem>>, vector<1x32xf32>
    %cst_102 = arith.constant dense<0.000000e+00> : vector<16xf32>
    %313 = vector.multi_reduction <add>, %310, %cst_102 [1] : vector<16x32xf32> to vector<16xf32>
    %314 = vector.shape_cast %313 : vector<16xf32> to vector<16x1xf32>
    %cst_103 = arith.constant 3.200000e+01 : f32
    %315 = vector.broadcast %cst_103 : f32 to vector<16x1xf32>
    %316 = arith.divf %314, %315 : vector<16x1xf32>
    %317 = arith.mulf %310, %310 : vector<16x32xf32>
    %cst_104 = arith.constant dense<0.000000e+00> : vector<16xf32>
    %318 = vector.multi_reduction <add>, %317, %cst_104 [1] : vector<16x32xf32> to vector<16xf32>
    %319 = vector.shape_cast %318 : vector<16xf32> to vector<16x1xf32>
    %cst_105 = arith.constant 3.200000e+01 : f32
    %320 = vector.broadcast %cst_105 : f32 to vector<16x1xf32>
    %321 = arith.divf %319, %320 : vector<16x1xf32>
    %322 = arith.mulf %316, %316 : vector<16x1xf32>
    %323 = arith.subf %321, %322 : vector<16x1xf32>
    %324 = vector.broadcast %316 : vector<16x1xf32> to vector<16x32xf32>
    %325 = arith.subf %310, %324 : vector<16x32xf32>
    %cst_106 = arith.constant 9.99999974E-6 : f32
    %326 = vector.broadcast %cst_106 : f32 to vector<16x1xf32>
    %327 = arith.addf %323, %326 : vector<16x1xf32>
    %328 = math.rsqrt %327 : vector<16x1xf32>
    %329 = vector.broadcast %328 : vector<16x1xf32> to vector<16x32xf32>
    %330 = arith.mulf %325, %329 : vector<16x32xf32>
    %331 = vector.broadcast %311 : vector<1x32xf32> to vector<16x32xf32>
    %332 = arith.mulf %330, %331 : vector<16x32xf32>
    %333 = vector.broadcast %312 : vector<1x32xf32> to vector<16x32xf32>
    %334 = arith.addf %332, %333 : vector<16x32xf32>
    %c56 = arith.constant 56 : index
    %c0_107 = arith.constant 0 : index
    %335 = vector.load %arg4[%c56, %c0_107] : memref<1512x128xf32, #tpu.memory_space<vmem>>, vector<1x32xf32>
    %c64 = arith.constant 64 : index
    %c0_108 = arith.constant 0 : index
    %336 = vector.load %arg4[%c64, %c0_108] : memref<1512x128xf32, #tpu.memory_space<vmem>>, vector<1x32xf32>
    %cst_109 = arith.constant dense<0.000000e+00> : vector<16xf32>
    %337 = vector.multi_reduction <add>, %334, %cst_109 [1] : vector<16x32xf32> to vector<16xf32>
    %338 = vector.shape_cast %337 : vector<16xf32> to vector<16x1xf32>
    %cst_110 = arith.constant 3.200000e+01 : f32
    %339 = vector.broadcast %cst_110 : f32 to vector<16x1xf32>
    %340 = arith.divf %338, %339 : vector<16x1xf32>
    %341 = arith.mulf %334, %334 : vector<16x32xf32>
    %cst_111 = arith.constant dense<0.000000e+00> : vector<16xf32>
    %342 = vector.multi_reduction <add>, %341, %cst_111 [1] : vector<16x32xf32> to vector<16xf32>
    %343 = vector.shape_cast %342 : vector<16xf32> to vector<16x1xf32>
    %cst_112 = arith.constant 3.200000e+01 : f32
    %344 = vector.broadcast %cst_112 : f32 to vector<16x1xf32>
    %345 = arith.divf %343, %344 : vector<16x1xf32>
    %346 = arith.mulf %340, %340 : vector<16x1xf32>
    %347 = arith.subf %345, %346 : vector<16x1xf32>
    %348 = vector.broadcast %340 : vector<16x1xf32> to vector<16x32xf32>
    %349 = arith.subf %334, %348 : vector<16x32xf32>
    %cst_113 = arith.constant 9.99999974E-6 : f32
    %350 = vector.broadcast %cst_113 : f32 to vector<16x1xf32>
    %351 = arith.addf %347, %350 : vector<16x1xf32>
    %352 = math.rsqrt %351 : vector<16x1xf32>
    %353 = vector.broadcast %352 : vector<16x1xf32> to vector<16x32xf32>
    %354 = arith.mulf %349, %353 : vector<16x32xf32>
    %355 = vector.broadcast %335 : vector<1x32xf32> to vector<16x32xf32>
    %356 = arith.mulf %354, %355 : vector<16x32xf32>
    %357 = vector.broadcast %336 : vector<1x32xf32> to vector<16x32xf32>
    %358 = arith.addf %356, %357 : vector<16x32xf32>
    %c664 = arith.constant 664 : index
    %c0_114 = arith.constant 0 : index
    %359 = vector.load %arg4[%c664, %c0_114] : memref<1512x128xf32, #tpu.memory_space<vmem>>, vector<32x96xf32>
    %cst_115 = arith.constant dense<0.000000e+00> : vector<16x96xf32>
    %360 = tpu.matmul %18, %359, %cst_115 {dimension_numbers = #tpu.dot_dimension_numbers<[1], [0], [0], [1], [0, 0, 1, 1], [], []>} : vector<16x32xf32>, vector<32x96xf32>, vector<16x96xf32> -> vector<16x96xf32>
    %c696 = arith.constant 696 : index
    %c0_116 = arith.constant 0 : index
    %361 = vector.load %arg4[%c696, %c0_116] : memref<1512x128xf32, #tpu.memory_space<vmem>>, vector<1x96xf32>
    %362 = vector.broadcast %361 : vector<1x96xf32> to vector<16x96xf32>
    %363 = arith.addf %360, %362 : vector<16x96xf32>
    %364 = vector.extract_strided_slice %363 {offsets = [0, 0], sizes = [16, 32], strides = [1, 1]} : vector<16x96xf32> to vector<16x32xf32>
    %365 = vector.shape_cast %364 : vector<16x32xf32> to vector<2x8x32xf32>
    %366 = vector.extract_strided_slice %363 {offsets = [0, 32], sizes = [16, 32], strides = [1, 1]} : vector<16x96xf32> to vector<16x32xf32>
    %367 = vector.shape_cast %366 : vector<16x32xf32> to vector<2x8x32xf32>
    %368 = vector.extract_strided_slice %363 {offsets = [0, 64], sizes = [16, 32], strides = [1, 1]} : vector<16x96xf32> to vector<16x32xf32>
    %369 = vector.shape_cast %368 : vector<16x32xf32> to vector<2x8x32xf32>
    %c704 = arith.constant 704 : index
    %c0_117 = arith.constant 0 : index
    %370 = vector.load %arg4[%c704, %c0_117] : memref<1512x128xf32, #tpu.memory_space<vmem>>, vector<32x32xf32>
    %c736 = arith.constant 736 : index
    %c0_118 = arith.constant 0 : index
    %371 = vector.load %arg4[%c736, %c0_118] : memref<1512x128xf32, #tpu.memory_space<vmem>>, vector<1x32xf32>
    %cst_119 = arith.constant 0.000000e+00 : f32
    %372 = vector.broadcast %cst_119 : f32 to vector<16x32xf32>
    %373 = vector.extract_strided_slice %365 {offsets = [0, 0, 0], sizes = [2, 8, 8], strides = [1, 1, 1]} : vector<2x8x32xf32> to vector<2x8x8xf32>
    %374 = vector.extract_strided_slice %367 {offsets = [0, 0, 0], sizes = [2, 8, 8], strides = [1, 1, 1]} : vector<2x8x32xf32> to vector<2x8x8xf32>
    "tpu.trace_start"() <{level = 10 : i32, message = "bqd,bkd->bqk"}> : () -> ()
    %cst_120 = arith.constant dense<0.000000e+00> : vector<2x8x8xf32>
    %375 = tpu.matmul %373, %374, %cst_120 {dimension_numbers = #tpu.dot_dimension_numbers<[2], [2], [1], [1], [0, 0, 0, 1, 1, 1], [0], [0]>} : vector<2x8x8xf32>, vector<2x8x8xf32>, vector<2x8x8xf32> -> vector<2x8x8xf32>
    "tpu.trace_stop"() : () -> ()
    %376 = arith.addf %375, %8 : vector<2x8x8xf32>
    %cst_121 = arith.constant dense<0xFF800000> : vector<2x8xf32>
    %377 = vector.multi_reduction <maximumf>, %376, %cst_121 [2] : vector<2x8x8xf32> to vector<2x8xf32>
    %378 = vector.shape_cast %377 : vector<2x8xf32> to vector<2x8x1xf32>
    %379 = vector.broadcast %378 : vector<2x8x1xf32> to vector<2x8x8xf32>
    %380 = arith.subf %376, %379 : vector<2x8x8xf32>
    %381 = math.exp %380 : vector<2x8x8xf32>
    %cst_122 = arith.constant dense<0.000000e+00> : vector<2x8xf32>
    %382 = vector.multi_reduction <add>, %381, %cst_122 [2] : vector<2x8x8xf32> to vector<2x8xf32>
    %383 = vector.shape_cast %382 : vector<2x8xf32> to vector<2x8x1xf32>
    %384 = tpu.reciprocal %383 : vector<2x8x1xf32> -> vector<2x8x1xf32>
    %385 = vector.broadcast %384 : vector<2x8x1xf32> to vector<2x8x8xf32>
    %386 = arith.mulf %381, %385 : vector<2x8x8xf32>
    %387 = vector.extract_strided_slice %369 {offsets = [0, 0, 0], sizes = [2, 8, 8], strides = [1, 1, 1]} : vector<2x8x32xf32> to vector<2x8x8xf32>
    "tpu.trace_start"() <{level = 10 : i32, message = "bqk,bkd->bqd"}> : () -> ()
    %cst_123 = arith.constant dense<0.000000e+00> : vector<2x8x8xf32>
    %388 = tpu.matmul %386, %387, %cst_123 {dimension_numbers = #tpu.dot_dimension_numbers<[2], [1], [1], [2], [0, 0, 0, 1, 1, 2], [0], [0]>} : vector<2x8x8xf32>, vector<2x8x8xf32>, vector<2x8x8xf32> -> vector<2x8x8xf32>
    "tpu.trace_stop"() : () -> ()
    %389 = vector.shape_cast %388 : vector<2x8x8xf32> to vector<16x8xf32>
    %390 = vector.extract_strided_slice %370 {offsets = [0, 0], sizes = [8, 32], strides = [1, 1]} : vector<32x32xf32> to vector<8x32xf32>
    %cst_124 = arith.constant dense<0.000000e+00> : vector<16x32xf32>
    %391 = tpu.matmul %389, %390, %cst_124 {dimension_numbers = #tpu.dot_dimension_numbers<[1], [0], [0], [1], [0, 0, 1, 1], [], []>} : vector<16x8xf32>, vector<8x32xf32>, vector<16x32xf32> -> vector<16x32xf32>
    %392 = arith.addf %372, %391 : vector<16x32xf32>
    %393 = vector.extract_strided_slice %365 {offsets = [0, 0, 8], sizes = [2, 8, 8], strides = [1, 1, 1]} : vector<2x8x32xf32> to vector<2x8x8xf32>
    %394 = vector.extract_strided_slice %367 {offsets = [0, 0, 8], sizes = [2, 8, 8], strides = [1, 1, 1]} : vector<2x8x32xf32> to vector<2x8x8xf32>
    "tpu.trace_start"() <{level = 10 : i32, message = "bqd,bkd->bqk"}> : () -> ()
    %cst_125 = arith.constant dense<0.000000e+00> : vector<2x8x8xf32>
    %395 = tpu.matmul %393, %394, %cst_125 {dimension_numbers = #tpu.dot_dimension_numbers<[2], [2], [1], [1], [0, 0, 0, 1, 1, 1], [0], [0]>} : vector<2x8x8xf32>, vector<2x8x8xf32>, vector<2x8x8xf32> -> vector<2x8x8xf32>
    "tpu.trace_stop"() : () -> ()
    %396 = arith.addf %395, %8 : vector<2x8x8xf32>
    %cst_126 = arith.constant dense<0xFF800000> : vector<2x8xf32>
    %397 = vector.multi_reduction <maximumf>, %396, %cst_126 [2] : vector<2x8x8xf32> to vector<2x8xf32>
    %398 = vector.shape_cast %397 : vector<2x8xf32> to vector<2x8x1xf32>
    %399 = vector.broadcast %398 : vector<2x8x1xf32> to vector<2x8x8xf32>
    %400 = arith.subf %396, %399 : vector<2x8x8xf32>
    %401 = math.exp %400 : vector<2x8x8xf32>
    %cst_127 = arith.constant dense<0.000000e+00> : vector<2x8xf32>
    %402 = vector.multi_reduction <add>, %401, %cst_127 [2] : vector<2x8x8xf32> to vector<2x8xf32>
    %403 = vector.shape_cast %402 : vector<2x8xf32> to vector<2x8x1xf32>
    %404 = tpu.reciprocal %403 : vector<2x8x1xf32> -> vector<2x8x1xf32>
    %405 = vector.broadcast %404 : vector<2x8x1xf32> to vector<2x8x8xf32>
    %406 = arith.mulf %401, %405 : vector<2x8x8xf32>
    %407 = vector.extract_strided_slice %369 {offsets = [0, 0, 8], sizes = [2, 8, 8], strides = [1, 1, 1]} : vector<2x8x32xf32> to vector<2x8x8xf32>
    "tpu.trace_start"() <{level = 10 : i32, message = "bqk,bkd->bqd"}> : () -> ()
    %cst_128 = arith.constant dense<0.000000e+00> : vector<2x8x8xf32>
    %408 = tpu.matmul %406, %407, %cst_128 {dimension_numbers = #tpu.dot_dimension_numbers<[2], [1], [1], [2], [0, 0, 0, 1, 1, 2], [0], [0]>} : vector<2x8x8xf32>, vector<2x8x8xf32>, vector<2x8x8xf32> -> vector<2x8x8xf32>
    "tpu.trace_stop"() : () -> ()
    %409 = vector.shape_cast %408 : vector<2x8x8xf32> to vector<16x8xf32>
    %410 = vector.extract_strided_slice %370 {offsets = [8, 0], sizes = [8, 32], strides = [1, 1]} : vector<32x32xf32> to vector<8x32xf32>
    %cst_129 = arith.constant dense<0.000000e+00> : vector<16x32xf32>
    %411 = tpu.matmul %409, %410, %cst_129 {dimension_numbers = #tpu.dot_dimension_numbers<[1], [0], [0], [1], [0, 0, 1, 1], [], []>} : vector<16x8xf32>, vector<8x32xf32>, vector<16x32xf32> -> vector<16x32xf32>
    %412 = arith.addf %392, %411 : vector<16x32xf32>
    %413 = vector.extract_strided_slice %365 {offsets = [0, 0, 16], sizes = [2, 8, 8], strides = [1, 1, 1]} : vector<2x8x32xf32> to vector<2x8x8xf32>
    %414 = vector.extract_strided_slice %367 {offsets = [0, 0, 16], sizes = [2, 8, 8], strides = [1, 1, 1]} : vector<2x8x32xf32> to vector<2x8x8xf32>
    "tpu.trace_start"() <{level = 10 : i32, message = "bqd,bkd->bqk"}> : () -> ()
    %cst_130 = arith.constant dense<0.000000e+00> : vector<2x8x8xf32>
    %415 = tpu.matmul %413, %414, %cst_130 {dimension_numbers = #tpu.dot_dimension_numbers<[2], [2], [1], [1], [0, 0, 0, 1, 1, 1], [0], [0]>} : vector<2x8x8xf32>, vector<2x8x8xf32>, vector<2x8x8xf32> -> vector<2x8x8xf32>
    "tpu.trace_stop"() : () -> ()
    %416 = arith.addf %415, %8 : vector<2x8x8xf32>
    %cst_131 = arith.constant dense<0xFF800000> : vector<2x8xf32>
    %417 = vector.multi_reduction <maximumf>, %416, %cst_131 [2] : vector<2x8x8xf32> to vector<2x8xf32>
    %418 = vector.shape_cast %417 : vector<2x8xf32> to vector<2x8x1xf32>
    %419 = vector.broadcast %418 : vector<2x8x1xf32> to vector<2x8x8xf32>
    %420 = arith.subf %416, %419 : vector<2x8x8xf32>
    %421 = math.exp %420 : vector<2x8x8xf32>
    %cst_132 = arith.constant dense<0.000000e+00> : vector<2x8xf32>
    %422 = vector.multi_reduction <add>, %421, %cst_132 [2] : vector<2x8x8xf32> to vector<2x8xf32>
    %423 = vector.shape_cast %422 : vector<2x8xf32> to vector<2x8x1xf32>
    %424 = tpu.reciprocal %423 : vector<2x8x1xf32> -> vector<2x8x1xf32>
    %425 = vector.broadcast %424 : vector<2x8x1xf32> to vector<2x8x8xf32>
    %426 = arith.mulf %421, %425 : vector<2x8x8xf32>
    %427 = vector.extract_strided_slice %369 {offsets = [0, 0, 16], sizes = [2, 8, 8], strides = [1, 1, 1]} : vector<2x8x32xf32> to vector<2x8x8xf32>
    "tpu.trace_start"() <{level = 10 : i32, message = "bqk,bkd->bqd"}> : () -> ()
    %cst_133 = arith.constant dense<0.000000e+00> : vector<2x8x8xf32>
    %428 = tpu.matmul %426, %427, %cst_133 {dimension_numbers = #tpu.dot_dimension_numbers<[2], [1], [1], [2], [0, 0, 0, 1, 1, 2], [0], [0]>} : vector<2x8x8xf32>, vector<2x8x8xf32>, vector<2x8x8xf32> -> vector<2x8x8xf32>
    "tpu.trace_stop"() : () -> ()
    %429 = vector.shape_cast %428 : vector<2x8x8xf32> to vector<16x8xf32>
    %430 = vector.extract_strided_slice %370 {offsets = [16, 0], sizes = [8, 32], strides = [1, 1]} : vector<32x32xf32> to vector<8x32xf32>
    %cst_134 = arith.constant dense<0.000000e+00> : vector<16x32xf32>
    %431 = tpu.matmul %429, %430, %cst_134 {dimension_numbers = #tpu.dot_dimension_numbers<[1], [0], [0], [1], [0, 0, 1, 1], [], []>} : vector<16x8xf32>, vector<8x32xf32>, vector<16x32xf32> -> vector<16x32xf32>
    %432 = arith.addf %412, %431 : vector<16x32xf32>
    %433 = vector.extract_strided_slice %365 {offsets = [0, 0, 24], sizes = [2, 8, 8], strides = [1, 1, 1]} : vector<2x8x32xf32> to vector<2x8x8xf32>
    %434 = vector.extract_strided_slice %367 {offsets = [0, 0, 24], sizes = [2, 8, 8], strides = [1, 1, 1]} : vector<2x8x32xf32> to vector<2x8x8xf32>
    "tpu.trace_start"() <{level = 10 : i32, message = "bqd,bkd->bqk"}> : () -> ()
    %cst_135 = arith.constant dense<0.000000e+00> : vector<2x8x8xf32>
    %435 = tpu.matmul %433, %434, %cst_135 {dimension_numbers = #tpu.dot_dimension_numbers<[2], [2], [1], [1], [0, 0, 0, 1, 1, 1], [0], [0]>} : vector<2x8x8xf32>, vector<2x8x8xf32>, vector<2x8x8xf32> -> vector<2x8x8xf32>
    "tpu.trace_stop"() : () -> ()
    %436 = arith.addf %435, %8 : vector<2x8x8xf32>
    %cst_136 = arith.constant dense<0xFF800000> : vector<2x8xf32>
    %437 = vector.multi_reduction <maximumf>, %436, %cst_136 [2] : vector<2x8x8xf32> to vector<2x8xf32>
    %438 = vector.shape_cast %437 : vector<2x8xf32> to vector<2x8x1xf32>
    %439 = vector.broadcast %438 : vector<2x8x1xf32> to vector<2x8x8xf32>
    %440 = arith.subf %436, %439 : vector<2x8x8xf32>
    %441 = math.exp %440 : vector<2x8x8xf32>
    %cst_137 = arith.constant dense<0.000000e+00> : vector<2x8xf32>
    %442 = vector.multi_reduction <add>, %441, %cst_137 [2] : vector<2x8x8xf32> to vector<2x8xf32>
    %443 = vector.shape_cast %442 : vector<2x8xf32> to vector<2x8x1xf32>
    %444 = tpu.reciprocal %443 : vector<2x8x1xf32> -> vector<2x8x1xf32>
    %445 = vector.broadcast %444 : vector<2x8x1xf32> to vector<2x8x8xf32>
    %446 = arith.mulf %441, %445 : vector<2x8x8xf32>
    %447 = vector.extract_strided_slice %369 {offsets = [0, 0, 24], sizes = [2, 8, 8], strides = [1, 1, 1]} : vector<2x8x32xf32> to vector<2x8x8xf32>
    "tpu.trace_start"() <{level = 10 : i32, message = "bqk,bkd->bqd"}> : () -> ()
    %cst_138 = arith.constant dense<0.000000e+00> : vector<2x8x8xf32>
    %448 = tpu.matmul %446, %447, %cst_138 {dimension_numbers = #tpu.dot_dimension_numbers<[2], [1], [1], [2], [0, 0, 0, 1, 1, 2], [0], [0]>} : vector<2x8x8xf32>, vector<2x8x8xf32>, vector<2x8x8xf32> -> vector<2x8x8xf32>
    "tpu.trace_stop"() : () -> ()
    %449 = vector.shape_cast %448 : vector<2x8x8xf32> to vector<16x8xf32>
    %450 = vector.extract_strided_slice %370 {offsets = [24, 0], sizes = [8, 32], strides = [1, 1]} : vector<32x32xf32> to vector<8x32xf32>
    %cst_139 = arith.constant dense<0.000000e+00> : vector<16x32xf32>
    %451 = tpu.matmul %449, %450, %cst_139 {dimension_numbers = #tpu.dot_dimension_numbers<[1], [0], [0], [1], [0, 0, 1, 1], [], []>} : vector<16x8xf32>, vector<8x32xf32>, vector<16x32xf32> -> vector<16x32xf32>
    %452 = arith.addf %432, %451 : vector<16x32xf32>
    %453 = vector.broadcast %371 : vector<1x32xf32> to vector<16x32xf32>
    %454 = arith.addf %452, %453 : vector<16x32xf32>
    %455 = arith.addf %18, %454 : vector<16x32xf32>
    %c1040 = arith.constant 1040 : index
    %c0_140 = arith.constant 0 : index
    %456 = vector.load %arg4[%c1040, %c0_140] : memref<1512x128xf32, #tpu.memory_space<vmem>>, vector<1x32xf32>
    %c1048 = arith.constant 1048 : index
    %c0_141 = arith.constant 0 : index
    %457 = vector.load %arg4[%c1048, %c0_141] : memref<1512x128xf32, #tpu.memory_space<vmem>>, vector<1x32xf32>
    %cst_142 = arith.constant dense<0.000000e+00> : vector<16xf32>
    %458 = vector.multi_reduction <add>, %455, %cst_142 [1] : vector<16x32xf32> to vector<16xf32>
    %459 = vector.shape_cast %458 : vector<16xf32> to vector<16x1xf32>
    %cst_143 = arith.constant 3.200000e+01 : f32
    %460 = vector.broadcast %cst_143 : f32 to vector<16x1xf32>
    %461 = arith.divf %459, %460 : vector<16x1xf32>
    %462 = arith.mulf %455, %455 : vector<16x32xf32>
    %cst_144 = arith.constant dense<0.000000e+00> : vector<16xf32>
    %463 = vector.multi_reduction <add>, %462, %cst_144 [1] : vector<16x32xf32> to vector<16xf32>
    %464 = vector.shape_cast %463 : vector<16xf32> to vector<16x1xf32>
    %cst_145 = arith.constant 3.200000e+01 : f32
    %465 = vector.broadcast %cst_145 : f32 to vector<16x1xf32>
    %466 = arith.divf %464, %465 : vector<16x1xf32>
    %467 = arith.mulf %461, %461 : vector<16x1xf32>
    %468 = arith.subf %466, %467 : vector<16x1xf32>
    %469 = vector.broadcast %461 : vector<16x1xf32> to vector<16x32xf32>
    %470 = arith.subf %455, %469 : vector<16x32xf32>
    %cst_146 = arith.constant 9.99999974E-6 : f32
    %471 = vector.broadcast %cst_146 : f32 to vector<16x1xf32>
    %472 = arith.addf %468, %471 : vector<16x1xf32>
    %473 = math.rsqrt %472 : vector<16x1xf32>
    %474 = vector.broadcast %473 : vector<16x1xf32> to vector<16x32xf32>
    %475 = arith.mulf %470, %474 : vector<16x32xf32>
    %476 = vector.broadcast %456 : vector<1x32xf32> to vector<16x32xf32>
    %477 = arith.mulf %475, %476 : vector<16x32xf32>
    %478 = vector.broadcast %457 : vector<1x32xf32> to vector<16x32xf32>
    %479 = arith.addf %477, %478 : vector<16x32xf32>
    %c744 = arith.constant 744 : index
    %c0_147 = arith.constant 0 : index
    %480 = vector.load %arg4[%c744, %c0_147] : memref<1512x128xf32, #tpu.memory_space<vmem>>, vector<32x32xf32>
    %cst_148 = arith.constant dense<0.000000e+00> : vector<16x32xf32>
    %481 = tpu.matmul %479, %480, %cst_148 {dimension_numbers = #tpu.dot_dimension_numbers<[1], [0], [0], [1], [0, 0, 1, 1], [], []>} : vector<16x32xf32>, vector<32x32xf32>, vector<16x32xf32> -> vector<16x32xf32>
    %c776 = arith.constant 776 : index
    %c0_149 = arith.constant 0 : index
    %482 = vector.load %arg4[%c776, %c0_149] : memref<1512x128xf32, #tpu.memory_space<vmem>>, vector<1x32xf32>
    %483 = vector.broadcast %482 : vector<1x32xf32> to vector<16x32xf32>
    %484 = arith.addf %481, %483 : vector<16x32xf32>
    %485 = vector.shape_cast %484 : vector<16x32xf32> to vector<2x8x32xf32>
    %c784 = arith.constant 784 : index
    %c0_150 = arith.constant 0 : index
    %486 = vector.load %arg4[%c784, %c0_150] : memref<1512x128xf32, #tpu.memory_space<vmem>>, vector<32x64xf32>
    %cst_151 = arith.constant dense<0.000000e+00> : vector<16x64xf32>
    %487 = tpu.matmul %358, %486, %cst_151 {dimension_numbers = #tpu.dot_dimension_numbers<[1], [0], [0], [1], [0, 0, 1, 1], [], []>} : vector<16x32xf32>, vector<32x64xf32>, vector<16x64xf32> -> vector<16x64xf32>
    %c816 = arith.constant 816 : index
    %c0_152 = arith.constant 0 : index
    %488 = vector.load %arg4[%c816, %c0_152] : memref<1512x128xf32, #tpu.memory_space<vmem>>, vector<1x64xf32>
    %489 = vector.broadcast %488 : vector<1x64xf32> to vector<16x64xf32>
    %490 = arith.addf %487, %489 : vector<16x64xf32>
    %491 = vector.extract_strided_slice %490 {offsets = [0, 0], sizes = [16, 32], strides = [1, 1]} : vector<16x64xf32> to vector<16x32xf32>
    %492 = vector.shape_cast %491 : vector<16x32xf32> to vector<2x8x32xf32>
    %493 = vector.extract_strided_slice %490 {offsets = [0, 32], sizes = [16, 32], strides = [1, 1]} : vector<16x64xf32> to vector<16x32xf32>
    %494 = vector.shape_cast %493 : vector<16x32xf32> to vector<2x8x32xf32>
    %c824 = arith.constant 824 : index
    %c0_153 = arith.constant 0 : index
    %495 = vector.load %arg4[%c824, %c0_153] : memref<1512x128xf32, #tpu.memory_space<vmem>>, vector<32x32xf32>
    %c856 = arith.constant 856 : index
    %c0_154 = arith.constant 0 : index
    %496 = vector.load %arg4[%c856, %c0_154] : memref<1512x128xf32, #tpu.memory_space<vmem>>, vector<1x32xf32>
    %cst_155 = arith.constant 0.000000e+00 : f32
    %497 = vector.broadcast %cst_155 : f32 to vector<16x32xf32>
    %498 = vector.extract_strided_slice %485 {offsets = [0, 0, 0], sizes = [2, 8, 8], strides = [1, 1, 1]} : vector<2x8x32xf32> to vector<2x8x8xf32>
    %499 = vector.extract_strided_slice %492 {offsets = [0, 0, 0], sizes = [2, 8, 8], strides = [1, 1, 1]} : vector<2x8x32xf32> to vector<2x8x8xf32>
    "tpu.trace_start"() <{level = 10 : i32, message = "bqd,bkd->bqk"}> : () -> ()
    %cst_156 = arith.constant dense<0.000000e+00> : vector<2x8x8xf32>
    %500 = tpu.matmul %498, %499, %cst_156 {dimension_numbers = #tpu.dot_dimension_numbers<[2], [2], [1], [1], [0, 0, 0, 1, 1, 1], [0], [0]>} : vector<2x8x8xf32>, vector<2x8x8xf32>, vector<2x8x8xf32> -> vector<2x8x8xf32>
    "tpu.trace_stop"() : () -> ()
    %cst_157 = arith.constant dense<0xFF800000> : vector<2x8xf32>
    %501 = vector.multi_reduction <maximumf>, %500, %cst_157 [2] : vector<2x8x8xf32> to vector<2x8xf32>
    %502 = vector.shape_cast %501 : vector<2x8xf32> to vector<2x8x1xf32>
    %503 = vector.broadcast %502 : vector<2x8x1xf32> to vector<2x8x8xf32>
    %504 = arith.subf %500, %503 : vector<2x8x8xf32>
    %505 = math.exp %504 : vector<2x8x8xf32>
    %cst_158 = arith.constant dense<0.000000e+00> : vector<2x8xf32>
    %506 = vector.multi_reduction <add>, %505, %cst_158 [2] : vector<2x8x8xf32> to vector<2x8xf32>
    %507 = vector.shape_cast %506 : vector<2x8xf32> to vector<2x8x1xf32>
    %508 = tpu.reciprocal %507 : vector<2x8x1xf32> -> vector<2x8x1xf32>
    %509 = vector.broadcast %508 : vector<2x8x1xf32> to vector<2x8x8xf32>
    %510 = arith.mulf %505, %509 : vector<2x8x8xf32>
    %511 = vector.extract_strided_slice %494 {offsets = [0, 0, 0], sizes = [2, 8, 8], strides = [1, 1, 1]} : vector<2x8x32xf32> to vector<2x8x8xf32>
    "tpu.trace_start"() <{level = 10 : i32, message = "bqk,bkd->bqd"}> : () -> ()
    %cst_159 = arith.constant dense<0.000000e+00> : vector<2x8x8xf32>
    %512 = tpu.matmul %510, %511, %cst_159 {dimension_numbers = #tpu.dot_dimension_numbers<[2], [1], [1], [2], [0, 0, 0, 1, 1, 2], [0], [0]>} : vector<2x8x8xf32>, vector<2x8x8xf32>, vector<2x8x8xf32> -> vector<2x8x8xf32>
    "tpu.trace_stop"() : () -> ()
    %513 = vector.shape_cast %512 : vector<2x8x8xf32> to vector<16x8xf32>
    %514 = vector.extract_strided_slice %495 {offsets = [0, 0], sizes = [8, 32], strides = [1, 1]} : vector<32x32xf32> to vector<8x32xf32>
    %cst_160 = arith.constant dense<0.000000e+00> : vector<16x32xf32>
    %515 = tpu.matmul %513, %514, %cst_160 {dimension_numbers = #tpu.dot_dimension_numbers<[1], [0], [0], [1], [0, 0, 1, 1], [], []>} : vector<16x8xf32>, vector<8x32xf32>, vector<16x32xf32> -> vector<16x32xf32>
    %516 = arith.addf %497, %515 : vector<16x32xf32>
    %517 = vector.extract_strided_slice %485 {offsets = [0, 0, 8], sizes = [2, 8, 8], strides = [1, 1, 1]} : vector<2x8x32xf32> to vector<2x8x8xf32>
    %518 = vector.extract_strided_slice %492 {offsets = [0, 0, 8], sizes = [2, 8, 8], strides = [1, 1, 1]} : vector<2x8x32xf32> to vector<2x8x8xf32>
    "tpu.trace_start"() <{level = 10 : i32, message = "bqd,bkd->bqk"}> : () -> ()
    %cst_161 = arith.constant dense<0.000000e+00> : vector<2x8x8xf32>
    %519 = tpu.matmul %517, %518, %cst_161 {dimension_numbers = #tpu.dot_dimension_numbers<[2], [2], [1], [1], [0, 0, 0, 1, 1, 1], [0], [0]>} : vector<2x8x8xf32>, vector<2x8x8xf32>, vector<2x8x8xf32> -> vector<2x8x8xf32>
    "tpu.trace_stop"() : () -> ()
    %cst_162 = arith.constant dense<0xFF800000> : vector<2x8xf32>
    %520 = vector.multi_reduction <maximumf>, %519, %cst_162 [2] : vector<2x8x8xf32> to vector<2x8xf32>
    %521 = vector.shape_cast %520 : vector<2x8xf32> to vector<2x8x1xf32>
    %522 = vector.broadcast %521 : vector<2x8x1xf32> to vector<2x8x8xf32>
    %523 = arith.subf %519, %522 : vector<2x8x8xf32>
    %524 = math.exp %523 : vector<2x8x8xf32>
    %cst_163 = arith.constant dense<0.000000e+00> : vector<2x8xf32>
    %525 = vector.multi_reduction <add>, %524, %cst_163 [2] : vector<2x8x8xf32> to vector<2x8xf32>
    %526 = vector.shape_cast %525 : vector<2x8xf32> to vector<2x8x1xf32>
    %527 = tpu.reciprocal %526 : vector<2x8x1xf32> -> vector<2x8x1xf32>
    %528 = vector.broadcast %527 : vector<2x8x1xf32> to vector<2x8x8xf32>
    %529 = arith.mulf %524, %528 : vector<2x8x8xf32>
    %530 = vector.extract_strided_slice %494 {offsets = [0, 0, 8], sizes = [2, 8, 8], strides = [1, 1, 1]} : vector<2x8x32xf32> to vector<2x8x8xf32>
    "tpu.trace_start"() <{level = 10 : i32, message = "bqk,bkd->bqd"}> : () -> ()
    %cst_164 = arith.constant dense<0.000000e+00> : vector<2x8x8xf32>
    %531 = tpu.matmul %529, %530, %cst_164 {dimension_numbers = #tpu.dot_dimension_numbers<[2], [1], [1], [2], [0, 0, 0, 1, 1, 2], [0], [0]>} : vector<2x8x8xf32>, vector<2x8x8xf32>, vector<2x8x8xf32> -> vector<2x8x8xf32>
    "tpu.trace_stop"() : () -> ()
    %532 = vector.shape_cast %531 : vector<2x8x8xf32> to vector<16x8xf32>
    %533 = vector.extract_strided_slice %495 {offsets = [8, 0], sizes = [8, 32], strides = [1, 1]} : vector<32x32xf32> to vector<8x32xf32>
    %cst_165 = arith.constant dense<0.000000e+00> : vector<16x32xf32>
    %534 = tpu.matmul %532, %533, %cst_165 {dimension_numbers = #tpu.dot_dimension_numbers<[1], [0], [0], [1], [0, 0, 1, 1], [], []>} : vector<16x8xf32>, vector<8x32xf32>, vector<16x32xf32> -> vector<16x32xf32>
    %535 = arith.addf %516, %534 : vector<16x32xf32>
    %536 = vector.extract_strided_slice %485 {offsets = [0, 0, 16], sizes = [2, 8, 8], strides = [1, 1, 1]} : vector<2x8x32xf32> to vector<2x8x8xf32>
    %537 = vector.extract_strided_slice %492 {offsets = [0, 0, 16], sizes = [2, 8, 8], strides = [1, 1, 1]} : vector<2x8x32xf32> to vector<2x8x8xf32>
    "tpu.trace_start"() <{level = 10 : i32, message = "bqd,bkd->bqk"}> : () -> ()
    %cst_166 = arith.constant dense<0.000000e+00> : vector<2x8x8xf32>
    %538 = tpu.matmul %536, %537, %cst_166 {dimension_numbers = #tpu.dot_dimension_numbers<[2], [2], [1], [1], [0, 0, 0, 1, 1, 1], [0], [0]>} : vector<2x8x8xf32>, vector<2x8x8xf32>, vector<2x8x8xf32> -> vector<2x8x8xf32>
    "tpu.trace_stop"() : () -> ()
    %cst_167 = arith.constant dense<0xFF800000> : vector<2x8xf32>
    %539 = vector.multi_reduction <maximumf>, %538, %cst_167 [2] : vector<2x8x8xf32> to vector<2x8xf32>
    %540 = vector.shape_cast %539 : vector<2x8xf32> to vector<2x8x1xf32>
    %541 = vector.broadcast %540 : vector<2x8x1xf32> to vector<2x8x8xf32>
    %542 = arith.subf %538, %541 : vector<2x8x8xf32>
    %543 = math.exp %542 : vector<2x8x8xf32>
    %cst_168 = arith.constant dense<0.000000e+00> : vector<2x8xf32>
    %544 = vector.multi_reduction <add>, %543, %cst_168 [2] : vector<2x8x8xf32> to vector<2x8xf32>
    %545 = vector.shape_cast %544 : vector<2x8xf32> to vector<2x8x1xf32>
    %546 = tpu.reciprocal %545 : vector<2x8x1xf32> -> vector<2x8x1xf32>
    %547 = vector.broadcast %546 : vector<2x8x1xf32> to vector<2x8x8xf32>
    %548 = arith.mulf %543, %547 : vector<2x8x8xf32>
    %549 = vector.extract_strided_slice %494 {offsets = [0, 0, 16], sizes = [2, 8, 8], strides = [1, 1, 1]} : vector<2x8x32xf32> to vector<2x8x8xf32>
    "tpu.trace_start"() <{level = 10 : i32, message = "bqk,bkd->bqd"}> : () -> ()
    %cst_169 = arith.constant dense<0.000000e+00> : vector<2x8x8xf32>
    %550 = tpu.matmul %548, %549, %cst_169 {dimension_numbers = #tpu.dot_dimension_numbers<[2], [1], [1], [2], [0, 0, 0, 1, 1, 2], [0], [0]>} : vector<2x8x8xf32>, vector<2x8x8xf32>, vector<2x8x8xf32> -> vector<2x8x8xf32>
    "tpu.trace_stop"() : () -> ()
    %551 = vector.shape_cast %550 : vector<2x8x8xf32> to vector<16x8xf32>
    %552 = vector.extract_strided_slice %495 {offsets = [16, 0], sizes = [8, 32], strides = [1, 1]} : vector<32x32xf32> to vector<8x32xf32>
    %cst_170 = arith.constant dense<0.000000e+00> : vector<16x32xf32>
    %553 = tpu.matmul %551, %552, %cst_170 {dimension_numbers = #tpu.dot_dimension_numbers<[1], [0], [0], [1], [0, 0, 1, 1], [], []>} : vector<16x8xf32>, vector<8x32xf32>, vector<16x32xf32> -> vector<16x32xf32>
    %554 = arith.addf %535, %553 : vector<16x32xf32>
    %555 = vector.extract_strided_slice %485 {offsets = [0, 0, 24], sizes = [2, 8, 8], strides = [1, 1, 1]} : vector<2x8x32xf32> to vector<2x8x8xf32>
    %556 = vector.extract_strided_slice %492 {offsets = [0, 0, 24], sizes = [2, 8, 8], strides = [1, 1, 1]} : vector<2x8x32xf32> to vector<2x8x8xf32>
    "tpu.trace_start"() <{level = 10 : i32, message = "bqd,bkd->bqk"}> : () -> ()
    %cst_171 = arith.constant dense<0.000000e+00> : vector<2x8x8xf32>
    %557 = tpu.matmul %555, %556, %cst_171 {dimension_numbers = #tpu.dot_dimension_numbers<[2], [2], [1], [1], [0, 0, 0, 1, 1, 1], [0], [0]>} : vector<2x8x8xf32>, vector<2x8x8xf32>, vector<2x8x8xf32> -> vector<2x8x8xf32>
    "tpu.trace_stop"() : () -> ()
    %cst_172 = arith.constant dense<0xFF800000> : vector<2x8xf32>
    %558 = vector.multi_reduction <maximumf>, %557, %cst_172 [2] : vector<2x8x8xf32> to vector<2x8xf32>
    %559 = vector.shape_cast %558 : vector<2x8xf32> to vector<2x8x1xf32>
    %560 = vector.broadcast %559 : vector<2x8x1xf32> to vector<2x8x8xf32>
    %561 = arith.subf %557, %560 : vector<2x8x8xf32>
    %562 = math.exp %561 : vector<2x8x8xf32>
    %cst_173 = arith.constant dense<0.000000e+00> : vector<2x8xf32>
    %563 = vector.multi_reduction <add>, %562, %cst_173 [2] : vector<2x8x8xf32> to vector<2x8xf32>
    %564 = vector.shape_cast %563 : vector<2x8xf32> to vector<2x8x1xf32>
    %565 = tpu.reciprocal %564 : vector<2x8x1xf32> -> vector<2x8x1xf32>
    %566 = vector.broadcast %565 : vector<2x8x1xf32> to vector<2x8x8xf32>
    %567 = arith.mulf %562, %566 : vector<2x8x8xf32>
    %568 = vector.extract_strided_slice %494 {offsets = [0, 0, 24], sizes = [2, 8, 8], strides = [1, 1, 1]} : vector<2x8x32xf32> to vector<2x8x8xf32>
    "tpu.trace_start"() <{level = 10 : i32, message = "bqk,bkd->bqd"}> : () -> ()
    %cst_174 = arith.constant dense<0.000000e+00> : vector<2x8x8xf32>
    %569 = tpu.matmul %567, %568, %cst_174 {dimension_numbers = #tpu.dot_dimension_numbers<[2], [1], [1], [2], [0, 0, 0, 1, 1, 2], [0], [0]>} : vector<2x8x8xf32>, vector<2x8x8xf32>, vector<2x8x8xf32> -> vector<2x8x8xf32>
    "tpu.trace_stop"() : () -> ()
    %570 = vector.shape_cast %569 : vector<2x8x8xf32> to vector<16x8xf32>
    %571 = vector.extract_strided_slice %495 {offsets = [24, 0], sizes = [8, 32], strides = [1, 1]} : vector<32x32xf32> to vector<8x32xf32>
    %cst_175 = arith.constant dense<0.000000e+00> : vector<16x32xf32>
    %572 = tpu.matmul %570, %571, %cst_175 {dimension_numbers = #tpu.dot_dimension_numbers<[1], [0], [0], [1], [0, 0, 1, 1], [], []>} : vector<16x8xf32>, vector<8x32xf32>, vector<16x32xf32> -> vector<16x32xf32>
    %573 = arith.addf %554, %572 : vector<16x32xf32>
    %574 = vector.broadcast %496 : vector<1x32xf32> to vector<16x32xf32>
    %575 = arith.addf %573, %574 : vector<16x32xf32>
    %576 = arith.addf %479, %575 : vector<16x32xf32>
    %c1056 = arith.constant 1056 : index
    %c0_176 = arith.constant 0 : index
    %577 = vector.load %arg4[%c1056, %c0_176] : memref<1512x128xf32, #tpu.memory_space<vmem>>, vector<1x32xf32>
    %c1064 = arith.constant 1064 : index
    %c0_177 = arith.constant 0 : index
    %578 = vector.load %arg4[%c1064, %c0_177] : memref<1512x128xf32, #tpu.memory_space<vmem>>, vector<1x32xf32>
    %cst_178 = arith.constant dense<0.000000e+00> : vector<16xf32>
    %579 = vector.multi_reduction <add>, %576, %cst_178 [1] : vector<16x32xf32> to vector<16xf32>
    %580 = vector.shape_cast %579 : vector<16xf32> to vector<16x1xf32>
    %cst_179 = arith.constant 3.200000e+01 : f32
    %581 = vector.broadcast %cst_179 : f32 to vector<16x1xf32>
    %582 = arith.divf %580, %581 : vector<16x1xf32>
    %583 = arith.mulf %576, %576 : vector<16x32xf32>
    %cst_180 = arith.constant dense<0.000000e+00> : vector<16xf32>
    %584 = vector.multi_reduction <add>, %583, %cst_180 [1] : vector<16x32xf32> to vector<16xf32>
    %585 = vector.shape_cast %584 : vector<16xf32> to vector<16x1xf32>
    %cst_181 = arith.constant 3.200000e+01 : f32
    %586 = vector.broadcast %cst_181 : f32 to vector<16x1xf32>
    %587 = arith.divf %585, %586 : vector<16x1xf32>
    %588 = arith.mulf %582, %582 : vector<16x1xf32>
    %589 = arith.subf %587, %588 : vector<16x1xf32>
    %590 = vector.broadcast %582 : vector<16x1xf32> to vector<16x32xf32>
    %591 = arith.subf %576, %590 : vector<16x32xf32>
    %cst_182 = arith.constant 9.99999974E-6 : f32
    %592 = vector.broadcast %cst_182 : f32 to vector<16x1xf32>
    %593 = arith.addf %589, %592 : vector<16x1xf32>
    %594 = math.rsqrt %593 : vector<16x1xf32>
    %595 = vector.broadcast %594 : vector<16x1xf32> to vector<16x32xf32>
    %596 = arith.mulf %591, %595 : vector<16x32xf32>
    %597 = vector.broadcast %577 : vector<1x32xf32> to vector<16x32xf32>
    %598 = arith.mulf %596, %597 : vector<16x32xf32>
    %599 = vector.broadcast %578 : vector<1x32xf32> to vector<16x32xf32>
    %600 = arith.addf %598, %599 : vector<16x32xf32>
    %c864 = arith.constant 864 : index
    %c0_183 = arith.constant 0 : index
    %601 = vector.load %arg4[%c864, %c0_183] : memref<1512x128xf32, #tpu.memory_space<vmem>>, vector<32x128xf32>
    %cst_184 = arith.constant dense<0.000000e+00> : vector<16x128xf32>
    %602 = tpu.matmul %600, %601, %cst_184 {dimension_numbers = #tpu.dot_dimension_numbers<[1], [0], [0], [1], [0, 0, 1, 1], [], []>} : vector<16x32xf32>, vector<32x128xf32>, vector<16x128xf32> -> vector<16x128xf32>
    %c896 = arith.constant 896 : index
    %c0_185 = arith.constant 0 : index
    %603 = vector.load %arg4[%c896, %c0_185] : memref<1512x128xf32, #tpu.memory_space<vmem>>, vector<1x128xf32>
    %604 = vector.broadcast %603 : vector<1x128xf32> to vector<16x128xf32>
    %605 = arith.addf %602, %604 : vector<16x128xf32>
    %cst_186 = arith.constant 0.000000e+00 : f32
    %606 = vector.broadcast %cst_186 : f32 to vector<16x128xf32>
    %607 = arith.maximumf %605, %606 : vector<16x128xf32>
    %c904 = arith.constant 904 : index
    %c0_187 = arith.constant 0 : index
    %608 = vector.load %arg4[%c904, %c0_187] : memref<1512x128xf32, #tpu.memory_space<vmem>>, vector<128x32xf32>
    %cst_188 = arith.constant dense<0.000000e+00> : vector<16x32xf32>
    %609 = tpu.matmul %607, %608, %cst_188 {dimension_numbers = #tpu.dot_dimension_numbers<[1], [0], [0], [1], [0, 0, 1, 1], [], []>} : vector<16x128xf32>, vector<128x32xf32>, vector<16x32xf32> -> vector<16x32xf32>
    %c1032 = arith.constant 1032 : index
    %c0_189 = arith.constant 0 : index
    %610 = vector.load %arg4[%c1032, %c0_189] : memref<1512x128xf32, #tpu.memory_space<vmem>>, vector<1x32xf32>
    %611 = vector.broadcast %610 : vector<1x32xf32> to vector<16x32xf32>
    %612 = arith.addf %609, %611 : vector<16x32xf32>
    %613 = arith.addf %600, %612 : vector<16x32xf32>
    %c1072 = arith.constant 1072 : index
    %c0_190 = arith.constant 0 : index
    %614 = vector.load %arg4[%c1072, %c0_190] : memref<1512x128xf32, #tpu.memory_space<vmem>>, vector<1x32xf32>
    %c1080 = arith.constant 1080 : index
    %c0_191 = arith.constant 0 : index
    %615 = vector.load %arg4[%c1080, %c0_191] : memref<1512x128xf32, #tpu.memory_space<vmem>>, vector<1x32xf32>
    %cst_192 = arith.constant dense<0.000000e+00> : vector<16xf32>
    %616 = vector.multi_reduction <add>, %613, %cst_192 [1] : vector<16x32xf32> to vector<16xf32>
    %617 = vector.shape_cast %616 : vector<16xf32> to vector<16x1xf32>
    %cst_193 = arith.constant 3.200000e+01 : f32
    %618 = vector.broadcast %cst_193 : f32 to vector<16x1xf32>
    %619 = arith.divf %617, %618 : vector<16x1xf32>
    %620 = arith.mulf %613, %613 : vector<16x32xf32>
    %cst_194 = arith.constant dense<0.000000e+00> : vector<16xf32>
    %621 = vector.multi_reduction <add>, %620, %cst_194 [1] : vector<16x32xf32> to vector<16xf32>
    %622 = vector.shape_cast %621 : vector<16xf32> to vector<16x1xf32>
    %cst_195 = arith.constant 3.200000e+01 : f32
    %623 = vector.broadcast %cst_195 : f32 to vector<16x1xf32>
    %624 = arith.divf %622, %623 : vector<16x1xf32>
    %625 = arith.mulf %619, %619 : vector<16x1xf32>
    %626 = arith.subf %624, %625 : vector<16x1xf32>
    %627 = vector.broadcast %619 : vector<16x1xf32> to vector<16x32xf32>
    %628 = arith.subf %613, %627 : vector<16x32xf32>
    %cst_196 = arith.constant 9.99999974E-6 : f32
    %629 = vector.broadcast %cst_196 : f32 to vector<16x1xf32>
    %630 = arith.addf %626, %629 : vector<16x1xf32>
    %631 = math.rsqrt %630 : vector<16x1xf32>
    %632 = vector.broadcast %631 : vector<16x1xf32> to vector<16x32xf32>
    %633 = arith.mulf %628, %632 : vector<16x32xf32>
    %634 = vector.broadcast %614 : vector<1x32xf32> to vector<16x32xf32>
    %635 = arith.mulf %633, %634 : vector<16x32xf32>
    %636 = vector.broadcast %615 : vector<1x32xf32> to vector<16x32xf32>
    %637 = arith.addf %635, %636 : vector<16x32xf32>
    %c1088 = arith.constant 1088 : index
    %c0_197 = arith.constant 0 : index
    %638 = vector.load %arg4[%c1088, %c0_197] : memref<1512x128xf32, #tpu.memory_space<vmem>>, vector<32x96xf32>
    %cst_198 = arith.constant dense<0.000000e+00> : vector<16x96xf32>
    %639 = tpu.matmul %637, %638, %cst_198 {dimension_numbers = #tpu.dot_dimension_numbers<[1], [0], [0], [1], [0, 0, 1, 1], [], []>} : vector<16x32xf32>, vector<32x96xf32>, vector<16x96xf32> -> vector<16x96xf32>
    %c1120 = arith.constant 1120 : index
    %c0_199 = arith.constant 0 : index
    %640 = vector.load %arg4[%c1120, %c0_199] : memref<1512x128xf32, #tpu.memory_space<vmem>>, vector<1x96xf32>
    %641 = vector.broadcast %640 : vector<1x96xf32> to vector<16x96xf32>
    %642 = arith.addf %639, %641 : vector<16x96xf32>
    %643 = vector.extract_strided_slice %642 {offsets = [0, 0], sizes = [16, 32], strides = [1, 1]} : vector<16x96xf32> to vector<16x32xf32>
    %644 = vector.shape_cast %643 : vector<16x32xf32> to vector<2x8x32xf32>
    %645 = vector.extract_strided_slice %642 {offsets = [0, 32], sizes = [16, 32], strides = [1, 1]} : vector<16x96xf32> to vector<16x32xf32>
    %646 = vector.shape_cast %645 : vector<16x32xf32> to vector<2x8x32xf32>
    %647 = vector.extract_strided_slice %642 {offsets = [0, 64], sizes = [16, 32], strides = [1, 1]} : vector<16x96xf32> to vector<16x32xf32>
    %648 = vector.shape_cast %647 : vector<16x32xf32> to vector<2x8x32xf32>
    %c1128 = arith.constant 1128 : index
    %c0_200 = arith.constant 0 : index
    %649 = vector.load %arg4[%c1128, %c0_200] : memref<1512x128xf32, #tpu.memory_space<vmem>>, vector<32x32xf32>
    %c1160 = arith.constant 1160 : index
    %c0_201 = arith.constant 0 : index
    %650 = vector.load %arg4[%c1160, %c0_201] : memref<1512x128xf32, #tpu.memory_space<vmem>>, vector<1x32xf32>
    %cst_202 = arith.constant 0.000000e+00 : f32
    %651 = vector.broadcast %cst_202 : f32 to vector<16x32xf32>
    %652 = vector.extract_strided_slice %644 {offsets = [0, 0, 0], sizes = [2, 8, 8], strides = [1, 1, 1]} : vector<2x8x32xf32> to vector<2x8x8xf32>
    %653 = vector.extract_strided_slice %646 {offsets = [0, 0, 0], sizes = [2, 8, 8], strides = [1, 1, 1]} : vector<2x8x32xf32> to vector<2x8x8xf32>
    "tpu.trace_start"() <{level = 10 : i32, message = "bqd,bkd->bqk"}> : () -> ()
    %cst_203 = arith.constant dense<0.000000e+00> : vector<2x8x8xf32>
    %654 = tpu.matmul %652, %653, %cst_203 {dimension_numbers = #tpu.dot_dimension_numbers<[2], [2], [1], [1], [0, 0, 0, 1, 1, 1], [0], [0]>} : vector<2x8x8xf32>, vector<2x8x8xf32>, vector<2x8x8xf32> -> vector<2x8x8xf32>
    "tpu.trace_stop"() : () -> ()
    %655 = arith.addf %654, %8 : vector<2x8x8xf32>
    %cst_204 = arith.constant dense<0xFF800000> : vector<2x8xf32>
    %656 = vector.multi_reduction <maximumf>, %655, %cst_204 [2] : vector<2x8x8xf32> to vector<2x8xf32>
    %657 = vector.shape_cast %656 : vector<2x8xf32> to vector<2x8x1xf32>
    %658 = vector.broadcast %657 : vector<2x8x1xf32> to vector<2x8x8xf32>
    %659 = arith.subf %655, %658 : vector<2x8x8xf32>
    %660 = math.exp %659 : vector<2x8x8xf32>
    %cst_205 = arith.constant dense<0.000000e+00> : vector<2x8xf32>
    %661 = vector.multi_reduction <add>, %660, %cst_205 [2] : vector<2x8x8xf32> to vector<2x8xf32>
    %662 = vector.shape_cast %661 : vector<2x8xf32> to vector<2x8x1xf32>
    %663 = tpu.reciprocal %662 : vector<2x8x1xf32> -> vector<2x8x1xf32>
    %664 = vector.broadcast %663 : vector<2x8x1xf32> to vector<2x8x8xf32>
    %665 = arith.mulf %660, %664 : vector<2x8x8xf32>
    %666 = vector.extract_strided_slice %648 {offsets = [0, 0, 0], sizes = [2, 8, 8], strides = [1, 1, 1]} : vector<2x8x32xf32> to vector<2x8x8xf32>
    "tpu.trace_start"() <{level = 10 : i32, message = "bqk,bkd->bqd"}> : () -> ()
    %cst_206 = arith.constant dense<0.000000e+00> : vector<2x8x8xf32>
    %667 = tpu.matmul %665, %666, %cst_206 {dimension_numbers = #tpu.dot_dimension_numbers<[2], [1], [1], [2], [0, 0, 0, 1, 1, 2], [0], [0]>} : vector<2x8x8xf32>, vector<2x8x8xf32>, vector<2x8x8xf32> -> vector<2x8x8xf32>
    "tpu.trace_stop"() : () -> ()
    %668 = vector.shape_cast %667 : vector<2x8x8xf32> to vector<16x8xf32>
    %669 = vector.extract_strided_slice %649 {offsets = [0, 0], sizes = [8, 32], strides = [1, 1]} : vector<32x32xf32> to vector<8x32xf32>
    %cst_207 = arith.constant dense<0.000000e+00> : vector<16x32xf32>
    %670 = tpu.matmul %668, %669, %cst_207 {dimension_numbers = #tpu.dot_dimension_numbers<[1], [0], [0], [1], [0, 0, 1, 1], [], []>} : vector<16x8xf32>, vector<8x32xf32>, vector<16x32xf32> -> vector<16x32xf32>
    %671 = arith.addf %651, %670 : vector<16x32xf32>
    %672 = vector.extract_strided_slice %644 {offsets = [0, 0, 8], sizes = [2, 8, 8], strides = [1, 1, 1]} : vector<2x8x32xf32> to vector<2x8x8xf32>
    %673 = vector.extract_strided_slice %646 {offsets = [0, 0, 8], sizes = [2, 8, 8], strides = [1, 1, 1]} : vector<2x8x32xf32> to vector<2x8x8xf32>
    "tpu.trace_start"() <{level = 10 : i32, message = "bqd,bkd->bqk"}> : () -> ()
    %cst_208 = arith.constant dense<0.000000e+00> : vector<2x8x8xf32>
    %674 = tpu.matmul %672, %673, %cst_208 {dimension_numbers = #tpu.dot_dimension_numbers<[2], [2], [1], [1], [0, 0, 0, 1, 1, 1], [0], [0]>} : vector<2x8x8xf32>, vector<2x8x8xf32>, vector<2x8x8xf32> -> vector<2x8x8xf32>
    "tpu.trace_stop"() : () -> ()
    %675 = arith.addf %674, %8 : vector<2x8x8xf32>
    %cst_209 = arith.constant dense<0xFF800000> : vector<2x8xf32>
    %676 = vector.multi_reduction <maximumf>, %675, %cst_209 [2] : vector<2x8x8xf32> to vector<2x8xf32>
    %677 = vector.shape_cast %676 : vector<2x8xf32> to vector<2x8x1xf32>
    %678 = vector.broadcast %677 : vector<2x8x1xf32> to vector<2x8x8xf32>
    %679 = arith.subf %675, %678 : vector<2x8x8xf32>
    %680 = math.exp %679 : vector<2x8x8xf32>
    %cst_210 = arith.constant dense<0.000000e+00> : vector<2x8xf32>
    %681 = vector.multi_reduction <add>, %680, %cst_210 [2] : vector<2x8x8xf32> to vector<2x8xf32>
    %682 = vector.shape_cast %681 : vector<2x8xf32> to vector<2x8x1xf32>
    %683 = tpu.reciprocal %682 : vector<2x8x1xf32> -> vector<2x8x1xf32>
    %684 = vector.broadcast %683 : vector<2x8x1xf32> to vector<2x8x8xf32>
    %685 = arith.mulf %680, %684 : vector<2x8x8xf32>
    %686 = vector.extract_strided_slice %648 {offsets = [0, 0, 8], sizes = [2, 8, 8], strides = [1, 1, 1]} : vector<2x8x32xf32> to vector<2x8x8xf32>
    "tpu.trace_start"() <{level = 10 : i32, message = "bqk,bkd->bqd"}> : () -> ()
    %cst_211 = arith.constant dense<0.000000e+00> : vector<2x8x8xf32>
    %687 = tpu.matmul %685, %686, %cst_211 {dimension_numbers = #tpu.dot_dimension_numbers<[2], [1], [1], [2], [0, 0, 0, 1, 1, 2], [0], [0]>} : vector<2x8x8xf32>, vector<2x8x8xf32>, vector<2x8x8xf32> -> vector<2x8x8xf32>
    "tpu.trace_stop"() : () -> ()
    %688 = vector.shape_cast %687 : vector<2x8x8xf32> to vector<16x8xf32>
    %689 = vector.extract_strided_slice %649 {offsets = [8, 0], sizes = [8, 32], strides = [1, 1]} : vector<32x32xf32> to vector<8x32xf32>
    %cst_212 = arith.constant dense<0.000000e+00> : vector<16x32xf32>
    %690 = tpu.matmul %688, %689, %cst_212 {dimension_numbers = #tpu.dot_dimension_numbers<[1], [0], [0], [1], [0, 0, 1, 1], [], []>} : vector<16x8xf32>, vector<8x32xf32>, vector<16x32xf32> -> vector<16x32xf32>
    %691 = arith.addf %671, %690 : vector<16x32xf32>
    %692 = vector.extract_strided_slice %644 {offsets = [0, 0, 16], sizes = [2, 8, 8], strides = [1, 1, 1]} : vector<2x8x32xf32> to vector<2x8x8xf32>
    %693 = vector.extract_strided_slice %646 {offsets = [0, 0, 16], sizes = [2, 8, 8], strides = [1, 1, 1]} : vector<2x8x32xf32> to vector<2x8x8xf32>
    "tpu.trace_start"() <{level = 10 : i32, message = "bqd,bkd->bqk"}> : () -> ()
    %cst_213 = arith.constant dense<0.000000e+00> : vector<2x8x8xf32>
    %694 = tpu.matmul %692, %693, %cst_213 {dimension_numbers = #tpu.dot_dimension_numbers<[2], [2], [1], [1], [0, 0, 0, 1, 1, 1], [0], [0]>} : vector<2x8x8xf32>, vector<2x8x8xf32>, vector<2x8x8xf32> -> vector<2x8x8xf32>
    "tpu.trace_stop"() : () -> ()
    %695 = arith.addf %694, %8 : vector<2x8x8xf32>
    %cst_214 = arith.constant dense<0xFF800000> : vector<2x8xf32>
    %696 = vector.multi_reduction <maximumf>, %695, %cst_214 [2] : vector<2x8x8xf32> to vector<2x8xf32>
    %697 = vector.shape_cast %696 : vector<2x8xf32> to vector<2x8x1xf32>
    %698 = vector.broadcast %697 : vector<2x8x1xf32> to vector<2x8x8xf32>
    %699 = arith.subf %695, %698 : vector<2x8x8xf32>
    %700 = math.exp %699 : vector<2x8x8xf32>
    %cst_215 = arith.constant dense<0.000000e+00> : vector<2x8xf32>
    %701 = vector.multi_reduction <add>, %700, %cst_215 [2] : vector<2x8x8xf32> to vector<2x8xf32>
    %702 = vector.shape_cast %701 : vector<2x8xf32> to vector<2x8x1xf32>
    %703 = tpu.reciprocal %702 : vector<2x8x1xf32> -> vector<2x8x1xf32>
    %704 = vector.broadcast %703 : vector<2x8x1xf32> to vector<2x8x8xf32>
    %705 = arith.mulf %700, %704 : vector<2x8x8xf32>
    %706 = vector.extract_strided_slice %648 {offsets = [0, 0, 16], sizes = [2, 8, 8], strides = [1, 1, 1]} : vector<2x8x32xf32> to vector<2x8x8xf32>
    "tpu.trace_start"() <{level = 10 : i32, message = "bqk,bkd->bqd"}> : () -> ()
    %cst_216 = arith.constant dense<0.000000e+00> : vector<2x8x8xf32>
    %707 = tpu.matmul %705, %706, %cst_216 {dimension_numbers = #tpu.dot_dimension_numbers<[2], [1], [1], [2], [0, 0, 0, 1, 1, 2], [0], [0]>} : vector<2x8x8xf32>, vector<2x8x8xf32>, vector<2x8x8xf32> -> vector<2x8x8xf32>
    "tpu.trace_stop"() : () -> ()
    %708 = vector.shape_cast %707 : vector<2x8x8xf32> to vector<16x8xf32>
    %709 = vector.extract_strided_slice %649 {offsets = [16, 0], sizes = [8, 32], strides = [1, 1]} : vector<32x32xf32> to vector<8x32xf32>
    %cst_217 = arith.constant dense<0.000000e+00> : vector<16x32xf32>
    %710 = tpu.matmul %708, %709, %cst_217 {dimension_numbers = #tpu.dot_dimension_numbers<[1], [0], [0], [1], [0, 0, 1, 1], [], []>} : vector<16x8xf32>, vector<8x32xf32>, vector<16x32xf32> -> vector<16x32xf32>
    %711 = arith.addf %691, %710 : vector<16x32xf32>
    %712 = vector.extract_strided_slice %644 {offsets = [0, 0, 24], sizes = [2, 8, 8], strides = [1, 1, 1]} : vector<2x8x32xf32> to vector<2x8x8xf32>
    %713 = vector.extract_strided_slice %646 {offsets = [0, 0, 24], sizes = [2, 8, 8], strides = [1, 1, 1]} : vector<2x8x32xf32> to vector<2x8x8xf32>
    "tpu.trace_start"() <{level = 10 : i32, message = "bqd,bkd->bqk"}> : () -> ()
    %cst_218 = arith.constant dense<0.000000e+00> : vector<2x8x8xf32>
    %714 = tpu.matmul %712, %713, %cst_218 {dimension_numbers = #tpu.dot_dimension_numbers<[2], [2], [1], [1], [0, 0, 0, 1, 1, 1], [0], [0]>} : vector<2x8x8xf32>, vector<2x8x8xf32>, vector<2x8x8xf32> -> vector<2x8x8xf32>
    "tpu.trace_stop"() : () -> ()
    %715 = arith.addf %714, %8 : vector<2x8x8xf32>
    %cst_219 = arith.constant dense<0xFF800000> : vector<2x8xf32>
    %716 = vector.multi_reduction <maximumf>, %715, %cst_219 [2] : vector<2x8x8xf32> to vector<2x8xf32>
    %717 = vector.shape_cast %716 : vector<2x8xf32> to vector<2x8x1xf32>
    %718 = vector.broadcast %717 : vector<2x8x1xf32> to vector<2x8x8xf32>
    %719 = arith.subf %715, %718 : vector<2x8x8xf32>
    %720 = math.exp %719 : vector<2x8x8xf32>
    %cst_220 = arith.constant dense<0.000000e+00> : vector<2x8xf32>
    %721 = vector.multi_reduction <add>, %720, %cst_220 [2] : vector<2x8x8xf32> to vector<2x8xf32>
    %722 = vector.shape_cast %721 : vector<2x8xf32> to vector<2x8x1xf32>
    %723 = tpu.reciprocal %722 : vector<2x8x1xf32> -> vector<2x8x1xf32>
    %724 = vector.broadcast %723 : vector<2x8x1xf32> to vector<2x8x8xf32>
    %725 = arith.mulf %720, %724 : vector<2x8x8xf32>
    %726 = vector.extract_strided_slice %648 {offsets = [0, 0, 24], sizes = [2, 8, 8], strides = [1, 1, 1]} : vector<2x8x32xf32> to vector<2x8x8xf32>
    "tpu.trace_start"() <{level = 10 : i32, message = "bqk,bkd->bqd"}> : () -> ()
    %cst_221 = arith.constant dense<0.000000e+00> : vector<2x8x8xf32>
    %727 = tpu.matmul %725, %726, %cst_221 {dimension_numbers = #tpu.dot_dimension_numbers<[2], [1], [1], [2], [0, 0, 0, 1, 1, 2], [0], [0]>} : vector<2x8x8xf32>, vector<2x8x8xf32>, vector<2x8x8xf32> -> vector<2x8x8xf32>
    "tpu.trace_stop"() : () -> ()
    %728 = vector.shape_cast %727 : vector<2x8x8xf32> to vector<16x8xf32>
    %729 = vector.extract_strided_slice %649 {offsets = [24, 0], sizes = [8, 32], strides = [1, 1]} : vector<32x32xf32> to vector<8x32xf32>
    %cst_222 = arith.constant dense<0.000000e+00> : vector<16x32xf32>
    %730 = tpu.matmul %728, %729, %cst_222 {dimension_numbers = #tpu.dot_dimension_numbers<[1], [0], [0], [1], [0, 0, 1, 1], [], []>} : vector<16x8xf32>, vector<8x32xf32>, vector<16x32xf32> -> vector<16x32xf32>
    %731 = arith.addf %711, %730 : vector<16x32xf32>
    %732 = vector.broadcast %650 : vector<1x32xf32> to vector<16x32xf32>
    %733 = arith.addf %731, %732 : vector<16x32xf32>
    %734 = arith.addf %637, %733 : vector<16x32xf32>
    %c1464 = arith.constant 1464 : index
    %c0_223 = arith.constant 0 : index
    %735 = vector.load %arg4[%c1464, %c0_223] : memref<1512x128xf32, #tpu.memory_space<vmem>>, vector<1x32xf32>
    %c1472 = arith.constant 1472 : index
    %c0_224 = arith.constant 0 : index
    %736 = vector.load %arg4[%c1472, %c0_224] : memref<1512x128xf32, #tpu.memory_space<vmem>>, vector<1x32xf32>
    %cst_225 = arith.constant dense<0.000000e+00> : vector<16xf32>
    %737 = vector.multi_reduction <add>, %734, %cst_225 [1] : vector<16x32xf32> to vector<16xf32>
    %738 = vector.shape_cast %737 : vector<16xf32> to vector<16x1xf32>
    %cst_226 = arith.constant 3.200000e+01 : f32
    %739 = vector.broadcast %cst_226 : f32 to vector<16x1xf32>
    %740 = arith.divf %738, %739 : vector<16x1xf32>
    %741 = arith.mulf %734, %734 : vector<16x32xf32>
    %cst_227 = arith.constant dense<0.000000e+00> : vector<16xf32>
    %742 = vector.multi_reduction <add>, %741, %cst_227 [1] : vector<16x32xf32> to vector<16xf32>
    %743 = vector.shape_cast %742 : vector<16xf32> to vector<16x1xf32>
    %cst_228 = arith.constant 3.200000e+01 : f32
    %744 = vector.broadcast %cst_228 : f32 to vector<16x1xf32>
    %745 = arith.divf %743, %744 : vector<16x1xf32>
    %746 = arith.mulf %740, %740 : vector<16x1xf32>
    %747 = arith.subf %745, %746 : vector<16x1xf32>
    %748 = vector.broadcast %740 : vector<16x1xf32> to vector<16x32xf32>
    %749 = arith.subf %734, %748 : vector<16x32xf32>
    %cst_229 = arith.constant 9.99999974E-6 : f32
    %750 = vector.broadcast %cst_229 : f32 to vector<16x1xf32>
    %751 = arith.addf %747, %750 : vector<16x1xf32>
    %752 = math.rsqrt %751 : vector<16x1xf32>
    %753 = vector.broadcast %752 : vector<16x1xf32> to vector<16x32xf32>
    %754 = arith.mulf %749, %753 : vector<16x32xf32>
    %755 = vector.broadcast %735 : vector<1x32xf32> to vector<16x32xf32>
    %756 = arith.mulf %754, %755 : vector<16x32xf32>
    %757 = vector.broadcast %736 : vector<1x32xf32> to vector<16x32xf32>
    %758 = arith.addf %756, %757 : vector<16x32xf32>
    %c1168 = arith.constant 1168 : index
    %c0_230 = arith.constant 0 : index
    %759 = vector.load %arg4[%c1168, %c0_230] : memref<1512x128xf32, #tpu.memory_space<vmem>>, vector<32x32xf32>
    %cst_231 = arith.constant dense<0.000000e+00> : vector<16x32xf32>
    %760 = tpu.matmul %758, %759, %cst_231 {dimension_numbers = #tpu.dot_dimension_numbers<[1], [0], [0], [1], [0, 0, 1, 1], [], []>} : vector<16x32xf32>, vector<32x32xf32>, vector<16x32xf32> -> vector<16x32xf32>
    %c1200 = arith.constant 1200 : index
    %c0_232 = arith.constant 0 : index
    %761 = vector.load %arg4[%c1200, %c0_232] : memref<1512x128xf32, #tpu.memory_space<vmem>>, vector<1x32xf32>
    %762 = vector.broadcast %761 : vector<1x32xf32> to vector<16x32xf32>
    %763 = arith.addf %760, %762 : vector<16x32xf32>
    %764 = vector.shape_cast %763 : vector<16x32xf32> to vector<2x8x32xf32>
    %c1208 = arith.constant 1208 : index
    %c0_233 = arith.constant 0 : index
    %765 = vector.load %arg4[%c1208, %c0_233] : memref<1512x128xf32, #tpu.memory_space<vmem>>, vector<32x64xf32>
    %cst_234 = arith.constant dense<0.000000e+00> : vector<16x64xf32>
    %766 = tpu.matmul %358, %765, %cst_234 {dimension_numbers = #tpu.dot_dimension_numbers<[1], [0], [0], [1], [0, 0, 1, 1], [], []>} : vector<16x32xf32>, vector<32x64xf32>, vector<16x64xf32> -> vector<16x64xf32>
    %c1240 = arith.constant 1240 : index
    %c0_235 = arith.constant 0 : index
    %767 = vector.load %arg4[%c1240, %c0_235] : memref<1512x128xf32, #tpu.memory_space<vmem>>, vector<1x64xf32>
    %768 = vector.broadcast %767 : vector<1x64xf32> to vector<16x64xf32>
    %769 = arith.addf %766, %768 : vector<16x64xf32>
    %770 = vector.extract_strided_slice %769 {offsets = [0, 0], sizes = [16, 32], strides = [1, 1]} : vector<16x64xf32> to vector<16x32xf32>
    %771 = vector.shape_cast %770 : vector<16x32xf32> to vector<2x8x32xf32>
    %772 = vector.extract_strided_slice %769 {offsets = [0, 32], sizes = [16, 32], strides = [1, 1]} : vector<16x64xf32> to vector<16x32xf32>
    %773 = vector.shape_cast %772 : vector<16x32xf32> to vector<2x8x32xf32>
    %c1248 = arith.constant 1248 : index
    %c0_236 = arith.constant 0 : index
    %774 = vector.load %arg4[%c1248, %c0_236] : memref<1512x128xf32, #tpu.memory_space<vmem>>, vector<32x32xf32>
    %c1280 = arith.constant 1280 : index
    %c0_237 = arith.constant 0 : index
    %775 = vector.load %arg4[%c1280, %c0_237] : memref<1512x128xf32, #tpu.memory_space<vmem>>, vector<1x32xf32>
    %cst_238 = arith.constant 0.000000e+00 : f32
    %776 = vector.broadcast %cst_238 : f32 to vector<16x32xf32>
    %777 = vector.extract_strided_slice %764 {offsets = [0, 0, 0], sizes = [2, 8, 8], strides = [1, 1, 1]} : vector<2x8x32xf32> to vector<2x8x8xf32>
    %778 = vector.extract_strided_slice %771 {offsets = [0, 0, 0], sizes = [2, 8, 8], strides = [1, 1, 1]} : vector<2x8x32xf32> to vector<2x8x8xf32>
    "tpu.trace_start"() <{level = 10 : i32, message = "bqd,bkd->bqk"}> : () -> ()
    %cst_239 = arith.constant dense<0.000000e+00> : vector<2x8x8xf32>
    %779 = tpu.matmul %777, %778, %cst_239 {dimension_numbers = #tpu.dot_dimension_numbers<[2], [2], [1], [1], [0, 0, 0, 1, 1, 1], [0], [0]>} : vector<2x8x8xf32>, vector<2x8x8xf32>, vector<2x8x8xf32> -> vector<2x8x8xf32>
    "tpu.trace_stop"() : () -> ()
    %cst_240 = arith.constant dense<0xFF800000> : vector<2x8xf32>
    %780 = vector.multi_reduction <maximumf>, %779, %cst_240 [2] : vector<2x8x8xf32> to vector<2x8xf32>
    %781 = vector.shape_cast %780 : vector<2x8xf32> to vector<2x8x1xf32>
    %782 = vector.broadcast %781 : vector<2x8x1xf32> to vector<2x8x8xf32>
    %783 = arith.subf %779, %782 : vector<2x8x8xf32>
    %784 = math.exp %783 : vector<2x8x8xf32>
    %cst_241 = arith.constant dense<0.000000e+00> : vector<2x8xf32>
    %785 = vector.multi_reduction <add>, %784, %cst_241 [2] : vector<2x8x8xf32> to vector<2x8xf32>
    %786 = vector.shape_cast %785 : vector<2x8xf32> to vector<2x8x1xf32>
    %787 = tpu.reciprocal %786 : vector<2x8x1xf32> -> vector<2x8x1xf32>
    %788 = vector.broadcast %787 : vector<2x8x1xf32> to vector<2x8x8xf32>
    %789 = arith.mulf %784, %788 : vector<2x8x8xf32>
    %790 = vector.extract_strided_slice %773 {offsets = [0, 0, 0], sizes = [2, 8, 8], strides = [1, 1, 1]} : vector<2x8x32xf32> to vector<2x8x8xf32>
    "tpu.trace_start"() <{level = 10 : i32, message = "bqk,bkd->bqd"}> : () -> ()
    %cst_242 = arith.constant dense<0.000000e+00> : vector<2x8x8xf32>
    %791 = tpu.matmul %789, %790, %cst_242 {dimension_numbers = #tpu.dot_dimension_numbers<[2], [1], [1], [2], [0, 0, 0, 1, 1, 2], [0], [0]>} : vector<2x8x8xf32>, vector<2x8x8xf32>, vector<2x8x8xf32> -> vector<2x8x8xf32>
    "tpu.trace_stop"() : () -> ()
    %792 = vector.shape_cast %791 : vector<2x8x8xf32> to vector<16x8xf32>
    %793 = vector.extract_strided_slice %774 {offsets = [0, 0], sizes = [8, 32], strides = [1, 1]} : vector<32x32xf32> to vector<8x32xf32>
    %cst_243 = arith.constant dense<0.000000e+00> : vector<16x32xf32>
    %794 = tpu.matmul %792, %793, %cst_243 {dimension_numbers = #tpu.dot_dimension_numbers<[1], [0], [0], [1], [0, 0, 1, 1], [], []>} : vector<16x8xf32>, vector<8x32xf32>, vector<16x32xf32> -> vector<16x32xf32>
    %795 = arith.addf %776, %794 : vector<16x32xf32>
    %796 = vector.extract_strided_slice %764 {offsets = [0, 0, 8], sizes = [2, 8, 8], strides = [1, 1, 1]} : vector<2x8x32xf32> to vector<2x8x8xf32>
    %797 = vector.extract_strided_slice %771 {offsets = [0, 0, 8], sizes = [2, 8, 8], strides = [1, 1, 1]} : vector<2x8x32xf32> to vector<2x8x8xf32>
    "tpu.trace_start"() <{level = 10 : i32, message = "bqd,bkd->bqk"}> : () -> ()
    %cst_244 = arith.constant dense<0.000000e+00> : vector<2x8x8xf32>
    %798 = tpu.matmul %796, %797, %cst_244 {dimension_numbers = #tpu.dot_dimension_numbers<[2], [2], [1], [1], [0, 0, 0, 1, 1, 1], [0], [0]>} : vector<2x8x8xf32>, vector<2x8x8xf32>, vector<2x8x8xf32> -> vector<2x8x8xf32>
    "tpu.trace_stop"() : () -> ()
    %cst_245 = arith.constant dense<0xFF800000> : vector<2x8xf32>
    %799 = vector.multi_reduction <maximumf>, %798, %cst_245 [2] : vector<2x8x8xf32> to vector<2x8xf32>
    %800 = vector.shape_cast %799 : vector<2x8xf32> to vector<2x8x1xf32>
    %801 = vector.broadcast %800 : vector<2x8x1xf32> to vector<2x8x8xf32>
    %802 = arith.subf %798, %801 : vector<2x8x8xf32>
    %803 = math.exp %802 : vector<2x8x8xf32>
    %cst_246 = arith.constant dense<0.000000e+00> : vector<2x8xf32>
    %804 = vector.multi_reduction <add>, %803, %cst_246 [2] : vector<2x8x8xf32> to vector<2x8xf32>
    %805 = vector.shape_cast %804 : vector<2x8xf32> to vector<2x8x1xf32>
    %806 = tpu.reciprocal %805 : vector<2x8x1xf32> -> vector<2x8x1xf32>
    %807 = vector.broadcast %806 : vector<2x8x1xf32> to vector<2x8x8xf32>
    %808 = arith.mulf %803, %807 : vector<2x8x8xf32>
    %809 = vector.extract_strided_slice %773 {offsets = [0, 0, 8], sizes = [2, 8, 8], strides = [1, 1, 1]} : vector<2x8x32xf32> to vector<2x8x8xf32>
    "tpu.trace_start"() <{level = 10 : i32, message = "bqk,bkd->bqd"}> : () -> ()
    %cst_247 = arith.constant dense<0.000000e+00> : vector<2x8x8xf32>
    %810 = tpu.matmul %808, %809, %cst_247 {dimension_numbers = #tpu.dot_dimension_numbers<[2], [1], [1], [2], [0, 0, 0, 1, 1, 2], [0], [0]>} : vector<2x8x8xf32>, vector<2x8x8xf32>, vector<2x8x8xf32> -> vector<2x8x8xf32>
    "tpu.trace_stop"() : () -> ()
    %811 = vector.shape_cast %810 : vector<2x8x8xf32> to vector<16x8xf32>
    %812 = vector.extract_strided_slice %774 {offsets = [8, 0], sizes = [8, 32], strides = [1, 1]} : vector<32x32xf32> to vector<8x32xf32>
    %cst_248 = arith.constant dense<0.000000e+00> : vector<16x32xf32>
    %813 = tpu.matmul %811, %812, %cst_248 {dimension_numbers = #tpu.dot_dimension_numbers<[1], [0], [0], [1], [0, 0, 1, 1], [], []>} : vector<16x8xf32>, vector<8x32xf32>, vector<16x32xf32> -> vector<16x32xf32>
    %814 = arith.addf %795, %813 : vector<16x32xf32>
    %815 = vector.extract_strided_slice %764 {offsets = [0, 0, 16], sizes = [2, 8, 8], strides = [1, 1, 1]} : vector<2x8x32xf32> to vector<2x8x8xf32>
    %816 = vector.extract_strided_slice %771 {offsets = [0, 0, 16], sizes = [2, 8, 8], strides = [1, 1, 1]} : vector<2x8x32xf32> to vector<2x8x8xf32>
    "tpu.trace_start"() <{level = 10 : i32, message = "bqd,bkd->bqk"}> : () -> ()
    %cst_249 = arith.constant dense<0.000000e+00> : vector<2x8x8xf32>
    %817 = tpu.matmul %815, %816, %cst_249 {dimension_numbers = #tpu.dot_dimension_numbers<[2], [2], [1], [1], [0, 0, 0, 1, 1, 1], [0], [0]>} : vector<2x8x8xf32>, vector<2x8x8xf32>, vector<2x8x8xf32> -> vector<2x8x8xf32>
    "tpu.trace_stop"() : () -> ()
    %cst_250 = arith.constant dense<0xFF800000> : vector<2x8xf32>
    %818 = vector.multi_reduction <maximumf>, %817, %cst_250 [2] : vector<2x8x8xf32> to vector<2x8xf32>
    %819 = vector.shape_cast %818 : vector<2x8xf32> to vector<2x8x1xf32>
    %820 = vector.broadcast %819 : vector<2x8x1xf32> to vector<2x8x8xf32>
    %821 = arith.subf %817, %820 : vector<2x8x8xf32>
    %822 = math.exp %821 : vector<2x8x8xf32>
    %cst_251 = arith.constant dense<0.000000e+00> : vector<2x8xf32>
    %823 = vector.multi_reduction <add>, %822, %cst_251 [2] : vector<2x8x8xf32> to vector<2x8xf32>
    %824 = vector.shape_cast %823 : vector<2x8xf32> to vector<2x8x1xf32>
    %825 = tpu.reciprocal %824 : vector<2x8x1xf32> -> vector<2x8x1xf32>
    %826 = vector.broadcast %825 : vector<2x8x1xf32> to vector<2x8x8xf32>
    %827 = arith.mulf %822, %826 : vector<2x8x8xf32>
    %828 = vector.extract_strided_slice %773 {offsets = [0, 0, 16], sizes = [2, 8, 8], strides = [1, 1, 1]} : vector<2x8x32xf32> to vector<2x8x8xf32>
    "tpu.trace_start"() <{level = 10 : i32, message = "bqk,bkd->bqd"}> : () -> ()
    %cst_252 = arith.constant dense<0.000000e+00> : vector<2x8x8xf32>
    %829 = tpu.matmul %827, %828, %cst_252 {dimension_numbers = #tpu.dot_dimension_numbers<[2], [1], [1], [2], [0, 0, 0, 1, 1, 2], [0], [0]>} : vector<2x8x8xf32>, vector<2x8x8xf32>, vector<2x8x8xf32> -> vector<2x8x8xf32>
    "tpu.trace_stop"() : () -> ()
    %830 = vector.shape_cast %829 : vector<2x8x8xf32> to vector<16x8xf32>
    %831 = vector.extract_strided_slice %774 {offsets = [16, 0], sizes = [8, 32], strides = [1, 1]} : vector<32x32xf32> to vector<8x32xf32>
    %cst_253 = arith.constant dense<0.000000e+00> : vector<16x32xf32>
    %832 = tpu.matmul %830, %831, %cst_253 {dimension_numbers = #tpu.dot_dimension_numbers<[1], [0], [0], [1], [0, 0, 1, 1], [], []>} : vector<16x8xf32>, vector<8x32xf32>, vector<16x32xf32> -> vector<16x32xf32>
    %833 = arith.addf %814, %832 : vector<16x32xf32>
    %834 = vector.extract_strided_slice %764 {offsets = [0, 0, 24], sizes = [2, 8, 8], strides = [1, 1, 1]} : vector<2x8x32xf32> to vector<2x8x8xf32>
    %835 = vector.extract_strided_slice %771 {offsets = [0, 0, 24], sizes = [2, 8, 8], strides = [1, 1, 1]} : vector<2x8x32xf32> to vector<2x8x8xf32>
    "tpu.trace_start"() <{level = 10 : i32, message = "bqd,bkd->bqk"}> : () -> ()
    %cst_254 = arith.constant dense<0.000000e+00> : vector<2x8x8xf32>
    %836 = tpu.matmul %834, %835, %cst_254 {dimension_numbers = #tpu.dot_dimension_numbers<[2], [2], [1], [1], [0, 0, 0, 1, 1, 1], [0], [0]>} : vector<2x8x8xf32>, vector<2x8x8xf32>, vector<2x8x8xf32> -> vector<2x8x8xf32>
    "tpu.trace_stop"() : () -> ()
    %cst_255 = arith.constant dense<0xFF800000> : vector<2x8xf32>
    %837 = vector.multi_reduction <maximumf>, %836, %cst_255 [2] : vector<2x8x8xf32> to vector<2x8xf32>
    %838 = vector.shape_cast %837 : vector<2x8xf32> to vector<2x8x1xf32>
    %839 = vector.broadcast %838 : vector<2x8x1xf32> to vector<2x8x8xf32>
    %840 = arith.subf %836, %839 : vector<2x8x8xf32>
    %841 = math.exp %840 : vector<2x8x8xf32>
    %cst_256 = arith.constant dense<0.000000e+00> : vector<2x8xf32>
    %842 = vector.multi_reduction <add>, %841, %cst_256 [2] : vector<2x8x8xf32> to vector<2x8xf32>
    %843 = vector.shape_cast %842 : vector<2x8xf32> to vector<2x8x1xf32>
    %844 = tpu.reciprocal %843 : vector<2x8x1xf32> -> vector<2x8x1xf32>
    %845 = vector.broadcast %844 : vector<2x8x1xf32> to vector<2x8x8xf32>
    %846 = arith.mulf %841, %845 : vector<2x8x8xf32>
    %847 = vector.extract_strided_slice %773 {offsets = [0, 0, 24], sizes = [2, 8, 8], strides = [1, 1, 1]} : vector<2x8x32xf32> to vector<2x8x8xf32>
    "tpu.trace_start"() <{level = 10 : i32, message = "bqk,bkd->bqd"}> : () -> ()
    %cst_257 = arith.constant dense<0.000000e+00> : vector<2x8x8xf32>
    %848 = tpu.matmul %846, %847, %cst_257 {dimension_numbers = #tpu.dot_dimension_numbers<[2], [1], [1], [2], [0, 0, 0, 1, 1, 2], [0], [0]>} : vector<2x8x8xf32>, vector<2x8x8xf32>, vector<2x8x8xf32> -> vector<2x8x8xf32>
    "tpu.trace_stop"() : () -> ()
    %849 = vector.shape_cast %848 : vector<2x8x8xf32> to vector<16x8xf32>
    %850 = vector.extract_strided_slice %774 {offsets = [24, 0], sizes = [8, 32], strides = [1, 1]} : vector<32x32xf32> to vector<8x32xf32>
    %cst_258 = arith.constant dense<0.000000e+00> : vector<16x32xf32>
    %851 = tpu.matmul %849, %850, %cst_258 {dimension_numbers = #tpu.dot_dimension_numbers<[1], [0], [0], [1], [0, 0, 1, 1], [], []>} : vector<16x8xf32>, vector<8x32xf32>, vector<16x32xf32> -> vector<16x32xf32>
    %852 = arith.addf %833, %851 : vector<16x32xf32>
    %853 = vector.broadcast %775 : vector<1x32xf32> to vector<16x32xf32>
    %854 = arith.addf %852, %853 : vector<16x32xf32>
    %855 = arith.addf %758, %854 : vector<16x32xf32>
    %c1480 = arith.constant 1480 : index
    %c0_259 = arith.constant 0 : index
    %856 = vector.load %arg4[%c1480, %c0_259] : memref<1512x128xf32, #tpu.memory_space<vmem>>, vector<1x32xf32>
    %c1488 = arith.constant 1488 : index
    %c0_260 = arith.constant 0 : index
    %857 = vector.load %arg4[%c1488, %c0_260] : memref<1512x128xf32, #tpu.memory_space<vmem>>, vector<1x32xf32>
    %cst_261 = arith.constant dense<0.000000e+00> : vector<16xf32>
    %858 = vector.multi_reduction <add>, %855, %cst_261 [1] : vector<16x32xf32> to vector<16xf32>
    %859 = vector.shape_cast %858 : vector<16xf32> to vector<16x1xf32>
    %cst_262 = arith.constant 3.200000e+01 : f32
    %860 = vector.broadcast %cst_262 : f32 to vector<16x1xf32>
    %861 = arith.divf %859, %860 : vector<16x1xf32>
    %862 = arith.mulf %855, %855 : vector<16x32xf32>
    %cst_263 = arith.constant dense<0.000000e+00> : vector<16xf32>
    %863 = vector.multi_reduction <add>, %862, %cst_263 [1] : vector<16x32xf32> to vector<16xf32>
    %864 = vector.shape_cast %863 : vector<16xf32> to vector<16x1xf32>
    %cst_264 = arith.constant 3.200000e+01 : f32
    %865 = vector.broadcast %cst_264 : f32 to vector<16x1xf32>
    %866 = arith.divf %864, %865 : vector<16x1xf32>
    %867 = arith.mulf %861, %861 : vector<16x1xf32>
    %868 = arith.subf %866, %867 : vector<16x1xf32>
    %869 = vector.broadcast %861 : vector<16x1xf32> to vector<16x32xf32>
    %870 = arith.subf %855, %869 : vector<16x32xf32>
    %cst_265 = arith.constant 9.99999974E-6 : f32
    %871 = vector.broadcast %cst_265 : f32 to vector<16x1xf32>
    %872 = arith.addf %868, %871 : vector<16x1xf32>
    %873 = math.rsqrt %872 : vector<16x1xf32>
    %874 = vector.broadcast %873 : vector<16x1xf32> to vector<16x32xf32>
    %875 = arith.mulf %870, %874 : vector<16x32xf32>
    %876 = vector.broadcast %856 : vector<1x32xf32> to vector<16x32xf32>
    %877 = arith.mulf %875, %876 : vector<16x32xf32>
    %878 = vector.broadcast %857 : vector<1x32xf32> to vector<16x32xf32>
    %879 = arith.addf %877, %878 : vector<16x32xf32>
    %c1288 = arith.constant 1288 : index
    %c0_266 = arith.constant 0 : index
    %880 = vector.load %arg4[%c1288, %c0_266] : memref<1512x128xf32, #tpu.memory_space<vmem>>, vector<32x128xf32>
    %cst_267 = arith.constant dense<0.000000e+00> : vector<16x128xf32>
    %881 = tpu.matmul %879, %880, %cst_267 {dimension_numbers = #tpu.dot_dimension_numbers<[1], [0], [0], [1], [0, 0, 1, 1], [], []>} : vector<16x32xf32>, vector<32x128xf32>, vector<16x128xf32> -> vector<16x128xf32>
    %c1320 = arith.constant 1320 : index
    %c0_268 = arith.constant 0 : index
    %882 = vector.load %arg4[%c1320, %c0_268] : memref<1512x128xf32, #tpu.memory_space<vmem>>, vector<1x128xf32>
    %883 = vector.broadcast %882 : vector<1x128xf32> to vector<16x128xf32>
    %884 = arith.addf %881, %883 : vector<16x128xf32>
    %cst_269 = arith.constant 0.000000e+00 : f32
    %885 = vector.broadcast %cst_269 : f32 to vector<16x128xf32>
    %886 = arith.maximumf %884, %885 : vector<16x128xf32>
    %c1328 = arith.constant 1328 : index
    %c0_270 = arith.constant 0 : index
    %887 = vector.load %arg4[%c1328, %c0_270] : memref<1512x128xf32, #tpu.memory_space<vmem>>, vector<128x32xf32>
    %cst_271 = arith.constant dense<0.000000e+00> : vector<16x32xf32>
    %888 = tpu.matmul %886, %887, %cst_271 {dimension_numbers = #tpu.dot_dimension_numbers<[1], [0], [0], [1], [0, 0, 1, 1], [], []>} : vector<16x128xf32>, vector<128x32xf32>, vector<16x32xf32> -> vector<16x32xf32>
    %c1456 = arith.constant 1456 : index
    %c0_272 = arith.constant 0 : index
    %889 = vector.load %arg4[%c1456, %c0_272] : memref<1512x128xf32, #tpu.memory_space<vmem>>, vector<1x32xf32>
    %890 = vector.broadcast %889 : vector<1x32xf32> to vector<16x32xf32>
    %891 = arith.addf %888, %890 : vector<16x32xf32>
    %892 = arith.addf %879, %891 : vector<16x32xf32>
    %c1496 = arith.constant 1496 : index
    %c0_273 = arith.constant 0 : index
    %893 = vector.load %arg4[%c1496, %c0_273] : memref<1512x128xf32, #tpu.memory_space<vmem>>, vector<1x32xf32>
    %c1504 = arith.constant 1504 : index
    %c0_274 = arith.constant 0 : index
    %894 = vector.load %arg4[%c1504, %c0_274] : memref<1512x128xf32, #tpu.memory_space<vmem>>, vector<1x32xf32>
    %cst_275 = arith.constant dense<0.000000e+00> : vector<16xf32>
    %895 = vector.multi_reduction <add>, %892, %cst_275 [1] : vector<16x32xf32> to vector<16xf32>
    %896 = vector.shape_cast %895 : vector<16xf32> to vector<16x1xf32>
    %cst_276 = arith.constant 3.200000e+01 : f32
    %897 = vector.broadcast %cst_276 : f32 to vector<16x1xf32>
    %898 = arith.divf %896, %897 : vector<16x1xf32>
    %899 = arith.mulf %892, %892 : vector<16x32xf32>
    %cst_277 = arith.constant dense<0.000000e+00> : vector<16xf32>
    %900 = vector.multi_reduction <add>, %899, %cst_277 [1] : vector<16x32xf32> to vector<16xf32>
    %901 = vector.shape_cast %900 : vector<16xf32> to vector<16x1xf32>
    %cst_278 = arith.constant 3.200000e+01 : f32
    %902 = vector.broadcast %cst_278 : f32 to vector<16x1xf32>
    %903 = arith.divf %901, %902 : vector<16x1xf32>
    %904 = arith.mulf %898, %898 : vector<16x1xf32>
    %905 = arith.subf %903, %904 : vector<16x1xf32>
    %906 = vector.broadcast %898 : vector<16x1xf32> to vector<16x32xf32>
    %907 = arith.subf %892, %906 : vector<16x32xf32>
    %cst_279 = arith.constant 9.99999974E-6 : f32
    %908 = vector.broadcast %cst_279 : f32 to vector<16x1xf32>
    %909 = arith.addf %905, %908 : vector<16x1xf32>
    %910 = math.rsqrt %909 : vector<16x1xf32>
    %911 = vector.broadcast %910 : vector<16x1xf32> to vector<16x32xf32>
    %912 = arith.mulf %907, %911 : vector<16x32xf32>
    %913 = vector.broadcast %893 : vector<1x32xf32> to vector<16x32xf32>
    %914 = arith.mulf %912, %913 : vector<16x32xf32>
    %915 = vector.broadcast %894 : vector<1x32xf32> to vector<16x32xf32>
    %916 = arith.addf %914, %915 : vector<16x32xf32>
    %c72 = arith.constant 72 : index
    %c0_280 = arith.constant 0 : index
    %917 = vector.load %arg4[%c72, %c0_280] : memref<1512x128xf32, #tpu.memory_space<vmem>>, vector<1x32xf32>
    %c80 = arith.constant 80 : index
    %c0_281 = arith.constant 0 : index
    %918 = vector.load %arg4[%c80, %c0_281] : memref<1512x128xf32, #tpu.memory_space<vmem>>, vector<1x32xf32>
    %cst_282 = arith.constant dense<0.000000e+00> : vector<16xf32>
    %919 = vector.multi_reduction <add>, %916, %cst_282 [1] : vector<16x32xf32> to vector<16xf32>
    %920 = vector.shape_cast %919 : vector<16xf32> to vector<16x1xf32>
    %cst_283 = arith.constant 3.200000e+01 : f32
    %921 = vector.broadcast %cst_283 : f32 to vector<16x1xf32>
    %922 = arith.divf %920, %921 : vector<16x1xf32>
    %923 = arith.mulf %916, %916 : vector<16x32xf32>
    %cst_284 = arith.constant dense<0.000000e+00> : vector<16xf32>
    %924 = vector.multi_reduction <add>, %923, %cst_284 [1] : vector<16x32xf32> to vector<16xf32>
    %925 = vector.shape_cast %924 : vector<16xf32> to vector<16x1xf32>
    %cst_285 = arith.constant 3.200000e+01 : f32
    %926 = vector.broadcast %cst_285 : f32 to vector<16x1xf32>
    %927 = arith.divf %925, %926 : vector<16x1xf32>
    %928 = arith.mulf %922, %922 : vector<16x1xf32>
    %929 = arith.subf %927, %928 : vector<16x1xf32>
    %930 = vector.broadcast %922 : vector<16x1xf32> to vector<16x32xf32>
    %931 = arith.subf %916, %930 : vector<16x32xf32>
    %cst_286 = arith.constant 9.99999974E-6 : f32
    %932 = vector.broadcast %cst_286 : f32 to vector<16x1xf32>
    %933 = arith.addf %929, %932 : vector<16x1xf32>
    %934 = math.rsqrt %933 : vector<16x1xf32>
    %935 = vector.broadcast %934 : vector<16x1xf32> to vector<16x32xf32>
    %936 = arith.mulf %931, %935 : vector<16x32xf32>
    %937 = vector.broadcast %917 : vector<1x32xf32> to vector<16x32xf32>
    %938 = arith.mulf %936, %937 : vector<16x32xf32>
    %939 = vector.broadcast %918 : vector<1x32xf32> to vector<16x32xf32>
    %940 = arith.addf %938, %939 : vector<16x32xf32>
    %c16 = arith.constant 16 : index
    %c0_287 = arith.constant 0 : index
    %941 = vector.load %arg4[%c16, %c0_287] : memref<1512x128xf32, #tpu.memory_space<vmem>>, vector<32x6xf32>
    %cst_288 = arith.constant dense<0.000000e+00> : vector<16x6xf32>
    %942 = tpu.matmul %940, %941, %cst_288 {dimension_numbers = #tpu.dot_dimension_numbers<[1], [0], [0], [1], [0, 0, 1, 1], [], []>} : vector<16x32xf32>, vector<32x6xf32>, vector<16x6xf32> -> vector<16x6xf32>
    %c48 = arith.constant 48 : index
    %c0_289 = arith.constant 0 : index
    %943 = vector.load %arg4[%c48, %c0_289] : memref<1512x128xf32, #tpu.memory_space<vmem>>, vector<1x6xf32>
    %944 = vector.broadcast %943 : vector<1x6xf32> to vector<16x6xf32>
    %945 = arith.addf %942, %944 : vector<16x6xf32>
    %c0_290 = arith.constant 0 : index
    %c0_291 = arith.constant 0 : index
    %946 = vector.load %arg5[%c0_290, %c0_291] : memref<16x6xf32, #tpu.memory_space<vmem>>, vector<16x6xf32>
    tpu.vector_store %arg5[%c0_290, %c0_291], %945 {strides = array<i32>} : memref<16x6xf32, #tpu.memory_space<vmem>>, vector<16x6xf32>,
    return
  }
}

</mosaic_0001>

<bundles_post_ra>
// kernel: tpu_custom_call.1
= control target key start
LH: loop header
LB: loop body
LE: loop exit
PB: predicated region body
PF: predicated region fallthrough
CT: control target
= control target key end

     0   :  { %10 = vsyncpa [#allocation3], 0  ;;  %s6504_s21 = smov [#allocation2]   ;;  %s6505_s23 = smov 128   ;;  %s7597_s0 = inlined_call_operand.vmem [shape: f32[16,8], index: 0, kind: input, shape index: {}]   ;;  %s7598_s1 = inlined_call_operand.vmem [shape: f32[16,8], index: 1, kind: input, shape index: {}]   ;;  %s7599_s2 = inlined_call_operand.vmem [shape: f32[16,32], index: 2, kind: input, shape index: {}]   ;;  %s7600_s3 = inlined_call_operand.vmem [shape: f32[16,32], index: 3, kind: input, shape index: {}]   ;;  %s7601_s4 = inlined_call_operand.hbm [shape: f32[1512,128], index: 4, kind: input, shape index: {}]   ;;  %s7602_s5 = inlined_call_operand.vmem [shape: f32[16,6], index: 5, kind: output, shape index: {}]  }
   0x1   :  { %s23_s20 = sshll.u32 %s7601_s4, 4  ;;  %s25_s22 = sshll.u32 %s6504_s21, 4  ;;  %s24_s20 = int_to_ptr.hbm [resolvable:$true] %s23_s20  ;;  %s26_s22 = int_to_ptr.vmem [resolvable:$true] %s25_s22 }
   0x2   :  { %s6506_s24 = smov 8  }
   0x3   :  { %31 = dma.hbm_to_vmem [thread:$0]  %s24_s20, 24192, %s26_s22, [#allocation3], %s6505_s23, %s6505_s23, %s6506_s24  }
   0x4   :  { %6502 = dma.done.wait [#allocation3], 24192  }
   0x5   :  { %6503 = vsyncadd [#allocation3], 4294943104  ;;  %vm47_vm0 = vcmask 64512   ;;  %v44_v0 = vld [vmem:[#allocation2] sm:$0xff]  ;;  %v114_v2 = vld [vmem:[#allocation2 + $0x70] sm:$0xff]  ;;  %vm117_vm1 = vcmask 261120   ;;  %v36_v25 = vlaneseq }
   0x6   :  { %v42_v1 = vld [vmem:[%s7597_s0] sm:$0xff]  ;;  %69 = vmatpush.msra.mxu0 %v44_v0  ;;  %v113_v3 = vld [vmem:[#allocation2 + $0x68] sm:$0xff]  ;;  %136 = vmatpush.msra.mxu2 %v114_v2  ;;  %v111_v6 = vld [vmem:[#allocation2 + $0x58] sm:$0xff]  ;;  %s6508_s7 = smov 96   ;;  %v6510_v28 = vmov -1e+30  }
   0x7   :  { %5936 = vmatmul.msk.f32.vlgmr.msra.gmra.mxu0 %vm47_vm0, %v42_v1  ;;  %v43_v4 = vld [vmem:[%s7597_s0 + $0x8] sm:$0xff]  ;;  %v112_v5 = vld [vmem:[#allocation2 + $0x60] sm:$0xff]  ;;  %v6189_v13 = vld [vmem:[#allocation2 + $0x78] ss:$0 sm:$0xff]  ;;  %s6507_s0 = smov 120   ;;  %v37_v26 = vshrl.u32 %v36_v25, 7 }
   0x8   :  { %137 = vmatpush.msra.mxu2 %v113_v3  ;;  %v45_v7 = vld [vmem:[%s7599_s2] sm:$0xff]  ;;  %v46_v10 = vld [vmem:[%s7599_s2 + $0x8] sm:$0xff]  ;;  %s6509_s2 = smov 88   ;;  %v39_v27 = vand.u32 127, %v36_v25  ;;  %s6512_s12 = smov 56  }
   0x9   :  { %v79_v18 = vld [vmem:[#allocation2 + $0x8] sm:$0xff]  ;;  %v77_v19 = vld [vmem:[%s7598_s1] sm:$0xff]  ;;  %s6513_s13 = smov 80   ;;  %s6514_s14 = smov 112  }
   0xa   :  { %138 = vmatpush.msra.mxu2 %v112_v5  ;;  %103 = vmatpush.msra.mxu1 %v79_v18  ;;  %v78_v20 = vld [vmem:[%s7598_s1 + $0x8] sm:$0xff]  ;;  %vm40_vm2 = vcmp.le.s32.totalorder %v39_v27, %v37_v26  ;;  %s6511_s1 = smov 64   ;;  %s6515_s15 = smov 48  }
   0xb   :  { %5938 = vmatmul.msk.f32.vlgmr.msra.gmra.mxu1 %vm47_vm0, %v77_v19  ;;  %v6603_v29 = vsel %vm40_vm2, 0.0, %v6510_v28  ;;  %s6516_s16 = smov 72   ;;  %s6517_s17 = smov 104  }
   0xc   :  { %139 = vmatpush.msra.mxu2 %v111_v6  ;;  %s6518_s18 = smov 40  }
   0xf   :  { %5937 = vmatmul.msk.f32.gmra.mxu0 %vm47_vm0, %v43_v4 }
  0x13   :  { %5939 = vmatmul.msk.f32.gmra.mxu1 %vm47_vm0, %v78_v20 }
  0x84   :  { %v71_v8 = vpop.f32.mrf.mxu0 }
  0x85   :  { %v6564_v9 = vadd.f32 %v71_v8, %v45_v7 }
  0x87   :  { %5940 = vmatmul.msk.f32.vlgmr.msra.gmra.mxu2 %vm117_vm1, %v6564_v9 }
  0x88   :  { %v6617_v36 = vpop.f32.mrf.mxu1 }
  0x8c   :  { %v74_v11 = vpop.f32.mrf.mxu0 }
  0x8d   :  { %v6571_v12 = vadd.f32 %v74_v11, %v46_v10 }
  0x8f   :  { %5941 = vmatmul.msk.f32.gmra.mxu2 %vm117_vm1, %v6571_v12 }
  0x90   :  { %v6619_v37 = vpop.f32.mrf.mxu1 }
 0x10a   :  { %v141_v14 = vpop.f32.mrf.mxu2 }
 0x10b   :  { %v6575_v15 = vadd.f32 %v6189_v13, %v141_v14 }
 0x10d   :  { %306 = vrot.lane.b32.xlu1 %v6575_v15, %s6507_s0  ;;  %153 = vrot.lane.b32.xlu0 %v6575_v15, %s6508_s7 }
 0x112   :  { %v144_v16 = vpop.f32.mrf.mxu2 }
 0x113   :  { %v6581_v17 = vadd.f32 %v6189_v13, %v144_v16 }
 0x115   :  { %308 = vrot.lane.b32.xlu0 %v6575_v15, %s6509_s2  ;;  %180 = vrot.lane.b32.xlu1 %v6581_v17, %s6508_s7 }
 0x17f   :  { %v307_v21 = vpop.permute.xlu1 %306  ;;  %v154_v22 = vpop.permute.xlu0 %153 }
 0x180   :  { %5942 = vmatpush.xpose.msk.msrb.mxu0 %vm47_vm0, %v154_v22 }
 0x183   :  { %5943 = vmatmul.msk.f32.vlgmr.msrb.gmra.mxu0 %vm47_vm0, %v6575_v15 }
 0x187   :  { %v309_v23 = vpop.permute.xlu0 %308  ;;  %v181_v24 = vpop.permute.xlu1 %180 }
 0x188   :  { %5948 = vmatpush.xpose.msk.msra.mxu3 %vm47_vm0, %v309_v23  ;;  %5944 = vmatpush.xpose.msk.msrb.mxu1 %vm47_vm0, %v181_v24 }
 0x18b   :  { %5949 = vmatmul.msk.f32.vlgmr.msra.gmra.mxu3 %vm47_vm0, %v307_v21  ;;  %5945 = vmatmul.msk.f32.vlgmr.msrb.gmra.mxu1 %vm47_vm0, %v6581_v17 }
 0x200   :  { %v176_v30 = vpop.f32.mrf.mxu0 }
 0x201   :  { %v177_v31 = vadd.f32 %v176_v30, %v6603_v29 }
 0x203   :  { %v206_v32 = vsel %vm47_vm0, %v177_v31, -inf }
 0x204   :  { %207 = vmax.xlane.f32.xlu2 %v206_v32 }
 0x208   :  { %v203_v38 = vpop.f32.mrf.mxu1 }
 0x209   :  { %v204_v39 = vadd.f32 %v203_v38, %v6603_v29 }
 0x20b   :  { %v209_v40 = vsel %vm47_vm0, %v204_v39, -inf }
 0x20e   :  { %v331_v33 = vpop.f32.mrf.mxu3 }
 0x20f   :  { %v332_v34 = vadd.f32 %v331_v33, %v6603_v29 }
 0x211   :  { %v362_v35 = vsel %vm47_vm0, %v332_v34, -inf }
 0x212   :  { %363 = vmax.xlane.f32.xlu2 %v362_v35  ;;  %v147_v35 = vld [vmem:[#allocation2 + $0x80] sm:$0xff] }
 0x22a   :  { %336 = vrot.lane.b32.xlu2 %v6581_v17, %s6509_s2 }
 0x232   :  { %254 = vrot.lane.b32.xlu2 %v6575_v15, %s6511_s1 }
 0x23a   :  { %334 = vrot.lane.b32.xlu2 %v6581_v17, %s6507_s0 }
 0x242   :  { %410 = vrot.lane.b32.xlu2 %v6575_v15, %s6512_s12 }
 0x26b   :  { %210 = vmax.xlane.f32.xlu2 %v209_v40 }
 0x277   :  { %v208_v41 = vpop.xlane.xlu2 %207 }
 0x278   :  { %v212_v42 = vsub.f32 %v177_v31, %v208_v41 }
 0x27a   :  { %v214_v43 = vmul.f32 1.442695, %v212_v42 }
 0x27c   :  { %6236 = vpow2.f32 %v214_v43 }
 0x282   :  { %v6237_v44 = vpop.eup %6236 }
 0x283   :  { %v218_v45 = vsel %vm47_vm0, %v6237_v44, 0.0 }
 0x284   :  { %219 = vadd.xlane.f32.xlu0 %v218_v45 }
 0x285   :  { %v364_v46 = vpop.xlane.xlu2 %363 }
 0x286   :  { %v368_v47 = vsub.f32 %v332_v34, %v364_v46 }
 0x288   :  { %v370_v48 = vmul.f32 1.442695, %v368_v47  ;;  %v148_v47 = vld [vmem:[#allocation2 + $0x88] sm:$0xff] }
 0x289   :  { %483 = vmatpush.msrb.mxu3 %v148_v47  ;;  %v149_v47 = vld [vmem:[#allocation2 + $0x90] sm:$0xff] }
 0x28a   :  { %6238 = vpow2.f32 %v370_v48 }
 0x28b   :  { %697 = vmatpush.msra.mxu3 %v149_v47 }
 0x28d   :  { %v337_v49 = vpop.permute.xlu2 %336 }
 0x28e   :  { %5950 = vmatpush.xpose.msk.msrb.mxu2 %vm47_vm0, %v337_v49 }
 0x290   :  { %v6239_v50 = vpop.eup %6238 }
 0x291   :  { %v374_v51 = vsel %vm47_vm0, %v6239_v50, 0.0 }
 0x292   :  { %375 = vadd.xlane.f32.xlu1 %v374_v51  ;;  %512 = vmatpush.msra.mxu2 %v147_v35 }
 0x295   :  { %v255_v52 = vpop.permute.xlu2 %254 }
 0x296   :  { %275 = vmatpush.msra.mxu0 %v255_v52 }
 0x298   :  { %522 = vrot.lane.b32.xlu0 %v6575_v15, %s6513_s13 }
 0x29d   :  { %v335_v53 = vpop.permute.xlu2 %334 }
 0x29e   :  { %5951 = vmatmul.msk.f32.vlgmr.msrb.gmra.mxu2 %vm47_vm0, %v335_v53 }
 0x2a5   :  { %v411_v54 = vpop.permute.xlu2 %410 }
 0x2a6   :  { %431 = vmatpush.msrb.mxu0 %v411_v54 }
 0x2ab   :  { %520 = vrot.lane.b32.xlu1 %v6575_v15, %s6514_s14 }
 0x2b3   :  { %280 = vrot.lane.b32.xlu1 %v6581_v17, %s6511_s1 }
 0x2de   :  { %v211_v55 = vpop.xlane.xlu2 %210 }
 0x2df   :  { %v213_v56 = vsub.f32 %v204_v39, %v211_v55 }
 0x2e1   :  { %v216_v57 = vmul.f32 1.442695, %v213_v56 }
 0x2e3   :  { %6240 = vpow2.f32 %v216_v57 }
 0x2e9   :  { %v6633_v58 = vpop.eup %6240 }
 0x2ea   :  { %v221_v59 = vsel %vm47_vm0, %v6633_v58, 0.0 }
 0x2eb   :  { %222 = vadd.xlane.f32.xlu0 %v221_v59 }
 0x2f7   :  { %v220_v60 = vpop.xlane.xlu0 %219 }
 0x2f8   :  { %6242 = vrcp.f32 %v220_v60  ;;  %v235_v0 = vand.u32 2147483648, %v220_v60  ;;  %v233_v2 = vand.u32 2147483647, %v220_v60  ;;  %vm229_vm4 = vweird.f32 %v220_v60 }
 0x2fa   :  { %v236_v5 = vor.u32 1.1754944e-38, %v235_v0  ;;  %vm234_vm6 = vcmp.eq.f32.partialorder %v233_v2, 8.507059e+37 }
 0x2fe   :  { %v6243_v61 = vpop.eup %6242 }
 0x2ff   :  { %v225_v62 = vmul.f32 %v6243_v61, %v220_v60  ;;  %550 = vrot.lane.b32.xlu0 %v6581_v17, %s6513_s13  ;;  %vm230_vm3 = vweird.f32 %v6243_v61 }
 0x300   :  { %vm231_vm5 = vmor %vm229_vm4, %vm230_vm3 }
 0x301   :  { %v226_v63 = vsub.f32 1.0, %v225_v62 }
 0x303   :  { %v227_v1 = vmul.f32 %v6243_v61, %v226_v63 }
 0x305   :  { %v228_v3 = vadd.f32 %v6243_v61, %v227_v1  ;;  %v376_v4 = vpop.xlane.xlu1 %375 }
 0x306   :  { %6244 = vrcp.f32 %v376_v4  ;;  %v391_v16 = vand.u32 2147483648, %v376_v4  ;;  %v389_v19 = vand.u32 2147483647, %v376_v4  ;;  %vm385_vm8 = vweird.f32 %v376_v4 }
 0x307   :  { %v232_v6 = vsel %vm231_vm5, %v6243_v61, %v228_v3  ;;  %624 = vrot.lane.b32.xlu0 %v6575_v15, %s6515_s15 }
 0x308   :  { %v237_v7 = vsel %vm234_vm6, %v236_v5, %v232_v6  ;;  %v392_v21 = vor.u32 1.1754944e-38, %v391_v16  ;;  %vm390_vm10 = vcmp.eq.f32.partialorder %v389_v19, 8.507059e+37 }
 0x309   :  { %v252_v8 = vmul.f32 %v6237_v44, %v237_v7 }
 0x30a   :  { %v523_v10 = vpop.permute.xlu0 %522 }
 0x30b   :  { %5946 = vmatmul.msk.f32.vlgmr.msra.gmra.mxu0 %vm47_vm0, %v252_v8 }
 0x30c   :  { %v6245_v11 = vpop.eup %6244  ;;  %5958 = vmatpush.xpose.msk.msra.mxu0 %vm47_vm0, %v523_v10 }
 0x30d   :  { %v381_v13 = vmul.f32 %v6245_v11, %v376_v4  ;;  %vm386_vm7 = vweird.f32 %v6245_v11 }
 0x30e   :  { %vm387_vm9 = vmor %vm385_vm8, %vm386_vm7 }
 0x30f   :  { %v382_v14 = vsub.f32 1.0, %v381_v13 }
 0x311   :  { %v383_v18 = vmul.f32 %v6245_v11, %v382_v14 }
 0x313   :  { %v384_v20 = vadd.f32 %v6245_v11, %v383_v18 }
 0x315   :  { %v388_v22 = vsel %vm387_vm9, %v6245_v11, %v384_v20 }
 0x316   :  { %v393_v23 = vsel %vm390_vm10, %v392_v21, %v388_v22 }
 0x317   :  { %v408_v24 = vmul.f32 %v6239_v50, %v393_v23 }
 0x319   :  { %5952 = vmatmul.msk.f32.vlgmr.msrb.gmra.mxu0 %vm47_vm0, %v408_v24 }
 0x31d   :  { %v521_v25 = vpop.permute.xlu1 %520 }
 0x321   :  { %v359_v26 = vpop.f32.mrf.mxu2  ;;  %5959 = vmatmul.msk.f32.vlgmr.msra.gmra.mxu0 %vm47_vm0, %v521_v25 }
 0x322   :  { %v360_v27 = vadd.f32 %v359_v26, %v6603_v29 }
 0x324   :  { %v365_v28 = vsel %vm47_vm0, %v360_v27, -inf }
 0x325   :  { %v281_v30 = vpop.permute.xlu1 %280  ;;  %366 = vmax.xlane.f32.xlu1 %v365_v28 }
 0x326   :  { %301 = vmatpush.msra.mxu1 %v281_v30 }
 0x33e   :  { %709 = vrot.lane.b32.xlu1 %v6575_v15, %s6516_s16 }
 0x346   :  { %735 = vrot.lane.b32.xlu1 %v6581_v17, %s6517_s17 }
 0x35e   :  { %v223_v31 = vpop.xlane.xlu0 %222 }
 0x35f   :  { %6246 = vrcp.f32 %v223_v31  ;;  %v249_v38 = vand.u32 2147483648, %v223_v31  ;;  %v247_v40 = vand.u32 2147483647, %v223_v31  ;;  %vm243_vm12 = vweird.f32 %v223_v31 }
 0x361   :  { %v250_v42 = vor.u32 1.1754944e-38, %v249_v38  ;;  %vm248_vm14 = vcmp.eq.f32.partialorder %v247_v40, 8.507059e+37 }
 0x365   :  { %v6247_v32 = vpop.eup %6246 }
 0x366   :  { %v239_v33 = vmul.f32 %v6247_v32, %v223_v31  ;;  %vm244_vm11 = vweird.f32 %v6247_v32 }
 0x367   :  { %vm245_vm13 = vmor %vm243_vm12, %vm244_vm11 }
 0x368   :  { %v240_v34 = vsub.f32 1.0, %v239_v33 }
 0x36a   :  { %v241_v39 = vmul.f32 %v6247_v32, %v240_v34 }
 0x36c   :  { %v242_v41 = vadd.f32 %v6247_v32, %v241_v39 }
 0x36e   :  { %v246_v43 = vsel %vm245_vm13, %v6247_v32, %v242_v41 }
 0x36f   :  { %v251_v44 = vsel %vm248_vm14, %v250_v42, %v246_v43 }
 0x370   :  { %v253_v45 = vmul.f32 %v6633_v58, %v251_v44 }
 0x371   :  { %v551_v46 = vpop.permute.xlu0 %550 }
 0x372   :  { %5947 = vmatmul.msk.f32.vlgmr.msra.gmra.mxu1 %vm47_vm0, %v253_v45 }
 0x379   :  { %v625_v48 = vpop.permute.xlu0 %624 }
 0x37a   :  { %645 = vmatpush.msrb.mxu0 %v625_v48 }
 0x388   :  { %v277_v49 = vpop.f32.mrf.mxu0 }
 0x389   :  { %5956 = vmatmul.msk.f32.vlgmr.msra.gmra.mxu2 %vm47_vm0, %v277_v49 }
 0x396   :  { %v433_v50 = vpop.f32.mrf.mxu0 }
 0x397   :  { %5954 = vmatmul.msk.f32.vlgmr.msrb.gmra.mxu3 %vm47_vm0, %v433_v50 }
 0x398   :  { %v367_v51 = vpop.xlane.xlu1 %366 }
 0x399   :  { %v369_v52 = vsub.f32 %v360_v27, %v367_v51 }
 0x39b   :  { %v372_v53 = vmul.f32 1.442695, %v369_v52 }
 0x39d   :  { %6248 = vpow2.f32 %v372_v53 }
 0x39e   :  { %v545_v54 = vpop.f32.mrf.mxu0 }
 0x39f   :  { %v546_v55 = vadd.f32 %v545_v54, %v6603_v29 }
 0x3a1   :  { %v576_v56 = vsel %vm47_vm0, %v546_v55, -inf }
 0x3a2   :  { %577 = vmax.xlane.f32.xlu2 %v576_v56 }
 0x3a3   :  { %v6249_v57 = vpop.eup %6248 }
 0x3a4   :  { %v377_v58 = vsel %vm47_vm0, %v6249_v57, 0.0 }
 0x3aa   :  { %378 = vadd.xlane.f32.xlu2 %v377_v58 }
 0x3b0   :  { %v710_v59 = vpop.permute.xlu1 %709 }
 0x3b1   :  { %5966 = vmatpush.xpose.msk.msrb.mxu2 %vm47_vm0, %v710_v59 }
 0x3b8   :  { %v736_v39 = vpop.permute.xlu1 %735 }
 0x3c2   :  { %436 = vrot.lane.b32.xlu2 %v6581_v17, %s6512_s12 }
 0x3ca   :  { %548 = vrot.lane.b32.xlu2 %v6581_v17, %s6514_s14 }
 0x3d2   :  { %707 = vrot.lane.b32.xlu2 %v6575_v15, %s6517_s17 }
 0x3ef   :  { %v303_v60 = vpop.f32.mrf.mxu1 }
 0x3f0   :  { %5957 = vmatmul.msk.f32.gmra.mxu2 %vm47_vm0, %v303_v60 }
 0x40c   :  { %v6673_v35 = vpop.f32.mrf.mxu2 }
 0x415   :  { %v578_v61 = vpop.xlane.xlu2 %577 }
 0x416   :  { %v582_v62 = vsub.f32 %v546_v55, %v578_v61 }
 0x418   :  { %v584_v63 = vmul.f32 1.442695, %v582_v62  ;;  %v6174_v62 = vpack.i.bf16 %v6581_v17, %v6575_v15 }
 0x41a   :  { %6250 = vpow2.f32 %v584_v63 }
 0x41d   :  { %v379_v0 = vpop.xlane.xlu2 %378 }
 0x41e   :  { %6252 = vrcp.f32 %v379_v0  ;;  %v405_v7 = vand.u32 2147483648, %v379_v0  ;;  %v403_v10 = vand.u32 2147483647, %v379_v0  ;;  %vm399_vm2 = vweird.f32 %v379_v0 }
 0x420   :  { %v6251_v1 = vpop.eup %6250  ;;  %v406_v13 = vor.u32 1.1754944e-38, %v405_v7  ;;  %vm404_vm4 = vcmp.eq.f32.partialorder %v403_v10, 8.507059e+37 }
 0x421   :  { %v588_v2 = vsel %vm47_vm0, %v6251_v1, 0.0 }
 0x422   :  { %589 = vadd.xlane.f32.xlu0 %v588_v2 }
 0x424   :  { %v6253_v3 = vpop.eup %6252 }
 0x425   :  { %v395_v4 = vmul.f32 %v6253_v3, %v379_v0  ;;  %v437_v5 = vpop.permute.xlu2 %436  ;;  %vm400_vm15 = vweird.f32 %v6253_v3 }
 0x426   :  { %457 = vmatpush.msrb.mxu1 %v437_v5  ;;  %vm401_vm3 = vmor %vm399_vm2, %vm400_vm15 }
 0x427   :  { %v396_v6 = vsub.f32 1.0, %v395_v4 }
 0x428   :  { %5960 = vmatpush.xpose.msk.msra.mxu1 %vm47_vm0, %v551_v46 }
 0x429   :  { %v397_v8 = vmul.f32 %v6253_v3, %v396_v6 }
 0x42b   :  { %v398_v11 = vadd.f32 %v6253_v3, %v397_v8 }
 0x42d   :  { %v402_v14 = vsel %vm401_vm3, %v6253_v3, %v398_v11  ;;  %v549_v16 = vpop.permute.xlu2 %548 }
 0x42e   :  { %v407_v18 = vsel %vm404_vm4, %v406_v13, %v402_v14 }
 0x42f   :  { %v409_v19 = vmul.f32 %v6249_v57, %v407_v18 }
 0x431   :  { %5953 = vmatmul.msk.f32.vlgmr.msrb.gmra.mxu1 %vm47_vm0, %v409_v19 }
 0x435   :  { %v708_v20 = vpop.permute.xlu2 %707 }
 0x436   :  { %737 = vrot.lane.b32.xlu0 %v6581_v17, %s6516_s16  ;;  %5967 = vmatmul.msk.f32.vlgmr.msrb.gmra.mxu2 %vm47_vm0, %v708_v20 }
 0x439   :  { %5961 = vmatmul.msk.f32.vlgmr.msra.gmra.mxu1 %vm47_vm0, %v549_v16 }
 0x473   :  { %v6678_v40 = vpop.f32.mrf.mxu2 }
 0x495   :  { %v590_v21 = vpop.xlane.xlu0 %589 }
 0x496   :  { %6254 = vrcp.f32 %v590_v21  ;;  %v605_v25 = vand.u32 2147483648, %v590_v21  ;;  %v603_v27 = vand.u32 2147483647, %v590_v21  ;;  %vm599_vm6 = vweird.f32 %v590_v21 }
 0x498   :  { %v606_v30 = vor.u32 1.1754944e-38, %v605_v25  ;;  %vm604_vm8 = vcmp.eq.f32.partialorder %v603_v27, 8.507059e+37 }
 0x49c   :  { %v6255_v22 = vpop.eup %6254 }
 0x49d   :  { %v595_v23 = vmul.f32 %v6255_v22, %v590_v21  ;;  %vm600_vm5 = vweird.f32 %v6255_v22 }
 0x49e   :  { %vm601_vm7 = vmor %vm599_vm6, %vm600_vm5 }
 0x49f   :  { %v596_v24 = vsub.f32 1.0, %v595_v23 }
 0x4a1   :  { %v597_v26 = vmul.f32 %v6255_v22, %v596_v24 }
 0x4a3   :  { %v598_v28 = vadd.f32 %v6255_v22, %v597_v26 }
 0x4a5   :  { %v602_v31 = vsel %vm601_vm7, %v6255_v22, %v598_v28 }
 0x4a6   :  { %v607_v32 = vsel %vm604_vm8, %v606_v30, %v602_v31 }
 0x4a7   :  { %v622_v33 = vmul.f32 %v6251_v1, %v607_v32 }
 0x4a8   :  { %v738_v34 = vpop.permute.xlu0 %737 }
 0x4a9   :  { %5962 = vmatmul.msk.f32.vlgmr.msrb.gmra.mxu0 %vm47_vm0, %v622_v33 }
 0x4aa   :  { %5968 = vmatpush.xpose.msk.msra.mxu0 %vm47_vm0, %v738_v34 }
 0x4ae   :  { %v459_v38 = vpop.f32.mrf.mxu1 }
 0x4af   :  { %5955 = vmatmul.msk.f32.gmra.mxu3 %vm47_vm0, %v459_v38 }
 0x4b1   :  { %5969 = vmatmul.msk.f32.vlgmr.msra.gmra.mxu0 %vm47_vm0, %v736_v39  ;;  %v150_v39 = vld [vmem:[#allocation2 + $0x98] sm:$0xff] }
 0x4b2   :  { %884 = vmatpush.msrb.mxu0 %v150_v39 }
 0x4b6   :  { %v573_v41 = vpop.f32.mrf.mxu1 }
 0x4b7   :  { %v574_v42 = vadd.f32 %v573_v41, %v6603_v29 }
 0x4b9   :  { %v732_v43 = vpop.f32.mrf.mxu2  ;;  %v579_v44 = vsel %vm47_vm0, %v574_v42, -inf }
 0x4ba   :  { %v733_v45 = vadd.f32 %v732_v43, %v6603_v29  ;;  %580 = vmax.xlane.f32.xlu2 %v579_v44 }
 0x4bc   :  { %v763_v46 = vsel %vm47_vm0, %v733_v45, -inf }
 0x4bd   :  { %764 = vmax.xlane.f32.xlu0 %v763_v46 }
 0x526   :  { %v647_v48 = vpop.f32.mrf.mxu0 }
 0x527   :  { %5964 = vmatmul.msk.f32.vlgmr.msra.gmra.mxu3 %vm47_vm0, %v647_v48 }
 0x52d   :  { %v581_v49 = vpop.xlane.xlu2 %580 }
 0x52e   :  { %v583_v50 = vsub.f32 %v574_v42, %v581_v49  ;;  %v760_v51 = vpop.f32.mrf.mxu0 }
 0x52f   :  { %v761_v52 = vadd.f32 %v760_v51, %v6603_v29 }
 0x530   :  { %v586_v53 = vmul.f32 1.442695, %v583_v50  ;;  %v765_v54 = vpop.xlane.xlu0 %764 }
 0x531   :  { %v769_v55 = vsub.f32 %v733_v45, %v765_v54  ;;  %v766_v56 = vsel %vm47_vm0, %v761_v52, -inf  ;;  %v485_v54 = vpop.f32.mrf.mxu3 }
 0x532   :  { %6256 = vpow2.f32 %v586_v53  ;;  %767 = vmax.xlane.f32.xlu1 %v766_v56 }
 0x533   :  { %v771_v57 = vmul.f32 1.442695, %v769_v55 }
 0x535   :  { %6258 = vpow2.f32 %v771_v57 }
 0x538   :  { %v6257_v58 = vpop.eup %6256 }
 0x539   :  { %v591_v59 = vsel %vm47_vm0, %v6257_v58, 0.0  ;;  %v488_v55 = vpop.f32.mrf.mxu3 }
 0x53a   :  { %592 = vadd.xlane.f32.xlu2 %v591_v59 }
 0x53b   :  { %v6259_v60 = vpop.eup %6258 }
 0x53c   :  { %v775_v61 = vsel %vm47_vm0, %v6259_v60, 0.0 }
 0x53d   :  { %776 = vadd.xlane.f32.xlu0 %v775_v61 }
 0x551   :  { %6175 = vrot.lane.b32.xlu0 %v6174_v62, %s6518_s18 }
 0x552   :  { %650 = vrot.lane.b32.xlu2 %v6581_v17, %s6515_s15 }
 0x5a5   :  { %v768_v63 = vpop.xlane.xlu1 %767 }
 0x5a6   :  { %v770_v0 = vsub.f32 %v761_v52, %v768_v63 }
 0x5a8   :  { %v773_v1 = vmul.f32 1.442695, %v770_v0 }
 0x5aa   :  { %6260 = vpow2.f32 %v773_v1  ;;  %v699_v57 = vpop.f32.mrf.mxu3 }
 0x5ad   :  { %v593_v2 = vpop.xlane.xlu2 %592 }
 0x5ae   :  { %6262 = vrcp.f32 %v593_v2  ;;  %v619_v10 = vand.u32 2147483648, %v593_v2  ;;  %v617_v14 = vand.u32 2147483647, %v593_v2  ;;  %vm613_vm10 = vweird.f32 %v593_v2 }
 0x5b0   :  { %v6695_v3 = vpop.eup %6260  ;;  %v777_v4 = vpop.xlane.xlu0 %776  ;;  %v620_v19 = vor.u32 1.1754944e-38, %v619_v10  ;;  %vm618_vm12 = vcmp.eq.f32.partialorder %v617_v14, 8.507059e+37 }
 0x5b1   :  { %6264 = vrcp.f32 %v777_v4  ;;  %v778_v5 = vsel %vm47_vm0, %v6695_v3, 0.0  ;;  %v792_v23 = vand.u32 2147483648, %v777_v4  ;;  %vm786_vm14 = vweird.f32 %v777_v4 }
 0x5b2   :  { %779 = vadd.xlane.f32.xlu1 %v778_v5  ;;  %v790_v25 = vand.u32 2147483647, %v777_v4 }
 0x5b3   :  { %v793_v28 = vor.u32 1.1754944e-38, %v792_v23  ;;  %v962_v23 = vld [vmem:[#allocation2 + $0xa8] sm:$0xff] }
 0x5b4   :  { %v6263_v15 = vpop.eup %6262  ;;  %vm791_vm2 = vcmp.eq.f32.partialorder %v790_v25, 8.507059e+37 }
 0x5b5   :  { %v609_v6 = vmul.f32 %v6263_v15, %v593_v2  ;;  %v651_v7 = vpop.permute.xlu2 %650  ;;  %vm614_vm9 = vweird.f32 %v6263_v15 }
 0x5b6   :  { %671 = vmatpush.msrb.mxu1 %v651_v7  ;;  %vm615_vm11 = vmor %vm613_vm10, %vm614_vm9  ;;  %v518_v7 = vadd.f32 %v6678_v40, %v488_v55 }
 0x5b7   :  { %v6265_v8 = vpop.eup %6264  ;;  %v610_v17 = vsub.f32 1.0, %v609_v6 }
 0x5b8   :  { %v782_v11 = vmul.f32 %v6265_v8, %v777_v4  ;;  %vm787_vm13 = vweird.f32 %v6265_v8  ;;  %v6519_v4 = vmov 32.0  }
 0x5b9   :  { %v611_v13 = vmul.f32 %v6263_v15, %v610_v17  ;;  %vm788_vm15 = vmor %vm786_vm14, %vm787_vm13 }
 0x5ba   :  { %v783_v16 = vsub.f32 1.0, %v782_v11 }
 0x5bb   :  { %v612_v18 = vadd.f32 %v6263_v15, %v611_v13 }
 0x5bc   :  { %v784_v20 = vmul.f32 %v6265_v8, %v783_v16  ;;  %v965_v16 = vld [vmem:[#allocation2 + $0xc0] sm:$0xff] }
 0x5bd   :  { %v616_v21 = vsel %vm615_vm11, %v6263_v15, %v612_v18 }
 0x5be   :  { %v785_v22 = vadd.f32 %v6265_v8, %v784_v20  ;;  %v621_v24 = vsel %vm618_vm12, %v620_v19, %v616_v21  ;;  %v964_v19 = vld [vmem:[#allocation2 + $0xb8] sm:$0xff]  ;;  %v963_v21 = vld [vmem:[#allocation2 + $0xb0] sm:$0xff] }
 0x5bf   :  { %v623_v26 = vmul.f32 %v6257_v58, %v621_v24  ;;  %v515_v58 = vadd.f32 %v6673_v35, %v485_v54  ;;  %v1008_v54 = vld [vmem:[#allocation2 + $0x118] sm:$0xff] }
 0x5c0   :  { %v789_v27 = vsel %vm788_vm15, %v6265_v8, %v785_v22 }
 0x5c1   :  { %5963 = vmatmul.msk.f32.vlgmr.msrb.gmra.mxu1 %vm47_vm0, %v623_v26  ;;  %v794_v33 = vsel %vm791_vm2, %v793_v28, %v789_v27  ;;  %v705_v59 = vadd.f32 %v699_v57, %v515_v58  ;;  %v1007_v57 = vld [vmem:[#allocation2 + $0x110] sm:$0xff]  ;;  %v1006_v58 = vld [vmem:[#allocation2 + $0x108] sm:$0xff] }
 0x5c2   :  { %v809_v34 = vmul.f32 %v6259_v60, %v794_v33  ;;  %v6190_v60 = vld [vmem:[#allocation2 + $0xa0] ss:$0 sm:$0xff] }
 0x5c3   :  { %v6176_v30 = vpop.permute.xlu0 %6175 }
 0x5c4   :  { %v6178_v31 = vunpack.i.h.bf16 %v6176_v30  ;;  %v6177_v32 = vunpack.i.l.bf16 %v6176_v30 }
 0x5c6   :  { %832 = vmatpush.msra.mxu1 %v6177_v32  ;;  %858 = vmatpush.msra.mxu2 %v6178_v31 }
 0x5c8   :  { %986 = vmatpush.msrb.mxu1 %v965_v16 }
 0x5c9   :  { %5970 = vmatmul.msk.f32.vlgmr.msra.gmra.mxu1 %vm47_vm0, %v809_v34 }
 0x5ca   :  { %987 = vmatpush.msrb.mxu1 %v964_v19  ;;  %v6193_v19 = vld [vmem:[#allocation2 + $0xc8] ss:$0 sm:$0xff] }
 0x5cc   :  { %988 = vmatpush.msrb.mxu1 %v963_v21 }
 0x5ce   :  { %989 = vmatpush.msrb.mxu1 %v962_v23 }
 0x625   :  { %v780_v38 = vpop.xlane.xlu1 %779 }
 0x626   :  { %6266 = vrcp.f32 %v780_v38  ;;  %v806_v44 = vand.u32 2147483648, %v780_v38  ;;  %v804_v46 = vand.u32 2147483647, %v780_v38  ;;  %vm800_vm4 = vweird.f32 %v780_v38 }
 0x627   :  { %6268 = vrcp.f32 %v6519_v4  ;;  %v1001_v4 = vld [vmem:[#allocation2 + $0xe0] sm:$0xff] }
 0x628   :  { %v807_v48 = vor.u32 1.1754944e-38, %v806_v44  ;;  %vm805_vm6 = vcmp.eq.f32.partialorder %v804_v46, 8.507059e+37 }
 0x62c   :  { %v6267_v41 = vpop.eup %6266 }
 0x62d   :  { %v796_v42 = vmul.f32 %v6267_v41, %v780_v38  ;;  %vm801_vm3 = vweird.f32 %v6267_v41  ;;  %v6269_v5 = vpop.eup %6268 }
 0x62e   :  { %vm802_vm5 = vmor %vm800_vm4, %vm801_vm3  ;;  %v908_v15 = vmul.f32 32.0, %v6269_v5  ;;  %vm912_vm7 = vweird.f32 %v6269_v5 }
 0x62f   :  { %v797_v43 = vsub.f32 1.0, %v796_v42  ;;  %v6191_v42 = vld [vmem:[#allocation2 + $0x158] ss:$0 sm:$0xff] }
 0x630   :  { %v909_v6 = vsub.f32 1.0, %v908_v15  ;;  %v1000_v15 = vld [vmem:[#allocation2 + $0xd8] sm:$0xff] }
 0x631   :  { %v798_v45 = vmul.f32 %v6267_v41, %v797_v43 }
 0x632   :  { %v910_v8 = vmul.f32 %v6269_v5, %v909_v6 }
 0x633   :  { %v799_v47 = vadd.f32 %v6267_v41, %v798_v45  ;;  %v6192_v45 = vld [vmem:[#allocation2 + $0x160] ss:$0 sm:$0xff] }
 0x635   :  { %v803_v49 = vsel %vm802_vm5, %v6267_v41, %v799_v47 }
 0x636   :  { %v808_v50 = vsel %vm805_vm6, %v807_v48, %v803_v49  ;;  %v1014_v48 = vld [vmem:[#allocation2 + $0x148] sm:$0xff]  ;;  %v1013_v49 = vld [vmem:[#allocation2 + $0x140] sm:$0xff] }
 0x637   :  { %v810_v51 = vmul.f32 %v6695_v3, %v808_v50  ;;  %1017 = vmatpush.msrb.mxu3 %v1014_v48  ;;  %v1012_v50 = vld [vmem:[#allocation2 + $0x138] sm:$0xff] }
 0x639   :  { %5971 = vmatmul.msk.f32.vlgmr.msra.gmra.mxu2 %vm47_vm0, %v810_v51  ;;  %1018 = vmatpush.msrb.mxu3 %v1013_v49  ;;  %v1011_v51 = vld [vmem:[#allocation2 + $0x130] sm:$0xff] }
 0x63b   :  { %1019 = vmatpush.msrb.mxu3 %v1012_v50 }
 0x63d   :  { %1020 = vmatpush.msrb.mxu3 %v1011_v51 }
 0x63e   :  { %v673_v52 = vpop.f32.mrf.mxu1 }
 0x63f   :  { %5965 = vmatmul.msk.f32.gmra.mxu3 %vm47_vm0, %v673_v52  ;;  %v1010_v52 = vld [vmem:[#allocation2 + $0x128] sm:$0xff] }
 0x640   :  { %1021 = vmatpush.msrb.mxu3 %v1010_v52 }
 0x646   :  { %v834_v53 = vpop.f32.mrf.mxu1 }
 0x647   :  { %5972 = vmatmul.msk.f32.vlgmr.msrb.gmra.mxu0 %vm47_vm0, %v834_v53  ;;  %v1009_v53 = vld [vmem:[#allocation2 + $0x120] sm:$0xff] }
 0x648   :  { %1022 = vmatpush.msrb.mxu3 %v1009_v53 }
 0x64a   :  { %1023 = vmatpush.msrb.mxu3 %v1008_v54 }
 0x64c   :  { %1024 = vmatpush.msrb.mxu3 %v1007_v57 }
 0x64e   :  { %1025 = vmatpush.msrb.mxu3 %v1006_v58 }
 0x6bc   :  { %v860_v56 = vpop.f32.mrf.mxu2 }
 0x6bd   :  { %5973 = vmatmul.msk.f32.gmra.mxu0 %vm47_vm0, %v860_v56 }
 0x6c2   :  { %v702_v35 = vpop.f32.mrf.mxu3 }
 0x6c3   :  { %v706_v17 = vadd.f32 %v702_v35, %v518_v7  ;;  %v999_v35 = vld [vmem:[#allocation2 + $0xd0] sm:$0xff] }
 0x6c4   :  { %v886_v61 = vpop.f32.mrf.mxu0 }
 0x6c5   :  { %v892_v62 = vadd.f32 %v886_v61, %v705_v59 }
 0x6c7   :  { %v895_v63 = vadd.f32 %v6190_v60, %v892_v62  ;;  %v1005_v62 = vld [vmem:[#allocation2 + $0x100] sm:$0xff] }
 0x6c8   :  { %1026 = vmatpush.msrb.mxu3 %v1005_v62 }
 0x6c9   :  { %v897_v0 = vadd.f32 %v895_v63, %v6564_v9  ;;  %v911_v9 = vadd.f32 %v6269_v5, %v910_v8 }
 0x6cb   :  { %v901_v1 = vsel %vm117_vm1, %v897_v0, 0.0  ;;  %v916_v2 = vmul.f32 %v897_v0, %v897_v0  ;;  %v6714_v20 = vsel %vm912_vm7, %v6269_v5, %v911_v9 }
 0x6cc   :  { %902 = vadd.xlane.f32.xlu1 %v901_v1 }
 0x6cd   :  { %v918_v3 = vsel %vm117_vm1, %v916_v2, 0.0  ;;  %v1003_v2 = vld [vmem:[#allocation2 + $0xf0] sm:$0xff] }
 0x6d4   :  { %919 = vadd.xlane.f32.xlu1 %v918_v3  ;;  %v1002_v3 = vld [vmem:[#allocation2 + $0xe8] sm:$0xff] }
 0x73a   :  { %v889_v10 = vpop.f32.mrf.mxu0 }
 0x73b   :  { %v893_v11 = vadd.f32 %v889_v10, %v706_v17 }
 0x73d   :  { %v896_v13 = vadd.f32 %v6190_v60, %v893_v11 }
 0x73f   :  { %v903_v14 = vpop.xlane.xlu1 %902  ;;  %v6712_v18 = vadd.f32 %v896_v13, %v6571_v12 }
 0x740   :  { %v914_v24 = vmul.f32 %v6714_v20, %v903_v14 }
 0x741   :  { %v904_v40 = vsel %vm117_vm1, %v6712_v18, 0.0  ;;  %v917_v22 = vmul.f32 %v6712_v18, %v6712_v18 }
 0x742   :  { %905 = vadd.xlane.f32.xlu1 %v904_v40  ;;  %v926_v26 = vmul.f32 %v914_v24, %v914_v24  ;;  %v930_v41 = vsub.f32 %v897_v0, %v914_v24  ;;  %v1004_v0 = vld [vmem:[#allocation2 + $0xf8] sm:$0xff] }
 0x743   :  { %v921_v25 = vsel %vm117_vm1, %v917_v22, 0.0  ;;  %1027 = vmatpush.msrb.mxu3 %v1004_v0 }
 0x744   :  { %922 = vadd.xlane.f32.xlu0 %v921_v25 }
 0x745   :  { %1028 = vmatpush.msrb.mxu3 %v1003_v2 }
 0x747   :  { %v920_v12 = vpop.xlane.xlu1 %919  ;;  %1029 = vmatpush.msrb.mxu3 %v1002_v3 }
 0x748   :  { %v924_v27 = vmul.f32 %v920_v12, %v6714_v20  ;;  %v6194_v12 = vld [vmem:[#allocation2 + $0x150] ss:$0 sm:$0xff] }
 0x749   :  { %1030 = vmatpush.msrb.mxu3 %v1001_v4 }
 0x74a   :  { %v928_v28 = vsub.f32 %v924_v27, %v926_v26 }
 0x74b   :  { %1031 = vmatpush.msrb.mxu3 %v1000_v15 }
 0x74c   :  { %v932_v30 = vadd.f32 1e-05, %v928_v28 }
 0x74d   :  { %1032 = vmatpush.msrb.mxu3 %v999_v35 }
 0x74e   :  { %6270 = vrsqrt.f32 %v932_v30  ;;  %vm940_vm9 = vweird.f32 %v932_v30 }
 0x754   :  { %v6271_v31 = vpop.eup %6270 }
 0x755   :  { %v935_v32 = vmul.f32 %v6271_v31, %v932_v30  ;;  %vm941_vm8 = vweird.f32 %v6271_v31 }
 0x756   :  { %vm942_vm10 = vmor %vm940_vm9, %vm941_vm8 }
 0x757   :  { %v936_v33 = vmul.f32 %v6271_v31, %v935_v32 }
 0x759   :  { %v937_v34 = vmul.f32 0.5, %v936_v33 }
 0x75b   :  { %v938_v38 = vsub.f32 1.5, %v937_v34  ;;  %v1101_v34 = vld [vmem:[#allocation2 + $0x190] sm:$0xff] }
 0x75c   :  { %1122 = vmatpush.msrb.mxu2 %v1101_v34 }
 0x75d   :  { %v939_v39 = vmul.f32 %v6271_v31, %v938_v38 }
 0x75f   :  { %v943_v43 = vsel %vm942_vm10, %v6271_v31, %v939_v39  ;;  %v1100_v39 = vld [vmem:[#allocation2 + $0x188] sm:$0xff] }
 0x760   :  { %v954_v44 = vmul.f32 %v943_v43, %v930_v41  ;;  %v1099_v41 = vld [vmem:[#allocation2 + $0x180] sm:$0xff]  ;;  %1123 = vmatpush.msrb.mxu2 %v1100_v39  ;;  %v1098_v43 = vld [vmem:[#allocation2 + $0x178] sm:$0xff] }
 0x762   :  { %v957_v46 = vmul.f32 %v6191_v42, %v954_v44  ;;  %1124 = vmatpush.msrb.mxu2 %v1099_v41 }
 0x764   :  { %v6723_v47 = vadd.f32 %v6192_v45, %v957_v46  ;;  %1125 = vmatpush.msrb.mxu2 %v1098_v43 }
 0x766   :  { %5974 = vmatmul.msk.f32.vlgmr.msrb.gmra.mxu1 %vm117_vm1, %v6723_v47 }
 0x7b5   :  { %v906_v55 = vpop.xlane.xlu1 %905 }
 0x7b6   :  { %v915_v56 = vmul.f32 %v6714_v20, %v906_v55 }
 0x7b7   :  { %v923_v59 = vpop.xlane.xlu0 %922 }
 0x7b8   :  { %v927_v60 = vmul.f32 %v915_v56, %v915_v56  ;;  %v925_v61 = vmul.f32 %v923_v59, %v6714_v20  ;;  %v931_v11 = vsub.f32 %v6712_v18, %v915_v56 }
 0x7ba   :  { %v929_v63 = vsub.f32 %v925_v61, %v927_v60  ;;  %v6195_v60 = vld [vmem:[#allocation2 + $0x168] ss:$0 sm:$0xff] }
 0x7bc   :  { %v933_v1 = vadd.f32 1e-05, %v929_v63  ;;  %v6196_v63 = vld [vmem:[#allocation2 + $0x170] ss:$0 sm:$0xff] }
 0x7be   :  { %6272 = vrsqrt.f32 %v933_v1  ;;  %vm950_vm12 = vweird.f32 %v933_v1 }
 0x7c4   :  { %v6273_v5 = vpop.eup %6272 }
 0x7c5   :  { %v945_v6 = vmul.f32 %v6273_v5, %v933_v1  ;;  %vm951_vm11 = vweird.f32 %v6273_v5 }
 0x7c6   :  { %vm952_vm13 = vmor %vm950_vm12, %vm951_vm11 }
 0x7c7   :  { %v946_v7 = vmul.f32 %v6273_v5, %v945_v6 }
 0x7c9   :  { %v947_v8 = vmul.f32 0.5, %v946_v7 }
 0x7cb   :  { %v948_v17 = vsub.f32 1.5, %v947_v8 }
 0x7cd   :  { %v949_v10 = vmul.f32 %v6273_v5, %v948_v17 }
 0x7cf   :  { %v953_v9 = vsel %vm952_vm13, %v6273_v5, %v949_v10 }
 0x7d0   :  { %v955_v13 = vmul.f32 %v953_v9, %v931_v11 }
 0x7d2   :  { %v958_v14 = vmul.f32 %v6191_v42, %v955_v13 }
 0x7d4   :  { %v961_v16 = vadd.f32 %v6192_v45, %v958_v14 }
 0x7d6   :  { %5975 = vmatmul.msk.f32.gmra.mxu1 %vm117_vm1, %v961_v16 }
 0x7e3   :  { %v991_v21 = vpop.f32.mrf.mxu1 }
 0x7e4   :  { %v992_v40 = vadd.f32 %v6193_v19, %v991_v21 }
 0x7e6   :  { %v997_v22 = vmax.f32 %v992_v40, 0.0  ;;  %v6197_v40 = vld [vmem:[#allocation2 + $0x198] ss:$0 sm:$0xff] }
 0x7e8   :  { %1033 = vmatmul.f32.vlgmr.msrb.gmra.mxu3 %v997_v22 }
 0x853   :  { %v994_v23 = vpop.f32.mrf.mxu1 }
 0x854   :  { %v995_v24 = vadd.f32 %v6193_v19, %v994_v23 }
 0x856   :  { %v998_v25 = vmax.f32 %v995_v24, 0.0 }
 0x858   :  { %1036 = vmatmul.f32.gmra.mxu3 %v998_v25 }
 0x86b   :  { %v1034_v26 = vpop.f32.mrf.mxu3 }
 0x86c   :  { %v1035_v27 = vadd.f32 %v6194_v12, %v1034_v26 }
 0x86e   :  { %v1040_v18 = vadd.f32 %v1035_v27, %v6723_v47 }
 0x870   :  { %v1044_v28 = vsel %vm117_vm1, %v1040_v18, 0.0  ;;  %v1052_v30 = vmul.f32 %v1040_v18, %v1040_v18 }
 0x871   :  { %1045 = vadd.xlane.f32.xlu2 %v1044_v28 }
 0x872   :  { %v1054_v31 = vsel %vm117_vm1, %v1052_v30, 0.0 }
 0x873   :  { %1055 = vadd.xlane.f32.xlu1 %v1054_v31 }
 0x8db   :  { %v1037_v32 = vpop.f32.mrf.mxu3 }
 0x8dc   :  { %v1038_v33 = vadd.f32 %v6194_v12, %v1037_v32 }
 0x8de   :  { %v1041_v38 = vadd.f32 %v1038_v33, %v961_v16 }
 0x8e0   :  { %v1047_v42 = vsel %vm117_vm1, %v1041_v38, 0.0  ;;  %v1053_v46 = vmul.f32 %v1041_v38, %v1041_v38 }
 0x8e1   :  { %1048 = vadd.xlane.f32.xlu1 %v1047_v42 }
 0x8e2   :  { %v1057_v51 = vsel %vm117_vm1, %v1053_v46, 0.0 }
 0x8e4   :  { %v1046_v44 = vpop.xlane.xlu2 %1045 }
 0x8e5   :  { %v1050_v45 = vmul.f32 %v1046_v44, %v6714_v20 }
 0x8e6   :  { %v1056_v47 = vpop.xlane.xlu1 %1055 }
 0x8e7   :  { %v1062_v48 = vmul.f32 %v1050_v45, %v1050_v45  ;;  %v1060_v49 = vmul.f32 %v1056_v47, %v6714_v20  ;;  %v1066_v59 = vsub.f32 %v1040_v18, %v1050_v45 }
 0x8e9   :  { %v1064_v50 = vsub.f32 %v1060_v49, %v1062_v48  ;;  %1058 = vadd.xlane.f32.xlu1 %v1057_v51 }
 0x8eb   :  { %v1068_v52 = vadd.f32 1e-05, %v1064_v50 }
 0x8ed   :  { %6274 = vrsqrt.f32 %v1068_v52  ;;  %vm1076_vm15 = vweird.f32 %v1068_v52 }
 0x8f3   :  { %v6275_v53 = vpop.eup %6274 }
 0x8f4   :  { %v1071_v54 = vmul.f32 %v6275_v53, %v1068_v52  ;;  %vm1077_vm14 = vweird.f32 %v6275_v53 }
 0x8f5   :  { %vm1078_vm2 = vmor %vm1076_vm15, %vm1077_vm14 }
 0x8f6   :  { %v1072_v55 = vmul.f32 %v6275_v53, %v1071_v54 }
 0x8f8   :  { %v1073_v56 = vmul.f32 0.5, %v1072_v55 }
 0x8fa   :  { %v1074_v57 = vsub.f32 1.5, %v1073_v56 }
 0x8fc   :  { %v1075_v58 = vmul.f32 %v6275_v53, %v1074_v57 }
 0x8fe   :  { %v1079_v61 = vsel %vm1078_vm2, %v6275_v53, %v1075_v58 }
 0x8ff   :  { %v1090_v62 = vmul.f32 %v1079_v61, %v1066_v59 }
 0x901   :  { %v1093_v0 = vmul.f32 %v6195_v60, %v1090_v62 }
 0x903   :  { %v6738_v1 = vadd.f32 %v6196_v63, %v1093_v0 }
 0x905   :  { %5976 = vmatmul.msk.f32.vlgmr.msrb.gmra.mxu2 %vm117_vm1, %v6738_v1 }
 0x954   :  { %v1049_v2 = vpop.xlane.xlu1 %1048 }
 0x955   :  { %v1051_v3 = vmul.f32 %v1049_v2, %v6714_v20 }
 0x957   :  { %v1063_v5 = vmul.f32 %v1051_v3, %v1051_v3  ;;  %v1067_v13 = vsub.f32 %v1041_v38, %v1051_v3 }
 0x95c   :  { %v1059_v4 = vpop.xlane.xlu1 %1058 }
 0x95d   :  { %v1061_v15 = vmul.f32 %v1059_v4, %v6714_v20 }
 0x95f   :  { %v1065_v6 = vsub.f32 %v1061_v15, %v1063_v5 }
 0x961   :  { %v1069_v35 = vadd.f32 1e-05, %v1065_v6 }
 0x963   :  { %6276 = vrsqrt.f32 %v1069_v35  ;;  %vm1086_vm4 = vweird.f32 %v1069_v35 }
 0x969   :  { %v6277_v7 = vpop.eup %6276 }
 0x96a   :  { %v1081_v8 = vmul.f32 %v6277_v7, %v1069_v35  ;;  %vm1087_vm3 = vweird.f32 %v6277_v7 }
 0x96b   :  { %vm1088_vm5 = vmor %vm1086_vm4, %vm1087_vm3 }
 0x96c   :  { %v1082_v17 = vmul.f32 %v6277_v7, %v1081_v8 }
 0x96e   :  { %v1083_v10 = vmul.f32 0.5, %v1082_v17 }
 0x970   :  { %v1084_v11 = vsub.f32 1.5, %v1083_v10 }
 0x972   :  { %v1085_v9 = vmul.f32 %v6277_v7, %v1084_v11 }
 0x974   :  { %v1089_v14 = vsel %vm1088_vm5, %v6277_v7, %v1085_v9 }
 0x975   :  { %v1091_v16 = vmul.f32 %v1089_v14, %v1067_v13 }
 0x977   :  { %v1094_v19 = vmul.f32 %v6195_v60, %v1091_v16 }
 0x979   :  { %v6744_v21 = vadd.f32 %v6196_v63, %v1094_v19 }
 0x97b   :  { %5977 = vmatmul.msk.f32.gmra.mxu2 %vm117_vm1, %v6744_v21 }
 0x988   :  { %v1127_v22 = vpop.f32.mrf.mxu2 }
 0x989   :  { %v6748_v23 = vadd.f32 %v6197_v40, %v1127_v22 }
 0x98b   :  { %1294 = vrot.lane.b32.xlu0 %v6748_v23, %s6509_s2  ;;  %1139 = vrot.lane.b32.xlu1 %v6748_v23, %s6508_s7 }
 0x993   :  { %1292 = vrot.lane.b32.xlu1 %v6748_v23, %s6507_s0 }
 0x9fd   :  { %v1140_v24 = vpop.permute.xlu1 %1139  ;;  %v1295_v27 = vpop.permute.xlu0 %1294 }
 0x9fe   :  { %5978 = vmatpush.xpose.msk.msra.mxu0 %vm47_vm0, %v1140_v24  ;;  %v1130_v25 = vpop.f32.mrf.mxu2 }
 0x9ff   :  { %v6757_v12 = vadd.f32 %v6197_v40, %v1130_v25 }
 0xa01   :  { %5979 = vmatmul.msk.f32.vlgmr.msra.gmra.mxu0 %vm47_vm0, %v6748_v23  ;;  %1166 = vrot.lane.b32.xlu2 %v6757_v12, %s6508_s7 }
 0xa05   :  { %v1293_v18 = vpop.permute.xlu1 %1292 }
 0xa5b   :  { %v1167_v26 = vpop.permute.xlu2 %1166 }
 0xa5c   :  { %5980 = vmatpush.xpose.msk.msra.mxu1 %vm47_vm0, %v1167_v26 }
 0xa5f   :  { %5981 = vmatmul.msk.f32.vlgmr.msra.gmra.mxu1 %vm47_vm0, %v6757_v12 }
 0xa60   :  { %5984 = vmatpush.xpose.msk.msrb.mxu1 %vm47_vm0, %v1295_v27 }
 0xa67   :  { %5985 = vmatmul.msk.f32.vlgmr.msrb.gmra.mxu1 %vm47_vm0, %v1293_v18 }
 0xa7e   :  { %v1162_v28 = vpop.f32.mrf.mxu0 }
 0xa7f   :  { %v1163_v30 = vadd.f32 %v1162_v28, %v6603_v29 }
 0xa81   :  { %v1192_v31 = vsel %vm47_vm0, %v1163_v30, -inf }
 0xa82   :  { %1193 = vmax.xlane.f32.xlu0 %v1192_v31 }
 0xa96   :  { %1240 = vrot.lane.b32.xlu0 %v6748_v23, %s6511_s1 }
 0xadc   :  { %v1189_v32 = vpop.f32.mrf.mxu1 }
 0xadd   :  { %v1190_v33 = vadd.f32 %v1189_v32, %v6603_v29 }
 0xadf   :  { %v1195_v34 = vsel %vm47_vm0, %v1190_v33, -inf }
 0xae0   :  { %1196 = vmax.xlane.f32.xlu1 %v1195_v34 }
 0xae4   :  { %v1317_v38 = vpop.f32.mrf.mxu1 }
 0xae5   :  { %v1318_v39 = vadd.f32 %v1317_v38, %v6603_v29 }
 0xae7   :  { %v1348_v41 = vsel %vm47_vm0, %v1318_v39, -inf }
 0xae8   :  { %1349 = vmax.xlane.f32.xlu2 %v1348_v41 }
 0xaf5   :  { %v1194_v42 = vpop.xlane.xlu0 %1193 }
 0xaf6   :  { %v1198_v43 = vsub.f32 %v1163_v30, %v1194_v42 }
 0xaf8   :  { %v1200_v44 = vmul.f32 1.442695, %v1198_v43 }
 0xaf9   :  { %1322 = vrot.lane.b32.xlu1 %v6757_v12, %s6509_s2 }
 0xafa   :  { %6278 = vpow2.f32 %v1200_v44 }
 0xb00   :  { %v6279_v45 = vpop.eup %6278  ;;  %1266 = vrot.lane.b32.xlu2 %v6757_v12, %s6511_s1 }
 0xb01   :  { %v1204_v46 = vsel %vm47_vm0, %v6279_v45, 0.0 }
 0xb02   :  { %1205 = vadd.xlane.f32.xlu0 %v1204_v46 }
 0xb08   :  { %v1241_v47 = vpop.permute.xlu0 %1240 }
 0xb09   :  { %1261 = vmatpush.msra.mxu2 %v1241_v47 }
 0xb16   :  { %1320 = vrot.lane.b32.xlu0 %v6757_v12, %s6507_s0 }
 0xb1e   :  { %1506 = vrot.lane.b32.xlu0 %v6748_v23, %s6514_s14 }
 0xb26   :  { %1536 = vrot.lane.b32.xlu0 %v6757_v12, %s6513_s13 }
 0xb53   :  { %v1197_v48 = vpop.xlane.xlu1 %1196 }
 0xb54   :  { %v1199_v49 = vsub.f32 %v1190_v33, %v1197_v48 }
 0xb56   :  { %v1202_v50 = vmul.f32 1.442695, %v1199_v49  ;;  %v1134_v49 = vld [vmem:[#allocation2 + $0x1a8] sm:$0xff] }
 0xb57   :  { %1469 = vmatpush.msra.mxu3 %v1134_v49 }
 0xb58   :  { %6280 = vpow2.f32 %v1202_v50 }
 0xb5b   :  { %v1350_v51 = vpop.xlane.xlu2 %1349 }
 0xb5c   :  { %v1354_v52 = vsub.f32 %v1318_v39, %v1350_v51  ;;  %v1133_v39 = vld [vmem:[#allocation2 + $0x1a0] sm:$0xff] }
 0xb5e   :  { %v6281_v53 = vpop.eup %6280  ;;  %v1356_v54 = vmul.f32 1.442695, %v1354_v52 }
 0xb5f   :  { %v1207_v55 = vsel %vm47_vm0, %v6281_v53, 0.0 }
 0xb60   :  { %6282 = vpow2.f32 %v1356_v54  ;;  %1208 = vadd.xlane.f32.xlu1 %v1207_v55 }
 0xb63   :  { %v1267_v56 = vpop.permute.xlu2 %1266 }
 0xb64   :  { %1287 = vmatpush.msrb.mxu0 %v1267_v56 }
 0xb66   :  { %v6788_v57 = vpop.eup %6282 }
 0xb67   :  { %v1360_v58 = vsel %vm47_vm0, %v6788_v57, 0.0 }
 0xb68   :  { %1361 = vadd.xlane.f32.xlu2 %v1360_v58 }
 0xb6b   :  { %v1323_v59 = vpop.permute.xlu1 %1322 }
 0xb6c   :  { %5986 = vmatpush.xpose.msk.msrb.mxu2 %vm47_vm0, %v1323_v59 }
 0xb75   :  { %v1206_v60 = vpop.xlane.xlu0 %1205 }
 0xb76   :  { %6284 = vrcp.f32 %v1206_v60  ;;  %v1221_v0 = vand.u32 2147483648, %v1206_v60  ;;  %v1219_v3 = vand.u32 2147483647, %v1206_v60  ;;  %vm1215_vm7 = vweird.f32 %v1206_v60 }
 0xb78   :  { %v1222_v5 = vor.u32 1.1754944e-38, %v1221_v0  ;;  %vm1220_vm9 = vcmp.eq.f32.partialorder %v1219_v3, 8.507059e+37 }
 0xb79   :  { %1396 = vrot.lane.b32.xlu1 %v6748_v23, %s6512_s12 }
 0xb7c   :  { %v6285_v61 = vpop.eup %6284 }
 0xb7d   :  { %v1211_v62 = vmul.f32 %v6285_v61, %v1206_v60  ;;  %vm1216_vm6 = vweird.f32 %v6285_v61 }
 0xb7e   :  { %vm1217_vm8 = vmor %vm1215_vm7, %vm1216_vm6 }
 0xb7f   :  { %v1212_v63 = vsub.f32 1.0, %v1211_v62 }
 0xb80   :  { %1508 = vrot.lane.b32.xlu2 %v6748_v23, %s6513_s13 }
 0xb81   :  { %v1213_v2 = vmul.f32 %v6285_v61, %v1212_v63 }
 0xb83   :  { %v1214_v4 = vadd.f32 %v6285_v61, %v1213_v2 }
 0xb85   :  { %v1218_v15 = vsel %vm1217_vm8, %v6285_v61, %v1214_v4 }
 0xb86   :  { %v1223_v6 = vsel %vm1220_vm9, %v1222_v5, %v1218_v15 }
 0xb87   :  { %v1238_v35 = vmul.f32 %v6279_v45, %v1223_v6 }
 0xb88   :  { %v1321_v7 = vpop.permute.xlu0 %1320 }
 0xb89   :  { %5982 = vmatmul.msk.f32.vlgmr.msra.gmra.mxu2 %vm47_vm0, %v1238_v35 }
 0xb8a   :  { %1498 = vmatpush.msra.mxu2 %v1133_v39 }
 0xb90   :  { %v1507_v44 = vpop.permute.xlu0 %1506 }
 0xb91   :  { %5987 = vmatmul.msk.f32.vlgmr.msrb.gmra.mxu2 %vm47_vm0, %v1321_v7 }
 0xb98   :  { %v1537_v61 = vpop.permute.xlu0 %1536 }
 0xbd3   :  { %v1209_v8 = vpop.xlane.xlu1 %1208 }
 0xbd4   :  { %6286 = vrcp.f32 %v1209_v8  ;;  %v1235_v13 = vand.u32 2147483648, %v1209_v8  ;;  %v1233_v16 = vand.u32 2147483647, %v1209_v8  ;;  %vm1229_vm11 = vweird.f32 %v1209_v8 }
 0xbd6   :  { %v1236_v22 = vor.u32 1.1754944e-38, %v1235_v13  ;;  %vm1234_vm13 = vcmp.eq.f32.partialorder %v1233_v16, 8.507059e+37 }
 0xbda   :  { %v6287_v17 = vpop.eup %6286 }
 0xbdb   :  { %v1225_v10 = vmul.f32 %v6287_v17, %v1209_v8  ;;  %v1362_v11 = vpop.xlane.xlu2 %1361  ;;  %vm1230_vm10 = vweird.f32 %v6287_v17 }
 0xbdc   :  { %6288 = vrcp.f32 %v1362_v11  ;;  %vm1231_vm12 = vmor %vm1229_vm11, %vm1230_vm10  ;;  %v1377_v28 = vand.u32 2147483648, %v1362_v11  ;;  %v1375_v31 = vand.u32 2147483647, %v1362_v11  ;;  %vm1371_vm15 = vweird.f32 %v1362_v11 }
 0xbdd   :  { %v1226_v9 = vsub.f32 1.0, %v1225_v10 }
 0xbde   :  { %v1378_v33 = vor.u32 1.1754944e-38, %v1377_v28  ;;  %vm1376_vm3 = vcmp.eq.f32.partialorder %v1375_v31, 8.507059e+37 }
 0xbdf   :  { %v1227_v14 = vmul.f32 %v6287_v17, %v1226_v9 }
 0xbe1   :  { %v1228_v19 = vadd.f32 %v6287_v17, %v1227_v14 }
 0xbe2   :  { %v6289_v40 = vpop.eup %6288 }
 0xbe3   :  { %v1232_v24 = vsel %vm1231_vm12, %v6287_v17, %v1228_v19  ;;  %v1367_v25 = vmul.f32 %v6289_v40, %v1362_v11  ;;  %vm1372_vm14 = vweird.f32 %v6289_v40  ;;  %v1509_v41 = vpop.permute.xlu2 %1508 }
 0xbe4   :  { %v1237_v26 = vsel %vm1234_vm13, %v1236_v22, %v1232_v24  ;;  %vm1373_vm2 = vmor %vm1371_vm15, %vm1372_vm14 }
 0xbe5   :  { %v1368_v27 = vsub.f32 1.0, %v1367_v25  ;;  %v1239_v18 = vmul.f32 %v6281_v53, %v1237_v26 }
 0xbe7   :  { %v1369_v30 = vmul.f32 %v6289_v40, %v1368_v27  ;;  %5983 = vmatmul.msk.f32.vlgmr.msrb.gmra.mxu0 %vm47_vm0, %v1239_v18 }
 0xbe9   :  { %v1370_v32 = vadd.f32 %v6289_v40, %v1369_v30 }
 0xbeb   :  { %v1374_v34 = vsel %vm1373_vm2, %v6289_v40, %v1370_v32  ;;  %v1397_v38 = vpop.permute.xlu1 %1396 }
 0xbec   :  { %1417 = vmatpush.msra.mxu0 %v1397_v38  ;;  %v1379_v42 = vsel %vm1376_vm3, %v1378_v33, %v1374_v34 }
 0xbed   :  { %v1394_v43 = vmul.f32 %v6788_v57, %v1379_v42 }
 0xbee   :  { %5994 = vmatpush.xpose.msk.msrb.mxu0 %vm47_vm0, %v1509_v41 }
 0xbef   :  { %5988 = vmatmul.msk.f32.vlgmr.msra.gmra.mxu0 %vm47_vm0, %v1394_v43 }
 0xbf7   :  { %5995 = vmatmul.msk.f32.vlgmr.msrb.gmra.mxu0 %vm47_vm0, %v1507_v44 }
 0xc0c   :  { %v1263_v45 = vpop.f32.mrf.mxu2 }
 0xc0d   :  { %5992 = vmatmul.msk.f32.vlgmr.msra.gmra.mxu2 %vm47_vm0, %v1263_v45 }
 0xc14   :  { %v1345_v46 = vpop.f32.mrf.mxu2 }
 0xc15   :  { %v1346_v47 = vadd.f32 %v1345_v46, %v6603_v29 }
 0xc17   :  { %v1351_v48 = vsel %vm47_vm0, %v1346_v47, -inf }
 0xc18   :  { %1352 = vmax.xlane.f32.xlu1 %v1351_v48 }
 0xc31   :  { %1422 = vrot.lane.b32.xlu1 %v6757_v12, %s6512_s12 }
 0xc39   :  { %1610 = vrot.lane.b32.xlu1 %v6748_v23, %s6515_s15 }
 0xc41   :  { %1721 = vrot.lane.b32.xlu1 %v6757_v12, %s6517_s17 }
 0xc64   :  { %v1289_v50 = vpop.f32.mrf.mxu0 }
 0xc65   :  { %5993 = vmatmul.msk.f32.gmra.mxu2 %vm47_vm0, %v1289_v50  ;;  %v1135_v50 = vld [vmem:[#allocation2 + $0x1b0] sm:$0xff] }
 0xc66   :  { %1683 = vmatpush.msrb.mxu3 %v1135_v50 }
 0xc6c   :  { %v1419_v51 = vpop.f32.mrf.mxu0 }
 0xc6d   :  { %5990 = vmatmul.msk.f32.vlgmr.msra.gmra.mxu3 %vm47_vm0, %v1419_v51 }
 0xc74   :  { %v1531_v52 = vpop.f32.mrf.mxu0 }
 0xc75   :  { %v1532_v53 = vadd.f32 %v1531_v52, %v6603_v29 }
 0xc77   :  { %v1562_v54 = vsel %vm47_vm0, %v1532_v53, -inf }
 0xc78   :  { %1563 = vmax.xlane.f32.xlu2 %v1562_v54 }
 0xc8b   :  { %v1353_v55 = vpop.xlane.xlu1 %1352 }
 0xc8c   :  { %v1355_v56 = vsub.f32 %v1346_v47, %v1353_v55 }
 0xc8e   :  { %v1358_v57 = vmul.f32 1.442695, %v1355_v56 }
 0xc90   :  { %6290 = vpow2.f32 %v1358_v57  ;;  %1695 = vrot.lane.b32.xlu2 %v6748_v23, %s6516_s16  ;;  %v6835_v41 = vpop.f32.mrf.mxu2 }
 0xc96   :  { %v6291_v58 = vpop.eup %6290 }
 0xc97   :  { %v1363_v59 = vsel %vm47_vm0, %v6291_v58, 0.0 }
 0xc98   :  { %1364 = vadd.xlane.f32.xlu0 %v1363_v59 }
 0xca3   :  { %v1423_v60 = vpop.permute.xlu1 %1422 }
 0xca4   :  { %1443 = vmatpush.msra.mxu1 %v1423_v60 }
 0xca6   :  { %5996 = vmatpush.xpose.msk.msrb.mxu1 %vm47_vm0, %v1537_v61 }
 0xcab   :  { %v1611_v62 = vpop.permute.xlu1 %1610 }
 0xcac   :  { %1534 = vrot.lane.b32.xlu0 %v6757_v12, %s6514_s14  ;;  %1631 = vmatpush.msra.mxu0 %v1611_v62 }
 0xcb3   :  { %v1722_v39 = vpop.permute.xlu1 %1721 }
 0xcb4   :  { %1693 = vrot.lane.b32.xlu0 %v6748_v23, %s6517_s17 }
 0xce8   :  { %v6838_v43 = vpop.f32.mrf.mxu2 }
 0xceb   :  { %v1564_v63 = vpop.xlane.xlu2 %1563 }
 0xcec   :  { %v1568_v0 = vsub.f32 %v1532_v53, %v1564_v63 }
 0xcee   :  { %v1570_v2 = vmul.f32 1.442695, %v1568_v0 }
 0xcf0   :  { %6292 = vpow2.f32 %v1570_v2  ;;  %v6179_v2 = vpack.i.bf16 %v6757_v12, %v6748_v23 }
 0xcf3   :  { %v1696_v3 = vpop.permute.xlu2 %1695 }
 0xcf4   :  { %6002 = vmatpush.xpose.msk.msrb.mxu2 %vm47_vm0, %v1696_v3 }
 0xcf6   :  { %v6293_v4 = vpop.eup %6292 }
 0xcf7   :  { %v1574_v5 = vsel %vm47_vm0, %v6293_v4, 0.0 }
 0xcf8   :  { %1575 = vadd.xlane.f32.xlu2 %v1574_v5 }
 0xd0b   :  { %v1365_v15 = vpop.xlane.xlu0 %1364 }
 0xd0c   :  { %6294 = vrcp.f32 %v1365_v15  ;;  %v1391_v8 = vand.u32 2147483648, %v1365_v15  ;;  %v1389_v10 = vand.u32 2147483647, %v1365_v15  ;;  %vm1385_vm5 = vweird.f32 %v1365_v15 }
 0xd0e   :  { %v1392_v9 = vor.u32 1.1754944e-38, %v1391_v8  ;;  %vm1390_vm7 = vcmp.eq.f32.partialorder %v1389_v10, 8.507059e+37 }
 0xd10   :  { %1723 = vrot.lane.b32.xlu2 %v6757_v12, %s6516_s16 }
 0xd12   :  { %v6295_v6 = vpop.eup %6294 }
 0xd13   :  { %v1381_v35 = vmul.f32 %v6295_v6, %v1365_v15  ;;  %vm1386_vm4 = vweird.f32 %v6295_v6 }
 0xd14   :  { %vm1387_vm6 = vmor %vm1385_vm5, %vm1386_vm4 }
 0xd15   :  { %v1382_v7 = vsub.f32 1.0, %v1381_v35 }
 0xd17   :  { %v1383_v17 = vmul.f32 %v6295_v6, %v1382_v7 }
 0xd19   :  { %v1384_v11 = vadd.f32 %v6295_v6, %v1383_v17 }
 0xd1b   :  { %v1388_v13 = vsel %vm1387_vm6, %v6295_v6, %v1384_v11 }
 0xd1c   :  { %v1393_v14 = vsel %vm1390_vm7, %v1392_v9, %v1388_v13 }
 0xd1d   :  { %v1395_v16 = vmul.f32 %v6291_v58, %v1393_v14 }
 0xd1e   :  { %v1535_v19 = vpop.permute.xlu0 %1534 }
 0xd1f   :  { %5989 = vmatmul.msk.f32.vlgmr.msra.gmra.mxu1 %vm47_vm0, %v1395_v16 }
 0xd26   :  { %v1694_v40 = vpop.permute.xlu0 %1693 }
 0xd27   :  { %5997 = vmatmul.msk.f32.vlgmr.msrb.gmra.mxu1 %vm47_vm0, %v1535_v19  ;;  %6003 = vmatmul.msk.f32.vlgmr.msrb.gmra.mxu2 %vm47_vm0, %v1694_v40 }
 0xd6b   :  { %v1576_v22 = vpop.xlane.xlu2 %1575 }
 0xd6c   :  { %6296 = vrcp.f32 %v1576_v22  ;;  %v1591_v18 = vand.u32 2147483648, %v1576_v22  ;;  %v1589_v30 = vand.u32 2147483647, %v1576_v22  ;;  %vm1585_vm9 = vweird.f32 %v1576_v22 }
 0xd6e   :  { %v1592_v32 = vor.u32 1.1754944e-38, %v1591_v18  ;;  %vm1590_vm11 = vcmp.eq.f32.partialorder %v1589_v30, 8.507059e+37 }
 0xd72   :  { %v6297_v24 = vpop.eup %6296 }
 0xd73   :  { %v1581_v25 = vmul.f32 %v6297_v24, %v1576_v22  ;;  %v1724_v26 = vpop.permute.xlu2 %1723  ;;  %vm1586_vm8 = vweird.f32 %v6297_v24 }
 0xd74   :  { %6004 = vmatpush.xpose.msk.msrb.mxu0 %vm47_vm0, %v1724_v26  ;;  %vm1587_vm10 = vmor %vm1585_vm9, %vm1586_vm8 }
 0xd75   :  { %v1582_v27 = vsub.f32 1.0, %v1581_v25 }
 0xd77   :  { %v1583_v28 = vmul.f32 %v6297_v24, %v1582_v27 }
 0xd79   :  { %v1584_v31 = vadd.f32 %v6297_v24, %v1583_v28 }
 0xd7b   :  { %v1588_v33 = vsel %vm1587_vm10, %v6297_v24, %v1584_v31 }
 0xd7c   :  { %v1593_v34 = vsel %vm1590_vm11, %v1592_v32, %v1588_v33 }
 0xd7d   :  { %v1608_v38 = vmul.f32 %v6293_v4, %v1593_v34 }
 0xd7f   :  { %5998 = vmatmul.msk.f32.vlgmr.msra.gmra.mxu0 %vm47_vm0, %v1608_v38 }
 0xd87   :  { %6005 = vmatmul.msk.f32.vlgmr.msrb.gmra.mxu0 %vm47_vm0, %v1722_v39 }
 0xd9c   :  { %v1445_v42 = vpop.f32.mrf.mxu1 }
 0xd9d   :  { %5991 = vmatmul.msk.f32.gmra.mxu3 %vm47_vm0, %v1445_v42  ;;  %v2136_v42 = vld [vmem:[#allocation2 + $0x2b0] sm:$0xff] }
 0xda4   :  { %v1559_v44 = vpop.f32.mrf.mxu1 }
 0xda5   :  { %v1560_v45 = vadd.f32 %v1559_v44, %v6603_v29  ;;  %v2135_v44 = vld [vmem:[#allocation2 + $0x2a8] sm:$0xff] }
 0xda7   :  { %v1565_v46 = vsel %vm47_vm0, %v1560_v45, -inf }
 0xda8   :  { %1566 = vmax.xlane.f32.xlu0 %v1565_v46  ;;  %v2133_v46 = vld [vmem:[#allocation2 + $0x298] sm:$0xff] }
 0xdaa   :  { %v1718_v47 = vpop.f32.mrf.mxu2 }
 0xdab   :  { %v1719_v48 = vadd.f32 %v1718_v47, %v6603_v29 }
 0xdad   :  { %v1749_v49 = vsel %vm47_vm0, %v1719_v48, -inf }
 0xdae   :  { %1750 = vmax.xlane.f32.xlu2 %v1749_v49 }
 0xdfc   :  { %v1633_v51 = vpop.f32.mrf.mxu0 }
 0xdfd   :  { %6000 = vmatmul.msk.f32.vlgmr.msrb.gmra.mxu3 %vm47_vm0, %v1633_v51 }
 0xe04   :  { %v1746_v52 = vpop.f32.mrf.mxu0 }
 0xe05   :  { %v1747_v53 = vadd.f32 %v1746_v52, %v6603_v29 }
 0xe07   :  { %v1752_v54 = vsel %vm47_vm0, %v1747_v53, -inf }
 0xe08   :  { %1753 = vmax.xlane.f32.xlu1 %v1752_v54 }
 0xe1b   :  { %v1567_v55 = vpop.xlane.xlu0 %1566 }
 0xe1c   :  { %v1569_v56 = vsub.f32 %v1560_v45, %v1567_v55  ;;  %v2134_v45 = vld [vmem:[#allocation2 + $0x2a0] sm:$0xff] }
 0xe1e   :  { %v1572_v57 = vmul.f32 1.442695, %v1569_v56 }
 0xe20   :  { %6298 = vpow2.f32 %v1572_v57 }
 0xe21   :  { %v1751_v58 = vpop.xlane.xlu2 %1750 }
 0xe22   :  { %v1755_v59 = vsub.f32 %v1719_v48, %v1751_v58 }
 0xe24   :  { %v1757_v60 = vmul.f32 1.442695, %v1755_v59  ;;  %v80_v59 = vld [vmem:[%s7600_s3] sm:$0xff] }
 0xe26   :  { %v6299_v61 = vpop.eup %6298  ;;  %6300 = vpow2.f32 %v1757_v60  ;;  %v1136_v60 = vld [vmem:[#allocation2 + $0x1b8] sm:$0xff] }
 0xe27   :  { %v1577_v62 = vsel %vm47_vm0, %v6299_v61, 0.0  ;;  %1870 = vmatpush.msra.mxu0 %v1136_v60 }
 0xe28   :  { %1578 = vadd.xlane.f32.xlu0 %v1577_v62  ;;  %v81_v62 = vld [vmem:[%s7600_s3 + $0x8] sm:$0xff] }
 0xe2c   :  { %v6301_v63 = vpop.eup %6300 }
 0xe2d   :  { %v1761_v0 = vsel %vm47_vm0, %v6301_v63, 0.0 }
 0xe2e   :  { %1762 = vadd.xlane.f32.xlu2 %v1761_v0 }
 0xe3c   :  { %1636 = vrot.lane.b32.xlu0 %v6757_v12, %s6515_s15 }
 0xe46   :  { %6180 = vrot.lane.b32.xlu2 %v6179_v2, %s6518_s18 }
 0xe7b   :  { %v1754_v3 = vpop.xlane.xlu1 %1753 }
 0xe7c   :  { %v1756_v4 = vsub.f32 %v1747_v53, %v1754_v3  ;;  %v6198_v3 = vld [vmem:[#allocation2 + $0x2b8] ss:$0 sm:$0xff] }
 0xe7e   :  { %v1759_v5 = vmul.f32 1.442695, %v1756_v4 }
 0xe80   :  { %6302 = vpow2.f32 %v1759_v5 }
 0xe86   :  { %v6854_v15 = vpop.eup %6302 }
 0xe87   :  { %v1764_v6 = vsel %vm47_vm0, %v6854_v15, 0.0 }
 0xe88   :  { %1765 = vadd.xlane.f32.xlu1 %v1764_v6 }
 0xe9b   :  { %v1579_v35 = vpop.xlane.xlu0 %1578 }
 0xe9c   :  { %6304 = vrcp.f32 %v1579_v35  ;;  %v1605_v23 = vand.u32 2147483648, %v1579_v35  ;;  %v1603_v11 = vand.u32 2147483647, %v1579_v35  ;;  %vm1599_vm13 = vweird.f32 %v1579_v35 }
 0xe9e   :  { %v1606_v19 = vor.u32 1.1754944e-38, %v1605_v23  ;;  %vm1604_vm15 = vcmp.eq.f32.partialorder %v1603_v11, 8.507059e+37 }
 0xea1   :  { %v1763_v7 = vpop.xlane.xlu2 %1762 }
 0xea2   :  { %v6305_v8 = vpop.eup %6304  ;;  %6306 = vrcp.f32 %v1763_v7  ;;  %v1778_v27 = vand.u32 2147483648, %v1763_v7  ;;  %v1776_v28 = vand.u32 2147483647, %v1763_v7  ;;  %vm1772_vm3 = vweird.f32 %v1763_v7 }
 0xea3   :  { %v1595_v17 = vmul.f32 %v6305_v8, %v1579_v35  ;;  %vm1600_vm12 = vweird.f32 %v6305_v8 }
 0xea4   :  { %vm1601_vm14 = vmor %vm1599_vm13, %vm1600_vm12  ;;  %v1779_v34 = vor.u32 1.1754944e-38, %v1778_v27  ;;  %vm1777_vm5 = vcmp.eq.f32.partialorder %v1776_v28, 8.507059e+37 }
 0xea5   :  { %v1596_v10 = vsub.f32 1.0, %v1595_v17 }
 0xea7   :  { %v1597_v12 = vmul.f32 %v6305_v8, %v1596_v10 }
 0xea8   :  { %v6307_v9 = vpop.eup %6306 }
 0xea9   :  { %v1598_v13 = vadd.f32 %v6305_v8, %v1597_v12  ;;  %v1768_v14 = vmul.f32 %v6307_v9, %v1763_v7  ;;  %v6181_v16 = vpop.permute.xlu2 %6180  ;;  %vm1773_vm2 = vweird.f32 %v6307_v9 }
 0xeaa   :  { %v6183_v40 = vunpack.i.h.bf16 %v6181_v16  ;;  %v6182_v32 = vunpack.i.l.bf16 %v6181_v16  ;;  %vm1774_vm4 = vmor %vm1772_vm3, %vm1773_vm2 }
 0xeab   :  { %v1602_v22 = vsel %vm1601_vm14, %v6305_v8, %v1598_v13  ;;  %v1769_v24 = vsub.f32 1.0, %v1768_v14  ;;  %v6199_v8 = vld [vmem:[#allocation2 + $0x1c0] ss:$0 sm:$0xff] }
 0xeac   :  { %1844 = vmatpush.msra.mxu2 %v6183_v40  ;;  %v1607_v25 = vsel %vm1604_vm15, %v1606_v19, %v1602_v22 }
 0xead   :  { %v1770_v26 = vmul.f32 %v6307_v9, %v1769_v24  ;;  %v1609_v18 = vmul.f32 %v6299_v61, %v1607_v25  ;;  %v6866_v61 = vadd.f32 %v6617_v36, %v80_v59 }
 0xeae   :  { %v1637_v30 = vpop.permute.xlu0 %1636  ;;  %2157 = vmatpush.msrb.mxu2 %v2136_v42 }
 0xeaf   :  { %v1771_v31 = vadd.f32 %v6307_v9, %v1770_v26  ;;  %1657 = vmatpush.msra.mxu1 %v1637_v30  ;;  %v1943_v30 = vld [vmem:[#allocation2 + $0x1d8] sm:$0xff] }
 0xeb0   :  { %5999 = vmatmul.msk.f32.vlgmr.msra.gmra.mxu1 %vm47_vm0, %v1609_v18  ;;  %2158 = vmatpush.msrb.mxu2 %v2135_v44 }
 0xeb1   :  { %v1775_v33 = vsel %vm1774_vm4, %v6307_v9, %v1771_v31  ;;  %1818 = vmatpush.msrb.mxu1 %v6182_v32  ;;  %v1942_v32 = vld [vmem:[#allocation2 + $0x1d0] sm:$0xff] }
 0xeb2   :  { %v1780_v38 = vsel %vm1777_vm5, %v1779_v34, %v1775_v33  ;;  %2159 = vmatpush.msrb.mxu2 %v2134_v45 }
 0xeb3   :  { %v1795_v39 = vmul.f32 %v6301_v63, %v1780_v38  ;;  %v6874_v63 = vadd.f32 %v6619_v37, %v81_v62  ;;  %v1471_v37 = vpop.f32.mrf.mxu3 }
 0xeb4   :  { %2160 = vmatpush.msrb.mxu2 %v2133_v46  ;;  %v1501_v35 = vadd.f32 %v6835_v41, %v1471_v37 }
 0xeb8   :  { %6006 = vmatmul.msk.f32.vlgmr.msrb.gmra.mxu1 %vm47_vm0, %v1795_v39 }
 0xefb   :  { %v1766_v47 = vpop.xlane.xlu1 %1765 }
 0xefc   :  { %6308 = vrcp.f32 %v1766_v47  ;;  %v1792_v51 = vand.u32 2147483648, %v1766_v47  ;;  %v1790_v53 = vand.u32 2147483647, %v1766_v47  ;;  %vm1786_vm7 = vweird.f32 %v1766_v47 }
 0xefe   :  { %v1793_v55 = vor.u32 1.1754944e-38, %v1792_v51  ;;  %vm1791_vm9 = vcmp.eq.f32.partialorder %v1790_v53, 8.507059e+37 }
 0xf02   :  { %v6309_v48 = vpop.eup %6308 }
 0xf03   :  { %v1782_v49 = vmul.f32 %v6309_v48, %v1766_v47  ;;  %vm1787_vm6 = vweird.f32 %v6309_v48 }
 0xf04   :  { %vm1788_vm8 = vmor %vm1786_vm7, %vm1787_vm6 }
 0xf05   :  { %v1783_v50 = vsub.f32 1.0, %v1782_v49 }
 0xf07   :  { %v1784_v52 = vmul.f32 %v6309_v48, %v1783_v50 }
 0xf09   :  { %v1785_v54 = vadd.f32 %v6309_v48, %v1784_v52  ;;  %v6200_v52 = vld [vmem:[#allocation2 + $0x278] ss:$0 sm:$0xff] }
 0xf0b   :  { %v1789_v56 = vsel %vm1788_vm8, %v6309_v48, %v1785_v54 }
 0xf0c   :  { %v1794_v57 = vsel %vm1791_vm9, %v1793_v55, %v1789_v56  ;;  %v6201_v55 = vld [vmem:[#allocation2 + $0x280] ss:$0 sm:$0xff] }
 0xf0d   :  { %v1796_v58 = vmul.f32 %v6854_v15, %v1794_v57  ;;  %v1474_v15 = vpop.f32.mrf.mxu3 }
 0xf0e   :  { %v1504_v16 = vadd.f32 %v6838_v43, %v1474_v15  ;;  %v1944_v43 = vld [vmem:[#allocation2 + $0x1e0] sm:$0xff]  ;;  %v1993_v15 = vld [vmem:[#allocation2 + $0x268] sm:$0xff] }
 0xf0f   :  { %6007 = vmatmul.msk.f32.vlgmr.msra.gmra.mxu2 %vm47_vm0, %v1796_v58  ;;  %1965 = vmatpush.msra.mxu1 %v1944_v43  ;;  %v1982_v43 = vld [vmem:[#allocation2 + $0x210] sm:$0xff] }
 0xf10   :  { %1996 = vmatpush.msra.mxu3 %v1993_v15 }
 0xf11   :  { %1966 = vmatpush.msra.mxu1 %v1943_v30  ;;  %v1980_v30 = vld [vmem:[#allocation2 + $0x200] sm:$0xff] }
 0xf13   :  { %1967 = vmatpush.msra.mxu1 %v1942_v32  ;;  %v1979_v32 = vld [vmem:[#allocation2 + $0x1f8] sm:$0xff] }
 0xf15   :  { %v1685_v6 = vpop.f32.mrf.mxu3 }
 0xf16   :  { %v1691_v7 = vadd.f32 %v1685_v6, %v1501_v35  ;;  %v1992_v6 = vld [vmem:[#allocation2 + $0x260] sm:$0xff]  ;;  %v1991_v35 = vld [vmem:[#allocation2 + $0x258] sm:$0xff] }
 0xf17   :  { %6012 = vmatmul.msk.f32.vlgmr.msrb.gmra.mxu2 %vm117_vm1, %v6866_v61  ;;  %1997 = vmatpush.msra.mxu3 %v1992_v6 }
 0xf19   :  { %1998 = vmatpush.msra.mxu3 %v1991_v35 }
 0xf1f   :  { %6013 = vmatmul.msk.f32.gmra.mxu2 %vm117_vm1, %v6874_v63 }
 0xf2d   :  { %v1659_v0 = vpop.f32.mrf.mxu1 }
 0xf2e   :  { %6001 = vmatmul.msk.f32.gmra.mxu3 %vm47_vm0, %v1659_v0 }
 0xf35   :  { %v1820_v2 = vpop.f32.mrf.mxu1 }
 0xf36   :  { %6008 = vmatmul.msk.f32.vlgmr.msra.gmra.mxu0 %vm47_vm0, %v1820_v2 }
 0xf92   :  { %v1846_v36 = vpop.f32.mrf.mxu2 }
 0xf93   :  { %6009 = vmatmul.msk.f32.gmra.mxu0 %vm47_vm0, %v1846_v36 }
 0xf9a   :  { %v2162_v4 = vpop.f32.mrf.mxu2 }
 0xf9b   :  { %v6881_v5 = vadd.f32 %v6198_v3, %v2162_v4 }
 0xf9d   :  { %2174 = vrot.lane.b32.xlu2 %v6881_v5, %s6508_s7 }
 0xfa2   :  { %v2165_v18 = vpop.f32.mrf.mxu2 }
 0xfa3   :  { %v6905_v31 = vadd.f32 %v6198_v3, %v2165_v18  ;;  %v1983_v18 = vld [vmem:[#allocation2 + $0x218] sm:$0xff] }
 0xfa5   :  { %2329 = vrot.lane.b32.xlu2 %v6881_v5, %s6509_s2 }
 0xfad   :  { %2327 = vrot.lane.b32.xlu2 %v6881_v5, %s6507_s0 }
 0xfb1   :  { %v1688_v41 = vpop.f32.mrf.mxu3 }
 0xfb2   :  { %v1692_v19 = vadd.f32 %v1688_v41, %v1504_v16 }
 0xfb3   :  { %v1872_v17 = vpop.f32.mrf.mxu0 }
 0xfb4   :  { %v1878_v10 = vadd.f32 %v1872_v17, %v1691_v7  ;;  %v1990_v17 = vld [vmem:[#allocation2 + $0x250] sm:$0xff] }
 0xfb5   :  { %1999 = vmatpush.msra.mxu3 %v1990_v17 }
 0xfb6   :  { %v1881_v23 = vadd.f32 %v6199_v8, %v1878_v10  ;;  %v1989_v10 = vld [vmem:[#allocation2 + $0x248] sm:$0xff] }
 0xfb7   :  { %2000 = vmatpush.msra.mxu3 %v1989_v10 }
 0xfb8   :  { %v1883_v12 = vadd.f32 %v1881_v23, %v6738_v1 }
 0xfba   :  { %v1887_v11 = vsel %vm117_vm1, %v1883_v12, 0.0  ;;  %v1895_v9 = vmul.f32 %v1883_v12, %v1883_v12 }
 0xfbb   :  { %1888 = vadd.xlane.f32.xlu1 %v1887_v11 }
 0xfbc   :  { %v1897_v13 = vsel %vm117_vm1, %v1895_v9, 0.0  ;;  %v1987_v9 = vld [vmem:[#allocation2 + $0x238] sm:$0xff] }
 0xfc3   :  { %1898 = vadd.xlane.f32.xlu1 %v1897_v13 }
 0xff7   :  { %v2175_v14 = vpop.permute.xlu2 %2174 }
 0xff8   :  { %6014 = vmatpush.xpose.msk.msrb.mxu0 %vm47_vm0, %v2175_v14  ;;  %v1986_v14 = vld [vmem:[#allocation2 + $0x230] sm:$0xff] }
 0xffb   :  { %6015 = vmatmul.msk.f32.vlgmr.msrb.gmra.mxu0 %vm47_vm0, %v6881_v5 }
0x1010   :  { %v1875_v40 = vpop.f32.mrf.mxu0 }
0x1011   :  { %v1879_v22 = vadd.f32 %v1875_v40, %v1692_v19  ;;  %v2330_v19 = vpop.permute.xlu2 %2329 }
0x1013   :  { %v1882_v1 = vadd.f32 %v6199_v8, %v1879_v22  ;;  %v1985_v22 = vld [vmem:[#allocation2 + $0x228] sm:$0xff] }
0x1015   :  { %v6898_v24 = vadd.f32 %v1882_v1, %v6744_v21  ;;  %v1941_v21 = vld [vmem:[#allocation2 + $0x1c8] sm:$0xff] }
0x1016   :  { %1968 = vmatpush.msra.mxu1 %v1941_v21  ;;  %v1978_v21 = vld [vmem:[#allocation2 + $0x1f0] sm:$0xff] }
0x1017   :  { %v1890_v25 = vsel %vm117_vm1, %v6898_v24, 0.0  ;;  %v1896_v26 = vmul.f32 %v6898_v24, %v6898_v24 }
0x1018   :  { %1891 = vadd.xlane.f32.xlu1 %v1890_v25 }
0x1019   :  { %v1900_v27 = vsel %vm117_vm1, %v1896_v26, 0.0  ;;  %v1984_v26 = vld [vmem:[#allocation2 + $0x220] sm:$0xff] }
0x101a   :  { %1901 = vadd.xlane.f32.xlu0 %v1900_v27 }
0x102e   :  { %v1889_v28 = vpop.xlane.xlu1 %1888 }
0x102f   :  { %v1893_v33 = vmul.f32 %v1889_v28, %v6714_v20 }
0x1031   :  { %2201 = vrot.lane.b32.xlu1 %v6905_v31, %s6508_s7  ;;  %v1905_v38 = vmul.f32 %v1893_v33, %v1893_v33  ;;  %v1909_v51 = vsub.f32 %v1883_v12, %v1893_v33  ;;  %v1988_v12 = vld [vmem:[#allocation2 + $0x240] sm:$0xff]  ;;  %v2328_v33 = vpop.permute.xlu2 %2327 }
0x1032   :  { %2001 = vmatpush.msra.mxu3 %v1988_v12 }
0x1034   :  { %2002 = vmatpush.msra.mxu3 %v1987_v9 }
0x1036   :  { %v1899_v34 = vpop.xlane.xlu1 %1898  ;;  %2003 = vmatpush.msra.mxu3 %v1986_v14 }
0x1037   :  { %v1903_v39 = vmul.f32 %v1899_v34, %v6714_v20  ;;  %v6202_v34 = vld [vmem:[#allocation2 + $0x1e8] ss:$0 sm:$0xff] }
0x1038   :  { %2004 = vmatpush.msra.mxu3 %v1985_v22 }
0x1039   :  { %v1907_v42 = vsub.f32 %v1903_v39, %v1905_v38 }
0x103a   :  { %2005 = vmatpush.msra.mxu3 %v1984_v26 }
0x103b   :  { %v1911_v44 = vadd.f32 1e-05, %v1907_v42 }
0x103c   :  { %2006 = vmatpush.msra.mxu3 %v1983_v18 }
0x103d   :  { %6310 = vrsqrt.f32 %v1911_v44  ;;  %vm1919_vm11 = vweird.f32 %v1911_v44 }
0x103e   :  { %2007 = vmatpush.msra.mxu3 %v1982_v43 }
0x1043   :  { %v6311_v45 = vpop.eup %6310 }
0x1044   :  { %v1914_v46 = vmul.f32 %v6311_v45, %v1911_v44  ;;  %vm1920_vm10 = vweird.f32 %v6311_v45 }
0x1045   :  { %vm1921_vm12 = vmor %vm1919_vm11, %vm1920_vm10 }
0x1046   :  { %v1915_v47 = vmul.f32 %v6311_v45, %v1914_v46 }
0x1048   :  { %v1916_v48 = vmul.f32 0.5, %v1915_v47 }
0x104a   :  { %v1917_v49 = vsub.f32 1.5, %v1916_v48 }
0x104c   :  { %v1918_v50 = vmul.f32 %v6311_v45, %v1917_v49 }
0x104e   :  { %v1922_v53 = vsel %vm1921_vm12, %v6311_v45, %v1918_v50 }
0x104f   :  { %v1933_v54 = vmul.f32 %v1922_v53, %v1909_v51 }
0x1051   :  { %v1936_v56 = vmul.f32 %v6200_v52, %v1933_v54 }
0x1053   :  { %v6911_v57 = vadd.f32 %v6201_v55, %v1936_v56 }
0x1055   :  { %6010 = vmatmul.msk.f32.vlgmr.msra.gmra.mxu1 %vm117_vm1, %v6911_v57 }
0x1078   :  { %v2197_v58 = vpop.f32.mrf.mxu0 }
0x1079   :  { %v6916_v59 = vadd.f32 %v2197_v58, %v6603_v29 }
0x107b   :  { %v2227_v60 = vsel %vm47_vm0, %v6916_v59, -inf }
0x107c   :  { %2228 = vmax.xlane.f32.xlu2 %v2227_v60 }
0x108b   :  { %v1892_v62 = vpop.xlane.xlu1 %1891 }
0x108c   :  { %v1894_v0 = vmul.f32 %v1892_v62, %v6714_v20 }
0x108d   :  { %v1902_v2 = vpop.xlane.xlu0 %1901 }
0x108e   :  { %v1906_v36 = vmul.f32 %v1894_v0, %v1894_v0  ;;  %v1904_v3 = vmul.f32 %v1902_v2, %v6714_v20  ;;  %v1910_v40 = vsub.f32 %v6898_v24, %v1894_v0  ;;  %v1981_v24 = vld [vmem:[#allocation2 + $0x208] sm:$0xff] }
0x108f   :  { %2008 = vmatpush.msra.mxu3 %v1981_v24 }
0x1090   :  { %v1908_v4 = vsub.f32 %v1904_v3, %v1906_v36 }
0x1091   :  { %2009 = vmatpush.msra.mxu3 %v1980_v30 }
0x1092   :  { %v1912_v37 = vadd.f32 1e-05, %v1908_v4 }
0x1093   :  { %2010 = vmatpush.msra.mxu3 %v1979_v32 }
0x1094   :  { %6312 = vrsqrt.f32 %v1912_v37  ;;  %2357 = vrot.lane.b32.xlu2 %v6905_v31, %s6509_s2  ;;  %vm1929_vm14 = vweird.f32 %v1912_v37 }
0x1095   :  { %2011 = vmatpush.msra.mxu3 %v1978_v21 }
0x109a   :  { %v6313_v7 = vpop.eup %6312 }
0x109b   :  { %v1924_v8 = vmul.f32 %v6313_v7, %v1912_v37  ;;  %vm1930_vm13 = vweird.f32 %v6313_v7 }
0x109c   :  { %vm1931_vm15 = vmor %vm1929_vm14, %vm1930_vm13 }
0x109d   :  { %v1925_v23 = vmul.f32 %v6313_v7, %v1924_v8 }
0x109f   :  { %v1926_v11 = vmul.f32 0.5, %v1925_v23 }
0x10a1   :  { %v1927_v13 = vsub.f32 1.5, %v1926_v11 }
0x10a3   :  { %v2202_v41 = vpop.permute.xlu1 %2201  ;;  %v1928_v16 = vmul.f32 %v6313_v7, %v1927_v13 }
0x10a4   :  { %6016 = vmatpush.xpose.msk.msrb.mxu1 %vm47_vm0, %v2202_v41 }
0x10a5   :  { %v1932_v1 = vsel %vm1931_vm15, %v6313_v7, %v1928_v16 }
0x10a6   :  { %v1934_v25 = vmul.f32 %v1932_v1, %v1910_v40  ;;  %v2168_v1 = vld [vmem:[#allocation2 + $0x2c0] sm:$0xff] }
0x10a8   :  { %6020 = vmatpush.xpose.msk.msra.mxu1 %vm47_vm0, %v2330_v19  ;;  %v1937_v27 = vmul.f32 %v6200_v52, %v1934_v25 }
0x10aa   :  { %v6927_v28 = vadd.f32 %v6201_v55, %v1937_v27 }
0x10ac   :  { %6011 = vmatmul.msk.f32.gmra.mxu1 %vm117_vm1, %v6927_v28 }
0x10b4   :  { %6017 = vmatmul.msk.f32.vlgmr.msrb.gmra.mxu1 %vm47_vm0, %v6905_v31 }
0x10bc   :  { %6021 = vmatmul.msk.f32.vlgmr.msra.gmra.mxu1 %vm47_vm0, %v2328_v33 }
0x10d2   :  { %v1970_v38 = vpop.f32.mrf.mxu1 }
0x10d3   :  { %v1971_v39 = vadd.f32 %v6202_v34, %v1970_v38 }
0x10d5   :  { %v1976_v42 = vmax.f32 %v1971_v39, 0.0 }
0x10d7   :  { %2012 = vmatmul.f32.vlgmr.msra.gmra.mxu3 %v1976_v42 }
0x10ef   :  { %v2229_v44 = vpop.xlane.xlu2 %2228 }
0x10f0   :  { %v2233_v45 = vsub.f32 %v6916_v59, %v2229_v44 }
0x10f2   :  { %v2235_v46 = vmul.f32 1.442695, %v2233_v45 }
0x10f4   :  { %6314 = vpow2.f32 %v2235_v46 }
0x10f7   :  { %v2358_v19 = vpop.permute.xlu2 %2357 }
0x10fa   :  { %v6315_v47 = vpop.eup %6314 }
0x10fb   :  { %v2239_v48 = vsel %vm47_vm0, %v6315_v47, 0.0 }
0x10fc   :  { %2240 = vadd.xlane.f32.xlu0 %v2239_v48 }
0x1129   :  { %v1973_v49 = vpop.f32.mrf.mxu1 }
0x112a   :  { %v1974_v50 = vadd.f32 %v6202_v34, %v1973_v49 }
0x112c   :  { %v1977_v51 = vmax.f32 %v1974_v50, 0.0 }
0x112e   :  { %2015 = vmatmul.f32.gmra.mxu3 %v1977_v51 }
0x1131   :  { %v2224_v52 = vpop.f32.mrf.mxu1 }
0x1132   :  { %v2225_v53 = vadd.f32 %v2224_v52, %v6603_v29 }
0x1134   :  { %v2230_v54 = vsel %vm47_vm0, %v2225_v53, -inf }
0x1135   :  { %2231 = vmax.xlane.f32.xlu1 %v2230_v54 }
0x1139   :  { %v2352_v55 = vpop.f32.mrf.mxu1 }
0x113a   :  { %v2353_v56 = vadd.f32 %v2352_v55, %v6603_v29 }
0x113c   :  { %v2383_v58 = vsel %vm47_vm0, %v2353_v56, -inf }
0x113d   :  { %2384 = vmax.xlane.f32.xlu0 %v2383_v58 }
0x114e   :  { %2355 = vrot.lane.b32.xlu1 %v6905_v31, %s6507_s0 }
0x1151   :  { %2275 = vrot.lane.b32.xlu0 %v6881_v5, %s6511_s1 }
0x1156   :  { %2301 = vrot.lane.b32.xlu1 %v6905_v31, %s6511_s1 }
0x115e   :  { %2431 = vrot.lane.b32.xlu1 %v6881_v5, %s6512_s12 }
0x1166   :  { %2543 = vrot.lane.b32.xlu1 %v6881_v5, %s6513_s13 }
0x116f   :  { %v2241_v59 = vpop.xlane.xlu0 %2240 }
0x1170   :  { %6316 = vrcp.f32 %v2241_v59  ;;  %v2256_v17 = vand.u32 2147483648, %v2241_v59  ;;  %vm2250_vm3 = vweird.f32 %v2241_v59  ;;  %v2254_v23 = vand.u32 2147483647, %v2241_v59 }
0x1172   :  { %v2257_v9 = vor.u32 1.1754944e-38, %v2256_v17  ;;  %vm2255_vm5 = vcmp.eq.f32.partialorder %v2254_v23, 8.507059e+37 }
0x1176   :  { %v6317_v0 = vpop.eup %6316 }
0x1177   :  { %v2246_v36 = vmul.f32 %v6317_v0, %v2241_v59  ;;  %vm2251_vm2 = vweird.f32 %v6317_v0 }
0x1178   :  { %vm2252_vm4 = vmor %vm2250_vm3, %vm2251_vm2 }
0x1179   :  { %v2247_v4 = vsub.f32 1.0, %v2246_v36 }
0x117b   :  { %v2248_v7 = vmul.f32 %v6317_v0, %v2247_v4 }
0x117d   :  { %v2249_v8 = vadd.f32 %v6317_v0, %v2248_v7 }
0x117f   :  { %v2253_v11 = vsel %vm2252_vm4, %v6317_v0, %v2249_v8 }
0x1180   :  { %v2258_v14 = vsel %vm2255_vm5, %v2257_v9, %v2253_v11 }
0x1181   :  { %v2273_v16 = vmul.f32 %v6315_v47, %v2258_v14 }
0x11a8   :  { %v2232_v60 = vpop.xlane.xlu1 %2231 }
0x11a9   :  { %v2234_v62 = vsub.f32 %v2225_v53, %v2232_v60 }
0x11ab   :  { %v2237_v2 = vmul.f32 1.442695, %v2234_v62 }
0x11ad   :  { %6318 = vpow2.f32 %v2237_v2  ;;  %v2169_v2 = vld [vmem:[#allocation2 + $0x2c8] sm:$0xff] }
0x11ae   :  { %2504 = vmatpush.msrb.mxu3 %v2169_v2  ;;  %v2013_v2 = vpop.f32.mrf.mxu3 }
0x11b0   :  { %v2385_v3 = vpop.xlane.xlu0 %2384 }
0x11b1   :  { %v2389_v37 = vsub.f32 %v2353_v56, %v2385_v3 }
0x11b3   :  { %v6319_v15 = vpop.eup %6318  ;;  %v2391_v6 = vmul.f32 1.442695, %v2389_v37 }
0x11b4   :  { %v2242_v35 = vsel %vm47_vm0, %v6319_v15, 0.0 }
0x11b5   :  { %6320 = vpow2.f32 %v2391_v6  ;;  %2243 = vadd.xlane.f32.xlu0 %v2242_v35 }
0x11bb   :  { %v6951_v10 = vpop.eup %6320 }
0x11bc   :  { %v2395_v12 = vsel %vm47_vm0, %v6951_v10, 0.0 }
0x11bd   :  { %2396 = vadd.xlane.f32.xlu2 %v2395_v12 }
0x11c0   :  { %v2356_v13 = vpop.permute.xlu1 %2355 }
0x11c3   :  { %v2276_v41 = vpop.permute.xlu0 %2275 }
0x11c4   :  { %2296 = vmatpush.msra.mxu2 %v2276_v41 }
0x11c5   :  { %6018 = vmatmul.msk.f32.vlgmr.msra.gmra.mxu2 %vm47_vm0, %v2273_v16 }
0x11c6   :  { %6022 = vmatpush.xpose.msk.msrb.mxu2 %vm47_vm0, %v2358_v19 }
0x11c8   :  { %v2302_v40 = vpop.permute.xlu1 %2301 }
0x11c9   :  { %2541 = vrot.lane.b32.xlu0 %v6881_v5, %s6514_s14  ;;  %2322 = vmatpush.msra.mxu0 %v2302_v40 }
0x11ca   :  { %2533 = vmatpush.msra.mxu2 %v2168_v1 }
0x11cd   :  { %6023 = vmatmul.msk.f32.vlgmr.msrb.gmra.mxu2 %vm47_vm0, %v2356_v13 }
0x11d0   :  { %v2432_v22 = vpop.permute.xlu1 %2431 }
0x11d1   :  { %2452 = vmatpush.msrb.mxu0 %v2432_v22 }
0x11d5   :  { %2457 = vrot.lane.b32.xlu2 %v6905_v31, %s6512_s12 }
0x11d8   :  { %v2544_v48 = vpop.permute.xlu1 %2543 }
0x11dd   :  { %2730 = vrot.lane.b32.xlu2 %v6881_v5, %s6516_s16 }
0x1228   :  { %v2244_v25 = vpop.xlane.xlu0 %2243 }
0x1229   :  { %6322 = vrcp.f32 %v2244_v25  ;;  %v2270_v24 = vand.u32 2147483648, %v2244_v25  ;;  %v2268_v32 = vand.u32 2147483647, %v2244_v25  ;;  %vm2264_vm7 = vweird.f32 %v2244_v25 }
0x122b   :  { %v2271_v34 = vor.u32 1.1754944e-38, %v2270_v24  ;;  %vm2269_vm9 = vcmp.eq.f32.partialorder %v2268_v32, 8.507059e+37 }
0x122f   :  { %v6323_v26 = vpop.eup %6322 }
0x1230   :  { %v2260_v27 = vmul.f32 %v6323_v26, %v2244_v25  ;;  %v2397_v18 = vpop.xlane.xlu2 %2396  ;;  %vm2265_vm6 = vweird.f32 %v6323_v26 }
0x1231   :  { %6324 = vrcp.f32 %v2397_v18  ;;  %vm2266_vm8 = vmor %vm2264_vm7, %vm2265_vm6  ;;  %v2412_v47 = vand.u32 2147483648, %v2397_v18  ;;  %v2410_v50 = vand.u32 2147483647, %v2397_v18  ;;  %vm2406_vm11 = vweird.f32 %v2397_v18 }
0x1232   :  { %v2261_v43 = vsub.f32 1.0, %v2260_v27 }
0x1233   :  { %v2413_v52 = vor.u32 1.1754944e-38, %v2412_v47  ;;  %vm2411_vm13 = vcmp.eq.f32.partialorder %v2410_v50, 8.507059e+37 }
0x1234   :  { %v2262_v30 = vmul.f32 %v6323_v26, %v2261_v43 }
0x1236   :  { %v2263_v21 = vadd.f32 %v6323_v26, %v2262_v30 }
0x1237   :  { %v6325_v33 = vpop.eup %6324 }
0x1238   :  { %v2267_v38 = vsel %vm2266_vm8, %v6323_v26, %v2263_v21  ;;  %v2402_v39 = vmul.f32 %v6325_v33, %v2397_v18  ;;  %v2458_v42 = vpop.permute.xlu2 %2457  ;;  %vm2407_vm10 = vweird.f32 %v6325_v33 }
0x1239   :  { %2478 = vmatpush.msrb.mxu1 %v2458_v42  ;;  %v2272_v44 = vsel %vm2269_vm9, %v2271_v34, %v2267_v38  ;;  %vm2408_vm12 = vmor %vm2406_vm11, %vm2407_vm10 }
0x123a   :  { %v2403_v45 = vsub.f32 1.0, %v2402_v39  ;;  %v2274_v46 = vmul.f32 %v6319_v15, %v2272_v44 }
0x123b   :  { %v2542_v59 = vpop.permute.xlu0 %2541 }
0x123c   :  { %v2404_v49 = vmul.f32 %v6325_v33, %v2403_v45  ;;  %6019 = vmatmul.msk.f32.vlgmr.msra.gmra.mxu0 %vm47_vm0, %v2274_v46 }
0x123d   :  { %6030 = vmatpush.xpose.msk.msra.mxu0 %vm47_vm0, %v2544_v48 }
0x123e   :  { %v2405_v51 = vadd.f32 %v6325_v33, %v2404_v49 }
0x1240   :  { %v2409_v53 = vsel %vm2408_vm12, %v6325_v33, %v2405_v51  ;;  %v2731_v54 = vpop.permute.xlu2 %2730 }
0x1241   :  { %6038 = vmatpush.xpose.msk.msrb.mxu2 %vm47_vm0, %v2731_v54  ;;  %v2414_v55 = vsel %vm2411_vm13, %v2413_v52, %v2409_v53 }
0x1242   :  { %v2429_v56 = vmul.f32 %v6951_v10, %v2414_v55 }
0x1244   :  { %6024 = vmatmul.msk.f32.vlgmr.msrb.gmra.mxu0 %vm47_vm0, %v2429_v56 }
0x1248   :  { %v2298_v58 = vpop.f32.mrf.mxu2 }
0x1249   :  { %6028 = vmatmul.msk.f32.vlgmr.msra.gmra.mxu2 %vm47_vm0, %v2298_v58 }
0x124c   :  { %6031 = vmatmul.msk.f32.vlgmr.msra.gmra.mxu0 %vm47_vm0, %v2542_v59 }
0x1250   :  { %v2380_v60 = vpop.f32.mrf.mxu2 }
0x1251   :  { %v2381_v62 = vadd.f32 %v2380_v60, %v6603_v29 }
0x1253   :  { %v2386_v0 = vsel %vm47_vm0, %v2381_v62, -inf }
0x1254   :  { %2387 = vmax.xlane.f32.xlu1 %v2386_v0  ;;  %v6203_v0 = vld [vmem:[#allocation2 + $0x270] ss:$0 sm:$0xff] }
0x126d   :  { %2571 = vrot.lane.b32.xlu1 %v6905_v31, %s6513_s13 }
0x1275   :  { %2645 = vrot.lane.b32.xlu1 %v6881_v5, %s6515_s15 }
0x127d   :  { %2758 = vrot.lane.b32.xlu1 %v6905_v31, %s6516_s16 }
0x12b9   :  { %v2324_v36 = vpop.f32.mrf.mxu0 }
0x12ba   :  { %6029 = vmatmul.msk.f32.gmra.mxu2 %vm47_vm0, %v2324_v36  ;;  %v2014_v36 = vadd.f32 %v6203_v0, %v2013_v2 }
0x12c1   :  { %v2454_v3 = vpop.f32.mrf.mxu0 }
0x12c2   :  { %6026 = vmatmul.msk.f32.vlgmr.msrb.gmra.mxu3 %vm47_vm0, %v2454_v3  ;;  %v7010_v3 = vadd.f32 %v2014_v36, %v6911_v57 }
0x12c7   :  { %v2388_v4 = vpop.xlane.xlu1 %2387 }
0x12c8   :  { %v2390_v37 = vsub.f32 %v2381_v62, %v2388_v4  ;;  %v2031_v4 = vmul.f32 %v7010_v3, %v7010_v3 }
0x12c9   :  { %v2566_v15 = vpop.f32.mrf.mxu0 }
0x12ca   :  { %v2393_v6 = vmul.f32 1.442695, %v2390_v37  ;;  %v2567_v35 = vadd.f32 %v2566_v15, %v6603_v29  ;;  %v2033_v37 = vsel %vm117_vm1, %v2031_v4, 0.0  ;;  %v2170_v15 = vld [vmem:[#allocation2 + $0x2d0] sm:$0xff] }
0x12cb   :  { %2718 = vmatpush.msra.mxu3 %v2170_v15 }
0x12cc   :  { %6326 = vpow2.f32 %v2393_v6  ;;  %v2597_v7 = vsel %vm47_vm0, %v2567_v35, -inf  ;;  %v6996_v46 = vpop.f32.mrf.mxu2 }
0x12cd   :  { %2598 = vmax.xlane.f32.xlu2 %v2597_v7 }
0x12d2   :  { %v6327_v8 = vpop.eup %6326 }
0x12d3   :  { %v2398_v17 = vsel %vm47_vm0, %v6327_v8, 0.0 }
0x12d4   :  { %2399 = vadd.xlane.f32.xlu0 %v2398_v17 }
0x12df   :  { %v2572_v10 = vpop.permute.xlu1 %2571 }
0x12e0   :  { %6032 = vmatpush.xpose.msk.msra.mxu1 %vm47_vm0, %v2572_v10 }
0x12e5   :  { %2569 = vrot.lane.b32.xlu2 %v6905_v31, %s6514_s14 }
0x12e7   :  { %v2646_v23 = vpop.permute.xlu1 %2645 }
0x12e8   :  { %2728 = vrot.lane.b32.xlu0 %v6881_v5, %s6517_s17  ;;  %2666 = vmatpush.msrb.mxu0 %v2646_v23 }
0x12ef   :  { %v2759_v12 = vpop.permute.xlu1 %2758 }
0x12f0   :  { %2756 = vrot.lane.b32.xlu0 %v6905_v31, %s6517_s17  ;;  %6040 = vmatpush.xpose.msk.msra.mxu0 %vm47_vm0, %v2759_v12 }
0x133d   :  { %v6999_v52 = vpop.f32.mrf.mxu2 }
0x1340   :  { %v2599_v11 = vpop.xlane.xlu2 %2598 }
0x1341   :  { %v2603_v9 = vsub.f32 %v2567_v35, %v2599_v11 }
0x1343   :  { %v2605_v13 = vmul.f32 1.442695, %v2603_v9 }
0x1345   :  { %6328 = vpow2.f32 %v2605_v13 }
0x1347   :  { %v2400_v14 = vpop.xlane.xlu0 %2399 }
0x1348   :  { %6330 = vrcp.f32 %v2400_v14  ;;  %v2426_v1 = vand.u32 2147483648, %v2400_v14  ;;  %v2424_v26 = vand.u32 2147483647, %v2400_v14  ;;  %vm2420_vm15 = vweird.f32 %v2400_v14  ;;  %v2570_v21 = vpop.permute.xlu2 %2569 }
0x134a   :  { %v2427_v18 = vor.u32 1.1754944e-38, %v2426_v1  ;;  %vm2425_vm3 = vcmp.eq.f32.partialorder %v2424_v26, 8.507059e+37 }
0x134b   :  { %v6329_v41 = vpop.eup %6328 }
0x134c   :  { %v2609_v16 = vsel %vm47_vm0, %v6329_v41, 0.0 }
0x134d   :  { %2610 = vadd.xlane.f32.xlu2 %v2609_v16 }
0x134e   :  { %v6331_v19 = vpop.eup %6330 }
0x134f   :  { %v2416_v40 = vmul.f32 %v6331_v19, %v2400_v14  ;;  %vm2421_vm14 = vweird.f32 %v6331_v19 }
0x1350   :  { %vm2422_vm2 = vmor %vm2420_vm15, %vm2421_vm14 }
0x1351   :  { %v2417_v22 = vsub.f32 1.0, %v2416_v40  ;;  %v2023_v40 = vsel %vm117_vm1, %v7010_v3, 0.0 }
0x1353   :  { %v2418_v25 = vmul.f32 %v6331_v19, %v2417_v22 }
0x1355   :  { %v2419_v27 = vadd.f32 %v6331_v19, %v2418_v25 }
0x1357   :  { %v2423_v43 = vsel %vm2422_vm2, %v6331_v19, %v2419_v27 }
0x1358   :  { %v2428_v24 = vsel %vm2425_vm3, %v2427_v18, %v2423_v43 }
0x1359   :  { %v2430_v30 = vmul.f32 %v6327_v8, %v2428_v24 }
0x135a   :  { %v2729_v32 = vpop.permute.xlu0 %2728 }
0x135b   :  { %6025 = vmatmul.msk.f32.vlgmr.msrb.gmra.mxu1 %vm47_vm0, %v2430_v30  ;;  %6039 = vmatmul.msk.f32.vlgmr.msrb.gmra.mxu2 %vm47_vm0, %v2729_v32 }
0x1362   :  { %v2757_v54 = vpop.permute.xlu0 %2756 }
0x1363   :  { %6033 = vmatmul.msk.f32.vlgmr.msra.gmra.mxu1 %vm47_vm0, %v2570_v21 }
0x13c0   :  { %v2611_v33 = vpop.xlane.xlu2 %2610 }
0x13c1   :  { %6332 = vrcp.f32 %v2611_v33  ;;  %v2626_v42 = vand.u32 2147483648, %v2611_v33  ;;  %v2624_v45 = vand.u32 2147483647, %v2611_v33  ;;  %vm2620_vm5 = vweird.f32 %v2611_v33 }
0x13c3   :  { %v2627_v48 = vor.u32 1.1754944e-38, %v2626_v42  ;;  %vm2625_vm7 = vcmp.eq.f32.partialorder %v2624_v45, 8.507059e+37 }
0x13c7   :  { %v6333_v34 = vpop.eup %6332 }
0x13c8   :  { %v2616_v38 = vmul.f32 %v6333_v34, %v2611_v33  ;;  %vm2621_vm4 = vweird.f32 %v6333_v34 }
0x13c9   :  { %vm2622_vm6 = vmor %vm2620_vm5, %vm2621_vm4 }
0x13ca   :  { %v2617_v39 = vsub.f32 1.0, %v2616_v38 }
0x13cc   :  { %v2618_v44 = vmul.f32 %v6333_v34, %v2617_v39 }
0x13ce   :  { %v2619_v47 = vadd.f32 %v6333_v34, %v2618_v44 }
0x13d0   :  { %v2623_v49 = vsel %vm2622_vm6, %v6333_v34, %v2619_v47 }
0x13d1   :  { %v2628_v50 = vsel %vm2625_vm7, %v2627_v48, %v2623_v49 }
0x13d2   :  { %v2643_v51 = vmul.f32 %v6329_v41, %v2628_v50  ;;  %v2016_v41 = vpop.f32.mrf.mxu3 }
0x13d3   :  { %v2017_v16 = vadd.f32 %v6203_v0, %v2016_v41 }
0x13d4   :  { %6034 = vmatmul.msk.f32.vlgmr.msrb.gmra.mxu0 %vm47_vm0, %v2643_v51 }
0x13d5   :  { %v7026_v19 = vadd.f32 %v2017_v16, %v6927_v28 }
0x13d7   :  { %v2032_v22 = vmul.f32 %v7026_v19, %v7026_v19 }
0x13d8   :  { %v2480_v53 = vpop.f32.mrf.mxu1 }
0x13d9   :  { %6027 = vmatmul.msk.f32.gmra.mxu3 %vm47_vm0, %v2480_v53  ;;  %v2036_v1 = vsel %vm117_vm1, %v2032_v22, 0.0 }
0x13dc   :  { %6041 = vmatmul.msk.f32.vlgmr.msra.gmra.mxu0 %vm47_vm0, %v2757_v54 }
0x13de   :  { %v2753_v55 = vpop.f32.mrf.mxu2 }
0x13df   :  { %v2754_v56 = vadd.f32 %v2753_v55, %v6603_v29 }
0x13e0   :  { %v2594_v58 = vpop.f32.mrf.mxu1 }
0x13e1   :  { %v2595_v59 = vadd.f32 %v2594_v58, %v6603_v29  ;;  %v2784_v60 = vsel %vm47_vm0, %v2754_v56, -inf }
0x13e2   :  { %2785 = vmax.xlane.f32.xlu0 %v2784_v60 }
0x13e3   :  { %v2600_v62 = vsel %vm47_vm0, %v2595_v59, -inf }
0x13e4   :  { %2601 = vmax.xlane.f32.xlu1 %v2600_v62 }
0x13fd   :  { %2832 = vrot.lane.b32.xlu1 %v6881_v5, %s6518_s18 }
0x1427   :  { %2034 = vadd.xlane.f32.xlu1 %v2033_v37 }
0x1451   :  { %v2668_v6 = vpop.f32.mrf.mxu0 }
0x1452   :  { %6036 = vmatmul.msk.f32.vlgmr.msra.gmra.mxu3 %vm47_vm0, %v2668_v6 }
0x1455   :  { %v2786_v35 = vpop.xlane.xlu0 %2785 }
0x1456   :  { %v2790_v7 = vsub.f32 %v2754_v56, %v2786_v35 }
0x1457   :  { %v2602_v5 = vpop.xlane.xlu1 %2601 }
0x1458   :  { %v2792_v8 = vmul.f32 1.442695, %v2790_v7  ;;  %v2604_v17 = vsub.f32 %v2595_v59, %v2602_v5  ;;  %v2026_v7 = vsel %vm117_vm1, %v7026_v19, 0.0 }
0x1459   :  { %v2781_v9 = vpop.f32.mrf.mxu0 }
0x145a   :  { %6334 = vpow2.f32 %v2792_v8  ;;  %v2607_v10 = vmul.f32 1.442695, %v2604_v17  ;;  %v2782_v13 = vadd.f32 %v2781_v9, %v6603_v29 }
0x145c   :  { %6336 = vpow2.f32 %v2607_v10  ;;  %v2787_v14 = vsel %vm47_vm0, %v2782_v13, -inf }
0x1460   :  { %v7016_v57 = vpop.eup %6334 }
0x1461   :  { %v2796_v23 = vsel %vm47_vm0, %v7016_v57, 0.0 }
0x1462   :  { %2797 = vadd.xlane.f32.xlu2 %v2796_v23  ;;  %v6337_v12 = vpop.eup %6336  ;;  %v7046_v23 = vld [vmem:[#allocation2 + $0x288] ss:$0 sm:$0xff] }
0x1463   :  { %v2612_v11 = vsel %vm47_vm0, %v6337_v12, 0.0 }
0x146a   :  { %2613 = vadd.xlane.f32.xlu2 %v2612_v11 }
0x146f   :  { %v2833_v50 = vpop.permute.xlu1 %2832 }
0x1472   :  { %2788 = vmax.xlane.f32.xlu2 %v2787_v14 }
0x148a   :  { %2671 = vrot.lane.b32.xlu2 %v6905_v31, %s6515_s15 }
0x149a   :  { %v2035_v2 = vpop.xlane.xlu1 %2034 }
0x149b   :  { %v2039_v37 = vmul.f32 %v2035_v2, %v6714_v20 }
0x14b3   :  { %2024 = vadd.xlane.f32.xlu2 %v2023_v40 }
0x14bb   :  { %2037 = vadd.xlane.f32.xlu2 %v2036_v1 }
0x14d5   :  { %v2798_v25 = vpop.xlane.xlu2 %2797 }
0x14d6   :  { %6338 = vrcp.f32 %v2798_v25  ;;  %v2813_v51 = vand.u32 2147483648, %v2798_v25  ;;  %vm2807_vm13 = vweird.f32 %v2798_v25  ;;  %v2811_v54 = vand.u32 2147483647, %v2798_v25 }
0x14d8   :  { %v2814_v60 = vor.u32 1.1754944e-38, %v2813_v51  ;;  %vm2812_vm15 = vcmp.eq.f32.partialorder %v2811_v54, 8.507059e+37 }
0x14dc   :  { %v6339_v27 = vpop.eup %6338 }
0x14dd   :  { %v2614_v26 = vpop.xlane.xlu2 %2613  ;;  %v2803_v18 = vmul.f32 %v6339_v27, %v2798_v25  ;;  %vm2808_vm11 = vweird.f32 %v6339_v27 }
0x14de   :  { %6340 = vrcp.f32 %v2614_v26  ;;  %v2640_v33 = vand.u32 2147483648, %v2614_v26  ;;  %v2638_v42 = vand.u32 2147483647, %v2614_v26  ;;  %vm2634_vm9 = vweird.f32 %v2614_v26  ;;  %vm2809_vm14 = vmor %vm2807_vm13, %vm2808_vm11 }
0x14df   :  { %v2804_v24 = vsub.f32 1.0, %v2803_v18 }
0x14e0   :  { %v2641_v45 = vor.u32 1.1754944e-38, %v2640_v33  ;;  %vm2639_vm12 = vcmp.eq.f32.partialorder %v2638_v42, 8.507059e+37 }
0x14e1   :  { %v2805_v38 = vmul.f32 %v6339_v27, %v2804_v24 }
0x14e3   :  { %v2806_v47 = vadd.f32 %v6339_v27, %v2805_v38 }
0x14e4   :  { %v6341_v43 = vpop.eup %6340 }
0x14e5   :  { %v2630_v28 = vmul.f32 %v6341_v43, %v2614_v26  ;;  %v2789_v30 = vpop.xlane.xlu2 %2788  ;;  %vm2635_vm8 = vweird.f32 %v6341_v43  ;;  %v2810_v58 = vsel %vm2809_vm14, %v6339_v27, %v2806_v47 }
0x14e6   :  { %v2791_v32 = vsub.f32 %v2782_v13, %v2789_v30  ;;  %vm2636_vm10 = vmor %vm2634_vm9, %vm2635_vm8  ;;  %v2815_v62 = vsel %vm2812_vm15, %v2814_v60, %v2810_v58  ;;  %v7049_v13 = vld [vmem:[#allocation2 + $0x290] ss:$0 sm:$0xff]  ;;  %v3013_v58 = vld [vmem:[#allocation2 + $0x320] sm:$0xff] }
0x14e7   :  { %v2631_v21 = vsub.f32 1.0, %v2630_v28  ;;  %v2830_v0 = vmul.f32 %v7016_v57, %v2815_v62  ;;  %v3011_v62 = vld [vmem:[#allocation2 + $0x310] sm:$0xff] }
0x14e8   :  { %v2794_v34 = vmul.f32 1.442695, %v2791_v32 }
0x14e9   :  { %v2632_v39 = vmul.f32 %v6341_v43, %v2631_v21 }
0x14ea   :  { %6342 = vpow2.f32 %v2794_v34 }
0x14eb   :  { %v2633_v44 = vadd.f32 %v6341_v43, %v2632_v39 }
0x14ed   :  { %v2637_v48 = vsel %vm2636_vm10, %v6341_v43, %v2633_v44  ;;  %v2672_v49 = vpop.permute.xlu2 %2671 }
0x14ee   :  { %v2642_v53 = vsel %vm2639_vm12, %v2641_v45, %v2637_v48  ;;  %2692 = vmatpush.msrb.mxu1 %v2672_v49 }
0x14ef   :  { %v2644_v55 = vmul.f32 %v6337_v12, %v2642_v53 }
0x14f0   :  { %2853 = vmatpush.msra.mxu1 %v2833_v50  ;;  %v7033_v56 = vpop.eup %6342 }
0x14f1   :  { %6035 = vmatmul.msk.f32.vlgmr.msrb.gmra.mxu1 %vm47_vm0, %v2644_v55  ;;  %v2799_v59 = vsel %vm47_vm0, %v7033_v56, 0.0  ;;  %v3014_v55 = vld [vmem:[#allocation2 + $0x328] sm:$0xff] }
0x14f2   :  { %2800 = vadd.xlane.f32.xlu0 %v2799_v59  ;;  %3035 = vmatpush.msrb.mxu3 %v3014_v55  ;;  %v3012_v59 = vld [vmem:[#allocation2 + $0x318] sm:$0xff] }
0x14f4   :  { %3036 = vmatpush.msrb.mxu3 %v3013_v58 }
0x14f6   :  { %3037 = vmatpush.msrb.mxu3 %v3012_v59 }
0x14f8   :  { %3038 = vmatpush.msrb.mxu3 %v3011_v62 }
0x14f9   :  { %6042 = vmatmul.msk.f32.vlgmr.msra.gmra.mxu1 %vm47_vm0, %v2830_v0 }
0x1506   :  { %2858 = vrot.lane.b32.xlu0 %v6905_v31, %s6518_s18 }
0x1526   :  { %v2025_v36 = vpop.xlane.xlu2 %2024 }
0x1527   :  { %v2029_v4 = vmul.f32 %v2025_v36, %v6714_v20 }
0x1529   :  { %v2041_v15 = vmul.f32 %v2029_v4, %v2029_v4  ;;  %v2045_v12 = vsub.f32 %v7010_v3, %v2029_v4  ;;  %v2171_v3 = vld [vmem:[#allocation2 + $0x2d8] sm:$0xff] }
0x152a   :  { %2905 = vmatpush.msrb.mxu0 %v2171_v3 }
0x152b   :  { %v2043_v6 = vsub.f32 %v2039_v37, %v2041_v15 }
0x152d   :  { %v2047_v35 = vadd.f32 1e-05, %v2043_v6 }
0x152e   :  { %v2038_v42 = vpop.xlane.xlu2 %2037 }
0x152f   :  { %6344 = vrsqrt.f32 %v2047_v35  ;;  %vm2055_vm3 = vweird.f32 %v2047_v35  ;;  %v2040_v47 = vmul.f32 %v2038_v42, %v6714_v20  ;;  %v7099_v42 = vld [vmem:[#allocation2 + $0x330] ss:$0 sm:$0xff] }
0x1530   :  { %2027 = vadd.xlane.f32.xlu0 %v2026_v7 }
0x1535   :  { %v6345_v5 = vpop.eup %6344 }
0x1536   :  { %v2050_v8 = vmul.f32 %v6345_v5, %v2047_v35  ;;  %vm2056_vm2 = vweird.f32 %v6345_v5 }
0x1537   :  { %vm2057_vm4 = vmor %vm2055_vm3, %vm2056_vm2 }
0x1538   :  { %v2051_v17 = vmul.f32 %v6345_v5, %v2050_v8 }
0x153a   :  { %v2052_v10 = vmul.f32 0.5, %v2051_v17 }
0x153c   :  { %v2053_v57 = vsub.f32 1.5, %v2052_v10 }
0x153e   :  { %v2054_v31 = vmul.f32 %v6345_v5, %v2053_v57 }
0x1540   :  { %v2058_v11 = vsel %vm2057_vm4, %v6345_v5, %v2054_v31 }
0x1541   :  { %v2069_v9 = vmul.f32 %v2058_v11, %v2045_v12 }
0x1543   :  { %v2072_v14 = vmul.f32 %v7046_v23, %v2069_v9 }
0x1545   :  { %v7053_v41 = vadd.f32 %v7049_v13, %v2072_v14 }
0x1547   :  { %v2079_v16 = vsel %vm117_vm1, %v7053_v41, 0.0  ;;  %v2087_v40 = vmul.f32 %v7053_v41, %v7053_v41 }
0x1548   :  { %2080 = vadd.xlane.f32.xlu1 %v2079_v16 }
0x1549   :  { %v2089_v22 = vsel %vm117_vm1, %v2087_v40, 0.0 }
0x154a   :  { %2090 = vadd.xlane.f32.xlu2 %v2089_v22  ;;  %v7078_v22 = vld [vmem:[#allocation2 + $0x40] ss:$0 sm:$0xff] }
0x1565   :  { %v2801_v1 = vpop.xlane.xlu0 %2800 }
0x1566   :  { %6346 = vrcp.f32 %v2801_v1  ;;  %v2827_v43 = vand.u32 2147483648, %v2801_v1  ;;  %v2825_v28 = vand.u32 2147483647, %v2801_v1  ;;  %vm2821_vm6 = vweird.f32 %v2801_v1 }
0x1568   :  { %v2828_v32 = vor.u32 1.1754944e-38, %v2827_v43  ;;  %vm2826_vm8 = vcmp.eq.f32.partialorder %v2825_v28, 8.507059e+37  ;;  %v6208_v43 = vld [vmem:[#allocation2 + $0x2e0] ss:$0 sm:$0xff] }
0x156c   :  { %v6347_v25 = vpop.eup %6346 }
0x156d   :  { %v2817_v26 = vmul.f32 %v6347_v25, %v2801_v1  ;;  %vm2822_vm5 = vweird.f32 %v6347_v25 }
0x156e   :  { %v2694_v27 = vpop.f32.mrf.mxu1  ;;  %vm2823_vm7 = vmor %vm2821_vm6, %vm2822_vm5 }
0x156f   :  { %v2818_v18 = vsub.f32 1.0, %v2817_v26  ;;  %6037 = vmatmul.msk.f32.gmra.mxu3 %vm47_vm0, %v2694_v27 }
0x1571   :  { %v2819_v24 = vmul.f32 %v6347_v25, %v2818_v18 }
0x1573   :  { %v2820_v30 = vadd.f32 %v6347_v25, %v2819_v24 }
0x1575   :  { %v2824_v21 = vsel %vm2823_vm7, %v6347_v25, %v2820_v30  ;;  %v2506_v25 = vpop.f32.mrf.mxu3 }
0x1576   :  { %v2855_v33 = vpop.f32.mrf.mxu1  ;;  %v2829_v34 = vsel %vm2826_vm8, %v2828_v32, %v2824_v21 }
0x1577   :  { %6044 = vmatmul.msk.f32.vlgmr.msrb.gmra.mxu0 %vm47_vm0, %v2855_v33  ;;  %v2831_v38 = vmul.f32 %v7033_v56, %v2829_v34 }
0x1578   :  { %v2859_v39 = vpop.permute.xlu0 %2858 }
0x1579   :  { %2879 = vmatpush.msra.mxu2 %v2859_v39 }
0x157a   :  { %6043 = vmatmul.msk.f32.vlgmr.msra.gmra.mxu2 %vm47_vm0, %v2831_v38 }
0x157d   :  { %v2509_v26 = vpop.f32.mrf.mxu3 }
0x1585   :  { %v2720_v27 = vpop.f32.mrf.mxu3 }
0x15a3   :  { %v2028_v44 = vpop.xlane.xlu0 %2027 }
0x15a4   :  { %v2030_v45 = vmul.f32 %v2028_v44, %v6714_v20 }
0x15a6   :  { %v2042_v48 = vmul.f32 %v2030_v45, %v2030_v45  ;;  %v2046_v36 = vsub.f32 %v7026_v19, %v2030_v45 }
0x15a8   :  { %v2044_v49 = vsub.f32 %v2040_v47, %v2042_v48  ;;  %v2979_v47 = vld [vmem:[#allocation2 + $0x300] sm:$0xff]  ;;  %v2978_v48 = vld [vmem:[#allocation2 + $0x2f8] sm:$0xff] }
0x15a9   :  { %3000 = vmatpush.msrb.mxu1 %v2979_v47 }
0x15aa   :  { %v2048_v50 = vadd.f32 1e-05, %v2044_v49  ;;  %v2977_v49 = vld [vmem:[#allocation2 + $0x2f0] sm:$0xff] }
0x15ab   :  { %3001 = vmatpush.msrb.mxu1 %v2978_v48 }
0x15ac   :  { %6348 = vrsqrt.f32 %v2048_v50  ;;  %vm2065_vm10 = vweird.f32 %v2048_v50 }
0x15ad   :  { %3002 = vmatpush.msrb.mxu1 %v2977_v49 }
0x15b2   :  { %v6349_v51 = vpop.eup %6348 }
0x15b3   :  { %v2060_v53 = vmul.f32 %v6349_v51, %v2048_v50  ;;  %vm2066_vm9 = vweird.f32 %v6349_v51  ;;  %v2976_v50 = vld [vmem:[#allocation2 + $0x2e8] sm:$0xff] }
0x15b4   :  { %vm2067_vm11 = vmor %vm2065_vm10, %vm2066_vm9  ;;  %3003 = vmatpush.msrb.mxu1 %v2976_v50 }
0x15b5   :  { %v2061_v54 = vmul.f32 %v6349_v51, %v2060_v53 }
0x15b7   :  { %v2062_v56 = vmul.f32 0.5, %v2061_v54 }
0x15b9   :  { %v2063_v60 = vsub.f32 1.5, %v2062_v56 }
0x15bb   :  { %v2064_v0 = vmul.f32 %v6349_v51, %v2063_v60  ;;  %v2081_v2 = vpop.xlane.xlu1 %2080 }
0x15bc   :  { %v2085_v4 = vmul.f32 %v2081_v2, %v6714_v20  ;;  %v2539_v2 = vadd.f32 %v6999_v52, %v2509_v26 }
0x15bd   :  { %v2068_v37 = vsel %vm2067_vm11, %v6349_v51, %v2064_v0  ;;  %v2091_v15 = vpop.xlane.xlu2 %2090 }
0x15be   :  { %v2070_v6 = vmul.f32 %v2068_v37, %v2046_v36  ;;  %v2097_v35 = vmul.f32 %v2085_v4, %v2085_v4  ;;  %v2095_v7 = vmul.f32 %v2091_v15, %v6714_v20  ;;  %v2101_v16 = vsub.f32 %v7053_v41, %v2085_v4 }
0x15bf   :  { %v2536_v41 = vadd.f32 %v6996_v46, %v2506_v25 }
0x15c0   :  { %v2099_v5 = vsub.f32 %v2095_v7, %v2097_v35  ;;  %v2073_v8 = vmul.f32 %v7046_v23, %v2070_v6  ;;  %v7076_v23 = vld [vmem:[#allocation2 + $0x38] ss:$0 sm:$0xff] }
0x15c1   :  { %v2726_v18 = vadd.f32 %v2720_v27, %v2536_v41  ;;  %v6211_v27 = vld [vmem:[#allocation2 + $0x418] ss:$0 sm:$0xff] }
0x15c2   :  { %v2103_v17 = vadd.f32 1e-05, %v2099_v5  ;;  %v7071_v10 = vadd.f32 %v7049_v13, %v2073_v8 }
0x15c4   :  { %6350 = vrsqrt.f32 %v2103_v17  ;;  %v2082_v19 = vsel %vm117_vm1, %v7071_v10, 0.0  ;;  %vm2111_vm13 = vweird.f32 %v2103_v17  ;;  %v2088_v46 = vmul.f32 %v7071_v10, %v7071_v10 }
0x15c5   :  { %2083 = vadd.xlane.f32.xlu2 %v2082_v19 }
0x15c6   :  { %v2092_v39 = vsel %vm117_vm1, %v2088_v46, 0.0 }
0x15ca   :  { %v6351_v57 = vpop.eup %6350 }
0x15cb   :  { %v2106_v31 = vmul.f32 %v6351_v57, %v2103_v17  ;;  %vm2112_vm12 = vweird.f32 %v6351_v57 }
0x15cc   :  { %vm2113_vm14 = vmor %vm2111_vm13, %vm2112_vm12 }
0x15cd   :  { %v2107_v12 = vmul.f32 %v6351_v57, %v2106_v31 }
0x15cf   :  { %v2108_v11 = vmul.f32 0.5, %v2107_v12 }
0x15d1   :  { %v2109_v9 = vsub.f32 1.5, %v2108_v11 }
0x15d3   :  { %v2110_v14 = vmul.f32 %v6351_v57, %v2109_v9 }
0x15d5   :  { %v2114_v13 = vsel %vm2113_vm14, %v6351_v57, %v2110_v14 }
0x15d6   :  { %v2125_v40 = vmul.f32 %v2114_v13, %v2101_v16 }
0x15d8   :  { %v2128_v3 = vmul.f32 %v7076_v23, %v2125_v40 }
0x15da   :  { %v7082_v1 = vadd.f32 %v7078_v22, %v2128_v3  ;;  %v6210_v3 = vld [vmem:[#allocation2 + $0x410] ss:$0 sm:$0xff] }
0x15dc   :  { %6048 = vmatmul.msk.f32.vlgmr.msrb.gmra.mxu3 %vm117_vm1, %v7082_v1 }
0x15f4   :  { %v2907_v24 = vpop.f32.mrf.mxu0 }
0x15f5   :  { %v2913_v28 = vadd.f32 %v2907_v24, %v2726_v18 }
0x15f7   :  { %v2916_v30 = vadd.f32 %v6208_v43, %v2913_v28 }
0x15f9   :  { %v7088_v32 = vadd.f32 %v2916_v30, %v6866_v61  ;;  %v2723_v61 = vpop.f32.mrf.mxu3 }
0x15fa   :  { %v2727_v37 = vadd.f32 %v2723_v61, %v2539_v2 }
0x15fb   :  { %v2922_v21 = vsel %vm117_vm1, %v7088_v32, 0.0  ;;  %v2930_v33 = vmul.f32 %v7088_v32, %v7088_v32 }
0x15fc   :  { %2923 = vadd.xlane.f32.xlu0 %v2922_v21 }
0x15fd   :  { %v2881_v34 = vpop.f32.mrf.mxu2  ;;  %v2932_v38 = vsel %vm117_vm1, %v2930_v33, 0.0 }
0x15fe   :  { %6045 = vmatmul.msk.f32.gmra.mxu0 %vm47_vm0, %v2881_v34  ;;  %2933 = vadd.xlane.f32.xlu1 %v2932_v38 }
0x1604   :  { %2093 = vadd.xlane.f32.xlu0 %v2092_v39 }
0x1638   :  { %v2084_v54 = vpop.xlane.xlu2 %2083 }
0x1639   :  { %v2086_v59 = vmul.f32 %v2084_v54, %v6714_v20 }
0x163b   :  { %v2098_v36 = vmul.f32 %v2086_v59, %v2086_v59  ;;  %v2102_v28 = vsub.f32 %v7071_v10, %v2086_v59 }
0x165f   :  { %v3040_v44 = vpop.f32.mrf.mxu3 }
0x1660   :  { %v7102_v45 = vadd.f32 %v7099_v42, %v3040_v44 }
0x1662   :  { %3205 = vrot.lane.b32.xlu0 %v7102_v45, %s6507_s0  ;;  %6050 = vmatpush.xpose.msk.msrb.mxu2 %vm47_vm0, %v7102_v45 }
0x166f   :  { %v2924_v51 = vpop.xlane.xlu0 %2923 }
0x1670   :  { %v2928_v53 = vmul.f32 %v2924_v51, %v6714_v20  ;;  %v6212_v51 = vld [vmem:[#allocation2 + $0x308] ss:$0 sm:$0xff] }
0x1671   :  { %v2934_v55 = vpop.xlane.xlu1 %2933 }
0x1672   :  { %v2940_v56 = vmul.f32 %v2928_v53, %v2928_v53  ;;  %v2938_v58 = vmul.f32 %v2934_v55, %v6714_v20  ;;  %v2944_v40 = vsub.f32 %v7088_v32, %v2928_v53 }
0x1674   :  { %v2942_v60 = vsub.f32 %v2938_v58, %v2940_v56 }
0x1676   :  { %v2946_v62 = vadd.f32 1e-05, %v2942_v60 }
0x1677   :  { %v2094_v0 = vpop.xlane.xlu0 %2093 }
0x1678   :  { %6352 = vrsqrt.f32 %v2946_v62  ;;  %v2096_v4 = vmul.f32 %v2094_v0, %v6714_v20  ;;  %vm2954_vm2 = vweird.f32 %v2946_v62 }
0x167a   :  { %v2100_v15 = vsub.f32 %v2096_v4, %v2098_v36 }
0x167b   :  { %v2910_v6 = vpop.f32.mrf.mxu0 }
0x167c   :  { %v2104_v35 = vadd.f32 1e-05, %v2100_v15  ;;  %v2914_v7 = vadd.f32 %v2910_v6, %v2727_v37 }
0x167e   :  { %v6353_v5 = vpop.eup %6352  ;;  %6354 = vrsqrt.f32 %v2104_v35  ;;  %v2917_v8 = vadd.f32 %v6208_v43, %v2914_v7  ;;  %vm2121_vm5 = vweird.f32 %v2104_v35 }
0x167f   :  { %v2949_v17 = vmul.f32 %v6353_v5, %v2946_v62  ;;  %vm2955_vm15 = vweird.f32 %v6353_v5 }
0x1680   :  { %v7114_v19 = vadd.f32 %v2917_v8, %v6874_v63  ;;  %vm2956_vm3 = vmor %vm2954_vm2, %vm2955_vm15 }
0x1681   :  { %v2950_v57 = vmul.f32 %v6353_v5, %v2949_v17 }
0x1682   :  { %v2925_v52 = vsel %vm117_vm1, %v7114_v19, 0.0  ;;  %v2931_v31 = vmul.f32 %v7114_v19, %v7114_v19 }
0x1683   :  { %v2951_v12 = vmul.f32 0.5, %v2950_v57  ;;  %2926 = vadd.xlane.f32.xlu1 %v2925_v52 }
0x1684   :  { %v6355_v11 = vpop.eup %6354  ;;  %v2935_v9 = vsel %vm117_vm1, %v2931_v31, 0.0 }
0x1685   :  { %v2952_v14 = vsub.f32 1.5, %v2951_v12  ;;  %v2116_v16 = vmul.f32 %v6355_v11, %v2104_v35  ;;  %2936 = vadd.xlane.f32.xlu2 %v2935_v9  ;;  %vm2122_vm4 = vweird.f32 %v6355_v11 }
0x1686   :  { %vm2123_vm6 = vmor %vm2121_vm5, %vm2122_vm4 }
0x1687   :  { %v2953_v13 = vmul.f32 %v6353_v5, %v2952_v14  ;;  %v2117_v63 = vmul.f32 %v6355_v11, %v2116_v16 }
0x1689   :  { %v2957_v25 = vsel %vm2956_vm3, %v6353_v5, %v2953_v13  ;;  %v2118_v26 = vmul.f32 0.5, %v2117_v63 }
0x168a   :  { %v2968_v41 = vmul.f32 %v2957_v25, %v2944_v40 }
0x168b   :  { %v2119_v18 = vsub.f32 1.5, %v2118_v26 }
0x168c   :  { %v2971_v43 = vmul.f32 %v6210_v3, %v2968_v41 }
0x168d   :  { %v2120_v24 = vmul.f32 %v6355_v11, %v2119_v18 }
0x168e   :  { %v7123_v30 = vadd.f32 %v6211_v27, %v2971_v43 }
0x168f   :  { %v2124_v21 = vsel %vm2123_vm6, %v6355_v11, %v2120_v24 }
0x1690   :  { %6046 = vmatmul.msk.f32.vlgmr.msrb.gmra.mxu1 %vm117_vm1, %v7123_v30  ;;  %v2126_v32 = vmul.f32 %v2124_v21, %v2102_v28 }
0x1692   :  { %v2129_v33 = vmul.f32 %v7076_v23, %v2126_v32  ;;  %v3046_v32 = vld [vmem:[#allocation2 + $0x338] sm:$0xff] }
0x1694   :  { %v7129_v34 = vadd.f32 %v7078_v22, %v2129_v33 }
0x1696   :  { %6049 = vmatmul.msk.f32.gmra.mxu3 %vm117_vm1, %v7129_v34 }
0x16d4   :  { %v3206_v38 = vpop.permute.xlu0 %3205 }
0x16d5   :  { %6056 = vmatpush.xpose.msk.msra.mxu3 %vm47_vm0, %v3206_v38 }
0x16f6   :  { %v2927_v10 = vpop.xlane.xlu1 %2926 }
0x16f7   :  { %v2929_v46 = vmul.f32 %v2927_v10, %v6714_v20 }
0x16f8   :  { %v2937_v39 = vpop.xlane.xlu2 %2936 }
0x16f9   :  { %v2941_v61 = vmul.f32 %v2929_v46, %v2929_v46  ;;  %v2939_v44 = vmul.f32 %v2937_v39, %v6714_v20  ;;  %v2945_v58 = vsub.f32 %v7114_v19, %v2929_v46 }
0x16fb   :  { %v2943_v47 = vsub.f32 %v2939_v44, %v2941_v61 }
0x16fd   :  { %v2947_v48 = vadd.f32 1e-05, %v2943_v47 }
0x16ff   :  { %6356 = vrsqrt.f32 %v2947_v48  ;;  %vm2964_vm8 = vweird.f32 %v2947_v48 }
0x1705   :  { %v6357_v23 = vpop.eup %6356 }
0x1706   :  { %v2959_v49 = vmul.f32 %v6357_v23, %v2947_v48  ;;  %vm2965_vm7 = vweird.f32 %v6357_v23 }
0x1707   :  { %vm2966_vm9 = vmor %vm2964_vm8, %vm2965_vm7 }
0x1708   :  { %v2960_v22 = vmul.f32 %v6357_v23, %v2959_v49 }
0x170a   :  { %v2961_v50 = vmul.f32 0.5, %v2960_v22 }
0x170c   :  { %v2962_v53 = vsub.f32 1.5, %v2961_v50 }
0x170d   :  { %v3005_v54 = vpop.f32.mrf.mxu1 }
0x170e   :  { %v2963_v55 = vmul.f32 %v6357_v23, %v2962_v53  ;;  %v3006_v56 = vadd.f32 %v6212_v51, %v3005_v54 }
0x1710   :  { %v2967_v59 = vsel %vm2966_vm9, %v6357_v23, %v2963_v55  ;;  %3203 = vrot.lane.b32.xlu1 %v3006_v56, %s6507_s0  ;;  %6051 = vmatmul.msk.f32.vlgmr.msrb.gmra.mxu2 %vm47_vm0, %v3006_v56 }
0x1711   :  { %v2969_v60 = vmul.f32 %v2967_v59, %v2945_v58 }
0x1713   :  { %v2972_v62 = vmul.f32 %v6210_v3, %v2969_v60 }
0x1715   :  { %v7139_v0 = vadd.f32 %v6211_v27, %v2972_v62 }
0x1717   :  { %6047 = vmatmul.msk.f32.gmra.mxu1 %vm117_vm1, %v7139_v0 }
0x1719   :  { %v3043_v2 = vpop.f32.mrf.mxu3 }
0x171a   :  { %v7144_v36 = vadd.f32 %v7099_v42, %v3043_v2 }
0x171c   :  { %3233 = vrot.lane.b32.xlu2 %v7144_v36, %s6507_s0  ;;  %6052 = vmatpush.xpose.msk.msra.mxu2 %vm47_vm0, %v7144_v36 }
0x1776   :  { %v3234_v4 = vpop.permute.xlu2 %3233 }
0x1777   :  { %6058 = vmatpush.xpose.msk.msrb.mxu2 %vm47_vm0, %v3234_v4 }
0x1782   :  { %v3204_v37 = vpop.permute.xlu1 %3203 }
0x1783   :  { %6057 = vmatmul.msk.f32.vlgmr.msra.gmra.mxu3 %vm47_vm0, %v3204_v37 }
0x1793   :  { %v3074_v15 = vpop.f32.mrf.mxu2 }
0x1794   :  { %v3008_v6 = vpop.f32.mrf.mxu1  ;;  %v3103_v35 = vsel %vm47_vm0, %v3074_v15, -inf }
0x1795   :  { %v7153_v7 = vadd.f32 %v6212_v51, %v3008_v6  ;;  %3104 = vmax.xlane.f32.xlu1 %v3103_v35 }
0x1797   :  { %3231 = vrot.lane.b32.xlu0 %v7153_v7, %s6507_s0  ;;  %6053 = vmatmul.msk.f32.vlgmr.msra.gmra.mxu2 %vm47_vm0, %v7153_v7 }
0x1798   :  { %3409 = vmatpush.msra.mxu2 %v3046_v32 }
0x1806   :  { %v3228_v42 = vpop.f32.mrf.mxu3 }
0x1807   :  { %v3259_v5 = vsel %vm47_vm0, %v3228_v42, -inf }
0x1808   :  { %3260 = vmax.xlane.f32.xlu2 %v3259_v5  ;;  %v3105_v8 = vpop.xlane.xlu1 %3104 }
0x1809   :  { %v3109_v17 = vsub.f32 %v3074_v15, %v3105_v8  ;;  %v3232_v19 = vpop.permute.xlu0 %3231 }
0x180a   :  { %6059 = vmatmul.msk.f32.vlgmr.msrb.gmra.mxu2 %vm47_vm0, %v3232_v19 }
0x180b   :  { %v3111_v57 = vmul.f32 1.442695, %v3109_v17 }
0x180d   :  { %6358 = vpow2.f32 %v3111_v57 }
0x1813   :  { %v6359_v52 = vpop.eup %6358 }
0x1814   :  { %v3115_v31 = vsel %vm47_vm0, %v6359_v52, 0.0 }
0x1815   :  { %3116 = vadd.xlane.f32.xlu1 %v3115_v31 }
0x181a   :  { %v3100_v12 = vpop.f32.mrf.mxu2 }
0x181b   :  { %v3106_v11 = vsel %vm47_vm0, %v3100_v12, -inf }
0x181c   :  { %3107 = vmax.xlane.f32.xlu0 %v3106_v11 }
0x182e   :  { %3151 = vrot.lane.b32.xlu1 %v7102_v45, %s6508_s7 }
0x1830   :  { %3177 = vrot.lane.b32.xlu0 %v7144_v36, %s6508_s7 }
0x1836   :  { %3417 = vrot.lane.b32.xlu1 %v3006_v56, %s6514_s14 }
0x183e   :  { %3333 = vrot.lane.b32.xlu1 %v7144_v36, %s6509_s2 }
0x1846   :  { %3447 = vrot.lane.b32.xlu1 %v7144_v36, %s6514_s14 }
0x184e   :  { %3606 = vrot.lane.b32.xlu1 %v7102_v45, %s6517_s17 }
0x1856   :  { %3445 = vrot.lane.b32.xlu1 %v7153_v7, %s6514_s14 }
0x185e   :  { %3604 = vrot.lane.b32.xlu1 %v3006_v56, %s6517_s17 }
0x1866   :  { %3521 = vrot.lane.b32.xlu1 %v7102_v45, %s6513_s13 }
0x187b   :  { %v3261_v9 = vpop.xlane.xlu2 %3260 }
0x187c   :  { %v3265_v14 = vsub.f32 %v3228_v42, %v3261_v9 }
0x187e   :  { %v3267_v16 = vmul.f32 1.442695, %v3265_v14 }
0x1880   :  { %6360 = vpow2.f32 %v3267_v16 }
0x1886   :  { %v7179_v13 = vpop.eup %6360 }
0x1887   :  { %v3271_v63 = vsel %vm47_vm0, %v7179_v13, 0.0 }
0x1888   :  { %3272 = vadd.xlane.f32.xlu2 %v3271_v63  ;;  %v3117_v40 = vpop.xlane.xlu1 %3116 }
0x1889   :  { %6362 = vrcp.f32 %v3117_v40  ;;  %v3132_v28 = vand.u32 2147483648, %v3117_v40  ;;  %vm3126_vm11 = vweird.f32 %v3117_v40  ;;  %v3130_v21 = vand.u32 2147483647, %v3117_v40 }
0x188b   :  { %v3133_v10 = vor.u32 1.1754944e-38, %v3132_v28  ;;  %vm3131_vm13 = vcmp.eq.f32.partialorder %v3130_v21, 8.507059e+37 }
0x188d   :  { %v3256_v50 = vpop.f32.mrf.mxu2 }
0x188e   :  { %v3262_v51 = vsel %vm47_vm0, %v3256_v50, -inf }
0x188f   :  { %v6363_v3 = vpop.eup %6362  ;;  %v3108_v25 = vpop.xlane.xlu0 %3107 }
0x1890   :  { %v3122_v26 = vmul.f32 %v6363_v3, %v3117_v40  ;;  %v3110_v27 = vsub.f32 %v3100_v12, %v3108_v25  ;;  %vm3127_vm10 = vweird.f32 %v6363_v3 }
0x1891   :  { %vm3128_vm12 = vmor %vm3126_vm11, %vm3127_vm10 }
0x1892   :  { %v3123_v41 = vsub.f32 1.0, %v3122_v26  ;;  %v3113_v18 = vmul.f32 1.442695, %v3110_v27 }
0x1894   :  { %v3124_v43 = vmul.f32 %v6363_v3, %v3123_v41  ;;  %6364 = vpow2.f32 %v3113_v18  ;;  %v3047_v18 = vld [vmem:[#allocation2 + $0x340] sm:$0xff] }
0x1895   :  { %3380 = vmatpush.msrb.mxu3 %v3047_v18 }
0x1896   :  { %v3125_v24 = vadd.f32 %v6363_v3, %v3124_v43 }
0x1898   :  { %v3129_v38 = vsel %vm3128_vm12, %v6363_v3, %v3125_v24 }
0x1899   :  { %v3134_v39 = vsel %vm3131_vm13, %v3133_v10, %v3129_v38 }
0x189a   :  { %v7183_v33 = vpop.eup %6364  ;;  %v3149_v61 = vmul.f32 %v6359_v52, %v3134_v39 }
0x189b   :  { %v3118_v46 = vsel %vm47_vm0, %v7183_v33, 0.0 }
0x189c   :  { %3119 = vadd.xlane.f32.xlu0 %v3118_v46 }
0x18a0   :  { %3307 = vrot.lane.b32.xlu2 %v7102_v45, %s6509_s2  ;;  %v3152_v44 = vpop.permute.xlu1 %3151 }
0x18a1   :  { %3172 = vmatpush.msra.mxu0 %v3152_v44 }
0x18a2   :  { %v3178_v47 = vpop.permute.xlu0 %3177  ;;  %6054 = vmatmul.msk.f32.vlgmr.msra.gmra.mxu0 %vm47_vm0, %v3149_v61 }
0x18a3   :  { %3198 = vmatpush.msra.mxu1 %v3178_v47 }
0x18a8   :  { %v3418_v48 = vpop.permute.xlu1 %3417 }
0x18b0   :  { %3419 = vrot.lane.b32.xlu0 %v7102_v45, %s6514_s14  ;;  %v3334_v23 = vpop.permute.xlu1 %3333 }
0x18b1   :  { %3354 = vmatpush.msrb.mxu1 %v3334_v23 }
0x18b8   :  { %v3448_v49 = vpop.permute.xlu1 %3447 }
0x18c0   :  { %v3607_v22 = vpop.permute.xlu1 %3606 }
0x18c1   :  { %6074 = vmatpush.xpose.msk.msrb.mxu2 %vm47_vm0, %v3607_v22 }
0x18c8   :  { %v7195_v35 = vpop.permute.xlu1 %3445 }
0x18c9   :  { %3263 = vmax.xlane.f32.xlu2 %v3262_v51 }
0x18d0   :  { %v3605_v17 = vpop.permute.xlu1 %3604 }
0x18d8   :  { %v3522_v40 = vpop.permute.xlu1 %3521 }
0x18fb   :  { %v3273_v53 = vpop.xlane.xlu2 %3272 }
0x18fc   :  { %6366 = vrcp.f32 %v3273_v53  ;;  %v3288_v59 = vand.u32 2147483648, %v3273_v53  ;;  %v3286_v62 = vand.u32 2147483647, %v3273_v53  ;;  %vm3282_vm15 = vweird.f32 %v3273_v53 }
0x18fe   :  { %v3289_v4 = vor.u32 1.1754944e-38, %v3288_v59  ;;  %vm3287_vm3 = vcmp.eq.f32.partialorder %v3286_v62, 8.507059e+37 }
0x1902   :  { %v6367_v54 = vpop.eup %6366 }
0x1903   :  { %v3278_v55 = vmul.f32 %v6367_v54, %v3273_v53  ;;  %v3308_v56 = vpop.permute.xlu2 %3307  ;;  %vm3283_vm14 = vweird.f32 %v6367_v54 }
0x1904   :  { %3328 = vmatpush.msrb.mxu0 %v3308_v56  ;;  %vm3284_vm2 = vmor %vm3282_vm15, %vm3283_vm14 }
0x1905   :  { %v3279_v58 = vsub.f32 1.0, %v3278_v55 }
0x1907   :  { %v3280_v60 = vmul.f32 %v6367_v54, %v3279_v58 }
0x1909   :  { %v3281_v2 = vadd.f32 %v6367_v54, %v3280_v60 }
0x190b   :  { %v3285_v37 = vsel %vm3284_vm2, %v6367_v54, %v3281_v2 }
0x190c   :  { %v3290_v15 = vsel %vm3287_vm3, %v3289_v4, %v3285_v37 }
0x190d   :  { %v3305_v6 = vmul.f32 %v7179_v13, %v3290_v15 }
0x190f   :  { %v3120_v42 = vpop.xlane.xlu0 %3119  ;;  %6060 = vmatmul.msk.f32.vlgmr.msrb.gmra.mxu0 %vm47_vm0, %v3305_v6 }
0x1910   :  { %6368 = vrcp.f32 %v3120_v42  ;;  %v3146_v57 = vand.u32 2147483648, %v3120_v42  ;;  %v3144_v31 = vand.u32 2147483647, %v3120_v42  ;;  %vm3140_vm5 = vweird.f32 %v3120_v42 }
0x1912   :  { %v3147_v11 = vor.u32 1.1754944e-38, %v3146_v57  ;;  %vm3145_vm7 = vcmp.eq.f32.partialorder %v3144_v31, 8.507059e+37 }
0x1916   :  { %v6369_v5 = vpop.eup %6368 }
0x1917   :  { %v3136_v8 = vmul.f32 %v6369_v5, %v3120_v42  ;;  %vm3141_vm4 = vweird.f32 %v6369_v5 }
0x1918   :  { %vm3142_vm6 = vmor %vm3140_vm5, %vm3141_vm4 }
0x1919   :  { %v3137_v19 = vsub.f32 1.0, %v3136_v8 }
0x191b   :  { %v3138_v52 = vmul.f32 %v6369_v5, %v3137_v19 }
0x191d   :  { %v3139_v12 = vadd.f32 %v6369_v5, %v3138_v52 }
0x191f   :  { %v3143_v9 = vsel %vm3142_vm6, %v6369_v5, %v3139_v12  ;;  %v3174_v14 = vpop.f32.mrf.mxu0 }
0x1920   :  { %v3148_v16 = vsel %vm3145_vm7, %v3147_v11, %v3143_v9  ;;  %6064 = vmatmul.msk.f32.vlgmr.msra.gmra.mxu2 %vm47_vm0, %v3174_v14 }
0x1921   :  { %v3150_v13 = vmul.f32 %v7183_v33, %v3148_v16 }
0x1922   :  { %v3420_v63 = vpop.permute.xlu0 %3419 }
0x1923   :  { %6055 = vmatmul.msk.f32.vlgmr.msra.gmra.mxu1 %vm47_vm0, %v3150_v13  ;;  %6066 = vmatpush.xpose.msk.msra.mxu0 %vm47_vm0, %v3420_v63 }
0x1924   :  { %6068 = vmatpush.xpose.msk.msra.mxu1 %vm47_vm0, %v3448_v49 }
0x1926   :  { %6067 = vmatmul.msk.f32.vlgmr.msra.gmra.mxu0 %vm47_vm0, %v3418_v48 }
0x1927   :  { %3542 = vmatpush.msrb.mxu0 %v3522_v40 }
0x193c   :  { %v3264_v3 = vpop.xlane.xlu2 %3263 }
0x193d   :  { %v3266_v25 = vsub.f32 %v3256_v50, %v3264_v3 }
0x193f   :  { %v3269_v26 = vmul.f32 1.442695, %v3266_v25 }
0x1941   :  { %6370 = vpow2.f32 %v3269_v26  ;;  %v3048_v26 = vld [vmem:[#allocation2 + $0x348] sm:$0xff] }
0x1942   :  { %3594 = vmatpush.msra.mxu3 %v3048_v26  ;;  %v7246_v26 = vld [vmem:[#allocation2 + $0x358] ss:$0 sm:$0xff] }
0x1947   :  { %v6371_v27 = vpop.eup %6370 }
0x1948   :  { %v3274_v41 = vsel %vm47_vm0, %v6371_v27, 0.0 }
0x1949   :  { %3275 = vadd.xlane.f32.xlu0 %v3274_v41 }
0x198c   :  { %v3330_v43 = vpop.f32.mrf.mxu0 }
0x198d   :  { %6062 = vmatmul.msk.f32.vlgmr.msrb.gmra.mxu3 %vm47_vm0, %v3330_v43 }
0x19a0   :  { %v3200_v24 = vpop.f32.mrf.mxu1 }
0x19a1   :  { %6065 = vmatmul.msk.f32.gmra.mxu2 %vm47_vm0, %v3200_v24 }
0x19a3   :  { %v3442_v28 = vpop.f32.mrf.mxu0  ;;  %v7218_v56 = vpop.f32.mrf.mxu2 }
0x19a4   :  { %v3473_v21 = vsel %vm47_vm0, %v3442_v28, -inf }
0x19a5   :  { %3474 = vmax.xlane.f32.xlu2 %v3473_v21 }
0x19a9   :  { %6075 = vmatmul.msk.f32.vlgmr.msrb.gmra.mxu2 %vm47_vm0, %v3605_v17 }
0x19bc   :  { %v3276_v32 = vpop.xlane.xlu0 %3275 }
0x19bd   :  { %6372 = vrcp.f32 %v3276_v32  ;;  %3634 = vrot.lane.b32.xlu2 %v7144_v36, %s6517_s17  ;;  %v3302_v46 = vand.u32 2147483648, %v3276_v32  ;;  %v3300_v61 = vand.u32 2147483647, %v3276_v32  ;;  %vm3296_vm9 = vweird.f32 %v3276_v32 }
0x19bf   :  { %v3303_v47 = vor.u32 1.1754944e-38, %v3302_v46  ;;  %vm3301_vm11 = vcmp.eq.f32.partialorder %v3300_v61, 8.507059e+37 }
0x19c3   :  { %v6373_v33 = vpop.eup %6372 }
0x19c4   :  { %v3292_v38 = vmul.f32 %v6373_v33, %v3276_v32  ;;  %vm3297_vm8 = vweird.f32 %v6373_v33 }
0x19c5   :  { %vm3298_vm10 = vmor %vm3296_vm9, %vm3297_vm8 }
0x19c6   :  { %v3293_v10 = vsub.f32 1.0, %v3292_v38 }
0x19c8   :  { %v3294_v39 = vmul.f32 %v6373_v33, %v3293_v10 }
0x19ca   :  { %v3295_v44 = vadd.f32 %v6373_v33, %v3294_v39 }
0x19cc   :  { %v3299_v48 = vsel %vm3298_vm10, %v6373_v33, %v3295_v44 }
0x19cd   :  { %v3304_v23 = vsel %vm3301_vm11, %v3303_v47, %v3299_v48 }
0x19ce   :  { %v3306_v49 = vmul.f32 %v6371_v27, %v3304_v23 }
0x19d0   :  { %6061 = vmatmul.msk.f32.vlgmr.msrb.gmra.mxu1 %vm47_vm0, %v3306_v49 }
0x19d8   :  { %6069 = vmatmul.msk.f32.vlgmr.msra.gmra.mxu1 %vm47_vm0, %v7195_v35 }
0x1a18   :  { %v3475_v22 = vpop.xlane.xlu2 %3474 }
0x1a19   :  { %v3479_v50 = vsub.f32 %v3442_v28, %v3475_v22 }
0x1a1b   :  { %v3481_v51 = vmul.f32 1.442695, %v3479_v50 }
0x1a1d   :  { %6374 = vpow2.f32 %v3481_v51 }
0x1a20   :  { %v3635_v53 = vpop.permute.xlu2 %3634 }
0x1a21   :  { %6076 = vmatpush.xpose.msk.msra.mxu0 %vm47_vm0, %v3635_v53 }
0x1a23   :  { %v6375_v54 = vpop.eup %6374 }
0x1a24   :  { %v3485_v55 = vsel %vm47_vm0, %v6375_v54, 0.0  ;;  %v7221_v59 = vpop.f32.mrf.mxu2 }
0x1a25   :  { %3486 = vadd.xlane.f32.xlu0 %v3485_v55 }
0x1a2c   :  { %v3629_v2 = vpop.f32.mrf.mxu2 }
0x1a2d   :  { %v3660_v4 = vsel %vm47_vm0, %v3629_v2, -inf }
0x1a39   :  { %3632 = vrot.lane.b32.xlu0 %v7153_v7, %s6517_s17 }
0x1a4d   :  { %v3356_v58 = vpop.f32.mrf.mxu1 }
0x1a4e   :  { %6063 = vmatmul.msk.f32.gmra.mxu3 %vm47_vm0, %v3356_v58 }
0x1a55   :  { %v3470_v60 = vpop.f32.mrf.mxu1 }
0x1a56   :  { %v3476_v62 = vsel %vm47_vm0, %v3470_v60, -inf }
0x1a57   :  { %3477 = vmax.xlane.f32.xlu1 %v3476_v62 }
0x1a63   :  { %3661 = vmax.xlane.f32.xlu0 %v3660_v4 }
0x1a98   :  { %v3487_v37 = vpop.xlane.xlu0 %3486 }
0x1a99   :  { %6376 = vrcp.f32 %v3487_v37  ;;  %v3502_v35 = vand.u32 2147483648, %v3487_v37  ;;  %v3500_v5 = vand.u32 2147483647, %v3487_v37  ;;  %vm3496_vm13 = vweird.f32 %v3487_v37 }
0x1a9b   :  { %v3503_v17 = vor.u32 1.1754944e-38, %v3502_v35  ;;  %vm3501_vm15 = vcmp.eq.f32.partialorder %v3500_v5, 8.507059e+37 }
0x1a9f   :  { %v6377_v15 = vpop.eup %6376 }
0x1aa0   :  { %v3492_v6 = vmul.f32 %v6377_v15, %v3487_v37  ;;  %vm3497_vm12 = vweird.f32 %v6377_v15 }
0x1aa1   :  { %vm3498_vm14 = vmor %vm3496_vm13, %vm3497_vm12 }
0x1aa2   :  { %v3493_v7 = vsub.f32 1.0, %v3492_v6 }
0x1aa4   :  { %v3494_v42 = vmul.f32 %v6377_v15, %v3493_v7  ;;  %v3049_v7 = vld [vmem:[#allocation2 + $0x350] sm:$0xff] }
0x1aa6   :  { %v3495_v8 = vadd.f32 %v6377_v15, %v3494_v42 }
0x1aa8   :  { %v3499_v19 = vsel %vm3498_vm14, %v6377_v15, %v3495_v8 }
0x1aa9   :  { %v3504_v57 = vsel %vm3501_vm15, %v3503_v17, %v3499_v19 }
0x1aaa   :  { %v3519_v52 = vmul.f32 %v6375_v54, %v3504_v57 }
0x1aab   :  { %v3633_v31 = vpop.permute.xlu0 %3632 }
0x1aac   :  { %6070 = vmatmul.msk.f32.vlgmr.msrb.gmra.mxu0 %vm47_vm0, %v3519_v52 }
0x1aad   :  { %3781 = vmatpush.msrb.mxu0 %v3049_v7  ;;  %v3899_v7 = vld [vmem:[#allocation2 + $0x3d8] sm:$0xff] }
0x1ab4   :  { %6077 = vmatmul.msk.f32.vlgmr.msra.gmra.mxu0 %vm47_vm0, %v3633_v31 }
0x1aca   :  { %v3478_v12 = vpop.xlane.xlu1 %3477 }
0x1acb   :  { %v3480_v11 = vsub.f32 %v3470_v60, %v3478_v12 }
0x1acd   :  { %v3483_v9 = vmul.f32 1.442695, %v3480_v11 }
0x1acf   :  { %6378 = vpow2.f32 %v3483_v9 }
0x1ad5   :  { %v6379_v14 = vpop.eup %6378 }
0x1ad6   :  { %v3662_v16 = vpop.xlane.xlu0 %3661  ;;  %v3488_v13 = vsel %vm47_vm0, %v6379_v14, 0.0 }
0x1ad7   :  { %v3666_v63 = vsub.f32 %v3629_v2, %v3662_v16  ;;  %3489 = vadd.xlane.f32.xlu2 %v3488_v13  ;;  %v3382_v13 = vpop.f32.mrf.mxu3 }
0x1ad9   :  { %v3668_v40 = vmul.f32 1.442695, %v3666_v63 }
0x1adb   :  { %6380 = vpow2.f32 %v3668_v40 }
0x1adf   :  { %v7243_v63 = vpop.f32.mrf.mxu3 }
0x1ae1   :  { %v6381_v3 = vpop.eup %6380 }
0x1ae2   :  { %v3672_v25 = vsel %vm47_vm0, %v6381_v3, 0.0 }
0x1ae3   :  { %3673 = vadd.xlane.f32.xlu1 %v3672_v25 }
0x1aef   :  { %3708 = vrot.lane.b32.xlu2 %v7102_v45, %s6516_s16 }
0x1afc   :  { %3547 = vrot.lane.b32.xlu1 %v7144_v36, %s6513_s13 }
0x1b04   :  { %3734 = vrot.lane.b32.xlu1 %v7144_v36, %s6516_s16 }
0x1b29   :  { %v3544_v27 = vpop.f32.mrf.mxu0 }
0x1b2a   :  { %6072 = vmatmul.msk.f32.vlgmr.msra.gmra.mxu3 %vm47_vm0, %v3544_v27 }
0x1b31   :  { %v3657_v41 = vpop.f32.mrf.mxu0 }
0x1b32   :  { %v3663_v18 = vsel %vm47_vm0, %v3657_v41, -inf }
0x1b33   :  { %3664 = vmax.xlane.f32.xlu0 %v3663_v18 }
0x1b4a   :  { %v3490_v43 = vpop.xlane.xlu2 %3489 }
0x1b4b   :  { %6382 = vrcp.f32 %v3490_v43  ;;  %v3516_v46 = vand.u32 2147483648, %v3490_v43  ;;  %vm3510_vm3 = vweird.f32 %v3490_v43  ;;  %v3514_v39 = vand.u32 2147483647, %v3490_v43 }
0x1b4d   :  { %v3517_v47 = vor.u32 1.1754944e-38, %v3516_v46  ;;  %vm3515_vm5 = vcmp.eq.f32.partialorder %v3514_v39, 8.507059e+37 }
0x1b51   :  { %v6383_v24 = vpop.eup %6382 }
0x1b52   :  { %v3506_v45 = vmul.f32 %v6383_v24, %v3490_v43  ;;  %vm3511_vm2 = vweird.f32 %v6383_v24  ;;  %v3709_v53 = vpop.permute.xlu2 %3708 }
0x1b53   :  { %vm3512_vm4 = vmor %vm3510_vm3, %vm3511_vm2 }
0x1b54   :  { %v3507_v21 = vsub.f32 1.0, %v3506_v45 }
0x1b56   :  { %v3674_v28 = vpop.xlane.xlu1 %3673  ;;  %v3508_v33 = vmul.f32 %v6383_v24, %v3507_v21 }
0x1b57   :  { %6384 = vrcp.f32 %v3674_v28  ;;  %v3689_v49 = vand.u32 2147483648, %v3674_v28  ;;  %vm3683_vm7 = vweird.f32 %v3674_v28  ;;  %v3687_v50 = vand.u32 2147483647, %v3674_v28 }
0x1b58   :  { %v3509_v36 = vadd.f32 %v6383_v24, %v3508_v33  ;;  %v3853_v33 = vld [vmem:[#allocation2 + $0x368] sm:$0xff] }
0x1b59   :  { %v3690_v55 = vor.u32 1.1754944e-38, %v3689_v49  ;;  %vm3688_vm9 = vcmp.eq.f32.partialorder %v3687_v50, 8.507059e+37 }
0x1b5a   :  { %v3513_v61 = vsel %vm3512_vm4, %v6383_v24, %v3509_v36 }
0x1b5b   :  { %v3518_v48 = vsel %vm3515_vm5, %v3517_v47, %v3513_v61 }
0x1b5c   :  { %v3520_v22 = vmul.f32 %v6379_v14, %v3518_v48 }
0x1b5d   :  { %v6385_v32 = vpop.eup %6384 }
0x1b5e   :  { %v3679_v38 = vmul.f32 %v6385_v32, %v3674_v28  ;;  %vm3684_vm6 = vweird.f32 %v6385_v32 }
0x1b5f   :  { %vm3685_vm8 = vmor %vm3683_vm7, %vm3684_vm6 }
0x1b60   :  { %v3680_v10 = vsub.f32 1.0, %v3679_v38  ;;  %v3852_v38 = vld [vmem:[#allocation2 + $0x360] sm:$0xff] }
0x1b62   :  { %v3681_v44 = vmul.f32 %v6385_v32, %v3680_v10 }
0x1b64   :  { %v3682_v23 = vadd.f32 %v6385_v32, %v3681_v44 }
0x1b66   :  { %v3686_v54 = vsel %vm3685_vm8, %v6385_v32, %v3682_v23  ;;  %v3854_v32 = vld [vmem:[#allocation2 + $0x370] sm:$0xff] }
0x1b67   :  { %v3691_v58 = vsel %vm3688_vm9, %v3690_v55, %v3686_v54  ;;  %v7257_v55 = vld [vmem:[#allocation2 + $0x428] ss:$0 sm:$0xff] }
0x1b68   :  { %v3706_v60 = vmul.f32 %v6381_v3, %v3691_v58  ;;  %v3412_v3 = vadd.f32 %v7218_v56, %v3382_v13  ;;  %v3855_v56 = vld [vmem:[#allocation2 + $0x378] sm:$0xff] }
0x1b6e   :  { %v3548_v51 = vpop.permute.xlu1 %3547 }
0x1b6f   :  { %3568 = vmatpush.msrb.mxu1 %v3548_v51 }
0x1b70   :  { %6071 = vmatmul.msk.f32.vlgmr.msrb.gmra.mxu1 %vm47_vm0, %v3520_v22 }
0x1b71   :  { %3729 = vmatpush.msra.mxu1 %v3709_v53  ;;  %v7255_v53 = vld [vmem:[#allocation2 + $0x420] ss:$0 sm:$0xff] }
0x1b73   :  { %3876 = vmatpush.msrb.mxu1 %v3855_v56 }
0x1b75   :  { %3877 = vmatpush.msrb.mxu1 %v3854_v32 }
0x1b76   :  { %v3735_v62 = vpop.permute.xlu1 %3734 }
0x1b77   :  { %3755 = vmatpush.msra.mxu2 %v3735_v62  ;;  %3878 = vmatpush.msrb.mxu1 %v3853_v33 }
0x1b78   :  { %6078 = vmatmul.msk.f32.vlgmr.msra.gmra.mxu1 %vm47_vm0, %v3706_v60 }
0x1b79   :  { %3879 = vmatpush.msrb.mxu1 %v3852_v38 }
0x1ba6   :  { %v3665_v2 = vpop.xlane.xlu0 %3664 }
0x1ba7   :  { %v3667_v4 = vsub.f32 %v3657_v41, %v3665_v2  ;;  %v3904_v2 = vld [vmem:[#allocation2 + $0x400] sm:$0xff] }
0x1ba8   :  { %3907 = vmatpush.msrb.mxu3 %v3904_v2 }
0x1ba9   :  { %v3670_v37 = vmul.f32 1.442695, %v3667_v4  ;;  %v3903_v4 = vld [vmem:[#allocation2 + $0x3f8] sm:$0xff] }
0x1baa   :  { %3908 = vmatpush.msrb.mxu3 %v3903_v4  ;;  %v3990_v4 = vld [vmem:[#allocation2 + $0x450] sm:$0xff] }
0x1bab   :  { %6386 = vpow2.f32 %v3670_v37  ;;  %v3902_v37 = vld [vmem:[#allocation2 + $0x3f0] sm:$0xff] }
0x1bac   :  { %3909 = vmatpush.msrb.mxu3 %v3902_v37  ;;  %v3989_v37 = vld [vmem:[#allocation2 + $0x448] sm:$0xff] }
0x1bad   :  { %v3596_v40 = vpop.f32.mrf.mxu3 }
0x1bae   :  { %v3602_v25 = vadd.f32 %v3596_v40, %v3412_v3 }
0x1bb1   :  { %v6387_v15 = vpop.eup %6386 }
0x1bb2   :  { %v3675_v6 = vsel %vm47_vm0, %v6387_v15, 0.0 }
0x1bb3   :  { %3676 = vadd.xlane.f32.xlu0 %v3675_v6  ;;  %v3900_v6 = vld [vmem:[#allocation2 + $0x3e0] sm:$0xff] }
0x1bed   :  { %v3570_v35 = vpop.f32.mrf.mxu1 }
0x1bee   :  { %6073 = vmatmul.msk.f32.gmra.mxu3 %vm47_vm0, %v3570_v35  ;;  %v3898_v35 = vld [vmem:[#allocation2 + $0x3d0] sm:$0xff] }
0x1bf5   :  { %v3731_v42 = vpop.f32.mrf.mxu1 }
0x1bf6   :  { %6080 = vmatmul.msk.f32.vlgmr.msrb.gmra.mxu0 %vm47_vm0, %v3731_v42  ;;  %v3897_v42 = vld [vmem:[#allocation2 + $0x3c8] sm:$0xff] }
0x1c26   :  { %v3677_v5 = vpop.xlane.xlu0 %3676 }
0x1c27   :  { %6388 = vrcp.f32 %v3677_v5  ;;  %v3703_v57 = vand.u32 2147483648, %v3677_v5  ;;  %v3701_v31 = vand.u32 2147483647, %v3677_v5  ;;  %vm3697_vm11 = vweird.f32 %v3677_v5 }
0x1c29   :  { %v3704_v11 = vor.u32 1.1754944e-38, %v3703_v57  ;;  %vm3702_vm13 = vcmp.eq.f32.partialorder %v3701_v31, 8.507059e+37  ;;  %v3415_v57 = vadd.f32 %v7221_v59, %v7243_v63  ;;  %v3891_v59 = vld [vmem:[#allocation2 + $0x398] sm:$0xff]  ;;  %v3890_v63 = vld [vmem:[#allocation2 + $0x390] sm:$0xff] }
0x1c2d   :  { %v6389_v8 = vpop.eup %6388 }
0x1c2e   :  { %v3693_v17 = vmul.f32 %v6389_v8, %v3677_v5  ;;  %vm3698_vm10 = vweird.f32 %v6389_v8  ;;  %v3896_v5 = vld [vmem:[#allocation2 + $0x3c0] sm:$0xff] }
0x1c2f   :  { %vm3699_vm12 = vmor %vm3697_vm11, %vm3698_vm10 }
0x1c30   :  { %v3694_v19 = vsub.f32 1.0, %v3693_v17 }
0x1c32   :  { %v3695_v52 = vmul.f32 %v6389_v8, %v3694_v19  ;;  %v3894_v19 = vld [vmem:[#allocation2 + $0x3b0] sm:$0xff] }
0x1c34   :  { %v3696_v12 = vadd.f32 %v6389_v8, %v3695_v52  ;;  %v3893_v52 = vld [vmem:[#allocation2 + $0x3a8] sm:$0xff] }
0x1c36   :  { %v3700_v9 = vsel %vm3699_vm12, %v6389_v8, %v3696_v12  ;;  %v3895_v8 = vld [vmem:[#allocation2 + $0x3b8] sm:$0xff] }
0x1c37   :  { %v3705_v14 = vsel %vm3702_vm13, %v3704_v11, %v3700_v9  ;;  %v3892_v11 = vld [vmem:[#allocation2 + $0x3a0] sm:$0xff] }
0x1c38   :  { %v3707_v16 = vmul.f32 %v6387_v15, %v3705_v14  ;;  %v3901_v15 = vld [vmem:[#allocation2 + $0x3e8] sm:$0xff] }
0x1c39   :  { %3910 = vmatpush.msrb.mxu3 %v3901_v15 }
0x1c3a   :  { %6079 = vmatmul.msk.f32.vlgmr.msra.gmra.mxu2 %vm47_vm0, %v3707_v16 }
0x1c3b   :  { %3911 = vmatpush.msrb.mxu3 %v3900_v6 }
0x1c3d   :  { %3912 = vmatpush.msrb.mxu3 %v3899_v7 }
0x1c3f   :  { %3913 = vmatpush.msrb.mxu3 %v3898_v35 }
0x1c41   :  { %3914 = vmatpush.msrb.mxu3 %v3897_v42 }
0x1c43   :  { %3915 = vmatpush.msrb.mxu3 %v3896_v5 }
0x1c45   :  { %3916 = vmatpush.msrb.mxu3 %v3895_v8 }
0x1c47   :  { %3917 = vmatpush.msrb.mxu3 %v3894_v19 }
0x1c49   :  { %3918 = vmatpush.msrb.mxu3 %v3893_v52 }
0x1c4b   :  { %3919 = vmatpush.msrb.mxu3 %v3892_v11  ;;  %v6218_v11 = vld [vmem:[#allocation2 + $0x430] ss:$0 sm:$0xff] }
0x1c4d   :  { %3920 = vmatpush.msrb.mxu3 %v3891_v59 }
0x1c4f   :  { %3921 = vmatpush.msrb.mxu3 %v3890_v63 }
0x1c71   :  { %v3599_v17 = vpop.f32.mrf.mxu3 }
0x1c72   :  { %v3603_v31 = vadd.f32 %v3599_v17, %v3415_v57 }
0x1c73   :  { %v3783_v27 = vpop.f32.mrf.mxu0 }
0x1c74   :  { %v3789_v41 = vadd.f32 %v3783_v27, %v3602_v25  ;;  %v3889_v25 = vld [vmem:[#allocation2 + $0x388] sm:$0xff]  ;;  %v6216_v27 = vld [vmem:[#allocation2 + $0x380] ss:$0 sm:$0xff] }
0x1c75   :  { %3922 = vmatpush.msrb.mxu3 %v3889_v25 }
0x1c76   :  { %v3792_v18 = vadd.f32 %v7246_v26, %v3789_v41 }
0x1c78   :  { %v3794_v43 = vadd.f32 %v3792_v18, %v7123_v30 }
0x1c7a   :  { %v3798_v24 = vsel %vm117_vm1, %v3794_v43, 0.0  ;;  %v3806_v28 = vmul.f32 %v3794_v43, %v3794_v43 }
0x1c7b   :  { %3799 = vadd.xlane.f32.xlu0 %v3798_v24 }
0x1c7c   :  { %v3808_v45 = vsel %vm117_vm1, %v3806_v28, 0.0 }
0x1c7d   :  { %3809 = vadd.xlane.f32.xlu1 %v3808_v45 }
0x1cbd   :  { %v3757_v21 = vpop.f32.mrf.mxu2 }
0x1cbe   :  { %6081 = vmatmul.msk.f32.gmra.mxu0 %vm47_vm0, %v3757_v21 }
0x1cee   :  { %v3800_v36 = vpop.xlane.xlu0 %3799 }
0x1cef   :  { %v3804_v30 = vmul.f32 %v3800_v36, %v6714_v20 }
0x1cf0   :  { %v3810_v10 = vpop.xlane.xlu1 %3809 }
0x1cf1   :  { %v3816_v46 = vmul.f32 %v3804_v30, %v3804_v30  ;;  %v3814_v39 = vmul.f32 %v3810_v10, %v6714_v20  ;;  %v3820_v51 = vsub.f32 %v3794_v43, %v3804_v30 }
0x1cf3   :  { %v3818_v61 = vsub.f32 %v3814_v39, %v3816_v46 }
0x1cf5   :  { %v3822_v44 = vadd.f32 1e-05, %v3818_v61 }
0x1cf7   :  { %6390 = vrsqrt.f32 %v3822_v44  ;;  %vm3830_vm15 = vweird.f32 %v3822_v44 }
0x1cfd   :  { %v6391_v47 = vpop.eup %6390 }
0x1cfe   :  { %v3825_v48 = vmul.f32 %v6391_v47, %v3822_v44  ;;  %vm3831_vm14 = vweird.f32 %v6391_v47 }
0x1cff   :  { %vm3832_vm2 = vmor %vm3830_vm15, %vm3831_vm14 }
0x1d00   :  { %v3826_v23 = vmul.f32 %v6391_v47, %v3825_v48  ;;  %v6217_v48 = vld [vmem:[#allocation2 + $0x408] ss:$0 sm:$0xff] }
0x1d02   :  { %v3827_v49 = vmul.f32 0.5, %v3826_v23 }
0x1d04   :  { %v3828_v22 = vsub.f32 1.5, %v3827_v49 }
0x1d06   :  { %v3829_v50 = vmul.f32 %v6391_v47, %v3828_v22 }
0x1d08   :  { %v3833_v54 = vsel %vm3832_vm2, %v6391_v47, %v3829_v50 }
0x1d09   :  { %v3844_v58 = vmul.f32 %v3833_v54, %v3820_v51 }
0x1d0b   :  { %v3847_v60 = vmul.f32 %v7255_v53, %v3844_v58 }
0x1d0d   :  { %v7261_v62 = vadd.f32 %v7257_v55, %v3847_v60 }
0x1d0f   :  { %6082 = vmatmul.msk.f32.vlgmr.msrb.gmra.mxu1 %vm117_vm1, %v7261_v62 }
0x1d3b   :  { %v3786_v12 = vpop.f32.mrf.mxu0 }
0x1d3c   :  { %v3790_v9 = vadd.f32 %v3786_v12, %v3603_v31 }
0x1d3e   :  { %v3793_v14 = vadd.f32 %v7246_v26, %v3790_v9 }
0x1d40   :  { %v3795_v16 = vadd.f32 %v3793_v14, %v7139_v0  ;;  %v6219_v14 = vld [vmem:[#allocation2 + $0x438] ss:$0 sm:$0xff] }
0x1d42   :  { %v3801_v13 = vsel %vm117_vm1, %v3795_v16, 0.0  ;;  %v3807_v40 = vmul.f32 %v3795_v16, %v3795_v16 }
0x1d43   :  { %3802 = vadd.xlane.f32.xlu2 %v3801_v13 }
0x1d44   :  { %v3811_v3 = vsel %vm117_vm1, %v3807_v40, 0.0 }
0x1d45   :  { %3812 = vadd.xlane.f32.xlu0 %v3811_v3 }
0x1d8c   :  { %v3881_v41 = vpop.f32.mrf.mxu1 }
0x1d8d   :  { %v3882_v18 = vadd.f32 %v6216_v27, %v3881_v41 }
0x1d8f   :  { %v3887_v26 = vmax.f32 %v3882_v18, 0.0  ;;  %v6220_v18 = vld [vmem:[#allocation2 + $0x460] ss:$0 sm:$0xff] }
0x1d91   :  { %3923 = vmatmul.f32.vlgmr.msrb.gmra.mxu3 %v3887_v26 }
0x1db6   :  { %v3803_v43 = vpop.xlane.xlu2 %3802 }
0x1db7   :  { %v3805_v0 = vmul.f32 %v3803_v43, %v6714_v20 }
0x1db8   :  { %v3813_v24 = vpop.xlane.xlu0 %3812 }
0x1db9   :  { %v3817_v28 = vmul.f32 %v3805_v0, %v3805_v0  ;;  %v3815_v45 = vmul.f32 %v3813_v24, %v6714_v20  ;;  %v3821_v46 = vsub.f32 %v3795_v16, %v3805_v0 }
0x1dbb   :  { %v3819_v21 = vsub.f32 %v3815_v45, %v3817_v28 }
0x1dbd   :  { %v3823_v56 = vadd.f32 1e-05, %v3819_v21 }
0x1dbf   :  { %6392 = vrsqrt.f32 %v3823_v56  ;;  %vm3840_vm4 = vweird.f32 %v3823_v56 }
0x1dc5   :  { %v6393_v32 = vpop.eup %6392 }
0x1dc6   :  { %v3835_v33 = vmul.f32 %v6393_v32, %v3823_v56  ;;  %vm3841_vm3 = vweird.f32 %v6393_v32 }
0x1dc7   :  { %vm3842_vm5 = vmor %vm3840_vm4, %vm3841_vm3 }
0x1dc8   :  { %v3836_v38 = vmul.f32 %v6393_v32, %v3835_v33 }
0x1dca   :  { %v3837_v36 = vmul.f32 0.5, %v3836_v38 }
0x1dcc   :  { %v3838_v30 = vsub.f32 1.5, %v3837_v36 }
0x1dce   :  { %v3839_v10 = vmul.f32 %v6393_v32, %v3838_v30 }
0x1dd0   :  { %v3843_v39 = vsel %vm3842_vm5, %v6393_v32, %v3839_v10 }
0x1dd1   :  { %v3845_v61 = vmul.f32 %v3843_v39, %v3821_v46 }
0x1dd3   :  { %v3848_v44 = vmul.f32 %v7255_v53, %v3845_v61 }
0x1dd5   :  { %v3851_v47 = vadd.f32 %v7257_v55, %v3848_v44  ;;  %v3991_v55 = vld [vmem:[#allocation2 + $0x458] sm:$0xff] }
0x1dd6   :  { %4012 = vmatpush.msrb.mxu2 %v3991_v55 }
0x1dd7   :  { %6083 = vmatmul.msk.f32.gmra.mxu1 %vm117_vm1, %v3851_v47 }
0x1dd8   :  { %4013 = vmatpush.msrb.mxu2 %v3990_v4 }
0x1dda   :  { %4014 = vmatpush.msrb.mxu2 %v3989_v37 }
0x1e14   :  { %v3924_v23 = vpop.f32.mrf.mxu3 }
0x1e15   :  { %v3925_v49 = vadd.f32 %v6217_v48, %v3924_v23 }
0x1e17   :  { %v3930_v22 = vadd.f32 %v3925_v49, %v7261_v62  ;;  %v3988_v62 = vld [vmem:[#allocation2 + $0x440] sm:$0xff] }
0x1e18   :  { %4015 = vmatpush.msrb.mxu2 %v3988_v62 }
0x1e19   :  { %v3934_v50 = vsel %vm117_vm1, %v3930_v22, 0.0  ;;  %v3942_v51 = vmul.f32 %v3930_v22, %v3930_v22 }
0x1e1a   :  { %3935 = vadd.xlane.f32.xlu0 %v3934_v50 }
0x1e1b   :  { %v3944_v54 = vsel %vm117_vm1, %v3942_v51, 0.0 }
0x1e22   :  { %3945 = vadd.xlane.f32.xlu0 %v3944_v54 }
0x1e54   :  { %v3884_v58 = vpop.f32.mrf.mxu1 }
0x1e55   :  { %v3885_v60 = vadd.f32 %v6216_v27, %v3884_v58 }
0x1e57   :  { %v3888_v2 = vmax.f32 %v3885_v60, 0.0 }
0x1e59   :  { %3926 = vmatmul.f32.gmra.mxu3 %v3888_v2 }
0x1e8d   :  { %v3936_v53 = vpop.xlane.xlu0 %3935 }
0x1e8e   :  { %v3940_v15 = vmul.f32 %v3936_v53, %v6714_v20 }
0x1e90   :  { %v3952_v7 = vmul.f32 %v3940_v15, %v3940_v15  ;;  %v3956_v12 = vsub.f32 %v3930_v22, %v3940_v15 }
0x1e95   :  { %v3946_v6 = vpop.xlane.xlu0 %3945 }
0x1e96   :  { %v3950_v35 = vmul.f32 %v3946_v6, %v6714_v20 }
0x1e98   :  { %v3954_v42 = vsub.f32 %v3950_v35, %v3952_v7 }
0x1e9a   :  { %v3958_v5 = vadd.f32 1e-05, %v3954_v42 }
0x1e9c   :  { %6394 = vrsqrt.f32 %v3958_v5  ;;  %vm3966_vm7 = vweird.f32 %v3958_v5 }
0x1ea2   :  { %v6395_v8 = vpop.eup %6394 }
0x1ea3   :  { %v3961_v17 = vmul.f32 %v6395_v8, %v3958_v5  ;;  %vm3967_vm6 = vweird.f32 %v6395_v8 }
0x1ea4   :  { %vm3968_vm8 = vmor %vm3966_vm7, %vm3967_vm6 }
0x1ea5   :  { %v3962_v19 = vmul.f32 %v6395_v8, %v3961_v17 }
0x1ea7   :  { %v3963_v57 = vmul.f32 0.5, %v3962_v19 }
0x1ea9   :  { %v3964_v52 = vsub.f32 1.5, %v3963_v57 }
0x1eab   :  { %v3965_v31 = vmul.f32 %v6395_v8, %v3964_v52 }
0x1ead   :  { %v3969_v9 = vsel %vm3968_vm8, %v6395_v8, %v3965_v31 }
0x1eae   :  { %v3980_v16 = vmul.f32 %v3969_v9, %v3956_v12 }
0x1eb0   :  { %v3983_v13 = vmul.f32 %v6218_v11, %v3980_v16 }
0x1eb2   :  { %v7281_v40 = vadd.f32 %v6219_v14, %v3983_v13 }
0x1eb4   :  { %6084 = vmatmul.msk.f32.vlgmr.msrb.gmra.mxu2 %vm117_vm1, %v7281_v40 }
0x1edc   :  { %v3927_v3 = vpop.f32.mrf.mxu3 }
0x1edd   :  { %v3928_v59 = vadd.f32 %v6217_v48, %v3927_v3 }
0x1edf   :  { %v3931_v63 = vadd.f32 %v3928_v59, %v3851_v47 }
0x1ee1   :  { %v3937_v25 = vsel %vm117_vm1, %v3931_v63, 0.0  ;;  %v3943_v27 = vmul.f32 %v3931_v63, %v3931_v63 }
0x1ee2   :  { %3938 = vadd.xlane.f32.xlu0 %v3937_v25 }
0x1ee3   :  { %v3947_v41 = vsel %vm117_vm1, %v3943_v27, 0.0 }
0x1eea   :  { %3948 = vadd.xlane.f32.xlu0 %v3947_v41 }
0x1f37   :  { %v4017_v26 = vpop.f32.mrf.mxu2 }
0x1f38   :  { %v7287_v43 = vadd.f32 %v6220_v18, %v4017_v26 }
0x1f3a   :  { %4184 = vrot.lane.b32.xlu2 %v7287_v43, %s6509_s2  ;;  %4029 = vrot.lane.b32.xlu0 %v7287_v43, %s6508_s7 }
0x1f42   :  { %4182 = vrot.lane.b32.xlu0 %v7287_v43, %s6507_s0 }
0x1f4a   :  { %4130 = vrot.lane.b32.xlu0 %v7287_v43, %s6511_s1 }
0x1f55   :  { %v3939_v0 = vpop.xlane.xlu0 %3938 }
0x1f56   :  { %v3941_v24 = vmul.f32 %v3939_v0, %v6714_v20 }
0x1f58   :  { %v3953_v45 = vmul.f32 %v3941_v24, %v3941_v24  ;;  %v3957_v39 = vsub.f32 %v3931_v63, %v3941_v24 }
0x1f5d   :  { %v3949_v28 = vpop.xlane.xlu0 %3948 }
0x1f5e   :  { %v3951_v21 = vmul.f32 %v3949_v28, %v6714_v20 }
0x1f60   :  { %v3955_v56 = vsub.f32 %v3951_v21, %v3953_v45 }
0x1f62   :  { %v3959_v32 = vadd.f32 1e-05, %v3955_v56 }
0x1f64   :  { %6396 = vrsqrt.f32 %v3959_v32  ;;  %vm3976_vm10 = vweird.f32 %v3959_v32 }
0x1f6a   :  { %v6397_v33 = vpop.eup %6396 }
0x1f6b   :  { %v3971_v38 = vmul.f32 %v6397_v33, %v3959_v32  ;;  %vm3977_vm9 = vweird.f32 %v6397_v33 }
0x1f6c   :  { %vm3978_vm11 = vmor %vm3976_vm10, %vm3977_vm9 }
0x1f6d   :  { %v3972_v36 = vmul.f32 %v6397_v33, %v3971_v38 }
0x1f6f   :  { %v3973_v30 = vmul.f32 0.5, %v3972_v36 }
0x1f71   :  { %v3974_v10 = vsub.f32 1.5, %v3973_v30 }
0x1f73   :  { %v3975_v46 = vmul.f32 %v6397_v33, %v3974_v10 }
0x1f75   :  { %v3979_v61 = vsel %vm3978_vm11, %v6397_v33, %v3975_v46 }
0x1f76   :  { %v3981_v44 = vmul.f32 %v3979_v61, %v3957_v39 }
0x1f78   :  { %v3984_v47 = vmul.f32 %v6218_v11, %v3981_v44 }
0x1f7a   :  { %v7299_v48 = vadd.f32 %v6219_v14, %v3984_v47 }
0x1f7c   :  { %6085 = vmatmul.msk.f32.gmra.mxu2 %vm117_vm1, %v7299_v48 }
0x1f94   :  { %v4185_v55 = vpop.permute.xlu2 %4184 }
0x1fac   :  { %v4030_v23 = vpop.permute.xlu0 %4029 }
0x1fad   :  { %6086 = vmatpush.xpose.msk.msra.mxu0 %vm47_vm0, %v4030_v23 }
0x1fb0   :  { %6087 = vmatmul.msk.f32.vlgmr.msra.gmra.mxu0 %vm47_vm0, %v7287_v43 }
0x1fb4   :  { %v4183_v49 = vpop.permute.xlu0 %4182 }
0x1fbc   :  { %v4131_v22 = vpop.permute.xlu0 %4130 }
0x1fbd   :  { %4151 = vmatpush.msra.mxu2 %v4131_v22 }
0x1fff   :  { %v4020_v50 = vpop.f32.mrf.mxu2 }
0x2000   :  { %v7306_v51 = vadd.f32 %v6220_v18, %v4020_v50  ;;  %v4023_v18 = vld [vmem:[#allocation2 + $0x468] sm:$0xff] }
0x2002   :  { %4212 = vrot.lane.b32.xlu0 %v7306_v51, %s6509_s2  ;;  %4056 = vrot.lane.b32.xlu1 %v7306_v51, %s6508_s7 }
0x200a   :  { %4210 = vrot.lane.b32.xlu0 %v7306_v51, %s6507_s0 }
0x202d   :  { %v4052_v54 = vpop.f32.mrf.mxu0 }
0x202e   :  { %v4053_v58 = vadd.f32 %v4052_v54, %v6603_v29 }
0x2030   :  { %v4082_v60 = vsel %vm47_vm0, %v4053_v58, -inf }
0x2031   :  { %4083 = vmax.xlane.f32.xlu2 %v4082_v60 }
0x2074   :  { %v4057_v2 = vpop.permute.xlu1 %4056  ;;  %v4213_v53 = vpop.permute.xlu0 %4212 }
0x2075   :  { %6088 = vmatpush.xpose.msk.msra.mxu1 %vm47_vm0, %v4057_v2  ;;  %6094 = vmatpush.xpose.msk.msrb.mxu2 %vm47_vm0, %v4213_v53 }
0x2078   :  { %6089 = vmatmul.msk.f32.vlgmr.msra.gmra.mxu1 %vm47_vm0, %v7306_v51 }
0x2079   :  { %6092 = vmatpush.xpose.msk.msrb.mxu1 %vm47_vm0, %v4185_v55 }
0x207c   :  { %v4211_v63 = vpop.permute.xlu0 %4210 }
0x2080   :  { %6093 = vmatmul.msk.f32.vlgmr.msrb.gmra.mxu1 %vm47_vm0, %v4183_v49 }
0x20a4   :  { %v4084_v4 = vpop.xlane.xlu2 %4083 }
0x20a5   :  { %v4088_v37 = vsub.f32 %v4053_v58, %v4084_v4 }
0x20a7   :  { %v4090_v15 = vmul.f32 1.442695, %v4088_v37 }
0x20a9   :  { %6398 = vpow2.f32 %v4090_v15 }
0x20af   :  { %v6399_v62 = vpop.eup %6398 }
0x20b0   :  { %v4094_v6 = vsel %vm47_vm0, %v6399_v62, 0.0 }
0x20b1   :  { %4095 = vadd.xlane.f32.xlu1 %v4094_v6 }
0x20f5   :  { %v4079_v7 = vpop.f32.mrf.mxu1 }
0x20f6   :  { %v4080_v35 = vadd.f32 %v4079_v7, %v6603_v29 }
0x20f8   :  { %v4085_v42 = vsel %vm47_vm0, %v4080_v35, -inf }
0x20f9   :  { %4086 = vmax.xlane.f32.xlu0 %v4085_v42 }
0x20fd   :  { %v4207_v5 = vpop.f32.mrf.mxu1 }
0x20fe   :  { %v4208_v8 = vadd.f32 %v4207_v5, %v6603_v29 }
0x2100   :  { %v4238_v17 = vsel %vm47_vm0, %v4208_v8, -inf }
0x2101   :  { %4239 = vmax.xlane.f32.xlu2 %v4238_v17 }
0x210d   :  { %4398 = vrot.lane.b32.xlu0 %v7287_v43, %s6513_s13 }
0x2115   :  { %4312 = vrot.lane.b32.xlu0 %v7306_v51, %s6512_s12 }
0x2119   :  { %4156 = vrot.lane.b32.xlu2 %v7306_v51, %s6511_s1 }
0x211d   :  { %4426 = vrot.lane.b32.xlu0 %v7306_v51, %s6513_s13 }
0x2121   :  { %4396 = vrot.lane.b32.xlu2 %v7287_v43, %s6514_s14 }
0x2124   :  { %v4096_v19 = vpop.xlane.xlu1 %4095 }
0x2125   :  { %6400 = vrcp.f32 %v4096_v19  ;;  %4585 = vrot.lane.b32.xlu0 %v7287_v43, %s6516_s16  ;;  %v4111_v12 = vand.u32 2147483648, %v4096_v19  ;;  %v4109_v9 = vand.u32 2147483647, %v4096_v19  ;;  %vm4105_vm13 = vweird.f32 %v4096_v19 }
0x2127   :  { %v4112_v16 = vor.u32 1.1754944e-38, %v4111_v12  ;;  %vm4110_vm15 = vcmp.eq.f32.partialorder %v4109_v9, 8.507059e+37 }
0x212b   :  { %v6401_v57 = vpop.eup %6400 }
0x212c   :  { %v4101_v52 = vmul.f32 %v6401_v57, %v4096_v19  ;;  %vm4106_vm12 = vweird.f32 %v6401_v57 }
0x212d   :  { %4424 = vrot.lane.b32.xlu0 %v7306_v51, %s6514_s14  ;;  %vm4107_vm14 = vmor %vm4105_vm13, %vm4106_vm12 }
0x212e   :  { %v4102_v31 = vsub.f32 1.0, %v4101_v52 }
0x2130   :  { %v4103_v11 = vmul.f32 %v6401_v57, %v4102_v31 }
0x2132   :  { %v4104_v14 = vadd.f32 %v6401_v57, %v4103_v11 }
0x2134   :  { %v4108_v13 = vsel %vm4107_vm14, %v6401_v57, %v4104_v14 }
0x2135   :  { %v4113_v3 = vsel %vm4110_vm15, %v4112_v16, %v4108_v13  ;;  %4583 = vrot.lane.b32.xlu0 %v7287_v43, %s6517_s17 }
0x2136   :  { %v4128_v59 = vmul.f32 %v6399_v62, %v4113_v3 }
0x2138   :  { %6090 = vmatmul.msk.f32.vlgmr.msra.gmra.mxu2 %vm47_vm0, %v4128_v59  ;;  %v4024_v59 = vld [vmem:[#allocation2 + $0x470] sm:$0xff] }
0x2139   :  { %4388 = vmatpush.msra.mxu2 %v4023_v18  ;;  %4359 = vmatpush.msra.mxu3 %v4024_v59 }
0x213d   :  { %4500 = vrot.lane.b32.xlu0 %v7287_v43, %s6515_s15 }
0x2140   :  { %6095 = vmatmul.msk.f32.vlgmr.msrb.gmra.mxu2 %vm47_vm0, %v4211_v63 }
0x216c   :  { %v4087_v25 = vpop.xlane.xlu0 %4086 }
0x216d   :  { %v4089_v27 = vsub.f32 %v4080_v35, %v4087_v25 }
0x216f   :  { %v4092_v41 = vmul.f32 1.442695, %v4089_v27 }
0x2171   :  { %6402 = vpow2.f32 %v4092_v41 }
0x2174   :  { %v4240_v26 = vpop.xlane.xlu2 %4239 }
0x2175   :  { %v4244_v0 = vsub.f32 %v4208_v8, %v4240_v26 }
0x2177   :  { %v6403_v24 = vpop.eup %6402  ;;  %v4246_v28 = vmul.f32 1.442695, %v4244_v0 }
0x2178   :  { %v4097_v45 = vsel %vm47_vm0, %v6403_v24, 0.0 }
0x2179   :  { %6404 = vpow2.f32 %v4246_v28  ;;  %4098 = vadd.xlane.f32.xlu1 %v4097_v45 }
0x217c   :  { %v4157_v21 = vpop.permute.xlu2 %4156 }
0x217d   :  { %4177 = vmatpush.msrb.mxu0 %v4157_v21 }
0x217f   :  { %v6405_v56 = vpop.eup %6404  ;;  %v4399_v32 = vpop.permute.xlu0 %4398 }
0x2180   :  { %v4250_v33 = vsel %vm47_vm0, %v6405_v56, 0.0 }
0x2181   :  { %4251 = vadd.xlane.f32.xlu1 %v4250_v33 }
0x2184   :  { %v4397_v11 = vpop.permute.xlu2 %4396 }
0x2187   :  { %v4313_v38 = vpop.permute.xlu0 %4312 }
0x2188   :  { %4333 = vmatpush.msra.mxu1 %v4313_v38 }
0x218f   :  { %v4427_v36 = vpop.permute.xlu0 %4426 }
0x2190   :  { %6104 = vmatpush.xpose.msk.msrb.mxu1 %vm47_vm0, %v4427_v36 }
0x2197   :  { %v4586_v30 = vpop.permute.xlu0 %4585 }
0x2198   :  { %6110 = vmatpush.xpose.msk.msrb.mxu2 %vm47_vm0, %v4586_v30 }
0x219a   :  { %4286 = vrot.lane.b32.xlu1 %v7287_v43, %s6512_s12 }
0x219f   :  { %v7356_v53 = vpop.permute.xlu0 %4424 }
0x21a7   :  { %v4584_v8 = vpop.permute.xlu0 %4583 }
0x21af   :  { %v4501_v12 = vpop.permute.xlu0 %4500 }
0x21bb   :  { %v4153_v10 = vpop.f32.mrf.mxu2 }
0x21bc   :  { %6100 = vmatmul.msk.f32.vlgmr.msra.gmra.mxu2 %vm47_vm0, %v4153_v10 }
0x21c3   :  { %v4235_v46 = vpop.f32.mrf.mxu2 }
0x21c4   :  { %v4236_v39 = vadd.f32 %v4235_v46, %v6603_v29 }
0x21c6   :  { %v4241_v61 = vsel %vm47_vm0, %v4236_v39, -inf }
0x21c7   :  { %4242 = vmax.xlane.f32.xlu2 %v4241_v61 }
0x21ec   :  { %v4099_v44 = vpop.xlane.xlu1 %4098 }
0x21ed   :  { %6406 = vrcp.f32 %v4099_v44  ;;  %v4125_v50 = vand.u32 2147483648, %v4099_v44  ;;  %v4123_v58 = vand.u32 2147483647, %v4099_v44  ;;  %vm4119_vm3 = vweird.f32 %v4099_v44 }
0x21ef   :  { %v4126_v55 = vor.u32 1.1754944e-38, %v4125_v50  ;;  %vm4124_vm5 = vcmp.eq.f32.partialorder %v4123_v58, 8.507059e+37 }
0x21f3   :  { %v6407_v47 = vpop.eup %6406 }
0x21f4   :  { %v4115_v23 = vmul.f32 %v6407_v47, %v4099_v44  ;;  %v4252_v49 = vpop.xlane.xlu1 %4251  ;;  %vm4120_vm2 = vweird.f32 %v6407_v47 }
0x21f5   :  { %6408 = vrcp.f32 %v4252_v49  ;;  %vm4121_vm4 = vmor %vm4119_vm3, %vm4120_vm2  ;;  %v4267_v42 = vand.u32 2147483648, %v4252_v49  ;;  %vm4261_vm7 = vweird.f32 %v4252_v49  ;;  %v4265_v5 = vand.u32 2147483647, %v4252_v49 }
0x21f6   :  { %v4116_v22 = vsub.f32 1.0, %v4115_v23 }
0x21f7   :  { %v4268_v19 = vor.u32 1.1754944e-38, %v4267_v42  ;;  %vm4266_vm9 = vcmp.eq.f32.partialorder %v4265_v5, 8.507059e+37 }
0x21f8   :  { %v4117_v54 = vmul.f32 %v6407_v47, %v4116_v22 }
0x21fa   :  { %v4118_v60 = vadd.f32 %v6407_v47, %v4117_v54 }
0x21fb   :  { %v6409_v2 = vpop.eup %6408 }
0x21fc   :  { %v4122_v4 = vsel %vm4121_vm4, %v6407_v47, %v4118_v60  ;;  %v4257_v37 = vmul.f32 %v6409_v2, %v4252_v49  ;;  %vm4262_vm6 = vweird.f32 %v6409_v2 }
0x21fd   :  { %v4127_v15 = vsel %vm4124_vm5, %v4126_v55, %v4122_v4  ;;  %vm4263_vm8 = vmor %vm4261_vm7, %vm4262_vm6 }
0x21fe   :  { %v4129_v62 = vmul.f32 %v6403_v24, %v4127_v15  ;;  %v4258_v6 = vsub.f32 1.0, %v4257_v37 }
0x2200   :  { %v4259_v7 = vmul.f32 %v6409_v2, %v4258_v6  ;;  %6091 = vmatmul.msk.f32.vlgmr.msrb.gmra.mxu0 %vm47_vm0, %v4129_v62 }
0x2202   :  { %v4260_v35 = vadd.f32 %v6409_v2, %v4259_v7 }
0x2204   :  { %v4264_v17 = vsel %vm4263_vm8, %v6409_v2, %v4260_v35 }
0x2205   :  { %v4269_v57 = vsel %vm4266_vm9, %v4268_v19, %v4264_v17 }
0x2206   :  { %v4284_v52 = vmul.f32 %v6405_v56, %v4269_v57 }
0x220c   :  { %v4287_v31 = vpop.permute.xlu1 %4286 }
0x220d   :  { %4307 = vmatpush.msra.mxu0 %v4287_v31 }
0x220e   :  { %6096 = vmatmul.msk.f32.vlgmr.msra.gmra.mxu0 %vm47_vm0, %v4284_v52 }
0x220f   :  { %6102 = vmatpush.xpose.msk.msrb.mxu0 %vm47_vm0, %v4399_v32 }
0x2213   :  { %4521 = vmatpush.msra.mxu0 %v4501_v12 }
0x2216   :  { %6103 = vmatmul.msk.f32.vlgmr.msrb.gmra.mxu0 %vm47_vm0, %v4397_v11 }
0x223a   :  { %v4243_v9 = vpop.xlane.xlu2 %4242 }
0x223b   :  { %v4245_v14 = vsub.f32 %v4236_v39, %v4243_v9 }
0x223d   :  { %v4248_v16 = vmul.f32 1.442695, %v4245_v14 }
0x223f   :  { %6410 = vpow2.f32 %v4248_v16  ;;  %v7373_v10 = vpop.f32.mrf.mxu2 }
0x2245   :  { %v6411_v13 = vpop.eup %6410 }
0x2246   :  { %v4253_v3 = vsel %vm47_vm0, %v6411_v13, 0.0 }
0x2247   :  { %4254 = vadd.xlane.f32.xlu1 %v4253_v3  ;;  %v4025_v3 = vld [vmem:[#allocation2 + $0x478] sm:$0xff] }
0x2248   :  { %4573 = vmatpush.msrb.mxu3 %v4025_v3 }
0x227d   :  { %v4179_v63 = vpop.f32.mrf.mxu0 }
0x227e   :  { %6101 = vmatmul.msk.f32.gmra.mxu2 %vm47_vm0, %v4179_v63 }
0x2286   :  { %6111 = vmatmul.msk.f32.vlgmr.msrb.gmra.mxu2 %vm47_vm0, %v4584_v8 }
0x228b   :  { %v4309_v25 = vpop.f32.mrf.mxu0 }
0x228c   :  { %6098 = vmatmul.msk.f32.vlgmr.msra.gmra.mxu3 %vm47_vm0, %v4309_v25 }
0x2293   :  { %v4421_v27 = vpop.f32.mrf.mxu0 }
0x2294   :  { %v4422_v41 = vadd.f32 %v4421_v27, %v6603_v29 }
0x2296   :  { %v4452_v18 = vsel %vm47_vm0, %v4422_v41, -inf }
0x2297   :  { %4453 = vmax.xlane.f32.xlu2 %v4452_v18 }
0x22af   :  { %4613 = vrot.lane.b32.xlu2 %v7306_v51, %s6516_s16 }
0x22ba   :  { %v4255_v26 = vpop.xlane.xlu1 %4254 }
0x22bb   :  { %6412 = vrcp.f32 %v4255_v26  ;;  %v4281_v45 = vand.u32 2147483648, %v4255_v26  ;;  %v4279_v56 = vand.u32 2147483647, %v4255_v26  ;;  %vm4275_vm11 = vweird.f32 %v4255_v26 }
0x22bd   :  { %v4282_v33 = vor.u32 1.1754944e-38, %v4281_v45  ;;  %vm4280_vm13 = vcmp.eq.f32.partialorder %v4279_v56, 8.507059e+37 }
0x22c1   :  { %v6413_v0 = vpop.eup %6412 }
0x22c2   :  { %v4271_v24 = vmul.f32 %v6413_v0, %v4255_v26  ;;  %vm4276_vm10 = vweird.f32 %v6413_v0 }
0x22c3   :  { %vm4277_vm12 = vmor %vm4275_vm11, %vm4276_vm10 }
0x22c4   :  { %v4272_v28 = vsub.f32 1.0, %v4271_v24 }
0x22c6   :  { %v4273_v21 = vmul.f32 %v6413_v0, %v4272_v28 }
0x22c8   :  { %v4274_v32 = vadd.f32 %v6413_v0, %v4273_v21 }
0x22ca   :  { %v4278_v38 = vsel %vm4277_vm12, %v6413_v0, %v4274_v32 }
0x22cb   :  { %v4283_v36 = vsel %vm4280_vm13, %v4282_v33, %v4278_v38 }
0x22cc   :  { %v4285_v30 = vmul.f32 %v6411_v13, %v4283_v36 }
0x22ce   :  { %6097 = vmatmul.msk.f32.vlgmr.msra.gmra.mxu1 %vm47_vm0, %v4285_v30 }
0x22d6   :  { %6105 = vmatmul.msk.f32.vlgmr.msrb.gmra.mxu1 %vm47_vm0, %v7356_v53 }
0x2301   :  { %v7375_v46 = vpop.f32.mrf.mxu2 }
0x2309   :  { %v4608_v39 = vpop.f32.mrf.mxu2 }
0x230a   :  { %v4609_v61 = vadd.f32 %v4608_v39, %v6603_v29  ;;  %v4454_v44 = vpop.xlane.xlu2 %4453 }
0x230b   :  { %v4458_v47 = vsub.f32 %v4422_v41, %v4454_v44 }
0x230c   :  { %v4639_v23 = vsel %vm47_vm0, %v4609_v61, -inf }
0x230d   :  { %v4460_v49 = vmul.f32 1.442695, %v4458_v47  ;;  %4640 = vmax.xlane.f32.xlu2 %v4639_v23 }
0x230f   :  { %6414 = vpow2.f32 %v4460_v49 }
0x2312   :  { %v4614_v22 = vpop.permute.xlu2 %4613 }
0x2313   :  { %6112 = vmatpush.xpose.msk.msrb.mxu0 %vm47_vm0, %v4614_v22 }
0x2315   :  { %v6415_v50 = vpop.eup %6414 }
0x2316   :  { %v4464_v54 = vsel %vm47_vm0, %v6415_v50, 0.0 }
0x2317   :  { %4465 = vadd.xlane.f32.xlu1 %v4464_v54 }
0x2325   :  { %4687 = vrot.lane.b32.xlu2 %v7287_v43, %s6518_s18 }
0x2330   :  { %4611 = vrot.lane.b32.xlu1 %v7306_v51, %s6517_s17 }
0x234b   :  { %v4335_v58 = vpop.f32.mrf.mxu1 }
0x234c   :  { %6099 = vmatmul.msk.f32.gmra.mxu3 %vm47_vm0, %v4335_v58 }
0x2353   :  { %v4449_v60 = vpop.f32.mrf.mxu1 }
0x2354   :  { %v4450_v2 = vadd.f32 %v4449_v60, %v6603_v29 }
0x2356   :  { %v4455_v53 = vsel %vm47_vm0, %v4450_v2, -inf }
0x2357   :  { %4456 = vmax.xlane.f32.xlu0 %v4455_v53 }
0x2380   :  { %v4641_v55 = vpop.xlane.xlu2 %4640 }
0x2381   :  { %v4645_v4 = vsub.f32 %v4609_v61, %v4641_v55 }
0x2383   :  { %v4647_v37 = vmul.f32 1.442695, %v4645_v4 }
0x2385   :  { %6416 = vpow2.f32 %v4647_v37 }
0x2388   :  { %v4688_v25 = vpop.permute.xlu2 %4687 }
0x238a   :  { %v4466_v15 = vpop.xlane.xlu1 %4465 }
0x238b   :  { %v7388_v62 = vpop.eup %6416  ;;  %6418 = vrcp.f32 %v4466_v15  ;;  %v4481_v42 = vand.u32 2147483648, %v4466_v15  ;;  %v4479_v8 = vand.u32 2147483647, %v4466_v15  ;;  %vm4475_vm15 = vweird.f32 %v4466_v15 }
0x238c   :  { %v4651_v43 = vsel %vm47_vm0, %v7388_v62, 0.0 }
0x238d   :  { %4652 = vadd.xlane.f32.xlu0 %v4651_v43  ;;  %v4482_v19 = vor.u32 1.1754944e-38, %v4481_v42  ;;  %vm4480_vm3 = vcmp.eq.f32.partialorder %v4479_v8, 8.507059e+37  ;;  %v4868_v43 = vld [vmem:[#allocation2 + $0x4c8] sm:$0xff] }
0x2391   :  { %v6419_v6 = vpop.eup %6418 }
0x2392   :  { %v4471_v7 = vmul.f32 %v6419_v6, %v4466_v15  ;;  %vm4476_vm14 = vweird.f32 %v6419_v6  ;;  %v4869_v15 = vld [vmem:[#allocation2 + $0x4d0] sm:$0xff] }
0x2393   :  { %vm4477_vm2 = vmor %vm4475_vm15, %vm4476_vm14  ;;  %4884 = vmatpush.msra.mxu3 %v4869_v15 }
0x2394   :  { %v4472_v35 = vsub.f32 1.0, %v4471_v7  ;;  %v4026_v7 = vld [vmem:[#allocation2 + $0x480] sm:$0xff] }
0x2395   :  { %4885 = vmatpush.msra.mxu3 %v4868_v43 }
0x2396   :  { %v4473_v5 = vmul.f32 %v6419_v6, %v4472_v35 }
0x2398   :  { %v4474_v17 = vadd.f32 %v6419_v6, %v4473_v5 }
0x239a   :  { %v4478_v57 = vsel %vm4477_vm2, %v6419_v6, %v4474_v17  ;;  %v4867_v6 = vld [vmem:[#allocation2 + $0x4c0] sm:$0xff] }
0x239b   :  { %v4483_v52 = vsel %vm4480_vm3, %v4482_v19, %v4478_v57  ;;  %4886 = vmatpush.msra.mxu3 %v4867_v6 }
0x239c   :  { %v4498_v31 = vmul.f32 %v6415_v50, %v4483_v52 }
0x239e   :  { %6106 = vmatmul.msk.f32.vlgmr.msra.gmra.mxu0 %vm47_vm0, %v4498_v31 }
0x239f   :  { %4760 = vmatpush.msra.mxu0 %v4026_v7 }
0x23a1   :  { %4526 = vrot.lane.b32.xlu0 %v7306_v51, %s6515_s15 }
0x23a2   :  { %v4612_v12 = vpop.permute.xlu1 %4611 }
0x23a6   :  { %6113 = vmatmul.msk.f32.vlgmr.msrb.gmra.mxu0 %vm47_vm0, %v4612_v12 }
0x23ca   :  { %v4457_v11 = vpop.xlane.xlu0 %4456 }
0x23cb   :  { %v4459_v9 = vsub.f32 %v4450_v2, %v4457_v11 }
0x23cd   :  { %v4462_v14 = vmul.f32 1.442695, %v4459_v9 }
0x23cf   :  { %6420 = vpow2.f32 %v4462_v14 }
0x23d5   :  { %v6421_v16 = vpop.eup %6420 }
0x23d6   :  { %v4467_v13 = vsel %vm47_vm0, %v6421_v16, 0.0 }
0x23d7   :  { %4468 = vadd.xlane.f32.xlu1 %v4467_v13 }
0x2400   :  { %v4653_v59 = vpop.xlane.xlu0 %4652 }
0x2401   :  { %6422 = vrcp.f32 %v4653_v59  ;;  %v4668_v44 = vand.u32 2147483648, %v4653_v59  ;;  %vm4662_vm9 = vweird.f32 %v4653_v59  ;;  %v4666_v23 = vand.u32 2147483647, %v4653_v59 }
0x2403   :  { %v4669_v50 = vor.u32 1.1754944e-38, %v4668_v44  ;;  %vm4667_vm11 = vcmp.eq.f32.partialorder %v4666_v23, 8.507059e+37 }
0x2407   :  { %v6423_v24 = vpop.eup %6422 }
0x2408   :  { %v4658_v28 = vmul.f32 %v6423_v24, %v4653_v59  ;;  %vm4663_vm7 = vweird.f32 %v6423_v24 }
0x2409   :  { %vm4664_vm10 = vmor %vm4662_vm9, %vm4663_vm7 }
0x240a   :  { %v4659_v21 = vsub.f32 1.0, %v4658_v28 }
0x240c   :  { %v4660_v38 = vmul.f32 %v6423_v24, %v4659_v21 }
0x240e   :  { %v4661_v61 = vadd.f32 %v6423_v24, %v4660_v38  ;;  %v4833_v38 = vld [vmem:[#allocation2 + $0x4a0] sm:$0xff] }
0x2410   :  { %v4665_v22 = vsel %vm4664_vm10, %v6423_v24, %v4661_v61 }
0x2411   :  { %v4670_v54 = vsel %vm4667_vm11, %v4669_v50, %v4665_v22 }
0x2412   :  { %v4685_v58 = vmul.f32 %v7388_v62, %v4670_v54  ;;  %v4866_v62 = vld [vmem:[#allocation2 + $0x4b8] sm:$0xff] }
0x2413   :  { %v4527_v63 = vpop.permute.xlu0 %4526  ;;  %4887 = vmatpush.msra.mxu3 %v4866_v62 }
0x2414   :  { %4547 = vmatpush.msra.mxu1 %v4527_v63 }
0x2416   :  { %4708 = vmatpush.msrb.mxu1 %v4688_v25  ;;  %v6221_v25 = vld [vmem:[#allocation2 + $0x488] ss:$0 sm:$0xff] }
0x241b   :  { %v4523_v27 = vpop.f32.mrf.mxu0 }
0x241c   :  { %6108 = vmatmul.msk.f32.vlgmr.msrb.gmra.mxu3 %vm47_vm0, %v4523_v27 }
0x2423   :  { %v4636_v41 = vpop.f32.mrf.mxu0 }
0x2424   :  { %v4637_v18 = vadd.f32 %v4636_v41, %v6603_v29 }
0x2426   :  { %v4642_v26 = vsel %vm47_vm0, %v4637_v18, -inf }
0x2427   :  { %4643 = vmax.xlane.f32.xlu1 %v4642_v26  ;;  %v6222_v26 = vld [vmem:[#allocation2 + $0x4d8] ss:$0 sm:$0xff] }
0x2440   :  { %4713 = vrot.lane.b32.xlu1 %v7306_v51, %s6518_s18 }
0x244a   :  { %v4469_v0 = vpop.xlane.xlu1 %4468 }
0x244b   :  { %6424 = vrcp.f32 %v4469_v0  ;;  %v4495_v33 = vand.u32 2147483648, %v4469_v0  ;;  %v4493_v29 = vand.u32 2147483647, %v4469_v0  ;;  %vm4489_vm5 = vweird.f32 %v4469_v0 }
0x244d   :  { %v4496_v39 = vor.u32 1.1754944e-38, %v4495_v33  ;;  %vm4494_vm8 = vcmp.eq.f32.partialorder %v4493_v29, 8.507059e+37  ;;  %v4834_v33 = vld [vmem:[#allocation2 + $0x4a8] sm:$0xff]  ;;  %v4831_v29 = vld [vmem:[#allocation2 + $0x490] sm:$0xff] }
0x2451   :  { %v6425_v45 = vpop.eup %6424 }
0x2452   :  { %v4485_v56 = vmul.f32 %v6425_v45, %v4469_v0  ;;  %vm4490_vm4 = vweird.f32 %v6425_v45 }
0x2453   :  { %vm4491_vm6 = vmor %vm4489_vm5, %vm4490_vm4 }
0x2454   :  { %v4486_v32 = vsub.f32 1.0, %v4485_v56 }
0x2456   :  { %v4487_v36 = vmul.f32 %v6425_v45, %v4486_v32 }
0x2458   :  { %v4488_v30 = vadd.f32 %v6425_v45, %v4487_v36  ;;  %v4832_v36 = vld [vmem:[#allocation2 + $0x498] sm:$0xff] }
0x245a   :  { %v4492_v51 = vsel %vm4491_vm6, %v6425_v45, %v4488_v30 }
0x245b   :  { %v4497_v47 = vsel %vm4494_vm8, %v4496_v39, %v4492_v51 }
0x245c   :  { %v4499_v49 = vmul.f32 %v6421_v16, %v4497_v47 }
0x245e   :  { %6107 = vmatmul.msk.f32.vlgmr.msra.gmra.mxu1 %vm47_vm0, %v4499_v49 }
0x245f   :  { %4855 = vmatpush.msra.mxu1 %v4834_v33 }
0x2461   :  { %4856 = vmatpush.msra.mxu1 %v4833_v38 }
0x2463   :  { %4857 = vmatpush.msra.mxu1 %v4832_v36 }
0x2465   :  { %4858 = vmatpush.msra.mxu1 %v4831_v29 }
0x2466   :  { %6114 = vmatmul.msk.f32.vlgmr.msrb.gmra.mxu1 %vm47_vm0, %v4685_v58 }
0x249a   :  { %v4644_v60 = vpop.xlane.xlu1 %4643 }
0x249b   :  { %v4646_v2 = vsub.f32 %v4637_v18, %v4644_v60 }
0x249d   :  { %v4649_v53 = vmul.f32 1.442695, %v4646_v2 }
0x249f   :  { %6426 = vpow2.f32 %v4649_v53 }
0x24a5   :  { %v6427_v55 = vpop.eup %6426 }
0x24a6   :  { %v4654_v4 = vsel %vm47_vm0, %v6427_v55, 0.0 }
0x24a7   :  { %4655 = vadd.xlane.f32.xlu0 %v4654_v4 }
0x24b2   :  { %v4714_v37 = vpop.permute.xlu1 %4713 }
0x24b3   :  { %4734 = vmatpush.msra.mxu2 %v4714_v37  ;;  %v6224_v37 = vld [vmem:[#allocation2 + $0x5c0] ss:$0 sm:$0xff] }
0x24db   :  { %v4549_v35 = vpop.f32.mrf.mxu1 }
0x24dc   :  { %6109 = vmatmul.msk.f32.gmra.mxu3 %vm47_vm0, %v4549_v35 }
0x24e3   :  { %v4710_v42 = vpop.f32.mrf.mxu1 }
0x24e4   :  { %6116 = vmatmul.msk.f32.vlgmr.msra.gmra.mxu0 %vm47_vm0, %v4710_v42  ;;  %6120 = vmatmul.msk.f32.vlgmr.msra.gmra.mxu3 %vm117_vm1, %v7082_v1 }
0x24ec   :  { %6121 = vmatmul.msk.f32.gmra.mxu3 %vm117_vm1, %v7129_v34  ;;  %v4361_v34 = vpop.f32.mrf.mxu3 }
0x24ed   :  { %v4391_v3 = vadd.f32 %v7373_v10, %v4361_v34 }
0x24f4   :  { %v4364_v16 = vpop.f32.mrf.mxu3 }
0x24f5   :  { %v4394_v7 = vadd.f32 %v7375_v46, %v4364_v16 }
0x24fc   :  { %v4575_v13 = vpop.f32.mrf.mxu3 }
0x24fd   :  { %v4581_v63 = vadd.f32 %v4575_v13, %v4391_v3 }
0x251a   :  { %v4656_v5 = vpop.xlane.xlu0 %4655 }
0x251b   :  { %6428 = vrcp.f32 %v4656_v5  ;;  %v4682_v57 = vand.u32 2147483648, %v4656_v5  ;;  %v4680_v31 = vand.u32 2147483647, %v4656_v5  ;;  %vm4676_vm13 = vweird.f32 %v4656_v5 }
0x251d   :  { %v4683_v11 = vor.u32 1.1754944e-38, %v4682_v57  ;;  %vm4681_vm15 = vcmp.eq.f32.partialorder %v4680_v31, 8.507059e+37 }
0x2521   :  { %v6429_v8 = vpop.eup %6428 }
0x2522   :  { %v4672_v17 = vmul.f32 %v6429_v8, %v4656_v5  ;;  %vm4677_vm12 = vweird.f32 %v6429_v8 }
0x2523   :  { %vm4678_vm14 = vmor %vm4676_vm13, %vm4677_vm12 }
0x2524   :  { %v4673_v19 = vsub.f32 1.0, %v4672_v17 }
0x2526   :  { %v4674_v52 = vmul.f32 %v6429_v8, %v4673_v19 }
0x2528   :  { %v4675_v12 = vadd.f32 %v6429_v8, %v4674_v52  ;;  %v6225_v52 = vld [vmem:[#allocation2 + $0x4b0] ss:$0 sm:$0xff] }
0x252a   :  { %v4679_v9 = vsel %vm4678_vm14, %v6429_v8, %v4675_v12 }
0x252b   :  { %v4684_v14 = vsel %vm4681_vm15, %v4683_v11, %v4679_v9 }
0x252c   :  { %v4686_v1 = vmul.f32 %v6427_v55, %v4684_v14  ;;  %v6223_v55 = vld [vmem:[#allocation2 + $0x5b8] ss:$0 sm:$0xff] }
0x252e   :  { %6115 = vmatmul.msk.f32.vlgmr.msra.gmra.mxu2 %vm47_vm0, %v4686_v1 }
0x255f   :  { %v4578_v59 = vpop.f32.mrf.mxu3 }
0x2560   :  { %v4582_v62 = vadd.f32 %v4578_v59, %v4394_v7 }
0x2561   :  { %v4762_v27 = vpop.f32.mrf.mxu0 }
0x2562   :  { %v4768_v41 = vadd.f32 %v4762_v27, %v4581_v63 }
0x2564   :  { %v4771_v18 = vadd.f32 %v6221_v25, %v4768_v41 }
0x2566   :  { %v4773_v0 = vadd.f32 %v4771_v18, %v7281_v40 }
0x2567   :  { %v4889_v24 = vpop.f32.mrf.mxu3 }
0x2568   :  { %v7415_v28 = vadd.f32 %v6222_v26, %v4889_v24  ;;  %v4777_v45 = vsel %vm117_vm1, %v4773_v0, 0.0  ;;  %v4785_v21 = vmul.f32 %v4773_v0, %v4773_v0 }
0x2569   :  { %4778 = vadd.xlane.f32.xlu2 %v4777_v45 }
0x256a   :  { %6122 = vmatpush.xpose.msk.msrb.mxu2 %vm47_vm0, %v7415_v28  ;;  %v4787_v10 = vsel %vm117_vm1, %v4785_v21, 0.0 }
0x256b   :  { %4788 = vadd.xlane.f32.xlu1 %v4787_v10 }
0x256f   :  { %v4892_v56 = vpop.f32.mrf.mxu3 }
0x2570   :  { %v7421_v32 = vadd.f32 %v6222_v26, %v4892_v56 }
0x2572   :  { %6124 = vmatpush.xpose.msk.msra.mxu2 %vm47_vm0, %v7421_v32 }
0x2581   :  { %5054 = vrot.lane.b32.xlu2 %v7415_v28, %s6507_s0 }
0x25b1   :  { %v4736_v40 = vpop.f32.mrf.mxu2 }
0x25b2   :  { %6117 = vmatmul.msk.f32.gmra.mxu0 %vm47_vm0, %v4736_v40 }
0x25dc   :  { %v4779_v30 = vpop.xlane.xlu2 %4778 }
0x25dd   :  { %v4783_v39 = vmul.f32 %v4779_v30, %v6714_v20 }
0x25de   :  { %v4789_v61 = vpop.xlane.xlu1 %4788 }
0x25df   :  { %v4795_v51 = vmul.f32 %v4783_v39, %v4783_v39  ;;  %v4793_v44 = vmul.f32 %v4789_v61, %v6714_v20  ;;  %v4799_v53 = vsub.f32 %v4773_v0, %v4783_v39 }
0x25e1   :  { %v4797_v47 = vsub.f32 %v4793_v44, %v4795_v51 }
0x25e3   :  { %v4801_v23 = vadd.f32 1e-05, %v4797_v47 }
0x25e4   :  { %v5055_v49 = vpop.permute.xlu2 %5054 }
0x25e5   :  { %6430 = vrsqrt.f32 %v4801_v23  ;;  %6128 = vmatpush.xpose.msk.msrb.mxu3 %vm47_vm0, %v5055_v49  ;;  %vm4809_vm3 = vweird.f32 %v4801_v23 }
0x25eb   :  { %v6431_v22 = vpop.eup %6430 }
0x25ec   :  { %v4804_v50 = vmul.f32 %v6431_v22, %v4801_v23  ;;  %vm4810_vm2 = vweird.f32 %v6431_v22 }
0x25ed   :  { %vm4811_vm4 = vmor %vm4809_vm3, %vm4810_vm2 }
0x25ee   :  { %v4805_v54 = vmul.f32 %v6431_v22, %v4804_v50 }
0x25f0   :  { %v4806_v58 = vmul.f32 0.5, %v4805_v54 }
0x25f2   :  { %v4807_v60 = vsub.f32 1.5, %v4806_v58 }
0x25f4   :  { %v4808_v2 = vmul.f32 %v6431_v22, %v4807_v60 }
0x25f6   :  { %v4812_v4 = vsel %vm4811_vm4, %v6431_v22, %v4808_v2 }
0x25f7   :  { %v4823_v15 = vmul.f32 %v4812_v4, %v4799_v53 }
0x25f9   :  { %v4826_v43 = vmul.f32 %v6223_v55, %v4823_v15 }
0x25fb   :  { %v7431_v6 = vadd.f32 %v6224_v37, %v4826_v43 }
0x25fd   :  { %6118 = vmatmul.msk.f32.vlgmr.msra.gmra.mxu1 %vm117_vm1, %v7431_v6 }
0x262f   :  { %v4765_v35 = vpop.f32.mrf.mxu0 }
0x2630   :  { %v4769_v42 = vadd.f32 %v4765_v35, %v4582_v62 }
0x2632   :  { %v4772_v5 = vadd.f32 %v6221_v25, %v4769_v42 }
0x2634   :  { %v4774_v8 = vadd.f32 %v4772_v5, %v7299_v48 }
0x2636   :  { %v4780_v17 = vsel %vm117_vm1, %v4774_v8, 0.0  ;;  %v4786_v19 = vmul.f32 %v4774_v8, %v4774_v8 }
0x2637   :  { %4781 = vadd.xlane.f32.xlu0 %v4780_v17 }
0x2638   :  { %v4790_v57 = vsel %vm117_vm1, %v4786_v19, 0.0 }
0x263f   :  { %4791 = vadd.xlane.f32.xlu0 %v4790_v57 }
0x267a   :  { %v4860_v31 = vpop.f32.mrf.mxu1 }
0x267b   :  { %v7439_v12 = vadd.f32 %v6225_v52, %v4860_v31 }
0x267d   :  { %6123 = vmatmul.msk.f32.vlgmr.msrb.gmra.mxu2 %vm47_vm0, %v7439_v12  ;;  %5052 = vrot.lane.b32.xlu0 %v7439_v12, %s6507_s0 }
0x26aa   :  { %v4782_v46 = vpop.xlane.xlu0 %4781 }
0x26ab   :  { %v4784_v48 = vmul.f32 %v4782_v46, %v6714_v20 }
0x26ad   :  { %v4796_v9 = vmul.f32 %v4784_v48, %v4784_v48  ;;  %v4800_v27 = vsub.f32 %v4774_v8, %v4784_v48  ;;  %v4895_v48 = vld [vmem:[#allocation2 + $0x4e0] sm:$0xff] }
0x26b2   :  { %v4792_v11 = vpop.xlane.xlu0 %4791 }
0x26b3   :  { %v4794_v14 = vmul.f32 %v4792_v11, %v6714_v20 }
0x26b5   :  { %v4798_v1 = vsub.f32 %v4794_v14, %v4796_v9 }
0x26b7   :  { %v4802_v34 = vadd.f32 1e-05, %v4798_v1 }
0x26b9   :  { %6432 = vrsqrt.f32 %v4802_v34  ;;  %vm4819_vm6 = vweird.f32 %v4802_v34 }
0x26bf   :  { %v6433_v16 = vpop.eup %6432 }
0x26c0   :  { %v4814_v13 = vmul.f32 %v6433_v16, %v4802_v34  ;;  %vm4820_vm5 = vweird.f32 %v6433_v16 }
0x26c1   :  { %vm4821_vm7 = vmor %vm4819_vm6, %vm4820_vm5 }
0x26c2   :  { %v4815_v3 = vmul.f32 %v6433_v16, %v4814_v13 }
0x26c4   :  { %v4816_v59 = vmul.f32 0.5, %v4815_v3 }
0x26c6   :  { %v4817_v63 = vsub.f32 1.5, %v4816_v59 }
0x26c8   :  { %v4818_v25 = vmul.f32 %v6433_v16, %v4817_v63 }
0x26ca   :  { %v4822_v41 = vsel %vm4821_vm7, %v6433_v16, %v4818_v25 }
0x26cb   :  { %v4824_v18 = vmul.f32 %v4822_v41, %v4800_v27 }
0x26cd   :  { %v4827_v26 = vmul.f32 %v6223_v55, %v4824_v18 }
0x26cf   :  { %v7447_v0 = vadd.f32 %v6224_v37, %v4827_v26 }
0x26d1   :  { %6119 = vmatmul.msk.f32.gmra.mxu1 %vm117_vm1, %v7447_v0 }
0x26ef   :  { %v5053_v24 = vpop.permute.xlu0 %5052 }
0x26f0   :  { %6129 = vmatmul.msk.f32.vlgmr.msrb.gmra.mxu3 %vm47_vm0, %v5053_v24 }
0x2700   :  { %v4923_v45 = vpop.f32.mrf.mxu2 }
0x2701   :  { %v4952_v21 = vsel %vm47_vm0, %v4923_v45, -inf }
0x2702   :  { %4953 = vmax.xlane.f32.xlu1 %v4952_v21 }
0x274e   :  { %v4863_v10 = vpop.f32.mrf.mxu1 }
0x274f   :  { %v7453_v56 = vadd.f32 %v6225_v52, %v4863_v10 }
0x2751   :  { %6125 = vmatmul.msk.f32.vlgmr.msra.gmra.mxu2 %vm47_vm0, %v7453_v56 }
0x2773   :  { %v5077_v40 = vpop.f32.mrf.mxu3 }
0x2774   :  { %v5108_v33 = vsel %vm47_vm0, %v5077_v40, -inf }
0x2775   :  { %v4954_v38 = vpop.xlane.xlu1 %4953  ;;  %5109 = vmax.xlane.f32.xlu1 %v5108_v33 }
0x2776   :  { %v4958_v36 = vsub.f32 %v4923_v45, %v4954_v38 }
0x2778   :  { %v4960_v29 = vmul.f32 1.442695, %v4958_v36 }
0x277a   :  { %6434 = vpow2.f32 %v4960_v29 }
0x2780   :  { %v6435_v30 = vpop.eup %6434 }
0x2781   :  { %v4964_v39 = vsel %vm47_vm0, %v6435_v30, 0.0 }
0x2782   :  { %4965 = vadd.xlane.f32.xlu2 %v4964_v39 }
0x278e   :  { %5082 = vrot.lane.b32.xlu1 %v7421_v32, %s6507_s0 }
0x2796   :  { %5000 = vrot.lane.b32.xlu1 %v7415_v28, %s6508_s7 }
0x279a   :  { %5156 = vrot.lane.b32.xlu2 %v7415_v28, %s6509_s2 }
0x279e   :  { %5080 = vrot.lane.b32.xlu1 %v7453_v56, %s6507_s0 }
0x27a2   :  { %5026 = vrot.lane.b32.xlu2 %v7421_v32, %s6508_s7 }
0x27a6   :  { %5266 = vrot.lane.b32.xlu1 %v7439_v12, %s6514_s14 }
0x27d4   :  { %v4949_v61 = vpop.f32.mrf.mxu2 }
0x27d5   :  { %v4955_v51 = vsel %vm47_vm0, %v4949_v61, -inf }
0x27d6   :  { %4956 = vmax.xlane.f32.xlu1 %v4955_v51 }
0x27e8   :  { %v5110_v44 = vpop.xlane.xlu1 %5109 }
0x27e9   :  { %v5114_v47 = vsub.f32 %v5077_v40, %v5110_v44 }
0x27eb   :  { %v5116_v23 = vmul.f32 1.442695, %v5114_v47 }
0x27ed   :  { %6436 = vpow2.f32 %v5116_v23 }
0x27f3   :  { %v6437_v49 = vpop.eup %6436 }
0x27f4   :  { %v5120_v22 = vsel %vm47_vm0, %v6437_v49, 0.0 }
0x27f5   :  { %v4966_v50 = vpop.xlane.xlu2 %4965  ;;  %5121 = vadd.xlane.f32.xlu0 %v5120_v22 }
0x27f6   :  { %6438 = vrcp.f32 %v4966_v50  ;;  %v4981_v53 = vand.u32 2147483648, %v4966_v50  ;;  %v4979_v37 = vand.u32 2147483647, %v4966_v50  ;;  %vm4975_vm9 = vweird.f32 %v4966_v50 }
0x27f8   :  { %v4982_v43 = vor.u32 1.1754944e-38, %v4981_v53  ;;  %vm4980_vm11 = vcmp.eq.f32.partialorder %v4979_v37, 8.507059e+37 }
0x27fc   :  { %v6439_v54 = vpop.eup %6438 }
0x27fd   :  { %v4971_v58 = vmul.f32 %v6439_v54, %v4966_v50  ;;  %v5157_v60 = vpop.permute.xlu2 %5156  ;;  %vm4976_vm8 = vweird.f32 %v6439_v54 }
0x27fe   :  { %vm4977_vm10 = vmor %vm4975_vm9, %vm4976_vm8 }
0x27ff   :  { %v4972_v2 = vsub.f32 1.0, %v4971_v58 }
0x2800   :  { %v5083_v55 = vpop.permute.xlu1 %5082 }
0x2801   :  { %v4973_v4 = vmul.f32 %v6439_v54, %v4972_v2  ;;  %6130 = vmatpush.xpose.msk.msrb.mxu2 %vm47_vm0, %v5083_v55 }
0x2803   :  { %v4974_v15 = vadd.f32 %v6439_v54, %v4973_v4 }
0x2805   :  { %v4978_v7 = vsel %vm4977_vm10, %v6439_v54, %v4974_v15  ;;  %v5027_v62 = vpop.permute.xlu2 %5026  ;;  %5258 = vmatpush.msra.mxu2 %v4895_v48 }
0x2806   :  { %v4983_v35 = vsel %vm4980_vm11, %v4982_v43, %v4978_v7  ;;  %5047 = vmatpush.msrb.mxu1 %v5027_v62 }
0x2807   :  { %v4998_v42 = vmul.f32 %v6435_v30, %v4983_v35 }
0x2808   :  { %v5001_v5 = vpop.permute.xlu1 %5000 }
0x2809   :  { %5268 = vrot.lane.b32.xlu0 %v7415_v28, %s6514_s14  ;;  %5021 = vmatpush.msrb.mxu0 %v5001_v5 }
0x280a   :  { %6126 = vmatmul.msk.f32.vlgmr.msrb.gmra.mxu0 %vm47_vm0, %v4998_v42 }
0x280b   :  { %5177 = vmatpush.msra.mxu0 %v5157_v60 }
0x2810   :  { %v5081_v8 = vpop.permute.xlu1 %5080 }
0x2811   :  { %6131 = vmatmul.msk.f32.vlgmr.msrb.gmra.mxu2 %vm47_vm0, %v5081_v8 }
0x2818   :  { %v5267_v17 = vpop.permute.xlu1 %5266 }
0x2849   :  { %v4957_v19 = vpop.xlane.xlu1 %4956 }
0x284a   :  { %v4959_v57 = vsub.f32 %v4949_v61, %v4957_v19  ;;  %v4896_v61 = vld [vmem:[#allocation2 + $0x4e8] sm:$0xff] }
0x284b   :  { %5229 = vmatpush.msra.mxu3 %v4896_v61 }
0x284c   :  { %v4962_v52 = vmul.f32 1.442695, %v4959_v57 }
0x284e   :  { %6440 = vpow2.f32 %v4962_v52 }
0x2854   :  { %v6441_v31 = vpop.eup %6440 }
0x2855   :  { %v4967_v46 = vsel %vm47_vm0, %v6441_v31, 0.0 }
0x2856   :  { %4968 = vadd.xlane.f32.xlu0 %v4967_v46 }
0x2868   :  { %v5122_v11 = vpop.xlane.xlu0 %5121 }
0x2869   :  { %6442 = vrcp.f32 %v5122_v11  ;;  %v5137_v34 = vand.u32 2147483648, %v5122_v11  ;;  %v5135_v13 = vand.u32 2147483647, %v5122_v11  ;;  %vm5131_vm13 = vweird.f32 %v5122_v11 }
0x286a   :  { %5182 = vrot.lane.b32.xlu0 %v7421_v32, %s6509_s2 }
0x286b   :  { %v5138_v59 = vor.u32 1.1754944e-38, %v5137_v34  ;;  %vm5136_vm15 = vcmp.eq.f32.partialorder %v5135_v13, 8.507059e+37 }
0x286f   :  { %v6443_v9 = vpop.eup %6442 }
0x2870   :  { %v5127_v14 = vmul.f32 %v6443_v9, %v5122_v11  ;;  %vm5132_vm12 = vweird.f32 %v6443_v9 }
0x2871   :  { %vm5133_vm14 = vmor %vm5131_vm13, %vm5132_vm12 }
0x2872   :  { %v5128_v1 = vsub.f32 1.0, %v5127_v14 }
0x2874   :  { %v5129_v16 = vmul.f32 %v6443_v9, %v5128_v1 }
0x2876   :  { %v5130_v3 = vadd.f32 %v6443_v9, %v5129_v16 }
0x2878   :  { %v5134_v63 = vsel %vm5133_vm14, %v6443_v9, %v5130_v3 }
0x2879   :  { %v5139_v25 = vsel %vm5136_vm15, %v5138_v59, %v5134_v63 }
0x287a   :  { %v5154_v27 = vmul.f32 %v6437_v49, %v5139_v25 }
0x287b   :  { %v5269_v41 = vpop.permute.xlu0 %5268 }
0x287c   :  { %6132 = vmatmul.msk.f32.vlgmr.msra.gmra.mxu0 %vm47_vm0, %v5154_v27 }
0x287d   :  { %6138 = vmatpush.xpose.msk.msrb.mxu0 %vm47_vm0, %v5269_v41 }
0x2884   :  { %6139 = vmatmul.msk.f32.vlgmr.msrb.gmra.mxu0 %vm47_vm0, %v5267_v17 }
0x2887   :  { %v5023_v18 = vpop.f32.mrf.mxu0 }
0x2888   :  { %6136 = vmatmul.msk.f32.vlgmr.msra.gmra.mxu2 %vm47_vm0, %v5023_v18 }
0x2894   :  { %v5105_v26 = vpop.f32.mrf.mxu2 }
0x2895   :  { %v5111_v24 = vsel %vm47_vm0, %v5105_v26, -inf }
0x2896   :  { %5112 = vmax.xlane.f32.xlu2 %v5111_v24 }
0x28ae   :  { %5296 = vrot.lane.b32.xlu2 %v7421_v32, %s6514_s14 }
0x28b6   :  { %5370 = vrot.lane.b32.xlu2 %v7415_v28, %s6513_s13 }
0x28be   :  { %5481 = vrot.lane.b32.xlu2 %v7453_v56, %s6517_s17 }
0x28c9   :  { %v4969_v45 = vpop.xlane.xlu0 %4968 }
0x28ca   :  { %6444 = vrcp.f32 %v4969_v45  ;;  %v4995_v33 = vand.u32 2147483648, %v4969_v45  ;;  %v4993_v36 = vand.u32 2147483647, %v4969_v45  ;;  %vm4989_vm3 = vweird.f32 %v4969_v45 }
0x28cc   :  { %v4996_v30 = vor.u32 1.1754944e-38, %v4995_v33  ;;  %vm4994_vm5 = vcmp.eq.f32.partialorder %v4993_v36, 8.507059e+37 }
0x28d0   :  { %v6445_v21 = vpop.eup %6444 }
0x28d1   :  { %v4985_v10 = vmul.f32 %v6445_v21, %v4969_v45  ;;  %vm4990_vm2 = vweird.f32 %v6445_v21 }
0x28d2   :  { %vm4991_vm4 = vmor %vm4989_vm3, %vm4990_vm2 }
0x28d3   :  { %v4986_v40 = vsub.f32 1.0, %v4985_v10 }
0x28d5   :  { %v4987_v38 = vmul.f32 %v6445_v21, %v4986_v40  ;;  %v4897_v40 = vld [vmem:[#allocation2 + $0x4f0] sm:$0xff] }
0x28d6   :  { %5443 = vmatpush.msrb.mxu3 %v4897_v40 }
0x28d7   :  { %v4988_v29 = vadd.f32 %v6445_v21, %v4987_v38 }
0x28d9   :  { %v4992_v39 = vsel %vm4991_vm4, %v6445_v21, %v4988_v29 }
0x28da   :  { %v4997_v51 = vsel %vm4994_vm5, %v4996_v30, %v4992_v39 }
0x28db   :  { %v4999_v44 = vmul.f32 %v6441_v31, %v4997_v51 }
0x28dc   :  { %v5183_v47 = vpop.permute.xlu0 %5182 }
0x28dd   :  { %6127 = vmatmul.msk.f32.vlgmr.msrb.gmra.mxu1 %vm47_vm0, %v4999_v44 }
0x28de   :  { %5203 = vmatpush.msra.mxu1 %v5183_v47 }
0x28f9   :  { %v5179_v23 = vpop.f32.mrf.mxu0 }
0x28fa   :  { %6134 = vmatmul.msk.f32.vlgmr.msra.gmra.mxu3 %vm47_vm0, %v5179_v23 }
0x2901   :  { %v5291_v49 = vpop.f32.mrf.mxu0 }
0x2902   :  { %v5322_v22 = vsel %vm47_vm0, %v5291_v49, -inf }
0x2903   :  { %5323 = vmax.xlane.f32.xlu1 %v5322_v22 }
0x2909   :  { %v5113_v50 = vpop.xlane.xlu2 %5112 }
0x290a   :  { %v5115_v54 = vsub.f32 %v5105_v26, %v5113_v50 }
0x290b   :  { %v7516_v33 = vpop.f32.mrf.mxu2 }
0x290c   :  { %v5118_v58 = vmul.f32 1.442695, %v5115_v54 }
0x290e   :  { %6446 = vpow2.f32 %v5118_v58 }
0x2911   :  { %v5297_v60 = vpop.permute.xlu2 %5296 }
0x2912   :  { %6140 = vmatpush.xpose.msk.msrb.mxu1 %vm47_vm0, %v5297_v60 }
0x2914   :  { %v6447_v2 = vpop.eup %6446 }
0x2915   :  { %v5123_v53 = vsel %vm47_vm0, %v6447_v2, 0.0 }
0x2916   :  { %5124 = vadd.xlane.f32.xlu0 %v5123_v53 }
0x2919   :  { %v5371_v55 = vpop.permute.xlu2 %5370 }
0x291a   :  { %5391 = vmatpush.msra.mxu0 %v5371_v55 }
0x291c   :  { %5455 = vrot.lane.b32.xlu1 %v7415_v28, %s6517_s17 }
0x2921   :  { %v5482_v24 = vpop.permute.xlu2 %5481 }
0x292a   :  { %5294 = vrot.lane.b32.xlu0 %v7453_v56, %s6514_s14 }
0x2932   :  { %5483 = vrot.lane.b32.xlu0 %v7421_v32, %s6517_s17 }
0x295a   :  { %v5049_v4 = vpop.f32.mrf.mxu1 }
0x295b   :  { %6137 = vmatmul.msk.f32.gmra.mxu2 %vm47_vm0, %v5049_v4 }
0x2976   :  { %v5324_v37 = vpop.xlane.xlu1 %5323 }
0x2977   :  { %v5328_v15 = vsub.f32 %v5291_v49, %v5324_v37 }
0x2979   :  { %v5330_v43 = vmul.f32 1.442695, %v5328_v15 }
0x297b   :  { %6448 = vpow2.f32 %v5330_v43 }
0x2981   :  { %v6449_v7 = vpop.eup %6448 }
0x2982   :  { %v5334_v62 = vsel %vm47_vm0, %v6449_v7, 0.0 }
0x2983   :  { %5335 = vadd.xlane.f32.xlu1 %v5334_v62 }
0x2989   :  { %v5125_v35 = vpop.xlane.xlu0 %5124 }
0x298a   :  { %6450 = vrcp.f32 %v5125_v35  ;;  %v5151_v17 = vand.u32 2147483648, %v5125_v35  ;;  %v5149_v57 = vand.u32 2147483647, %v5125_v35  ;;  %vm5145_vm7 = vweird.f32 %v5125_v35 }
0x298c   :  { %v5152_v31 = vor.u32 1.1754944e-38, %v5151_v17  ;;  %vm5150_vm9 = vcmp.eq.f32.partialorder %v5149_v57, 8.507059e+37 }
0x298e   :  { %v5456_v42 = vpop.permute.xlu1 %5455 }
0x298f   :  { %6146 = vmatpush.xpose.msk.msrb.mxu2 %vm47_vm0, %v5456_v42 }
0x2990   :  { %v6451_v56 = vpop.eup %6450 }
0x2991   :  { %v5141_v5 = vmul.f32 %v6451_v56, %v5125_v35  ;;  %vm5146_vm6 = vweird.f32 %v6451_v56 }
0x2992   :  { %vm5147_vm8 = vmor %vm5145_vm7, %vm5146_vm6 }
0x2993   :  { %v5142_v8 = vsub.f32 1.0, %v5141_v5  ;;  %v6184_v5 = vpack.i.bf16 %v7421_v32, %v7415_v28 }
0x2995   :  { %v5143_v19 = vmul.f32 %v6451_v56, %v5142_v8 }
0x2997   :  { %v5144_v52 = vadd.f32 %v6451_v56, %v5143_v19 }
0x2999   :  { %v5148_v46 = vsel %vm5147_vm8, %v6451_v56, %v5144_v52 }
0x299a   :  { %v5153_v48 = vsel %vm5150_vm9, %v5152_v31, %v5148_v46 }
0x299b   :  { %v5155_v11 = vmul.f32 %v6447_v2, %v5153_v48 }
0x299c   :  { %v5295_v9 = vpop.permute.xlu0 %5294  ;;  %5453 = vrot.lane.b32.xlu1 %v7439_v12, %s6517_s17 }
0x299d   :  { %6133 = vmatmul.msk.f32.vlgmr.msra.gmra.mxu1 %vm47_vm0, %v5155_v11 }
0x29a4   :  { %v5484_v14 = vpop.permute.xlu0 %5483 }
0x29a5   :  { %6141 = vmatmul.msk.f32.vlgmr.msrb.gmra.mxu1 %vm47_vm0, %v5295_v9  ;;  %6148 = vmatpush.xpose.msk.msrb.mxu0 %vm47_vm0, %v5484_v14 }
0x29de   :  { %v7519_v36 = vpop.f32.mrf.mxu2 }
0x29f6   :  { %v5336_v1 = vpop.xlane.xlu1 %5335 }
0x29f7   :  { %6452 = vrcp.f32 %v5336_v1  ;;  %v5351_v3 = vand.u32 2147483648, %v5336_v1  ;;  %v5349_v63 = vand.u32 2147483647, %v5336_v1  ;;  %vm5345_vm11 = vweird.f32 %v5336_v1 }
0x29f9   :  { %v5352_v12 = vor.u32 1.1754944e-38, %v5351_v3  ;;  %vm5350_vm13 = vcmp.eq.f32.partialorder %v5349_v63, 8.507059e+37 }
0x29fd   :  { %v6453_v34 = vpop.eup %6452 }
0x29fe   :  { %v5341_v16 = vmul.f32 %v6453_v34, %v5336_v1  ;;  %vm5346_vm10 = vweird.f32 %v6453_v34 }
0x29ff   :  { %vm5347_vm12 = vmor %vm5345_vm11, %vm5346_vm10 }
0x2a00   :  { %v5342_v13 = vsub.f32 1.0, %v5341_v16 }
0x2a02   :  { %v5343_v59 = vmul.f32 %v6453_v34, %v5342_v13 }
0x2a04   :  { %v5344_v25 = vadd.f32 %v6453_v34, %v5343_v59 }
0x2a06   :  { %v5348_v27 = vsel %vm5347_vm12, %v6453_v34, %v5344_v25 }
0x2a07   :  { %v5353_v41 = vsel %vm5350_vm13, %v5352_v12, %v5348_v27 }
0x2a08   :  { %v5368_v18 = vmul.f32 %v6449_v7, %v5353_v41 }
0x2a0a   :  { %6142 = vmatmul.msk.f32.vlgmr.msra.gmra.mxu0 %vm47_vm0, %v5368_v18 }
0x2a0e   :  { %v5454_v26 = vpop.permute.xlu1 %5453 }
0x2a0f   :  { %6147 = vmatmul.msk.f32.vlgmr.msrb.gmra.mxu2 %vm47_vm0, %v5454_v26 }
0x2a12   :  { %6149 = vmatmul.msk.f32.vlgmr.msrb.gmra.mxu0 %vm47_vm0, %v5482_v24 }
0x2a1a   :  { %v5205_v45 = vpop.f32.mrf.mxu1 }
0x2a1b   :  { %6135 = vmatmul.msk.f32.gmra.mxu3 %vm47_vm0, %v5205_v45 }
0x2a22   :  { %v5319_v21 = vpop.f32.mrf.mxu1 }
0x2a23   :  { %v5325_v10 = vsel %vm47_vm0, %v5319_v21, -inf }
0x2a24   :  { %5326 = vmax.xlane.f32.xlu1 %v5325_v10 }
0x2a87   :  { %v5393_v38 = vpop.f32.mrf.mxu0 }
0x2a88   :  { %6144 = vmatmul.msk.f32.vlgmr.msrb.gmra.mxu3 %vm47_vm0, %v5393_v38 }
0x2a8f   :  { %v5506_v29 = vpop.f32.mrf.mxu0 }
0x2a90   :  { %v5512_v30 = vsel %vm47_vm0, %v5506_v29, -inf }
0x2a91   :  { %5513 = vmax.xlane.f32.xlu2 %v5512_v30 }
0x2a92   :  { %v5478_v39 = vpop.f32.mrf.mxu2 }
0x2a93   :  { %v5509_v61 = vsel %vm47_vm0, %v5478_v39, -inf }
0x2a94   :  { %5510 = vmax.xlane.f32.xlu0 %v5509_v61 }
0x2a97   :  { %v5327_v51 = vpop.xlane.xlu1 %5326 }
0x2a98   :  { %v5329_v44 = vsub.f32 %v5319_v21, %v5327_v51 }
0x2a9a   :  { %v5332_v47 = vmul.f32 1.442695, %v5329_v44  ;;  %v5231_v44 = vpop.f32.mrf.mxu3 }
0x2a9c   :  { %6454 = vpow2.f32 %v5332_v47 }
0x2aa2   :  { %v6455_v23 = vpop.eup %6454  ;;  %v5234_v47 = vpop.f32.mrf.mxu3 }
0x2aa3   :  { %v5337_v49 = vsel %vm47_vm0, %v6455_v23, 0.0 }
0x2aa4   :  { %5338 = vadd.xlane.f32.xlu1 %v5337_v49  ;;  %v5261_v49 = vadd.f32 %v7516_v33, %v5231_v44  ;;  %v5744_v44 = vld [vmem:[#allocation2 + $0x560] sm:$0xff] }
0x2abd   :  { %5396 = vrot.lane.b32.xlu1 %v7421_v32, %s6513_s13 }
0x2b04   :  { %v5514_v22 = vpop.xlane.xlu2 %5513 }
0x2b05   :  { %v5516_v50 = vsub.f32 %v5506_v29, %v5514_v22 }
0x2b07   :  { %v5519_v54 = vmul.f32 1.442695, %v5516_v50  ;;  %v5511_v58 = vpop.xlane.xlu0 %5510  ;;  %v6226_v50 = vld [vmem:[#allocation2 + $0x500] ss:$0 sm:$0xff] }
0x2b08   :  { %v5515_v60 = vsub.f32 %v5478_v39, %v5511_v58  ;;  %v4898_v39 = vld [vmem:[#allocation2 + $0x4f8] sm:$0xff] }
0x2b09   :  { %6456 = vpow2.f32 %v5519_v54  ;;  %5630 = vmatpush.msra.mxu0 %v4898_v39 }
0x2b0a   :  { %v5517_v2 = vmul.f32 1.442695, %v5515_v60 }
0x2b0c   :  { %6458 = vpow2.f32 %v5517_v2 }
0x2b0f   :  { %v7526_v53 = vpop.eup %6456 }
0x2b10   :  { %v5524_v55 = vsel %vm47_vm0, %v7526_v53, 0.0 }
0x2b11   :  { %5525 = vadd.xlane.f32.xlu2 %v5524_v55 }
0x2b12   :  { %v6459_v4 = vpop.eup %6458 }
0x2b13   :  { %v5521_v37 = vsel %vm47_vm0, %v6459_v4, 0.0 }
0x2b14   :  { %5522 = vadd.xlane.f32.xlu0 %v5521_v37 }
0x2b17   :  { %v5339_v15 = vpop.xlane.xlu1 %5338 }
0x2b18   :  { %6460 = vrcp.f32 %v5339_v15  ;;  %v5365_v56 = vand.u32 2147483648, %v5339_v15  ;;  %vm5359_vm15 = vweird.f32 %v5339_v15  ;;  %v5363_v8 = vand.u32 2147483647, %v5339_v15 }
0x2b1a   :  { %v5366_v19 = vor.u32 1.1754944e-38, %v5365_v56  ;;  %vm5364_vm3 = vcmp.eq.f32.partialorder %v5363_v8, 8.507059e+37  ;;  %v5703_v8 = vld [vmem:[#allocation2 + $0x518] sm:$0xff] }
0x2b1e   :  { %v6461_v43 = vpop.eup %6460 }
0x2b1f   :  { %v5355_v7 = vmul.f32 %v6461_v43, %v5339_v15  ;;  %vm5360_vm14 = vweird.f32 %v6461_v43 }
0x2b20   :  { %vm5361_vm2 = vmor %vm5359_vm15, %vm5360_vm14 }
0x2b21   :  { %v5356_v62 = vsub.f32 1.0, %v5355_v7 }
0x2b23   :  { %v5357_v35 = vmul.f32 %v6461_v43, %v5356_v62 }
0x2b25   :  { %v5358_v42 = vadd.f32 %v6461_v43, %v5357_v35 }
0x2b27   :  { %v5362_v17 = vsel %vm5361_vm2, %v6461_v43, %v5358_v42 }
0x2b28   :  { %6185 = vrot.lane.b32.xlu0 %v6184_v5, %s6516_s16  ;;  %v5367_v57 = vsel %vm5364_vm3, %v5366_v19, %v5362_v17  ;;  %v5704_v5 = vld [vmem:[#allocation2 + $0x520] sm:$0xff]  ;;  %v5701_v19 = vld [vmem:[#allocation2 + $0x508] sm:$0xff] }
0x2b29   :  { %v5369_v52 = vmul.f32 %v6455_v23, %v5367_v57  ;;  %v5445_v23 = vpop.f32.mrf.mxu3 }
0x2b2a   :  { %v5451_v22 = vadd.f32 %v5445_v23, %v5261_v49  ;;  %v5743_v49 = vld [vmem:[#allocation2 + $0x558] sm:$0xff] }
0x2b2f   :  { %v5397_v31 = vpop.permute.xlu1 %5396 }
0x2b30   :  { %5417 = vmatpush.msra.mxu1 %v5397_v31 }
0x2b31   :  { %6143 = vmatmul.msk.f32.vlgmr.msra.gmra.mxu1 %vm47_vm0, %v5369_v52 }
0x2b84   :  { %v5526_v46 = vpop.xlane.xlu2 %5525 }
0x2b85   :  { %6462 = vrcp.f32 %v5526_v46  ;;  %v5552_v13 = vand.u32 2147483648, %v5526_v46  ;;  %vm5546_vm6 = vweird.f32 %v5526_v46  ;;  %v5550_v63 = vand.u32 2147483647, %v5526_v46 }
0x2b87   :  { %v5523_v48 = vpop.xlane.xlu0 %5522  ;;  %v5553_v41 = vor.u32 1.1754944e-38, %v5552_v13  ;;  %vm5551_vm10 = vcmp.eq.f32.partialorder %v5550_v63, 8.507059e+37 }
0x2b88   :  { %6464 = vrcp.f32 %v5523_v48  ;;  %v5538_v59 = vand.u32 2147483648, %v5523_v48  ;;  %v5536_v25 = vand.u32 2147483647, %v5523_v48  ;;  %vm5532_vm8 = vweird.f32 %v5523_v48 }
0x2b8a   :  { %v5539_v26 = vor.u32 1.1754944e-38, %v5538_v59  ;;  %vm5537_vm11 = vcmp.eq.f32.partialorder %v5536_v25, 8.507059e+37  ;;  %v5750_v59 = vld [vmem:[#allocation2 + $0x590] sm:$0xff] }
0x2b8b   :  { %v6463_v11 = vpop.eup %6462 }
0x2b8c   :  { %v5542_v28 = vmul.f32 %v6463_v11, %v5526_v46  ;;  %vm5547_vm4 = vweird.f32 %v6463_v11 }
0x2b8d   :  { %vm5548_vm7 = vmor %vm5546_vm6, %vm5547_vm4 }
0x2b8e   :  { %v6465_v32 = vpop.eup %6464  ;;  %v5543_v9 = vsub.f32 1.0, %v5542_v28 }
0x2b8f   :  { %v5528_v14 = vmul.f32 %v6465_v32, %v5523_v48  ;;  %vm5533_vm5 = vweird.f32 %v6465_v32 }
0x2b90   :  { %v5544_v1 = vmul.f32 %v6463_v11, %v5543_v9  ;;  %vm5534_vm9 = vmor %vm5532_vm8, %vm5533_vm5  ;;  %v5753_v9 = vld [vmem:[#allocation2 + $0x5a8] sm:$0xff] }
0x2b91   :  { %v5529_v34 = vsub.f32 1.0, %v5528_v14  ;;  %v5752_v14 = vld [vmem:[#allocation2 + $0x5a0] sm:$0xff]  ;;  %5756 = vmatpush.msra.mxu3 %v5753_v9 }
0x2b92   :  { %v5545_v16 = vadd.f32 %v6463_v11, %v5544_v1 }
0x2b93   :  { %v5530_v3 = vmul.f32 %v6465_v32, %v5529_v34  ;;  %5757 = vmatpush.msra.mxu3 %v5752_v14 }
0x2b94   :  { %v5549_v27 = vsel %vm5548_vm7, %v6463_v11, %v5545_v16  ;;  %v5751_v16 = vld [vmem:[#allocation2 + $0x598] sm:$0xff] }
0x2b95   :  { %v5531_v12 = vadd.f32 %v6465_v32, %v5530_v3  ;;  %v5554_v24 = vsel %vm5551_vm10, %v5553_v41, %v5549_v27  ;;  %5758 = vmatpush.msra.mxu3 %v5751_v16  ;;  %v5748_v41 = vld [vmem:[#allocation2 + $0x580] sm:$0xff] }
0x2b96   :  { %v5556_v38 = vmul.f32 %v7526_v53, %v5554_v24  ;;  %v5264_v53 = vadd.f32 %v7519_v36, %v5234_v47 }
0x2b97   :  { %v5535_v18 = vsel %vm5534_vm9, %v6465_v32, %v5531_v12  ;;  %v5749_v12 = vld [vmem:[#allocation2 + $0x588] sm:$0xff]  ;;  %5759 = vmatpush.msra.mxu3 %v5750_v59 }
0x2b98   :  { %v5540_v45 = vsel %vm5537_vm11, %v5539_v26, %v5535_v18  ;;  %v5747_v26 = vld [vmem:[#allocation2 + $0x578] sm:$0xff] }
0x2b99   :  { %v5555_v29 = vmul.f32 %v6459_v4, %v5540_v45  ;;  %5760 = vmatpush.msra.mxu3 %v5749_v12  ;;  %v5746_v45 = vld [vmem:[#allocation2 + $0x570] sm:$0xff] }
0x2b9a   :  { %v6186_v21 = vpop.permute.xlu0 %6185 }
0x2b9b   :  { %v6188_v10 = vunpack.i.h.bf16 %v6186_v21  ;;  %v6187_v40 = vunpack.i.l.bf16 %v6186_v21  ;;  %5761 = vmatpush.msra.mxu3 %v5748_v41 }
0x2b9d   :  { %5578 = vmatpush.msrb.mxu1 %v6187_v40  ;;  %5604 = vmatpush.msra.mxu2 %v6188_v10 }
0x2b9e   :  { %6150 = vmatmul.msk.f32.vlgmr.msrb.gmra.mxu1 %vm47_vm0, %v5555_v29  ;;  %6151 = vmatmul.msk.f32.vlgmr.msra.gmra.mxu2 %vm47_vm0, %v5556_v38  ;;  %v6227_v38 = vld [vmem:[#allocation2 + $0x5c8] ss:$0 sm:$0xff] }
0x2b9f   :  { %5725 = vmatpush.msra.mxu1 %v5704_v5  ;;  %5762 = vmatpush.msra.mxu3 %v5747_v26  ;;  %v5745_v29 = vld [vmem:[#allocation2 + $0x568] sm:$0xff] }
0x2ba1   :  { %5726 = vmatpush.msra.mxu1 %v5703_v8  ;;  %5763 = vmatpush.msra.mxu3 %v5746_v45  ;;  %v6230_v8 = vld [vmem:[#allocation2 + $0x5b0] ss:$0 sm:$0xff] }
0x2ba3   :  { %5764 = vmatpush.msra.mxu3 %v5745_v29 }
0x2ba5   :  { %5765 = vmatpush.msra.mxu3 %v5744_v44 }
0x2ba7   :  { %5766 = vmatpush.msra.mxu3 %v5743_v49 }
0x2bae   :  { %v5419_v30 = vpop.f32.mrf.mxu1 }
0x2baf   :  { %6145 = vmatmul.msk.f32.gmra.mxu3 %vm47_vm0, %v5419_v30 }
0x2c1b   :  { %v5580_v61 = vpop.f32.mrf.mxu1 }
0x2c1c   :  { %6152 = vmatmul.msk.f32.vlgmr.msra.gmra.mxu0 %vm47_vm0, %v5580_v61 }
0x2c21   :  { %v5606_v51 = vpop.f32.mrf.mxu2 }
0x2c24   :  { %6153 = vmatmul.msk.f32.gmra.mxu0 %vm47_vm0, %v5606_v51  ;;  %v6228_v51 = vld [vmem:[#allocation2 + $0x5d0] ss:$0 sm:$0xff] }
0x2c32   :  { %v5448_v2 = vpop.f32.mrf.mxu3 }
0x2c33   :  { %v5452_v4 = vadd.f32 %v5448_v2, %v5264_v53 }
0x2c99   :  { %v5632_v54 = vpop.f32.mrf.mxu0 }
0x2c9a   :  { %v5638_v58 = vadd.f32 %v5632_v54, %v5451_v22  ;;  %v5742_v54 = vld [vmem:[#allocation2 + $0x550] sm:$0xff] }
0x2c9b   :  { %5767 = vmatpush.msra.mxu3 %v5742_v54 }
0x2c9c   :  { %v5641_v60 = vadd.f32 %v6226_v50, %v5638_v58 }
0x2c9e   :  { %v7544_v55 = vadd.f32 %v5641_v60, %v7431_v6  ;;  %v5741_v60 = vld [vmem:[#allocation2 + $0x548] sm:$0xff] }
0x2c9f   :  { %5768 = vmatpush.msra.mxu3 %v5741_v60 }
0x2ca0   :  { %v5647_v37 = vsel %vm117_vm1, %v7544_v55, 0.0  ;;  %v5655_v33 = vmul.f32 %v7544_v55, %v7544_v55 }
0x2ca1   :  { %5648 = vadd.xlane.f32.xlu2 %v5647_v37  ;;  %v5635_v15 = vpop.f32.mrf.mxu0 }
0x2ca2   :  { %v5639_v43 = vadd.f32 %v5635_v15, %v5452_v4  ;;  %v5657_v35 = vsel %vm117_vm1, %v5655_v33, 0.0  ;;  %v5738_v33 = vld [vmem:[#allocation2 + $0x530] sm:$0xff] }
0x2ca4   :  { %v5642_v7 = vadd.f32 %v6226_v50, %v5639_v43  ;;  %v5740_v43 = vld [vmem:[#allocation2 + $0x540] sm:$0xff] }
0x2ca5   :  { %5769 = vmatpush.msra.mxu3 %v5740_v43 }
0x2ca6   :  { %v7551_v62 = vadd.f32 %v5642_v7, %v7447_v0  ;;  %v5702_v0 = vld [vmem:[#allocation2 + $0x510] sm:$0xff]  ;;  %v5739_v7 = vld [vmem:[#allocation2 + $0x538] sm:$0xff] }
0x2ca7   :  { %5727 = vmatpush.msra.mxu1 %v5702_v0  ;;  %5770 = vmatpush.msra.mxu3 %v5739_v7 }
0x2ca8   :  { %v5656_v6 = vmul.f32 %v7551_v62, %v7551_v62  ;;  %v5650_v42 = vsel %vm117_vm1, %v7551_v62, 0.0 }
0x2ca9   :  { %5658 = vadd.xlane.f32.xlu2 %v5657_v35  ;;  %5728 = vmatpush.msra.mxu1 %v5701_v19  ;;  %v6229_v35 = vld [vmem:[#allocation2 + $0x528] ss:$0 sm:$0xff] }
0x2caa   :  { %v5660_v36 = vsel %vm117_vm1, %v5656_v6, 0.0  ;;  %5771 = vmatpush.msra.mxu3 %v5738_v33 }
0x2cab   :  { %5661 = vadd.xlane.f32.xlu0 %v5660_v36 }
0x2cb1   :  { %5651 = vadd.xlane.f32.xlu2 %v5650_v42 }
0x2d14   :  { %v5649_v56 = vpop.xlane.xlu2 %5648 }
0x2d15   :  { %v5653_v17 = vmul.f32 %v5649_v56, %v6714_v20 }
0x2d17   :  { %v5665_v52 = vmul.f32 %v5653_v17, %v5653_v17  ;;  %v5669_v40 = vsub.f32 %v7544_v55, %v5653_v17 }
0x2d1c   :  { %v5659_v57 = vpop.xlane.xlu2 %5658 }
0x2d1d   :  { %v5663_v31 = vmul.f32 %v5659_v57, %v6714_v20 }
0x2d1e   :  { %v5662_v11 = vpop.xlane.xlu0 %5661 }
0x2d1f   :  { %v5667_v46 = vsub.f32 %v5663_v31, %v5665_v52  ;;  %v5664_v1 = vmul.f32 %v5662_v11, %v6714_v20 }
0x2d21   :  { %v5671_v48 = vadd.f32 1e-05, %v5667_v46 }
0x2d23   :  { %6466 = vrsqrt.f32 %v5671_v48  ;;  %vm5679_vm12 = vweird.f32 %v5671_v48 }
0x2d24   :  { %v5652_v28 = vpop.xlane.xlu2 %5651 }
0x2d25   :  { %v5654_v32 = vmul.f32 %v5652_v28, %v6714_v20 }
0x2d27   :  { %v5666_v34 = vmul.f32 %v5654_v32, %v5654_v32  ;;  %v5670_v53 = vsub.f32 %v7551_v62, %v5654_v32 }
0x2d29   :  { %v6467_v13 = vpop.eup %6466  ;;  %v5668_v3 = vsub.f32 %v5664_v1, %v5666_v34 }
0x2d2a   :  { %v5674_v63 = vmul.f32 %v6467_v13, %v5671_v48  ;;  %vm5680_vm0 = vweird.f32 %v6467_v13 }
0x2d2b   :  { %v5672_v25 = vadd.f32 1e-05, %v5668_v3  ;;  %vm5681_vm13 = vmor %vm5679_vm12, %vm5680_vm0 }
0x2d2c   :  { %v5675_v27 = vmul.f32 %v6467_v13, %v5674_v63 }
0x2d2d   :  { %6468 = vrsqrt.f32 %v5672_v25  ;;  %vm5689_vm15 = vweird.f32 %v5672_v25 }
0x2d2e   :  { %v5676_v18 = vmul.f32 0.5, %v5675_v27 }
0x2d30   :  { %v5677_v24 = vsub.f32 1.5, %v5676_v18 }
0x2d32   :  { %v5678_v21 = vmul.f32 %v6467_v13, %v5677_v24 }
0x2d33   :  { %v6469_v10 = vpop.eup %6468 }
0x2d34   :  { %v5682_v30 = vsel %vm5681_vm13, %v6467_v13, %v5678_v21  ;;  %v5684_v39 = vmul.f32 %v6469_v10, %v5672_v25  ;;  %vm5690_vm14 = vweird.f32 %v6469_v10 }
0x2d35   :  { %v5693_v61 = vmul.f32 %v5682_v30, %v5669_v40  ;;  %vm5691_vm2 = vmor %vm5689_vm15, %vm5690_vm14  ;;  %v6231_v30 = vld [vmem:[#allocation2 + $0x5d8] ss:$0 sm:$0xff]  ;;  %vm5928_vm14 = vcmask 48128  }
0x2d36   :  { %v5685_v47 = vmul.f32 %v6469_v10, %v5684_v39 }
0x2d37   :  { %v5696_v23 = vmul.f32 %v6227_v38, %v5693_v61 }
0x2d38   :  { %v5686_v22 = vmul.f32 0.5, %v5685_v47 }
0x2d39   :  { %v5699_v50 = vadd.f32 %v6228_v51, %v5696_v23 }
0x2d3a   :  { %v5687_v58 = vsub.f32 1.5, %v5686_v22 }
0x2d3b   :  { %6154 = vmatmul.msk.f32.vlgmr.msra.gmra.mxu1 %vm117_vm1, %v5699_v50 }
0x2d3c   :  { %v5688_v2 = vmul.f32 %v6469_v10, %v5687_v58 }
0x2d3e   :  { %v5692_v55 = vsel %vm5691_vm2, %v6469_v10, %v5688_v2 }
0x2d3f   :  { %v5694_v4 = vmul.f32 %v5692_v55, %v5670_v53 }
0x2d41   :  { %v5697_v37 = vmul.f32 %v6227_v38, %v5694_v4 }
0x2d43   :  { %v5700_v15 = vadd.f32 %v6228_v51, %v5697_v37  ;;  %v6232_v51 = vld [vmem:[#allocation2 + $0x5e0] ss:$0 sm:$0xff] }
0x2d45   :  { %6155 = vmatmul.msk.f32.gmra.mxu1 %vm117_vm1, %v5700_v15 }
0x2db8   :  { %v5730_v6 = vpop.f32.mrf.mxu1 }
0x2db9   :  { %v5731_v36 = vadd.f32 %v6229_v35, %v5730_v6 }
0x2dbb   :  { %v5736_v42 = vmax.f32 %v5731_v36, 0.0  ;;  %v5896_v36 = vld [vmem:[#allocation2 + $0x28] sm:$0xff] }
0x2dbc   :  { %5917 = vmatpush.msrb.mxu2 %v5896_v36 }
0x2dbd   :  { %5772 = vmatmul.f32.vlgmr.msra.gmra.mxu3 %v5736_v42  ;;  %v5895_v42 = vld [vmem:[#allocation2 + $0x20] sm:$0xff] }
0x2dbe   :  { %5918 = vmatpush.msrb.mxu2 %v5895_v42 }
0x2dc2   :  { %v5733_v62 = vpop.f32.mrf.mxu1 }
0x2dc3   :  { %v5734_v56 = vadd.f32 %v6229_v35, %v5733_v62  ;;  %v5894_v62 = vld [vmem:[#allocation2 + $0x18] sm:$0xff] }
0x2dc4   :  { %5919 = vmatpush.msrb.mxu2 %v5894_v62 }
0x2dc5   :  { %v5737_v5 = vmax.f32 %v5734_v56, 0.0 }
0x2dc7   :  { %5775 = vmatmul.f32.gmra.mxu3 %v5737_v5  ;;  %v5893_v5 = vld [vmem:[#allocation2 + $0x10] sm:$0xff] }
0x2dc8   :  { %5920 = vmatpush.msrb.mxu2 %v5893_v5 }
0x2e40   :  { %v5773_v0 = vpop.f32.mrf.mxu3 }
0x2e41   :  { %v5774_v17 = vadd.f32 %v6230_v8, %v5773_v0 }
0x2e43   :  { %v5779_v19 = vadd.f32 %v5774_v17, %v5699_v50 }
0x2e45   :  { %v5783_v57 = vsel %vm117_vm1, %v5779_v19, 0.0  ;;  %v5791_v52 = vmul.f32 %v5779_v19, %v5779_v19 }
0x2e46   :  { %5784 = vadd.xlane.f32.xlu1 %v5783_v57 }
0x2e47   :  { %v5793_v31 = vsel %vm117_vm1, %v5791_v52, 0.0 }
0x2e48   :  { %5794 = vadd.xlane.f32.xlu2 %v5793_v31 }
0x2e4a   :  { %v5776_v46 = vpop.f32.mrf.mxu3 }
0x2e4b   :  { %v5777_v48 = vadd.f32 %v6230_v8, %v5776_v46 }
0x2e4d   :  { %v5780_v11 = vadd.f32 %v5777_v48, %v5700_v15 }
0x2e4f   :  { %v5786_v28 = vsel %vm117_vm1, %v5780_v11, 0.0  ;;  %v5792_v32 = vmul.f32 %v5780_v11, %v5780_v11 }
0x2e50   :  { %5787 = vadd.xlane.f32.xlu2 %v5786_v28 }
0x2e51   :  { %v5796_v9 = vsel %vm117_vm1, %v5792_v32, 0.0 }
0x2e58   :  { %5797 = vadd.xlane.f32.xlu2 %v5796_v9 }
0x2eb9   :  { %v5785_v14 = vpop.xlane.xlu1 %5784 }
0x2eba   :  { %v5789_v1 = vmul.f32 %v5785_v14, %v6714_v20 }
0x2ebb   :  { %v5795_v34 = vpop.xlane.xlu2 %5794 }
0x2ebc   :  { %v5801_v16 = vmul.f32 %v5789_v1, %v5789_v1  ;;  %v5799_v13 = vmul.f32 %v5795_v34, %v6714_v20  ;;  %v5805_v29 = vsub.f32 %v5779_v19, %v5789_v1 }
0x2ebe   :  { %v5803_v3 = vsub.f32 %v5799_v13, %v5801_v16 }
0x2ec0   :  { %v5807_v59 = vadd.f32 1e-05, %v5803_v3 }
0x2ec2   :  { %6470 = vrsqrt.f32 %v5807_v59  ;;  %vm5815_vm4 = vweird.f32 %v5807_v59 }
0x2ec3   :  { %v5788_v63 = vpop.xlane.xlu2 %5787 }
0x2ec4   :  { %v5790_v12 = vmul.f32 %v5788_v63, %v6714_v20  ;;  %v6233_v63 = vld [vmem:[#allocation2 + $0x48] ss:$0 sm:$0xff] }
0x2ec6   :  { %v5802_v26 = vmul.f32 %v5790_v12, %v5790_v12  ;;  %v5806_v53 = vsub.f32 %v5780_v11, %v5790_v12 }
0x2ec8   :  { %v6471_v25 = vpop.eup %6470 }
0x2ec9   :  { %v5810_v27 = vmul.f32 %v6471_v25, %v5807_v59  ;;  %vm5816_vm3 = vweird.f32 %v6471_v25 }
0x2eca   :  { %vm5817_vm5 = vmor %vm5815_vm4, %vm5816_vm3 }
0x2ecb   :  { %v5811_v41 = vmul.f32 %v6471_v25, %v5810_v27  ;;  %v5798_v18 = vpop.xlane.xlu2 %5797  ;;  %v6234_v27 = vld [vmem:[#allocation2 + $0x50] ss:$0 sm:$0xff] }
0x2ecc   :  { %v5800_v24 = vmul.f32 %v5798_v18, %v6714_v20 }
0x2ecd   :  { %v5812_v45 = vmul.f32 0.5, %v5811_v41 }
0x2ece   :  { %v5804_v21 = vsub.f32 %v5800_v24, %v5802_v26 }
0x2ecf   :  { %v5813_v10 = vsub.f32 1.5, %v5812_v45 }
0x2ed0   :  { %v5808_v40 = vadd.f32 1e-05, %v5804_v21 }
0x2ed1   :  { %v5814_v38 = vmul.f32 %v6471_v25, %v5813_v10 }
0x2ed2   :  { %6472 = vrsqrt.f32 %v5808_v40  ;;  %vm5825_vm7 = vweird.f32 %v5808_v40 }
0x2ed3   :  { %v5818_v39 = vsel %vm5817_vm5, %v6471_v25, %v5814_v38 }
0x2ed4   :  { %v5829_v61 = vmul.f32 %v5818_v39, %v5805_v29  ;;  %v6235_v39 = vld [vmem:[#allocation2 + $0x30] ss:$0 sm:$0xff] }
0x2ed6   :  { %v5832_v44 = vmul.f32 %v6231_v30, %v5829_v61 }
0x2ed8   :  { %v6473_v47 = vpop.eup %6472  ;;  %v7575_v23 = vadd.f32 %v6232_v51, %v5832_v44 }
0x2ed9   :  { %v5820_v49 = vmul.f32 %v6473_v47, %v5808_v40  ;;  %vm5826_vm6 = vweird.f32 %v6473_v47 }
0x2eda   :  { %v5839_v22 = vsel %vm117_vm1, %v7575_v23, 0.0  ;;  %v5847_v58 = vmul.f32 %v7575_v23, %v7575_v23  ;;  %vm5827_vm8 = vmor %vm5825_vm7, %vm5826_vm6 }
0x2edb   :  { %v5821_v50 = vmul.f32 %v6473_v47, %v5820_v49  ;;  %5840 = vadd.xlane.f32.xlu2 %v5839_v22 }
0x2edc   :  { %v5849_v55 = vsel %vm117_vm1, %v5847_v58, 0.0 }
0x2edd   :  { %v5822_v54 = vmul.f32 0.5, %v5821_v50 }
0x2edf   :  { %v5823_v60 = vsub.f32 1.5, %v5822_v54 }
0x2ee1   :  { %v5824_v2 = vmul.f32 %v6473_v47, %v5823_v60 }
0x2ee3   :  { %v5828_v4 = vsel %vm5827_vm8, %v6473_v47, %v5824_v2  ;;  %5850 = vadd.xlane.f32.xlu2 %v5849_v55 }
0x2ee4   :  { %v5830_v37 = vmul.f32 %v5828_v4, %v5806_v53 }
0x2ee6   :  { %v5833_v15 = vmul.f32 %v6231_v30, %v5830_v37 }
0x2ee8   :  { %v5836_v43 = vadd.f32 %v6232_v51, %v5833_v15 }
0x2eea   :  { %v5842_v7 = vsel %vm117_vm1, %v5836_v43, 0.0  ;;  %v5848_v33 = vmul.f32 %v5836_v43, %v5836_v43 }
0x2eeb   :  { %5843 = vadd.xlane.f32.xlu0 %v5842_v7 }
0x2eec   :  { %v5852_v35 = vsel %vm117_vm1, %v5848_v33, 0.0 }
0x2eed   :  { %5853 = vadd.xlane.f32.xlu1 %v5852_v35 }
0x2f4e   :  { %v5841_v6 = vpop.xlane.xlu2 %5840 }
0x2f4f   :  { %v5845_v56 = vmul.f32 %v5841_v6, %v6714_v20 }
0x2f51   :  { %v5857_v0 = vmul.f32 %v5845_v56, %v5845_v56  ;;  %v5861_v59 = vsub.f32 %v7575_v23, %v5845_v56 }
0x2f56   :  { %v5851_v8 = vpop.xlane.xlu2 %5850 }
0x2f57   :  { %v5855_v17 = vmul.f32 %v5851_v8, %v6714_v20 }
0x2f59   :  { %v5859_v19 = vsub.f32 %v5855_v17, %v5857_v0 }
0x2f5b   :  { %v5863_v57 = vadd.f32 1e-05, %v5859_v19 }
0x2f5d   :  { %6474 = vrsqrt.f32 %v5863_v57  ;;  %vm5871_vm10 = vweird.f32 %v5863_v57 }
0x2f5e   :  { %v5844_v52 = vpop.xlane.xlu0 %5843 }
0x2f5f   :  { %v5846_v31 = vmul.f32 %v5844_v52, %v6714_v20 }
0x2f60   :  { %v5854_v46 = vpop.xlane.xlu1 %5853 }
0x2f61   :  { %v5858_v48 = vmul.f32 %v5846_v31, %v5846_v31  ;;  %v5856_v11 = vmul.f32 %v5854_v46, %v6714_v20  ;;  %v5862_v10 = vsub.f32 %v5836_v43, %v5846_v31 }
0x2f63   :  { %v6475_v28 = vpop.eup %6474  ;;  %v5860_v32 = vsub.f32 %v5856_v11, %v5858_v48 }
0x2f64   :  { %v5866_v9 = vmul.f32 %v6475_v28, %v5863_v57  ;;  %vm5872_vm9 = vweird.f32 %v6475_v28 }
0x2f65   :  { %v5864_v14 = vadd.f32 1e-05, %v5860_v32  ;;  %vm5873_vm11 = vmor %vm5871_vm10, %vm5872_vm9 }
0x2f66   :  { %v5867_v1 = vmul.f32 %v6475_v28, %v5866_v9 }
0x2f67   :  { %6476 = vrsqrt.f32 %v5864_v14  ;;  %vm5881_vm12 = vweird.f32 %v5864_v14 }
0x2f68   :  { %v5868_v34 = vmul.f32 0.5, %v5867_v1 }
0x2f6a   :  { %v5869_v16 = vsub.f32 1.5, %v5868_v34 }
0x2f6c   :  { %v5870_v13 = vmul.f32 %v6475_v28, %v5869_v16 }
0x2f6d   :  { %v6477_v3 = vpop.eup %6476 }
0x2f6e   :  { %v5874_v25 = vsel %vm5873_vm11, %v6475_v28, %v5870_v13  ;;  %v5876_v12 = vmul.f32 %v6477_v3, %v5864_v14  ;;  %vm5882_vm0 = vweird.f32 %v6477_v3 }
0x2f6f   :  { %v5885_v20 = vmul.f32 %v5874_v25, %v5861_v59  ;;  %vm5883_vm13 = vmor %vm5881_vm12, %vm5882_vm0 }
0x2f70   :  { %v5877_v41 = vmul.f32 %v6477_v3, %v5876_v12 }
0x2f71   :  { %v5888_v18 = vmul.f32 %v6233_v63, %v5885_v20 }
0x2f72   :  { %v5878_v26 = vmul.f32 0.5, %v5877_v41 }
0x2f73   :  { %v5891_v24 = vadd.f32 %v6234_v27, %v5888_v18 }
0x2f74   :  { %v5879_v45 = vsub.f32 1.5, %v5878_v26 }
0x2f75   :  { %6156 = vmatmul.msk.f32.vlgmr.msrb.gmra.mxu2 %vm117_vm1, %v5891_v24 }
0x2f76   :  { %v5880_v21 = vmul.f32 %v6477_v3, %v5879_v45 }
0x2f78   :  { %v5884_v40 = vsel %vm5883_vm13, %v6477_v3, %v5880_v21 }
0x2f79   :  { %v5886_v38 = vmul.f32 %v5884_v40, %v5862_v10 }
0x2f7b   :  { %v5889_v29 = vmul.f32 %v6233_v63, %v5886_v38 }
0x2f7d   :  { %v5892_v30 = vadd.f32 %v6234_v27, %v5889_v29 }
0x2f7f   :  { %6157 = vmatmul.msk.f32.gmra.mxu2 %vm117_vm1, %v5892_v30 }
0x2ff8   :  { %v5922_v61 = vpop.f32.mrf.mxu2 }
0x2ff9   :  { %v5923_v51 = vadd.f32 %v6235_v39, %v5922_v61 }
0x2ffb   :  { %5929 = vst.msk [vmem:[%s7602_s5] sm:$0xff] %vm5928_vm14, %v5923_v51 }
0x3002   :  { %v5925_v44 = vpop.f32.mrf.mxu2 }
0x3003   :  { %v5926_v47 = vadd.f32 %v6235_v39, %v5925_v44 }
0x3005   :  { %5930 = vst.msk [vmem:[%s7602_s5 + $0x8] sm:$0xff] %vm5928_vm14, %v5926_v47 }
0x3006   :  { %5935 = vsyncpa [#allocation3], 1 }

</bundles_post_ra>
